<compile_context>
chip_gen: v7x
topology: tpu7x:2x2x1
jax: 0.10.0
libtpu: 0.0.40
codegen_flags: <defaults>
</compile_context>

<pallas_src>
import jax
import jax.numpy as jnp
from jax.experimental import pallas as pl
from jax.experimental.pallas import tpu as pltpu

LN_EPS = 1e-5          # PyTorch nn.LayerNorm default eps
MAX_COUT = 1024        # widest layer; aux rows are padded to this many lanes
N_LAYERS = 18          # 5 (start) + 7 (time) + 6 (end)


# ----------------------------- fused kernel -------------------------------- #
def _net_kernel(start_ref, time_ref, aux_ref,
                w_s0, w_s1, w_s2, w_s3, w_s4,                 # start_mlp (VMEM)
                w_t0, w_t1, w_t2, w_t3, w_t4, w_t5, w_t6,     # time_mlp  (VMEM)
                end_big_hbm, end_mid_hbm, end_small_hbm,      # end_mlp   (HBM)
                out_ref,
                end_big, end_mid, end_small, dma_sem):
    """Whole Net forward in one kernel.

    aux_ref: [3 * N_LAYERS, MAX_COUT] f32, rows (bias, gamma, beta) per layer.
    end_big_hbm  : [1024, 1024] bf16  -- end_mlp Basic-0 weight (layer 12).
    end_mid_hbm  : [1024,  512] bf16  -- end_mlp Basic-1 weight (layer 13).
    end_small_hbm: [ 960,  256] bf16  -- layers 14..17 packed:
        [  0:512, :256] Basic-2 (512,256)   [512:768, :128] Basic-3 (256,128)
        [768:896, : 64] Basic-4 (128, 64)   [896:960, :  3] final   ( 64,  3)
    """
    # Kick off the end_mlp weight DMAs immediately so they stream while the
    # start/time branches compute on already-resident VMEM weights.
    big_cp = pltpu.make_async_copy(end_big_hbm, end_big, dma_sem.at[0])
    mid_cp = pltpu.make_async_copy(end_mid_hbm, end_mid, dma_sem.at[1])
    small_cp = pltpu.make_async_copy(end_small_hbm, end_small, dma_sem.at[2])
    big_cp.start()
    mid_cp.start()
    small_cp.start()

    def bias(layer, cout):
        r = 3 * layer
        return aux_ref[r:r + 1, :cout]

    def gamma(layer, cout):
        r = 3 * layer + 1
        return aux_ref[r:r + 1, :cout]

    def beta(layer, cout):
        r = 3 * layer + 2
        return aux_ref[r:r + 1, :cout]

    def matmul(x, w):
        """x: [B, cin] f32, w: [cin, cout] bf16 -> [B, cout] f32."""
        cin = w.shape[0]
        if cin <= 4:
            # Tiny contraction dim: VPU broadcast-MAC, skip the MXU entirely.
            w32 = w.astype(jnp.float32)
            y = x[:, 0:1] * w32[0:1, :]
            for k in range(1, cin):
                y = y + x[:, k:k + 1] * w32[k:k + 1, :]
            return y
        return jnp.dot(x.astype(jnp.bfloat16), w,
                       preferred_element_type=jnp.float32)

    def ln_relu(y, layer):
        """Single-pass LayerNorm (clamped biased var) + affine + ReLU."""
        cout = y.shape[-1]
        mean = jnp.mean(y, axis=-1, keepdims=True)
        mean_sq = jnp.mean(y * y, axis=-1, keepdims=True)
        var = jnp.maximum(mean_sq - mean * mean, 0.0)
        inv = jax.lax.rsqrt(var + LN_EPS)
        y = (y - mean) * inv * gamma(layer, cout) + beta(layer, cout)
        return jnp.maximum(y, 0.0)

    def basic(x, w, layer):
        cout = w.shape[1]
        y = matmul(x, w) + bias(layer, cout)
        return ln_relu(y, layer)

    def final_relu(x, w, layer):
        cout = w.shape[1]
        return jnp.maximum(matmul(x, w) + bias(layer, cout), 0.0)

    # ---------------- start_mlp (layers 0..4) ------------------------------ #
    x = start_ref[...]
    for i, w_ref in enumerate((w_s0, w_s1, w_s2, w_s3)):
        x = basic(x, w_ref[...], i)
    z1 = final_relu(x, w_s4[...], 4)

    # ---------------- time_mlp (layers 5..11) ------------------------------ #
    x = time_ref[...]
    for i, w_ref in enumerate((w_t0, w_t1, w_t2, w_t3, w_t4, w_t5)):
        x = basic(x, w_ref[...], 5 + i)
    z2 = final_relu(x, w_t6[...], 11)

    # ---------------- end_mlp (layers 12..17) ------------------------------ #
    # Layer 12: Basic(1024 -> 1024) with split weight => no concat of z1/z2.
    big_cp.wait()
    y = (jnp.dot(z1.astype(jnp.bfloat16), end_big[0:512, :],
                 preferred_element_type=jnp.float32)
         + jnp.dot(z2.astype(jnp.bfloat16), end_big[512:1024, :],
                   preferred_element_type=jnp.float32)
         + bias(12, 1024))
    x = ln_relu(y, 12)

    # Layer 13: Basic(1024 -> 512).
    mid_cp.wait()
    x = basic(x, end_mid[...], 13)

    # Layers 14..16: Basic(512->256), Basic(256->128), Basic(128->64).
    small_cp.wait()
    x = basic(x, end_small[0:512, 0:256], 14)
    x = basic(x, end_small[512:768, 0:128], 15)
    x = basic(x, end_small[768:896, 0:64], 16)

    # Layer 17: Linear(64, 3) + Sigmoid.
    y = matmul(x, end_small[896:960, 0:3]) + bias(17, 3)
    out_ref[...] = jax.nn.sigmoid(y).astype(out_ref.dtype)


def _vmem_spec():
    return pl.BlockSpec(memory_space=pltpu.MemorySpace.VMEM)


# ----------------------------- wrapper -------------------------------------- #
def net_forward(packed, start, time):
    """Fused Net.forward(start, time). start: [B,3], time: [B,1] -> [B,3]."""
    bw = packed["branch_weights"]
    bsz = start.shape[0]
    args = (start, time, packed["aux"], *bw,
            packed["end_big"], packed["end_mid"], packed["end_small"])
    n_vmem_in = 3 + len(bw)
    in_specs = ([_vmem_spec()] * n_vmem_in
                + [pl.BlockSpec(memory_space=pl.ANY)] * 3)
    return pl.pallas_call(
        _net_kernel,
        out_shape=jax.ShapeDtypeStruct((bsz, 3), jnp.float32),
        in_specs=in_specs,
        out_specs=_vmem_spec(),
        scratch_shapes=[
            pltpu.VMEM((1024, 1024), jnp.bfloat16),   # end_big  (2 MiB)
            pltpu.VMEM((1024, 512), jnp.bfloat16),    # end_mid  (1 MiB)
            pltpu.VMEM((960, 256), jnp.bfloat16),     # end_small (~0.5 MiB)
            pltpu.SemaphoreType.DMA((3,)),
        ],
        compiler_params=pltpu.CompilerParams(
            vmem_limit_bytes=16 * 1024 * 1024),       # ~5 MiB actual usage
    )(*args)


# ----------------------------- parameters ----------------------------------- #
def _init_linear(key, cin, cout):
    # Deterministic synthetic init (PyTorch-style uniform bound 1/sqrt(cin)).
    kw, kb = jax.random.split(key)
    bound = 1.0 / jnp.sqrt(jnp.float32(cin))
    w = jax.random.uniform(kw, (cin, cout), jnp.float32, -bound, bound)
    b = jax.random.uniform(kb, (cout,), jnp.float32, -bound, bound)
    return {"w": w, "b": b}


def _init_basic(key, cin, cout):
    p = _init_linear(key, cin, cout)
    p["gamma"] = jnp.ones((cout,), jnp.float32)
    p["beta"] = jnp.zeros((cout,), jnp.float32)
    return p


def init_net_params(seed=0):
    key = jax.random.PRNGKey(seed)
    keys = iter(jax.random.split(key, 32))
    params = {
        "start_mlp": {
            "basics": [_init_basic(next(keys), cin, cout)
                       for cin, cout in [(3, 64), (64, 128), (128, 256), (256, 512)]],
            "final": _init_linear(next(keys), 512, 512),
        },
        "time_mlp": {
            "basics": [_init_basic(next(keys), cin, cout)
                       for cin, cout in [(1, 16), (16, 32), (32, 64),
                                         (64, 128), (128, 256), (256, 512)]],
            "final": _init_linear(next(keys), 512, 512),
        },
        "end_mlp": {
            "basics": [_init_basic(next(keys), cin, cout)
                       for cin, cout in [(1024, 1024), (1024, 512), (512, 256),
                                         (256, 128), (128, 64)]],
            "final": _init_linear(next(keys), 64, 3),
        },
    }
    return params


def pack_params(params):
    """Convert the f32 params pytree into kernel-ready inputs:
       * branch_weights: tuple of 12 bf16 [cin, cout] arrays (start + time),
       * end_big / end_mid / end_small: bf16 HBM slabs for end_mlp weights,
       * aux: one [3 * N_LAYERS, MAX_COUT] f32 table of (bias, gamma, beta)."""
    zeros_row = jnp.zeros((1, MAX_COUT), jnp.float32)

    def row(v):
        v = jnp.asarray(v, jnp.float32).reshape(-1)
        return jnp.pad(v, (0, MAX_COUT - v.shape[0]))[None, :]

    rows, branch_weights = [], []

    def add_basic_aux(p):
        rows.extend([row(p["b"]), row(p["gamma"]), row(p["beta"])])

    def add_final_aux(p):
        rows.extend([row(p["b"]), zeros_row, zeros_row])

    for p in params["start_mlp"]["basics"]:
        branch_weights.append(p["w"].astype(jnp.bfloat16))
        add_basic_aux(p)
    branch_weights.append(params["start_mlp"]["final"]["w"].astype(jnp.bfloat16))
    add_final_aux(params["start_mlp"]["final"])

    for p in params["time_mlp"]["basics"]:
        branch_weights.append(p["w"].astype(jnp.bfloat16))
        add_basic_aux(p)
    branch_weights.append(params["time_mlp"]["final"]["w"].astype(jnp.bfloat16))
    add_final_aux(params["time_mlp"]["final"])

    eb = params["end_mlp"]["basics"]
    ef = params["end_mlp"]["final"]
    for p in eb:
        add_basic_aux(p)
    add_final_aux(ef)

    end_big = eb[0]["w"].astype(jnp.bfloat16)        # [1024, 1024]
    end_mid = eb[1]["w"].astype(jnp.bfloat16)        # [1024,  512]
    end_small = jnp.zeros((960, 256), jnp.bfloat16)  # layers 14..17 packed
    end_small = end_small.at[0:512, 0:256].set(eb[2]["w"].astype(jnp.bfloat16))
    end_small = end_small.at[512:768, 0:128].set(eb[3]["w"].astype(jnp.bfloat16))
    end_small = end_small.at[768:896, 0:64].set(eb[4]["w"].astype(jnp.bfloat16))
    end_small = end_small.at[896:960, 0:3].set(ef["w"].astype(jnp.bfloat16))

    aux = jnp.concatenate(rows, axis=0)              # [54, 1024] f32
    return {"branch_weights": tuple(branch_weights), "end_big": end_big,
            "end_mid": end_mid, "end_small": end_small, "aux": aux}


# ----------------------------- pure-JAX reference ---------------------------- #
def net_forward_reference(params, start, time):
    def basic(x, p):
        y = x @ p["w"] + p["b"]
        mean = y.mean(-1, keepdims=True)
        var = ((y - mean) ** 2).mean(-1, keepdims=True)
        y = (y - mean) / jnp.sqrt(var + LN_EPS)
        return jnp.maximum(y * p["gamma"] + p["beta"], 0.0)

    def branch(br, x, act):
        for p in br["basics"]:
            x = basic(x, p)
        y = x @ br["final"]["w"] + br["final"]["b"]
        return jnp.maximum(y, 0.0) if act == "relu" else jax.nn.sigmoid(y)

    z1 = branch(params["start_mlp"], start, "relu")
    z2 = branch(params["time_mlp"], time, "relu")
    z = jnp.concatenate([z1, z2], axis=-1)
    return branch(params["end_mlp"], z, "sigmoid")


# ----------------------------- main ----------------------------------------- #
if __name__ == "__main__":
    key = jax.random.PRNGKey(0)
    k_start, k_time = jax.random.split(key)
    B = 8
    start = jax.random.normal(k_start, (B, 3), jnp.float32)
    time = jax.random.normal(k_time, (B, 1), jnp.float32)

    params = init_net_params(seed=0)
    packed = pack_params(params)

    y = jax.jit(net_forward)(packed, start, time)
    y = jax.block_until_ready(y)

    assert y.shape == (B, 3) and y.dtype == jnp.float32
    assert bool(jnp.all(jnp.isfinite(y)))
    assert bool(jnp.all((y >= 0.0) & (y <= 1.0)))  # sigmoid output range

    # Loose tolerance check vs f32 reference (weights are bf16 in the kernel).
    y_ref = jax.jit(net_forward_reference)(params, start, time)
    y_ref = jax.block_until_ready(y_ref)
    assert bool(jnp.max(jnp.abs(y - y_ref)) < 0.15)

    print("KERNEL_OK")
</pallas_src>

<mosaic_0001>
module attributes {stable_mosaic.version = 11 : i64} {
  func.func @_net_kernel(%arg0: memref<8x3xf32, #tpu.memory_space<vmem>>, %arg1: memref<8x1xf32, #tpu.memory_space<vmem>>, %arg2: memref<54x1024xf32, #tpu.memory_space<vmem>>, %arg3: memref<3x64xbf16, #tpu.memory_space<vmem>>, %arg4: memref<64x128xbf16, #tpu.memory_space<vmem>>, %arg5: memref<128x256xbf16, #tpu.memory_space<vmem>>, %arg6: memref<256x512xbf16, #tpu.memory_space<vmem>>, %arg7: memref<512x512xbf16, #tpu.memory_space<vmem>>, %arg8: memref<1x16xbf16, #tpu.memory_space<vmem>>, %arg9: memref<16x32xbf16, #tpu.memory_space<vmem>>, %arg10: memref<32x64xbf16, #tpu.memory_space<vmem>>, %arg11: memref<64x128xbf16, #tpu.memory_space<vmem>>, %arg12: memref<128x256xbf16, #tpu.memory_space<vmem>>, %arg13: memref<256x512xbf16, #tpu.memory_space<vmem>>, %arg14: memref<512x512xbf16, #tpu.memory_space<vmem>>, %arg15: memref<1024x1024xbf16, #tpu.memory_space<any>>, %arg16: memref<1024x512xbf16, #tpu.memory_space<any>>, %arg17: memref<960x256xbf16, #tpu.memory_space<any>>, %arg18: memref<8x3xf32, #tpu.memory_space<vmem>>, %arg19: memref<1024x1024xbf16, #tpu.memory_space<vmem>>, %arg20: memref<1024x512xbf16, #tpu.memory_space<vmem>>, %arg21: memref<960x256xbf16, #tpu.memory_space<vmem>>, %arg22: memref<3x!tpu.dma_semaphore, #tpu.memory_space<semaphore_mem>>) attributes {dimension_semantics = [], scalar_prefetch = 0 : i64, scratch_operands = 4 : i64, tpu.core_type = #tpu.core_type<tc>} {
    %c0_i32 = arith.constant 0 : i32
    %0 = tpu.memref_slice %arg22[%c0_i32] : memref<3x!tpu.dma_semaphore, #tpu.memory_space<semaphore_mem>> -> memref<1x!tpu.dma_semaphore, #tpu.memory_space<semaphore_mem>>
    %1 = tpu.memref_squeeze %0 : memref<1x!tpu.dma_semaphore, #tpu.memory_space<semaphore_mem>> -> memref<!tpu.dma_semaphore, #tpu.memory_space<semaphore_mem>>
    tpu.enqueue_dma source(%arg15 : memref<1024x1024xbf16, #tpu.memory_space<any>>) target(%arg19 : memref<1024x1024xbf16, #tpu.memory_space<vmem>>) target_semaphore(%1 : memref<!tpu.dma_semaphore, #tpu.memory_space<semaphore_mem>>)
    %c1_i32 = arith.constant 1 : i32
    %2 = tpu.memref_slice %arg22[%c1_i32] : memref<3x!tpu.dma_semaphore, #tpu.memory_space<semaphore_mem>> -> memref<1x!tpu.dma_semaphore, #tpu.memory_space<semaphore_mem>>
    %3 = tpu.memref_squeeze %2 : memref<1x!tpu.dma_semaphore, #tpu.memory_space<semaphore_mem>> -> memref<!tpu.dma_semaphore, #tpu.memory_space<semaphore_mem>>
    tpu.enqueue_dma source(%arg16 : memref<1024x512xbf16, #tpu.memory_space<any>>) target(%arg20 : memref<1024x512xbf16, #tpu.memory_space<vmem>>) target_semaphore(%3 : memref<!tpu.dma_semaphore, #tpu.memory_space<semaphore_mem>>)
    %c2_i32 = arith.constant 2 : i32
    %4 = tpu.memref_slice %arg22[%c2_i32] : memref<3x!tpu.dma_semaphore, #tpu.memory_space<semaphore_mem>> -> memref<1x!tpu.dma_semaphore, #tpu.memory_space<semaphore_mem>>
    %5 = tpu.memref_squeeze %4 : memref<1x!tpu.dma_semaphore, #tpu.memory_space<semaphore_mem>> -> memref<!tpu.dma_semaphore, #tpu.memory_space<semaphore_mem>>
    tpu.enqueue_dma source(%arg17 : memref<960x256xbf16, #tpu.memory_space<any>>) target(%arg21 : memref<960x256xbf16, #tpu.memory_space<vmem>>) target_semaphore(%5 : memref<!tpu.dma_semaphore, #tpu.memory_space<semaphore_mem>>)
    %c0 = arith.constant 0 : index
    %c0_0 = arith.constant 0 : index
    %6 = vector.load %arg0[%c0, %c0_0] : memref<8x3xf32, #tpu.memory_space<vmem>>, vector<8x3xf32>
    %c0_1 = arith.constant 0 : index
    %c0_2 = arith.constant 0 : index
    %7 = vector.load %arg3[%c0_1, %c0_2] : memref<3x64xbf16, #tpu.memory_space<vmem>>, vector<3x64xbf16>
    %8 = arith.extf %7 : vector<3x64xbf16> to vector<3x64xf32>
    %9 = vector.extract_strided_slice %6 {offsets = [0, 0], sizes = [8, 1], strides = [1, 1]} : vector<8x3xf32> to vector<8x1xf32>
    %10 = vector.extract_strided_slice %8 {offsets = [0, 0], sizes = [1, 64], strides = [1, 1]} : vector<3x64xf32> to vector<1x64xf32>
    %11 = vector.broadcast %9 : vector<8x1xf32> to vector<8x64xf32>
    %12 = vector.broadcast %10 : vector<1x64xf32> to vector<8x64xf32>
    %13 = arith.mulf %11, %12 : vector<8x64xf32>
    %14 = vector.extract_strided_slice %6 {offsets = [0, 1], sizes = [8, 1], strides = [1, 1]} : vector<8x3xf32> to vector<8x1xf32>
    %15 = vector.extract_strided_slice %8 {offsets = [1, 0], sizes = [1, 64], strides = [1, 1]} : vector<3x64xf32> to vector<1x64xf32>
    %16 = vector.broadcast %14 : vector<8x1xf32> to vector<8x64xf32>
    %17 = vector.broadcast %15 : vector<1x64xf32> to vector<8x64xf32>
    %18 = arith.mulf %16, %17 : vector<8x64xf32>
    %19 = arith.addf %13, %18 : vector<8x64xf32>
    %20 = vector.extract_strided_slice %6 {offsets = [0, 2], sizes = [8, 1], strides = [1, 1]} : vector<8x3xf32> to vector<8x1xf32>
    %21 = vector.extract_strided_slice %8 {offsets = [2, 0], sizes = [1, 64], strides = [1, 1]} : vector<3x64xf32> to vector<1x64xf32>
    %22 = vector.broadcast %20 : vector<8x1xf32> to vector<8x64xf32>
    %23 = vector.broadcast %21 : vector<1x64xf32> to vector<8x64xf32>
    %24 = arith.mulf %22, %23 : vector<8x64xf32>
    %25 = arith.addf %19, %24 : vector<8x64xf32>
    %c0_3 = arith.constant 0 : index
    %c0_4 = arith.constant 0 : index
    %26 = vector.load %arg2[%c0_3, %c0_4] : memref<54x1024xf32, #tpu.memory_space<vmem>>, vector<1x64xf32>
    %27 = vector.broadcast %26 : vector<1x64xf32> to vector<8x64xf32>
    %28 = arith.addf %25, %27 : vector<8x64xf32>
    %cst = arith.constant dense<0.000000e+00> : vector<8xf32>
    %29 = vector.multi_reduction <add>, %28, %cst [1] : vector<8x64xf32> to vector<8xf32>
    %30 = vector.shape_cast %29 : vector<8xf32> to vector<8x1xf32>
    %cst_5 = arith.constant 6.400000e+01 : f32
    %31 = vector.broadcast %cst_5 : f32 to vector<8x1xf32>
    %32 = arith.divf %30, %31 : vector<8x1xf32>
    %33 = arith.mulf %28, %28 : vector<8x64xf32>
    %cst_6 = arith.constant dense<0.000000e+00> : vector<8xf32>
    %34 = vector.multi_reduction <add>, %33, %cst_6 [1] : vector<8x64xf32> to vector<8xf32>
    %35 = vector.shape_cast %34 : vector<8xf32> to vector<8x1xf32>
    %cst_7 = arith.constant 6.400000e+01 : f32
    %36 = vector.broadcast %cst_7 : f32 to vector<8x1xf32>
    %37 = arith.divf %35, %36 : vector<8x1xf32>
    %38 = arith.mulf %32, %32 : vector<8x1xf32>
    %39 = arith.subf %37, %38 : vector<8x1xf32>
    %cst_8 = arith.constant 0.000000e+00 : f32
    %40 = vector.broadcast %cst_8 : f32 to vector<8x1xf32>
    %41 = arith.maximumf %39, %40 : vector<8x1xf32>
    %cst_9 = arith.constant 9.99999974E-6 : f32
    %42 = vector.broadcast %cst_9 : f32 to vector<8x1xf32>
    %43 = arith.addf %41, %42 : vector<8x1xf32>
    %44 = math.rsqrt %43 : vector<8x1xf32>
    %45 = vector.broadcast %32 : vector<8x1xf32> to vector<8x64xf32>
    %46 = arith.subf %28, %45 : vector<8x64xf32>
    %47 = vector.broadcast %44 : vector<8x1xf32> to vector<8x64xf32>
    %48 = arith.mulf %46, %47 : vector<8x64xf32>
    %c1 = arith.constant 1 : index
    %c0_10 = arith.constant 0 : index
    %49 = vector.load %arg2[%c1, %c0_10] : memref<54x1024xf32, #tpu.memory_space<vmem>>, vector<1x64xf32>
    %50 = vector.broadcast %49 : vector<1x64xf32> to vector<8x64xf32>
    %51 = arith.mulf %48, %50 : vector<8x64xf32>
    %c2 = arith.constant 2 : index
    %c0_11 = arith.constant 0 : index
    %52 = vector.load %arg2[%c2, %c0_11] : memref<54x1024xf32, #tpu.memory_space<vmem>>, vector<1x64xf32>
    %53 = vector.broadcast %52 : vector<1x64xf32> to vector<8x64xf32>
    %54 = arith.addf %51, %53 : vector<8x64xf32>
    %cst_12 = arith.constant 0.000000e+00 : f32
    %55 = vector.broadcast %cst_12 : f32 to vector<8x64xf32>
    %56 = arith.maximumf %54, %55 : vector<8x64xf32>
    %c0_13 = arith.constant 0 : index
    %c0_14 = arith.constant 0 : index
    %57 = vector.load %arg4[%c0_13, %c0_14] : memref<64x128xbf16, #tpu.memory_space<vmem>>, vector<64x128xbf16>
    %58 = arith.truncf %56 : vector<8x64xf32> to vector<8x64xbf16>
    %cst_15 = arith.constant dense<0.000000e+00> : vector<8x128xf32>
    %59 = tpu.matmul %58, %57, %cst_15 {dimension_numbers = #tpu.dot_dimension_numbers<[1], [0], [0], [1], [0, 0, 1, 1], [], []>} : vector<8x64xbf16>, vector<64x128xbf16>, vector<8x128xf32> -> vector<8x128xf32>
    %c3 = arith.constant 3 : index
    %c0_16 = arith.constant 0 : index
    %60 = vector.load %arg2[%c3, %c0_16] : memref<54x1024xf32, #tpu.memory_space<vmem>>, vector<1x128xf32>
    %61 = vector.broadcast %60 : vector<1x128xf32> to vector<8x128xf32>
    %62 = arith.addf %59, %61 : vector<8x128xf32>
    %cst_17 = arith.constant dense<0.000000e+00> : vector<8xf32>
    %63 = vector.multi_reduction <add>, %62, %cst_17 [1] : vector<8x128xf32> to vector<8xf32>
    %64 = vector.shape_cast %63 : vector<8xf32> to vector<8x1xf32>
    %cst_18 = arith.constant 1.280000e+02 : f32
    %65 = vector.broadcast %cst_18 : f32 to vector<8x1xf32>
    %66 = arith.divf %64, %65 : vector<8x1xf32>
    %67 = arith.mulf %62, %62 : vector<8x128xf32>
    %cst_19 = arith.constant dense<0.000000e+00> : vector<8xf32>
    %68 = vector.multi_reduction <add>, %67, %cst_19 [1] : vector<8x128xf32> to vector<8xf32>
    %69 = vector.shape_cast %68 : vector<8xf32> to vector<8x1xf32>
    %cst_20 = arith.constant 1.280000e+02 : f32
    %70 = vector.broadcast %cst_20 : f32 to vector<8x1xf32>
    %71 = arith.divf %69, %70 : vector<8x1xf32>
    %72 = arith.mulf %66, %66 : vector<8x1xf32>
    %73 = arith.subf %71, %72 : vector<8x1xf32>
    %cst_21 = arith.constant 0.000000e+00 : f32
    %74 = vector.broadcast %cst_21 : f32 to vector<8x1xf32>
    %75 = arith.maximumf %73, %74 : vector<8x1xf32>
    %cst_22 = arith.constant 9.99999974E-6 : f32
    %76 = vector.broadcast %cst_22 : f32 to vector<8x1xf32>
    %77 = arith.addf %75, %76 : vector<8x1xf32>
    %78 = math.rsqrt %77 : vector<8x1xf32>
    %79 = vector.broadcast %66 : vector<8x1xf32> to vector<8x128xf32>
    %80 = arith.subf %62, %79 : vector<8x128xf32>
    %81 = vector.broadcast %78 : vector<8x1xf32> to vector<8x128xf32>
    %82 = arith.mulf %80, %81 : vector<8x128xf32>
    %c4 = arith.constant 4 : index
    %c0_23 = arith.constant 0 : index
    %83 = vector.load %arg2[%c4, %c0_23] : memref<54x1024xf32, #tpu.memory_space<vmem>>, vector<1x128xf32>
    %84 = vector.broadcast %83 : vector<1x128xf32> to vector<8x128xf32>
    %85 = arith.mulf %82, %84 : vector<8x128xf32>
    %c5 = arith.constant 5 : index
    %c0_24 = arith.constant 0 : index
    %86 = vector.load %arg2[%c5, %c0_24] : memref<54x1024xf32, #tpu.memory_space<vmem>>, vector<1x128xf32>
    %87 = vector.broadcast %86 : vector<1x128xf32> to vector<8x128xf32>
    %88 = arith.addf %85, %87 : vector<8x128xf32>
    %cst_25 = arith.constant 0.000000e+00 : f32
    %89 = vector.broadcast %cst_25 : f32 to vector<8x128xf32>
    %90 = arith.maximumf %88, %89 : vector<8x128xf32>
    %c0_26 = arith.constant 0 : index
    %c0_27 = arith.constant 0 : index
    %91 = vector.load %arg5[%c0_26, %c0_27] : memref<128x256xbf16, #tpu.memory_space<vmem>>, vector<128x256xbf16>
    %92 = arith.truncf %90 : vector<8x128xf32> to vector<8x128xbf16>
    %cst_28 = arith.constant dense<0.000000e+00> : vector<8x256xf32>
    %93 = tpu.matmul %92, %91, %cst_28 {dimension_numbers = #tpu.dot_dimension_numbers<[1], [0], [0], [1], [0, 0, 1, 1], [], []>} : vector<8x128xbf16>, vector<128x256xbf16>, vector<8x256xf32> -> vector<8x256xf32>
    %c6 = arith.constant 6 : index
    %c0_29 = arith.constant 0 : index
    %94 = vector.load %arg2[%c6, %c0_29] : memref<54x1024xf32, #tpu.memory_space<vmem>>, vector<1x256xf32>
    %95 = vector.broadcast %94 : vector<1x256xf32> to vector<8x256xf32>
    %96 = arith.addf %93, %95 : vector<8x256xf32>
    %cst_30 = arith.constant dense<0.000000e+00> : vector<8xf32>
    %97 = vector.multi_reduction <add>, %96, %cst_30 [1] : vector<8x256xf32> to vector<8xf32>
    %98 = vector.shape_cast %97 : vector<8xf32> to vector<8x1xf32>
    %cst_31 = arith.constant 2.560000e+02 : f32
    %99 = vector.broadcast %cst_31 : f32 to vector<8x1xf32>
    %100 = arith.divf %98, %99 : vector<8x1xf32>
    %101 = arith.mulf %96, %96 : vector<8x256xf32>
    %cst_32 = arith.constant dense<0.000000e+00> : vector<8xf32>
    %102 = vector.multi_reduction <add>, %101, %cst_32 [1] : vector<8x256xf32> to vector<8xf32>
    %103 = vector.shape_cast %102 : vector<8xf32> to vector<8x1xf32>
    %cst_33 = arith.constant 2.560000e+02 : f32
    %104 = vector.broadcast %cst_33 : f32 to vector<8x1xf32>
    %105 = arith.divf %103, %104 : vector<8x1xf32>
    %106 = arith.mulf %100, %100 : vector<8x1xf32>
    %107 = arith.subf %105, %106 : vector<8x1xf32>
    %cst_34 = arith.constant 0.000000e+00 : f32
    %108 = vector.broadcast %cst_34 : f32 to vector<8x1xf32>
    %109 = arith.maximumf %107, %108 : vector<8x1xf32>
    %cst_35 = arith.constant 9.99999974E-6 : f32
    %110 = vector.broadcast %cst_35 : f32 to vector<8x1xf32>
    %111 = arith.addf %109, %110 : vector<8x1xf32>
    %112 = math.rsqrt %111 : vector<8x1xf32>
    %113 = vector.broadcast %100 : vector<8x1xf32> to vector<8x256xf32>
    %114 = arith.subf %96, %113 : vector<8x256xf32>
    %115 = vector.broadcast %112 : vector<8x1xf32> to vector<8x256xf32>
    %116 = arith.mulf %114, %115 : vector<8x256xf32>
    %c7 = arith.constant 7 : index
    %c0_36 = arith.constant 0 : index
    %117 = vector.load %arg2[%c7, %c0_36] : memref<54x1024xf32, #tpu.memory_space<vmem>>, vector<1x256xf32>
    %118 = vector.broadcast %117 : vector<1x256xf32> to vector<8x256xf32>
    %119 = arith.mulf %116, %118 : vector<8x256xf32>
    %c8 = arith.constant 8 : index
    %c0_37 = arith.constant 0 : index
    %120 = vector.load %arg2[%c8, %c0_37] : memref<54x1024xf32, #tpu.memory_space<vmem>>, vector<1x256xf32>
    %121 = vector.broadcast %120 : vector<1x256xf32> to vector<8x256xf32>
    %122 = arith.addf %119, %121 : vector<8x256xf32>
    %cst_38 = arith.constant 0.000000e+00 : f32
    %123 = vector.broadcast %cst_38 : f32 to vector<8x256xf32>
    %124 = arith.maximumf %122, %123 : vector<8x256xf32>
    %c0_39 = arith.constant 0 : index
    %c0_40 = arith.constant 0 : index
    %125 = vector.load %arg6[%c0_39, %c0_40] : memref<256x512xbf16, #tpu.memory_space<vmem>>, vector<256x512xbf16>
    %126 = arith.truncf %124 : vector<8x256xf32> to vector<8x256xbf16>
    %cst_41 = arith.constant dense<0.000000e+00> : vector<8x512xf32>
    %127 = tpu.matmul %126, %125, %cst_41 {dimension_numbers = #tpu.dot_dimension_numbers<[1], [0], [0], [1], [0, 0, 1, 1], [], []>} : vector<8x256xbf16>, vector<256x512xbf16>, vector<8x512xf32> -> vector<8x512xf32>
    %c9 = arith.constant 9 : index
    %c0_42 = arith.constant 0 : index
    %128 = vector.load %arg2[%c9, %c0_42] : memref<54x1024xf32, #tpu.memory_space<vmem>>, vector<1x512xf32>
    %129 = vector.broadcast %128 : vector<1x512xf32> to vector<8x512xf32>
    %130 = arith.addf %127, %129 : vector<8x512xf32>
    %cst_43 = arith.constant dense<0.000000e+00> : vector<8xf32>
    %131 = vector.multi_reduction <add>, %130, %cst_43 [1] : vector<8x512xf32> to vector<8xf32>
    %132 = vector.shape_cast %131 : vector<8xf32> to vector<8x1xf32>
    %cst_44 = arith.constant 5.120000e+02 : f32
    %133 = vector.broadcast %cst_44 : f32 to vector<8x1xf32>
    %134 = arith.divf %132, %133 : vector<8x1xf32>
    %135 = arith.mulf %130, %130 : vector<8x512xf32>
    %cst_45 = arith.constant dense<0.000000e+00> : vector<8xf32>
    %136 = vector.multi_reduction <add>, %135, %cst_45 [1] : vector<8x512xf32> to vector<8xf32>
    %137 = vector.shape_cast %136 : vector<8xf32> to vector<8x1xf32>
    %cst_46 = arith.constant 5.120000e+02 : f32
    %138 = vector.broadcast %cst_46 : f32 to vector<8x1xf32>
    %139 = arith.divf %137, %138 : vector<8x1xf32>
    %140 = arith.mulf %134, %134 : vector<8x1xf32>
    %141 = arith.subf %139, %140 : vector<8x1xf32>
    %cst_47 = arith.constant 0.000000e+00 : f32
    %142 = vector.broadcast %cst_47 : f32 to vector<8x1xf32>
    %143 = arith.maximumf %141, %142 : vector<8x1xf32>
    %cst_48 = arith.constant 9.99999974E-6 : f32
    %144 = vector.broadcast %cst_48 : f32 to vector<8x1xf32>
    %145 = arith.addf %143, %144 : vector<8x1xf32>
    %146 = math.rsqrt %145 : vector<8x1xf32>
    %147 = vector.broadcast %134 : vector<8x1xf32> to vector<8x512xf32>
    %148 = arith.subf %130, %147 : vector<8x512xf32>
    %149 = vector.broadcast %146 : vector<8x1xf32> to vector<8x512xf32>
    %150 = arith.mulf %148, %149 : vector<8x512xf32>
    %c10 = arith.constant 10 : index
    %c0_49 = arith.constant 0 : index
    %151 = vector.load %arg2[%c10, %c0_49] : memref<54x1024xf32, #tpu.memory_space<vmem>>, vector<1x512xf32>
    %152 = vector.broadcast %151 : vector<1x512xf32> to vector<8x512xf32>
    %153 = arith.mulf %150, %152 : vector<8x512xf32>
    %c11 = arith.constant 11 : index
    %c0_50 = arith.constant 0 : index
    %154 = vector.load %arg2[%c11, %c0_50] : memref<54x1024xf32, #tpu.memory_space<vmem>>, vector<1x512xf32>
    %155 = vector.broadcast %154 : vector<1x512xf32> to vector<8x512xf32>
    %156 = arith.addf %153, %155 : vector<8x512xf32>
    %cst_51 = arith.constant 0.000000e+00 : f32
    %157 = vector.broadcast %cst_51 : f32 to vector<8x512xf32>
    %158 = arith.maximumf %156, %157 : vector<8x512xf32>
    %c0_52 = arith.constant 0 : index
    %c0_53 = arith.constant 0 : index
    %159 = vector.load %arg7[%c0_52, %c0_53] : memref<512x512xbf16, #tpu.memory_space<vmem>>, vector<512x512xbf16>
    %160 = arith.truncf %158 : vector<8x512xf32> to vector<8x512xbf16>
    %cst_54 = arith.constant dense<0.000000e+00> : vector<8x512xf32>
    %161 = tpu.matmul %160, %159, %cst_54 {dimension_numbers = #tpu.dot_dimension_numbers<[1], [0], [0], [1], [0, 0, 1, 1], [], []>} : vector<8x512xbf16>, vector<512x512xbf16>, vector<8x512xf32> -> vector<8x512xf32>
    %c12 = arith.constant 12 : index
    %c0_55 = arith.constant 0 : index
    %162 = vector.load %arg2[%c12, %c0_55] : memref<54x1024xf32, #tpu.memory_space<vmem>>, vector<1x512xf32>
    %163 = vector.broadcast %162 : vector<1x512xf32> to vector<8x512xf32>
    %164 = arith.addf %161, %163 : vector<8x512xf32>
    %cst_56 = arith.constant 0.000000e+00 : f32
    %165 = vector.broadcast %cst_56 : f32 to vector<8x512xf32>
    %166 = arith.maximumf %164, %165 : vector<8x512xf32>
    %c0_57 = arith.constant 0 : index
    %c0_58 = arith.constant 0 : index
    %167 = vector.load %arg1[%c0_57, %c0_58] : memref<8x1xf32, #tpu.memory_space<vmem>>, vector<8x1xf32>
    %c0_59 = arith.constant 0 : index
    %c0_60 = arith.constant 0 : index
    %168 = vector.load %arg8[%c0_59, %c0_60] : memref<1x16xbf16, #tpu.memory_space<vmem>>, vector<1x16xbf16>
    %169 = arith.extf %168 : vector<1x16xbf16> to vector<1x16xf32>
    %170 = vector.broadcast %167 : vector<8x1xf32> to vector<8x16xf32>
    %171 = vector.broadcast %169 : vector<1x16xf32> to vector<8x16xf32>
    %172 = arith.mulf %170, %171 : vector<8x16xf32>
    %c15 = arith.constant 15 : index
    %c0_61 = arith.constant 0 : index
    %173 = vector.load %arg2[%c15, %c0_61] : memref<54x1024xf32, #tpu.memory_space<vmem>>, vector<1x16xf32>
    %174 = vector.broadcast %173 : vector<1x16xf32> to vector<8x16xf32>
    %175 = arith.addf %172, %174 : vector<8x16xf32>
    %cst_62 = arith.constant dense<0.000000e+00> : vector<8xf32>
    %176 = vector.multi_reduction <add>, %175, %cst_62 [1] : vector<8x16xf32> to vector<8xf32>
    %177 = vector.shape_cast %176 : vector<8xf32> to vector<8x1xf32>
    %cst_63 = arith.constant 1.600000e+01 : f32
    %178 = vector.broadcast %cst_63 : f32 to vector<8x1xf32>
    %179 = arith.divf %177, %178 : vector<8x1xf32>
    %180 = arith.mulf %175, %175 : vector<8x16xf32>
    %cst_64 = arith.constant dense<0.000000e+00> : vector<8xf32>
    %181 = vector.multi_reduction <add>, %180, %cst_64 [1] : vector<8x16xf32> to vector<8xf32>
    %182 = vector.shape_cast %181 : vector<8xf32> to vector<8x1xf32>
    %cst_65 = arith.constant 1.600000e+01 : f32
    %183 = vector.broadcast %cst_65 : f32 to vector<8x1xf32>
    %184 = arith.divf %182, %183 : vector<8x1xf32>
    %185 = arith.mulf %179, %179 : vector<8x1xf32>
    %186 = arith.subf %184, %185 : vector<8x1xf32>
    %cst_66 = arith.constant 0.000000e+00 : f32
    %187 = vector.broadcast %cst_66 : f32 to vector<8x1xf32>
    %188 = arith.maximumf %186, %187 : vector<8x1xf32>
    %cst_67 = arith.constant 9.99999974E-6 : f32
    %189 = vector.broadcast %cst_67 : f32 to vector<8x1xf32>
    %190 = arith.addf %188, %189 : vector<8x1xf32>
    %191 = math.rsqrt %190 : vector<8x1xf32>
    %192 = vector.broadcast %179 : vector<8x1xf32> to vector<8x16xf32>
    %193 = arith.subf %175, %192 : vector<8x16xf32>
    %194 = vector.broadcast %191 : vector<8x1xf32> to vector<8x16xf32>
    %195 = arith.mulf %193, %194 : vector<8x16xf32>
    %c16 = arith.constant 16 : index
    %c0_68 = arith.constant 0 : index
    %196 = vector.load %arg2[%c16, %c0_68] : memref<54x1024xf32, #tpu.memory_space<vmem>>, vector<1x16xf32>
    %197 = vector.broadcast %196 : vector<1x16xf32> to vector<8x16xf32>
    %198 = arith.mulf %195, %197 : vector<8x16xf32>
    %c17 = arith.constant 17 : index
    %c0_69 = arith.constant 0 : index
    %199 = vector.load %arg2[%c17, %c0_69] : memref<54x1024xf32, #tpu.memory_space<vmem>>, vector<1x16xf32>
    %200 = vector.broadcast %199 : vector<1x16xf32> to vector<8x16xf32>
    %201 = arith.addf %198, %200 : vector<8x16xf32>
    %cst_70 = arith.constant 0.000000e+00 : f32
    %202 = vector.broadcast %cst_70 : f32 to vector<8x16xf32>
    %203 = arith.maximumf %201, %202 : vector<8x16xf32>
    %c0_71 = arith.constant 0 : index
    %c0_72 = arith.constant 0 : index
    %204 = vector.load %arg9[%c0_71, %c0_72] : memref<16x32xbf16, #tpu.memory_space<vmem>>, vector<16x32xbf16>
    %205 = arith.truncf %203 : vector<8x16xf32> to vector<8x16xbf16>
    %cst_73 = arith.constant dense<0.000000e+00> : vector<8x32xf32>
    %206 = tpu.matmul %205, %204, %cst_73 {dimension_numbers = #tpu.dot_dimension_numbers<[1], [0], [0], [1], [0, 0, 1, 1], [], []>} : vector<8x16xbf16>, vector<16x32xbf16>, vector<8x32xf32> -> vector<8x32xf32>
    %c18 = arith.constant 18 : index
    %c0_74 = arith.constant 0 : index
    %207 = vector.load %arg2[%c18, %c0_74] : memref<54x1024xf32, #tpu.memory_space<vmem>>, vector<1x32xf32>
    %208 = vector.broadcast %207 : vector<1x32xf32> to vector<8x32xf32>
    %209 = arith.addf %206, %208 : vector<8x32xf32>
    %cst_75 = arith.constant dense<0.000000e+00> : vector<8xf32>
    %210 = vector.multi_reduction <add>, %209, %cst_75 [1] : vector<8x32xf32> to vector<8xf32>
    %211 = vector.shape_cast %210 : vector<8xf32> to vector<8x1xf32>
    %cst_76 = arith.constant 3.200000e+01 : f32
    %212 = vector.broadcast %cst_76 : f32 to vector<8x1xf32>
    %213 = arith.divf %211, %212 : vector<8x1xf32>
    %214 = arith.mulf %209, %209 : vector<8x32xf32>
    %cst_77 = arith.constant dense<0.000000e+00> : vector<8xf32>
    %215 = vector.multi_reduction <add>, %214, %cst_77 [1] : vector<8x32xf32> to vector<8xf32>
    %216 = vector.shape_cast %215 : vector<8xf32> to vector<8x1xf32>
    %cst_78 = arith.constant 3.200000e+01 : f32
    %217 = vector.broadcast %cst_78 : f32 to vector<8x1xf32>
    %218 = arith.divf %216, %217 : vector<8x1xf32>
    %219 = arith.mulf %213, %213 : vector<8x1xf32>
    %220 = arith.subf %218, %219 : vector<8x1xf32>
    %cst_79 = arith.constant 0.000000e+00 : f32
    %221 = vector.broadcast %cst_79 : f32 to vector<8x1xf32>
    %222 = arith.maximumf %220, %221 : vector<8x1xf32>
    %cst_80 = arith.constant 9.99999974E-6 : f32
    %223 = vector.broadcast %cst_80 : f32 to vector<8x1xf32>
    %224 = arith.addf %222, %223 : vector<8x1xf32>
    %225 = math.rsqrt %224 : vector<8x1xf32>
    %226 = vector.broadcast %213 : vector<8x1xf32> to vector<8x32xf32>
    %227 = arith.subf %209, %226 : vector<8x32xf32>
    %228 = vector.broadcast %225 : vector<8x1xf32> to vector<8x32xf32>
    %229 = arith.mulf %227, %228 : vector<8x32xf32>
    %c19 = arith.constant 19 : index
    %c0_81 = arith.constant 0 : index
    %230 = vector.load %arg2[%c19, %c0_81] : memref<54x1024xf32, #tpu.memory_space<vmem>>, vector<1x32xf32>
    %231 = vector.broadcast %230 : vector<1x32xf32> to vector<8x32xf32>
    %232 = arith.mulf %229, %231 : vector<8x32xf32>
    %c20 = arith.constant 20 : index
    %c0_82 = arith.constant 0 : index
    %233 = vector.load %arg2[%c20, %c0_82] : memref<54x1024xf32, #tpu.memory_space<vmem>>, vector<1x32xf32>
    %234 = vector.broadcast %233 : vector<1x32xf32> to vector<8x32xf32>
    %235 = arith.addf %232, %234 : vector<8x32xf32>
    %cst_83 = arith.constant 0.000000e+00 : f32
    %236 = vector.broadcast %cst_83 : f32 to vector<8x32xf32>
    %237 = arith.maximumf %235, %236 : vector<8x32xf32>
    %c0_84 = arith.constant 0 : index
    %c0_85 = arith.constant 0 : index
    %238 = vector.load %arg10[%c0_84, %c0_85] : memref<32x64xbf16, #tpu.memory_space<vmem>>, vector<32x64xbf16>
    %239 = arith.truncf %237 : vector<8x32xf32> to vector<8x32xbf16>
    %cst_86 = arith.constant dense<0.000000e+00> : vector<8x64xf32>
    %240 = tpu.matmul %239, %238, %cst_86 {dimension_numbers = #tpu.dot_dimension_numbers<[1], [0], [0], [1], [0, 0, 1, 1], [], []>} : vector<8x32xbf16>, vector<32x64xbf16>, vector<8x64xf32> -> vector<8x64xf32>
    %c21 = arith.constant 21 : index
    %c0_87 = arith.constant 0 : index
    %241 = vector.load %arg2[%c21, %c0_87] : memref<54x1024xf32, #tpu.memory_space<vmem>>, vector<1x64xf32>
    %242 = vector.broadcast %241 : vector<1x64xf32> to vector<8x64xf32>
    %243 = arith.addf %240, %242 : vector<8x64xf32>
    %cst_88 = arith.constant dense<0.000000e+00> : vector<8xf32>
    %244 = vector.multi_reduction <add>, %243, %cst_88 [1] : vector<8x64xf32> to vector<8xf32>
    %245 = vector.shape_cast %244 : vector<8xf32> to vector<8x1xf32>
    %cst_89 = arith.constant 6.400000e+01 : f32
    %246 = vector.broadcast %cst_89 : f32 to vector<8x1xf32>
    %247 = arith.divf %245, %246 : vector<8x1xf32>
    %248 = arith.mulf %243, %243 : vector<8x64xf32>
    %cst_90 = arith.constant dense<0.000000e+00> : vector<8xf32>
    %249 = vector.multi_reduction <add>, %248, %cst_90 [1] : vector<8x64xf32> to vector<8xf32>
    %250 = vector.shape_cast %249 : vector<8xf32> to vector<8x1xf32>
    %cst_91 = arith.constant 6.400000e+01 : f32
    %251 = vector.broadcast %cst_91 : f32 to vector<8x1xf32>
    %252 = arith.divf %250, %251 : vector<8x1xf32>
    %253 = arith.mulf %247, %247 : vector<8x1xf32>
    %254 = arith.subf %252, %253 : vector<8x1xf32>
    %cst_92 = arith.constant 0.000000e+00 : f32
    %255 = vector.broadcast %cst_92 : f32 to vector<8x1xf32>
    %256 = arith.maximumf %254, %255 : vector<8x1xf32>
    %cst_93 = arith.constant 9.99999974E-6 : f32
    %257 = vector.broadcast %cst_93 : f32 to vector<8x1xf32>
    %258 = arith.addf %256, %257 : vector<8x1xf32>
    %259 = math.rsqrt %258 : vector<8x1xf32>
    %260 = vector.broadcast %247 : vector<8x1xf32> to vector<8x64xf32>
    %261 = arith.subf %243, %260 : vector<8x64xf32>
    %262 = vector.broadcast %259 : vector<8x1xf32> to vector<8x64xf32>
    %263 = arith.mulf %261, %262 : vector<8x64xf32>
    %c22 = arith.constant 22 : index
    %c0_94 = arith.constant 0 : index
    %264 = vector.load %arg2[%c22, %c0_94] : memref<54x1024xf32, #tpu.memory_space<vmem>>, vector<1x64xf32>
    %265 = vector.broadcast %264 : vector<1x64xf32> to vector<8x64xf32>
    %266 = arith.mulf %263, %265 : vector<8x64xf32>
    %c23 = arith.constant 23 : index
    %c0_95 = arith.constant 0 : index
    %267 = vector.load %arg2[%c23, %c0_95] : memref<54x1024xf32, #tpu.memory_space<vmem>>, vector<1x64xf32>
    %268 = vector.broadcast %267 : vector<1x64xf32> to vector<8x64xf32>
    %269 = arith.addf %266, %268 : vector<8x64xf32>
    %cst_96 = arith.constant 0.000000e+00 : f32
    %270 = vector.broadcast %cst_96 : f32 to vector<8x64xf32>
    %271 = arith.maximumf %269, %270 : vector<8x64xf32>
    %c0_97 = arith.constant 0 : index
    %c0_98 = arith.constant 0 : index
    %272 = vector.load %arg11[%c0_97, %c0_98] : memref<64x128xbf16, #tpu.memory_space<vmem>>, vector<64x128xbf16>
    %273 = arith.truncf %271 : vector<8x64xf32> to vector<8x64xbf16>
    %cst_99 = arith.constant dense<0.000000e+00> : vector<8x128xf32>
    %274 = tpu.matmul %273, %272, %cst_99 {dimension_numbers = #tpu.dot_dimension_numbers<[1], [0], [0], [1], [0, 0, 1, 1], [], []>} : vector<8x64xbf16>, vector<64x128xbf16>, vector<8x128xf32> -> vector<8x128xf32>
    %c24 = arith.constant 24 : index
    %c0_100 = arith.constant 0 : index
    %275 = vector.load %arg2[%c24, %c0_100] : memref<54x1024xf32, #tpu.memory_space<vmem>>, vector<1x128xf32>
    %276 = vector.broadcast %275 : vector<1x128xf32> to vector<8x128xf32>
    %277 = arith.addf %274, %276 : vector<8x128xf32>
    %cst_101 = arith.constant dense<0.000000e+00> : vector<8xf32>
    %278 = vector.multi_reduction <add>, %277, %cst_101 [1] : vector<8x128xf32> to vector<8xf32>
    %279 = vector.shape_cast %278 : vector<8xf32> to vector<8x1xf32>
    %cst_102 = arith.constant 1.280000e+02 : f32
    %280 = vector.broadcast %cst_102 : f32 to vector<8x1xf32>
    %281 = arith.divf %279, %280 : vector<8x1xf32>
    %282 = arith.mulf %277, %277 : vector<8x128xf32>
    %cst_103 = arith.constant dense<0.000000e+00> : vector<8xf32>
    %283 = vector.multi_reduction <add>, %282, %cst_103 [1] : vector<8x128xf32> to vector<8xf32>
    %284 = vector.shape_cast %283 : vector<8xf32> to vector<8x1xf32>
    %cst_104 = arith.constant 1.280000e+02 : f32
    %285 = vector.broadcast %cst_104 : f32 to vector<8x1xf32>
    %286 = arith.divf %284, %285 : vector<8x1xf32>
    %287 = arith.mulf %281, %281 : vector<8x1xf32>
    %288 = arith.subf %286, %287 : vector<8x1xf32>
    %cst_105 = arith.constant 0.000000e+00 : f32
    %289 = vector.broadcast %cst_105 : f32 to vector<8x1xf32>
    %290 = arith.maximumf %288, %289 : vector<8x1xf32>
    %cst_106 = arith.constant 9.99999974E-6 : f32
    %291 = vector.broadcast %cst_106 : f32 to vector<8x1xf32>
    %292 = arith.addf %290, %291 : vector<8x1xf32>
    %293 = math.rsqrt %292 : vector<8x1xf32>
    %294 = vector.broadcast %281 : vector<8x1xf32> to vector<8x128xf32>
    %295 = arith.subf %277, %294 : vector<8x128xf32>
    %296 = vector.broadcast %293 : vector<8x1xf32> to vector<8x128xf32>
    %297 = arith.mulf %295, %296 : vector<8x128xf32>
    %c25 = arith.constant 25 : index
    %c0_107 = arith.constant 0 : index
    %298 = vector.load %arg2[%c25, %c0_107] : memref<54x1024xf32, #tpu.memory_space<vmem>>, vector<1x128xf32>
    %299 = vector.broadcast %298 : vector<1x128xf32> to vector<8x128xf32>
    %300 = arith.mulf %297, %299 : vector<8x128xf32>
    %c26 = arith.constant 26 : index
    %c0_108 = arith.constant 0 : index
    %301 = vector.load %arg2[%c26, %c0_108] : memref<54x1024xf32, #tpu.memory_space<vmem>>, vector<1x128xf32>
    %302 = vector.broadcast %301 : vector<1x128xf32> to vector<8x128xf32>
    %303 = arith.addf %300, %302 : vector<8x128xf32>
    %cst_109 = arith.constant 0.000000e+00 : f32
    %304 = vector.broadcast %cst_109 : f32 to vector<8x128xf32>
    %305 = arith.maximumf %303, %304 : vector<8x128xf32>
    %c0_110 = arith.constant 0 : index
    %c0_111 = arith.constant 0 : index
    %306 = vector.load %arg12[%c0_110, %c0_111] : memref<128x256xbf16, #tpu.memory_space<vmem>>, vector<128x256xbf16>
    %307 = arith.truncf %305 : vector<8x128xf32> to vector<8x128xbf16>
    %cst_112 = arith.constant dense<0.000000e+00> : vector<8x256xf32>
    %308 = tpu.matmul %307, %306, %cst_112 {dimension_numbers = #tpu.dot_dimension_numbers<[1], [0], [0], [1], [0, 0, 1, 1], [], []>} : vector<8x128xbf16>, vector<128x256xbf16>, vector<8x256xf32> -> vector<8x256xf32>
    %c27 = arith.constant 27 : index
    %c0_113 = arith.constant 0 : index
    %309 = vector.load %arg2[%c27, %c0_113] : memref<54x1024xf32, #tpu.memory_space<vmem>>, vector<1x256xf32>
    %310 = vector.broadcast %309 : vector<1x256xf32> to vector<8x256xf32>
    %311 = arith.addf %308, %310 : vector<8x256xf32>
    %cst_114 = arith.constant dense<0.000000e+00> : vector<8xf32>
    %312 = vector.multi_reduction <add>, %311, %cst_114 [1] : vector<8x256xf32> to vector<8xf32>
    %313 = vector.shape_cast %312 : vector<8xf32> to vector<8x1xf32>
    %cst_115 = arith.constant 2.560000e+02 : f32
    %314 = vector.broadcast %cst_115 : f32 to vector<8x1xf32>
    %315 = arith.divf %313, %314 : vector<8x1xf32>
    %316 = arith.mulf %311, %311 : vector<8x256xf32>
    %cst_116 = arith.constant dense<0.000000e+00> : vector<8xf32>
    %317 = vector.multi_reduction <add>, %316, %cst_116 [1] : vector<8x256xf32> to vector<8xf32>
    %318 = vector.shape_cast %317 : vector<8xf32> to vector<8x1xf32>
    %cst_117 = arith.constant 2.560000e+02 : f32
    %319 = vector.broadcast %cst_117 : f32 to vector<8x1xf32>
    %320 = arith.divf %318, %319 : vector<8x1xf32>
    %321 = arith.mulf %315, %315 : vector<8x1xf32>
    %322 = arith.subf %320, %321 : vector<8x1xf32>
    %cst_118 = arith.constant 0.000000e+00 : f32
    %323 = vector.broadcast %cst_118 : f32 to vector<8x1xf32>
    %324 = arith.maximumf %322, %323 : vector<8x1xf32>
    %cst_119 = arith.constant 9.99999974E-6 : f32
    %325 = vector.broadcast %cst_119 : f32 to vector<8x1xf32>
    %326 = arith.addf %324, %325 : vector<8x1xf32>
    %327 = math.rsqrt %326 : vector<8x1xf32>
    %328 = vector.broadcast %315 : vector<8x1xf32> to vector<8x256xf32>
    %329 = arith.subf %311, %328 : vector<8x256xf32>
    %330 = vector.broadcast %327 : vector<8x1xf32> to vector<8x256xf32>
    %331 = arith.mulf %329, %330 : vector<8x256xf32>
    %c28 = arith.constant 28 : index
    %c0_120 = arith.constant 0 : index
    %332 = vector.load %arg2[%c28, %c0_120] : memref<54x1024xf32, #tpu.memory_space<vmem>>, vector<1x256xf32>
    %333 = vector.broadcast %332 : vector<1x256xf32> to vector<8x256xf32>
    %334 = arith.mulf %331, %333 : vector<8x256xf32>
    %c29 = arith.constant 29 : index
    %c0_121 = arith.constant 0 : index
    %335 = vector.load %arg2[%c29, %c0_121] : memref<54x1024xf32, #tpu.memory_space<vmem>>, vector<1x256xf32>
    %336 = vector.broadcast %335 : vector<1x256xf32> to vector<8x256xf32>
    %337 = arith.addf %334, %336 : vector<8x256xf32>
    %cst_122 = arith.constant 0.000000e+00 : f32
    %338 = vector.broadcast %cst_122 : f32 to vector<8x256xf32>
    %339 = arith.maximumf %337, %338 : vector<8x256xf32>
    %c0_123 = arith.constant 0 : index
    %c0_124 = arith.constant 0 : index
    %340 = vector.load %arg13[%c0_123, %c0_124] : memref<256x512xbf16, #tpu.memory_space<vmem>>, vector<256x512xbf16>
    %341 = arith.truncf %339 : vector<8x256xf32> to vector<8x256xbf16>
    %cst_125 = arith.constant dense<0.000000e+00> : vector<8x512xf32>
    %342 = tpu.matmul %341, %340, %cst_125 {dimension_numbers = #tpu.dot_dimension_numbers<[1], [0], [0], [1], [0, 0, 1, 1], [], []>} : vector<8x256xbf16>, vector<256x512xbf16>, vector<8x512xf32> -> vector<8x512xf32>
    %c30 = arith.constant 30 : index
    %c0_126 = arith.constant 0 : index
    %343 = vector.load %arg2[%c30, %c0_126] : memref<54x1024xf32, #tpu.memory_space<vmem>>, vector<1x512xf32>
    %344 = vector.broadcast %343 : vector<1x512xf32> to vector<8x512xf32>
    %345 = arith.addf %342, %344 : vector<8x512xf32>
    %cst_127 = arith.constant dense<0.000000e+00> : vector<8xf32>
    %346 = vector.multi_reduction <add>, %345, %cst_127 [1] : vector<8x512xf32> to vector<8xf32>
    %347 = vector.shape_cast %346 : vector<8xf32> to vector<8x1xf32>
    %cst_128 = arith.constant 5.120000e+02 : f32
    %348 = vector.broadcast %cst_128 : f32 to vector<8x1xf32>
    %349 = arith.divf %347, %348 : vector<8x1xf32>
    %350 = arith.mulf %345, %345 : vector<8x512xf32>
    %cst_129 = arith.constant dense<0.000000e+00> : vector<8xf32>
    %351 = vector.multi_reduction <add>, %350, %cst_129 [1] : vector<8x512xf32> to vector<8xf32>
    %352 = vector.shape_cast %351 : vector<8xf32> to vector<8x1xf32>
    %cst_130 = arith.constant 5.120000e+02 : f32
    %353 = vector.broadcast %cst_130 : f32 to vector<8x1xf32>
    %354 = arith.divf %352, %353 : vector<8x1xf32>
    %355 = arith.mulf %349, %349 : vector<8x1xf32>
    %356 = arith.subf %354, %355 : vector<8x1xf32>
    %cst_131 = arith.constant 0.000000e+00 : f32
    %357 = vector.broadcast %cst_131 : f32 to vector<8x1xf32>
    %358 = arith.maximumf %356, %357 : vector<8x1xf32>
    %cst_132 = arith.constant 9.99999974E-6 : f32
    %359 = vector.broadcast %cst_132 : f32 to vector<8x1xf32>
    %360 = arith.addf %358, %359 : vector<8x1xf32>
    %361 = math.rsqrt %360 : vector<8x1xf32>
    %362 = vector.broadcast %349 : vector<8x1xf32> to vector<8x512xf32>
    %363 = arith.subf %345, %362 : vector<8x512xf32>
    %364 = vector.broadcast %361 : vector<8x1xf32> to vector<8x512xf32>
    %365 = arith.mulf %363, %364 : vector<8x512xf32>
    %c31 = arith.constant 31 : index
    %c0_133 = arith.constant 0 : index
    %366 = vector.load %arg2[%c31, %c0_133] : memref<54x1024xf32, #tpu.memory_space<vmem>>, vector<1x512xf32>
    %367 = vector.broadcast %366 : vector<1x512xf32> to vector<8x512xf32>
    %368 = arith.mulf %365, %367 : vector<8x512xf32>
    %c32 = arith.constant 32 : index
    %c0_134 = arith.constant 0 : index
    %369 = vector.load %arg2[%c32, %c0_134] : memref<54x1024xf32, #tpu.memory_space<vmem>>, vector<1x512xf32>
    %370 = vector.broadcast %369 : vector<1x512xf32> to vector<8x512xf32>
    %371 = arith.addf %368, %370 : vector<8x512xf32>
    %cst_135 = arith.constant 0.000000e+00 : f32
    %372 = vector.broadcast %cst_135 : f32 to vector<8x512xf32>
    %373 = arith.maximumf %371, %372 : vector<8x512xf32>
    %c0_136 = arith.constant 0 : index
    %c0_137 = arith.constant 0 : index
    %374 = vector.load %arg14[%c0_136, %c0_137] : memref<512x512xbf16, #tpu.memory_space<vmem>>, vector<512x512xbf16>
    %375 = arith.truncf %373 : vector<8x512xf32> to vector<8x512xbf16>
    %cst_138 = arith.constant dense<0.000000e+00> : vector<8x512xf32>
    %376 = tpu.matmul %375, %374, %cst_138 {dimension_numbers = #tpu.dot_dimension_numbers<[1], [0], [0], [1], [0, 0, 1, 1], [], []>} : vector<8x512xbf16>, vector<512x512xbf16>, vector<8x512xf32> -> vector<8x512xf32>
    %c33 = arith.constant 33 : index
    %c0_139 = arith.constant 0 : index
    %377 = vector.load %arg2[%c33, %c0_139] : memref<54x1024xf32, #tpu.memory_space<vmem>>, vector<1x512xf32>
    %378 = vector.broadcast %377 : vector<1x512xf32> to vector<8x512xf32>
    %379 = arith.addf %376, %378 : vector<8x512xf32>
    %cst_140 = arith.constant 0.000000e+00 : f32
    %380 = vector.broadcast %cst_140 : f32 to vector<8x512xf32>
    %381 = arith.maximumf %379, %380 : vector<8x512xf32>
    %c0_i32_141 = arith.constant 0 : i32
    %382 = tpu.memref_slice %arg22[%c0_i32_141] : memref<3x!tpu.dma_semaphore, #tpu.memory_space<semaphore_mem>> -> memref<1x!tpu.dma_semaphore, #tpu.memory_space<semaphore_mem>>
    %383 = tpu.memref_squeeze %382 : memref<1x!tpu.dma_semaphore, #tpu.memory_space<semaphore_mem>> -> memref<!tpu.dma_semaphore, #tpu.memory_space<semaphore_mem>>
    tpu.wait_dma2 semaphore(%383 : memref<!tpu.dma_semaphore, #tpu.memory_space<semaphore_mem>>) src(%arg15 : memref<1024x1024xbf16, #tpu.memory_space<any>>) dst(%arg19 : memref<1024x1024xbf16, #tpu.memory_space<vmem>>)
    %384 = arith.truncf %166 : vector<8x512xf32> to vector<8x512xbf16>
    %c0_142 = arith.constant 0 : index
    %c0_143 = arith.constant 0 : index
    %385 = vector.load %arg19[%c0_142, %c0_143] : memref<1024x1024xbf16, #tpu.memory_space<vmem>>, vector<512x1024xbf16>
    %cst_144 = arith.constant dense<0.000000e+00> : vector<8x1024xf32>
    %386 = tpu.matmul %384, %385, %cst_144 {dimension_numbers = #tpu.dot_dimension_numbers<[1], [0], [0], [1], [0, 0, 1, 1], [], []>} : vector<8x512xbf16>, vector<512x1024xbf16>, vector<8x1024xf32> -> vector<8x1024xf32>
    %387 = arith.truncf %381 : vector<8x512xf32> to vector<8x512xbf16>
    %c512 = arith.constant 512 : index
    %c0_145 = arith.constant 0 : index
    %388 = vector.load %arg19[%c512, %c0_145] : memref<1024x1024xbf16, #tpu.memory_space<vmem>>, vector<512x1024xbf16>
    %cst_146 = arith.constant dense<0.000000e+00> : vector<8x1024xf32>
    %389 = tpu.matmul %387, %388, %cst_146 {dimension_numbers = #tpu.dot_dimension_numbers<[1], [0], [0], [1], [0, 0, 1, 1], [], []>} : vector<8x512xbf16>, vector<512x1024xbf16>, vector<8x1024xf32> -> vector<8x1024xf32>
    %390 = arith.addf %386, %389 : vector<8x1024xf32>
    %c36 = arith.constant 36 : index
    %c0_147 = arith.constant 0 : index
    %391 = vector.load %arg2[%c36, %c0_147] : memref<54x1024xf32, #tpu.memory_space<vmem>>, vector<1x1024xf32>
    %392 = vector.broadcast %391 : vector<1x1024xf32> to vector<8x1024xf32>
    %393 = arith.addf %390, %392 : vector<8x1024xf32>
    %cst_148 = arith.constant dense<0.000000e+00> : vector<8xf32>
    %394 = vector.multi_reduction <add>, %393, %cst_148 [1] : vector<8x1024xf32> to vector<8xf32>
    %395 = vector.shape_cast %394 : vector<8xf32> to vector<8x1xf32>
    %cst_149 = arith.constant 1.024000e+03 : f32
    %396 = vector.broadcast %cst_149 : f32 to vector<8x1xf32>
    %397 = arith.divf %395, %396 : vector<8x1xf32>
    %398 = arith.mulf %393, %393 : vector<8x1024xf32>
    %cst_150 = arith.constant dense<0.000000e+00> : vector<8xf32>
    %399 = vector.multi_reduction <add>, %398, %cst_150 [1] : vector<8x1024xf32> to vector<8xf32>
    %400 = vector.shape_cast %399 : vector<8xf32> to vector<8x1xf32>
    %cst_151 = arith.constant 1.024000e+03 : f32
    %401 = vector.broadcast %cst_151 : f32 to vector<8x1xf32>
    %402 = arith.divf %400, %401 : vector<8x1xf32>
    %403 = arith.mulf %397, %397 : vector<8x1xf32>
    %404 = arith.subf %402, %403 : vector<8x1xf32>
    %cst_152 = arith.constant 0.000000e+00 : f32
    %405 = vector.broadcast %cst_152 : f32 to vector<8x1xf32>
    %406 = arith.maximumf %404, %405 : vector<8x1xf32>
    %cst_153 = arith.constant 9.99999974E-6 : f32
    %407 = vector.broadcast %cst_153 : f32 to vector<8x1xf32>
    %408 = arith.addf %406, %407 : vector<8x1xf32>
    %409 = math.rsqrt %408 : vector<8x1xf32>
    %410 = vector.broadcast %397 : vector<8x1xf32> to vector<8x1024xf32>
    %411 = arith.subf %393, %410 : vector<8x1024xf32>
    %412 = vector.broadcast %409 : vector<8x1xf32> to vector<8x1024xf32>
    %413 = arith.mulf %411, %412 : vector<8x1024xf32>
    %c37 = arith.constant 37 : index
    %c0_154 = arith.constant 0 : index
    %414 = vector.load %arg2[%c37, %c0_154] : memref<54x1024xf32, #tpu.memory_space<vmem>>, vector<1x1024xf32>
    %415 = vector.broadcast %414 : vector<1x1024xf32> to vector<8x1024xf32>
    %416 = arith.mulf %413, %415 : vector<8x1024xf32>
    %c38 = arith.constant 38 : index
    %c0_155 = arith.constant 0 : index
    %417 = vector.load %arg2[%c38, %c0_155] : memref<54x1024xf32, #tpu.memory_space<vmem>>, vector<1x1024xf32>
    %418 = vector.broadcast %417 : vector<1x1024xf32> to vector<8x1024xf32>
    %419 = arith.addf %416, %418 : vector<8x1024xf32>
    %cst_156 = arith.constant 0.000000e+00 : f32
    %420 = vector.broadcast %cst_156 : f32 to vector<8x1024xf32>
    %421 = arith.maximumf %419, %420 : vector<8x1024xf32>
    %c1_i32_157 = arith.constant 1 : i32
    %422 = tpu.memref_slice %arg22[%c1_i32_157] : memref<3x!tpu.dma_semaphore, #tpu.memory_space<semaphore_mem>> -> memref<1x!tpu.dma_semaphore, #tpu.memory_space<semaphore_mem>>
    %423 = tpu.memref_squeeze %422 : memref<1x!tpu.dma_semaphore, #tpu.memory_space<semaphore_mem>> -> memref<!tpu.dma_semaphore, #tpu.memory_space<semaphore_mem>>
    tpu.wait_dma2 semaphore(%423 : memref<!tpu.dma_semaphore, #tpu.memory_space<semaphore_mem>>) src(%arg16 : memref<1024x512xbf16, #tpu.memory_space<any>>) dst(%arg20 : memref<1024x512xbf16, #tpu.memory_space<vmem>>)
    %c0_158 = arith.constant 0 : index
    %c0_159 = arith.constant 0 : index
    %424 = vector.load %arg20[%c0_158, %c0_159] : memref<1024x512xbf16, #tpu.memory_space<vmem>>, vector<1024x512xbf16>
    %425 = arith.truncf %421 : vector<8x1024xf32> to vector<8x1024xbf16>
    %cst_160 = arith.constant dense<0.000000e+00> : vector<8x512xf32>
    %426 = tpu.matmul %425, %424, %cst_160 {dimension_numbers = #tpu.dot_dimension_numbers<[1], [0], [0], [1], [0, 0, 1, 1], [], []>} : vector<8x1024xbf16>, vector<1024x512xbf16>, vector<8x512xf32> -> vector<8x512xf32>
    %c39 = arith.constant 39 : index
    %c0_161 = arith.constant 0 : index
    %427 = vector.load %arg2[%c39, %c0_161] : memref<54x1024xf32, #tpu.memory_space<vmem>>, vector<1x512xf32>
    %428 = vector.broadcast %427 : vector<1x512xf32> to vector<8x512xf32>
    %429 = arith.addf %426, %428 : vector<8x512xf32>
    %cst_162 = arith.constant dense<0.000000e+00> : vector<8xf32>
    %430 = vector.multi_reduction <add>, %429, %cst_162 [1] : vector<8x512xf32> to vector<8xf32>
    %431 = vector.shape_cast %430 : vector<8xf32> to vector<8x1xf32>
    %cst_163 = arith.constant 5.120000e+02 : f32
    %432 = vector.broadcast %cst_163 : f32 to vector<8x1xf32>
    %433 = arith.divf %431, %432 : vector<8x1xf32>
    %434 = arith.mulf %429, %429 : vector<8x512xf32>
    %cst_164 = arith.constant dense<0.000000e+00> : vector<8xf32>
    %435 = vector.multi_reduction <add>, %434, %cst_164 [1] : vector<8x512xf32> to vector<8xf32>
    %436 = vector.shape_cast %435 : vector<8xf32> to vector<8x1xf32>
    %cst_165 = arith.constant 5.120000e+02 : f32
    %437 = vector.broadcast %cst_165 : f32 to vector<8x1xf32>
    %438 = arith.divf %436, %437 : vector<8x1xf32>
    %439 = arith.mulf %433, %433 : vector<8x1xf32>
    %440 = arith.subf %438, %439 : vector<8x1xf32>
    %cst_166 = arith.constant 0.000000e+00 : f32
    %441 = vector.broadcast %cst_166 : f32 to vector<8x1xf32>
    %442 = arith.maximumf %440, %441 : vector<8x1xf32>
    %cst_167 = arith.constant 9.99999974E-6 : f32
    %443 = vector.broadcast %cst_167 : f32 to vector<8x1xf32>
    %444 = arith.addf %442, %443 : vector<8x1xf32>
    %445 = math.rsqrt %444 : vector<8x1xf32>
    %446 = vector.broadcast %433 : vector<8x1xf32> to vector<8x512xf32>
    %447 = arith.subf %429, %446 : vector<8x512xf32>
    %448 = vector.broadcast %445 : vector<8x1xf32> to vector<8x512xf32>
    %449 = arith.mulf %447, %448 : vector<8x512xf32>
    %c40 = arith.constant 40 : index
    %c0_168 = arith.constant 0 : index
    %450 = vector.load %arg2[%c40, %c0_168] : memref<54x1024xf32, #tpu.memory_space<vmem>>, vector<1x512xf32>
    %451 = vector.broadcast %450 : vector<1x512xf32> to vector<8x512xf32>
    %452 = arith.mulf %449, %451 : vector<8x512xf32>
    %c41 = arith.constant 41 : index
    %c0_169 = arith.constant 0 : index
    %453 = vector.load %arg2[%c41, %c0_169] : memref<54x1024xf32, #tpu.memory_space<vmem>>, vector<1x512xf32>
    %454 = vector.broadcast %453 : vector<1x512xf32> to vector<8x512xf32>
    %455 = arith.addf %452, %454 : vector<8x512xf32>
    %cst_170 = arith.constant 0.000000e+00 : f32
    %456 = vector.broadcast %cst_170 : f32 to vector<8x512xf32>
    %457 = arith.maximumf %455, %456 : vector<8x512xf32>
    %c2_i32_171 = arith.constant 2 : i32
    %458 = tpu.memref_slice %arg22[%c2_i32_171] : memref<3x!tpu.dma_semaphore, #tpu.memory_space<semaphore_mem>> -> memref<1x!tpu.dma_semaphore, #tpu.memory_space<semaphore_mem>>
    %459 = tpu.memref_squeeze %458 : memref<1x!tpu.dma_semaphore, #tpu.memory_space<semaphore_mem>> -> memref<!tpu.dma_semaphore, #tpu.memory_space<semaphore_mem>>
    tpu.wait_dma2 semaphore(%459 : memref<!tpu.dma_semaphore, #tpu.memory_space<semaphore_mem>>) src(%arg17 : memref<960x256xbf16, #tpu.memory_space<any>>) dst(%arg21 : memref<960x256xbf16, #tpu.memory_space<vmem>>)
    %c0_172 = arith.constant 0 : index
    %c0_173 = arith.constant 0 : index
    %460 = vector.load %arg21[%c0_172, %c0_173] : memref<960x256xbf16, #tpu.memory_space<vmem>>, vector<512x256xbf16>
    %461 = arith.truncf %457 : vector<8x512xf32> to vector<8x512xbf16>
    %cst_174 = arith.constant dense<0.000000e+00> : vector<8x256xf32>
    %462 = tpu.matmul %461, %460, %cst_174 {dimension_numbers = #tpu.dot_dimension_numbers<[1], [0], [0], [1], [0, 0, 1, 1], [], []>} : vector<8x512xbf16>, vector<512x256xbf16>, vector<8x256xf32> -> vector<8x256xf32>
    %c42 = arith.constant 42 : index
    %c0_175 = arith.constant 0 : index
    %463 = vector.load %arg2[%c42, %c0_175] : memref<54x1024xf32, #tpu.memory_space<vmem>>, vector<1x256xf32>
    %464 = vector.broadcast %463 : vector<1x256xf32> to vector<8x256xf32>
    %465 = arith.addf %462, %464 : vector<8x256xf32>
    %cst_176 = arith.constant dense<0.000000e+00> : vector<8xf32>
    %466 = vector.multi_reduction <add>, %465, %cst_176 [1] : vector<8x256xf32> to vector<8xf32>
    %467 = vector.shape_cast %466 : vector<8xf32> to vector<8x1xf32>
    %cst_177 = arith.constant 2.560000e+02 : f32
    %468 = vector.broadcast %cst_177 : f32 to vector<8x1xf32>
    %469 = arith.divf %467, %468 : vector<8x1xf32>
    %470 = arith.mulf %465, %465 : vector<8x256xf32>
    %cst_178 = arith.constant dense<0.000000e+00> : vector<8xf32>
    %471 = vector.multi_reduction <add>, %470, %cst_178 [1] : vector<8x256xf32> to vector<8xf32>
    %472 = vector.shape_cast %471 : vector<8xf32> to vector<8x1xf32>
    %cst_179 = arith.constant 2.560000e+02 : f32
    %473 = vector.broadcast %cst_179 : f32 to vector<8x1xf32>
    %474 = arith.divf %472, %473 : vector<8x1xf32>
    %475 = arith.mulf %469, %469 : vector<8x1xf32>
    %476 = arith.subf %474, %475 : vector<8x1xf32>
    %cst_180 = arith.constant 0.000000e+00 : f32
    %477 = vector.broadcast %cst_180 : f32 to vector<8x1xf32>
    %478 = arith.maximumf %476, %477 : vector<8x1xf32>
    %cst_181 = arith.constant 9.99999974E-6 : f32
    %479 = vector.broadcast %cst_181 : f32 to vector<8x1xf32>
    %480 = arith.addf %478, %479 : vector<8x1xf32>
    %481 = math.rsqrt %480 : vector<8x1xf32>
    %482 = vector.broadcast %469 : vector<8x1xf32> to vector<8x256xf32>
    %483 = arith.subf %465, %482 : vector<8x256xf32>
    %484 = vector.broadcast %481 : vector<8x1xf32> to vector<8x256xf32>
    %485 = arith.mulf %483, %484 : vector<8x256xf32>
    %c43 = arith.constant 43 : index
    %c0_182 = arith.constant 0 : index
    %486 = vector.load %arg2[%c43, %c0_182] : memref<54x1024xf32, #tpu.memory_space<vmem>>, vector<1x256xf32>
    %487 = vector.broadcast %486 : vector<1x256xf32> to vector<8x256xf32>
    %488 = arith.mulf %485, %487 : vector<8x256xf32>
    %c44 = arith.constant 44 : index
    %c0_183 = arith.constant 0 : index
    %489 = vector.load %arg2[%c44, %c0_183] : memref<54x1024xf32, #tpu.memory_space<vmem>>, vector<1x256xf32>
    %490 = vector.broadcast %489 : vector<1x256xf32> to vector<8x256xf32>
    %491 = arith.addf %488, %490 : vector<8x256xf32>
    %cst_184 = arith.constant 0.000000e+00 : f32
    %492 = vector.broadcast %cst_184 : f32 to vector<8x256xf32>
    %493 = arith.maximumf %491, %492 : vector<8x256xf32>
    %c512_185 = arith.constant 512 : index
    %c0_186 = arith.constant 0 : index
    %494 = vector.load %arg21[%c512_185, %c0_186] : memref<960x256xbf16, #tpu.memory_space<vmem>>, vector<256x128xbf16>
    %495 = arith.truncf %493 : vector<8x256xf32> to vector<8x256xbf16>
    %cst_187 = arith.constant dense<0.000000e+00> : vector<8x128xf32>
    %496 = tpu.matmul %495, %494, %cst_187 {dimension_numbers = #tpu.dot_dimension_numbers<[1], [0], [0], [1], [0, 0, 1, 1], [], []>} : vector<8x256xbf16>, vector<256x128xbf16>, vector<8x128xf32> -> vector<8x128xf32>
    %c45 = arith.constant 45 : index
    %c0_188 = arith.constant 0 : index
    %497 = vector.load %arg2[%c45, %c0_188] : memref<54x1024xf32, #tpu.memory_space<vmem>>, vector<1x128xf32>
    %498 = vector.broadcast %497 : vector<1x128xf32> to vector<8x128xf32>
    %499 = arith.addf %496, %498 : vector<8x128xf32>
    %cst_189 = arith.constant dense<0.000000e+00> : vector<8xf32>
    %500 = vector.multi_reduction <add>, %499, %cst_189 [1] : vector<8x128xf32> to vector<8xf32>
    %501 = vector.shape_cast %500 : vector<8xf32> to vector<8x1xf32>
    %cst_190 = arith.constant 1.280000e+02 : f32
    %502 = vector.broadcast %cst_190 : f32 to vector<8x1xf32>
    %503 = arith.divf %501, %502 : vector<8x1xf32>
    %504 = arith.mulf %499, %499 : vector<8x128xf32>
    %cst_191 = arith.constant dense<0.000000e+00> : vector<8xf32>
    %505 = vector.multi_reduction <add>, %504, %cst_191 [1] : vector<8x128xf32> to vector<8xf32>
    %506 = vector.shape_cast %505 : vector<8xf32> to vector<8x1xf32>
    %cst_192 = arith.constant 1.280000e+02 : f32
    %507 = vector.broadcast %cst_192 : f32 to vector<8x1xf32>
    %508 = arith.divf %506, %507 : vector<8x1xf32>
    %509 = arith.mulf %503, %503 : vector<8x1xf32>
    %510 = arith.subf %508, %509 : vector<8x1xf32>
    %cst_193 = arith.constant 0.000000e+00 : f32
    %511 = vector.broadcast %cst_193 : f32 to vector<8x1xf32>
    %512 = arith.maximumf %510, %511 : vector<8x1xf32>
    %cst_194 = arith.constant 9.99999974E-6 : f32
    %513 = vector.broadcast %cst_194 : f32 to vector<8x1xf32>
    %514 = arith.addf %512, %513 : vector<8x1xf32>
    %515 = math.rsqrt %514 : vector<8x1xf32>
    %516 = vector.broadcast %503 : vector<8x1xf32> to vector<8x128xf32>
    %517 = arith.subf %499, %516 : vector<8x128xf32>
    %518 = vector.broadcast %515 : vector<8x1xf32> to vector<8x128xf32>
    %519 = arith.mulf %517, %518 : vector<8x128xf32>
    %c46 = arith.constant 46 : index
    %c0_195 = arith.constant 0 : index
    %520 = vector.load %arg2[%c46, %c0_195] : memref<54x1024xf32, #tpu.memory_space<vmem>>, vector<1x128xf32>
    %521 = vector.broadcast %520 : vector<1x128xf32> to vector<8x128xf32>
    %522 = arith.mulf %519, %521 : vector<8x128xf32>
    %c47 = arith.constant 47 : index
    %c0_196 = arith.constant 0 : index
    %523 = vector.load %arg2[%c47, %c0_196] : memref<54x1024xf32, #tpu.memory_space<vmem>>, vector<1x128xf32>
    %524 = vector.broadcast %523 : vector<1x128xf32> to vector<8x128xf32>
    %525 = arith.addf %522, %524 : vector<8x128xf32>
    %cst_197 = arith.constant 0.000000e+00 : f32
    %526 = vector.broadcast %cst_197 : f32 to vector<8x128xf32>
    %527 = arith.maximumf %525, %526 : vector<8x128xf32>
    %c768 = arith.constant 768 : index
    %c0_198 = arith.constant 0 : index
    %528 = vector.load %arg21[%c768, %c0_198] : memref<960x256xbf16, #tpu.memory_space<vmem>>, vector<128x64xbf16>
    %529 = arith.truncf %527 : vector<8x128xf32> to vector<8x128xbf16>
    %cst_199 = arith.constant dense<0.000000e+00> : vector<8x64xf32>
    %530 = tpu.matmul %529, %528, %cst_199 {dimension_numbers = #tpu.dot_dimension_numbers<[1], [0], [0], [1], [0, 0, 1, 1], [], []>} : vector<8x128xbf16>, vector<128x64xbf16>, vector<8x64xf32> -> vector<8x64xf32>
    %c48 = arith.constant 48 : index
    %c0_200 = arith.constant 0 : index
    %531 = vector.load %arg2[%c48, %c0_200] : memref<54x1024xf32, #tpu.memory_space<vmem>>, vector<1x64xf32>
    %532 = vector.broadcast %531 : vector<1x64xf32> to vector<8x64xf32>
    %533 = arith.addf %530, %532 : vector<8x64xf32>
    %cst_201 = arith.constant dense<0.000000e+00> : vector<8xf32>
    %534 = vector.multi_reduction <add>, %533, %cst_201 [1] : vector<8x64xf32> to vector<8xf32>
    %535 = vector.shape_cast %534 : vector<8xf32> to vector<8x1xf32>
    %cst_202 = arith.constant 6.400000e+01 : f32
    %536 = vector.broadcast %cst_202 : f32 to vector<8x1xf32>
    %537 = arith.divf %535, %536 : vector<8x1xf32>
    %538 = arith.mulf %533, %533 : vector<8x64xf32>
    %cst_203 = arith.constant dense<0.000000e+00> : vector<8xf32>
    %539 = vector.multi_reduction <add>, %538, %cst_203 [1] : vector<8x64xf32> to vector<8xf32>
    %540 = vector.shape_cast %539 : vector<8xf32> to vector<8x1xf32>
    %cst_204 = arith.constant 6.400000e+01 : f32
    %541 = vector.broadcast %cst_204 : f32 to vector<8x1xf32>
    %542 = arith.divf %540, %541 : vector<8x1xf32>
    %543 = arith.mulf %537, %537 : vector<8x1xf32>
    %544 = arith.subf %542, %543 : vector<8x1xf32>
    %cst_205 = arith.constant 0.000000e+00 : f32
    %545 = vector.broadcast %cst_205 : f32 to vector<8x1xf32>
    %546 = arith.maximumf %544, %545 : vector<8x1xf32>
    %cst_206 = arith.constant 9.99999974E-6 : f32
    %547 = vector.broadcast %cst_206 : f32 to vector<8x1xf32>
    %548 = arith.addf %546, %547 : vector<8x1xf32>
    %549 = math.rsqrt %548 : vector<8x1xf32>
    %550 = vector.broadcast %537 : vector<8x1xf32> to vector<8x64xf32>
    %551 = arith.subf %533, %550 : vector<8x64xf32>
    %552 = vector.broadcast %549 : vector<8x1xf32> to vector<8x64xf32>
    %553 = arith.mulf %551, %552 : vector<8x64xf32>
    %c49 = arith.constant 49 : index
    %c0_207 = arith.constant 0 : index
    %554 = vector.load %arg2[%c49, %c0_207] : memref<54x1024xf32, #tpu.memory_space<vmem>>, vector<1x64xf32>
    %555 = vector.broadcast %554 : vector<1x64xf32> to vector<8x64xf32>
    %556 = arith.mulf %553, %555 : vector<8x64xf32>
    %c50 = arith.constant 50 : index
    %c0_208 = arith.constant 0 : index
    %557 = vector.load %arg2[%c50, %c0_208] : memref<54x1024xf32, #tpu.memory_space<vmem>>, vector<1x64xf32>
    %558 = vector.broadcast %557 : vector<1x64xf32> to vector<8x64xf32>
    %559 = arith.addf %556, %558 : vector<8x64xf32>
    %cst_209 = arith.constant 0.000000e+00 : f32
    %560 = vector.broadcast %cst_209 : f32 to vector<8x64xf32>
    %561 = arith.maximumf %559, %560 : vector<8x64xf32>
    %c896 = arith.constant 896 : index
    %c0_210 = arith.constant 0 : index
    %562 = vector.load %arg21[%c896, %c0_210] : memref<960x256xbf16, #tpu.memory_space<vmem>>, vector<64x3xbf16>
    %563 = arith.truncf %561 : vector<8x64xf32> to vector<8x64xbf16>
    %cst_211 = arith.constant dense<0.000000e+00> : vector<8x3xf32>
    %564 = tpu.matmul %563, %562, %cst_211 {dimension_numbers = #tpu.dot_dimension_numbers<[1], [0], [0], [1], [0, 0, 1, 1], [], []>} : vector<8x64xbf16>, vector<64x3xbf16>, vector<8x3xf32> -> vector<8x3xf32>
    %c51 = arith.constant 51 : index
    %c0_212 = arith.constant 0 : index
    %565 = vector.load %arg2[%c51, %c0_212] : memref<54x1024xf32, #tpu.memory_space<vmem>>, vector<1x3xf32>
    %566 = vector.broadcast %565 : vector<1x3xf32> to vector<8x3xf32>
    %567 = arith.addf %564, %566 : vector<8x3xf32>
    %568 = arith.negf %567 : vector<8x3xf32>
    %569 = math.exp %568 : vector<8x3xf32>
    %cst_213 = arith.constant 1.000000e+00 : f32
    %570 = vector.broadcast %cst_213 : f32 to vector<8x3xf32>
    %571 = arith.addf %570, %569 : vector<8x3xf32>
    %572 = arith.divf %570, %571 : vector<8x3xf32>
    %c0_214 = arith.constant 0 : index
    %c0_215 = arith.constant 0 : index
    %573 = vector.load %arg18[%c0_214, %c0_215] : memref<8x3xf32, #tpu.memory_space<vmem>>, vector<8x3xf32>
    tpu.vector_store %arg18[%c0_214, %c0_215], %572 {strides = array<i32>} : memref<8x3xf32, #tpu.memory_space<vmem>>, vector<8x3xf32>,
    return
  }
}

</mosaic_0001>

<bundles_post_ra>
// kernel: net_forward.1
= control target key start
LH: loop header
LB: loop body
LE: loop exit
PB: predicated region body
PF: predicated region fallthrough
CT: control target
= control target key end

     0   :  { %s9320_s0 = inlined_call_operand.vmem [shape: f32[8,3], index: 0, kind: input, shape index: {}]   ;;  %s9321_s1 = inlined_call_operand.vmem [shape: f32[8,1], index: 1, kind: input, shape index: {}]   ;;  %s9322_s2 = inlined_call_operand.hbm [shape: f32[54,1024], index: 2, kind: input, shape index: {}]   ;;  %s9323_s3 = inlined_call_operand.hbm [shape: bf16[3,64], index: 3, kind: input, shape index: {}]   ;;  %s9324_s4 = inlined_call_operand.hbm [shape: bf16[64,128], index: 4, kind: input, shape index: {}]   ;;  %s9325_s5 = inlined_call_operand.hbm [shape: bf16[128,256], index: 5, kind: input, shape index: {}]   ;;  %s9326_s6 = inlined_call_operand.hbm [shape: bf16[256,512], index: 6, kind: input, shape index: {}]   ;;  %s9327_s7 = inlined_call_operand.hbm [shape: bf16[512,512], index: 7, kind: input, shape index: {}]   ;;  %s9328_s8 = inlined_call_operand.hbm [shape: bf16[1,16], index: 8, kind: input, shape index: {}]   ;;  %s9329_s9 = inlined_call_operand.hbm [shape: bf16[16,32], index: 9, kind: input, shape index: {}]   ;;  %s9330_s10 = inlined_call_operand.hbm [shape: bf16[32,64], index: 10, kind: input, shape index: {}]   ;;  %s9331_s11 = inlined_call_operand.hbm [shape: bf16[64,128], index: 11, kind: input, shape index: {}]   ;;  %s9332_s12 = inlined_call_operand.hbm [shape: bf16[128,256], index: 12, kind: input, shape index: {}]   ;;  %s9333_s13 = inlined_call_operand.hbm [shape: bf16[256,512], index: 13, kind: input, shape index: {}]   ;;  %s9334_s14 = inlined_call_operand.hbm [shape: bf16[512,512], index: 14, kind: input, shape index: {}]   ;;  %s9335_s15 = inlined_call_operand.hbm [shape: bf16[1024,1024], index: 15, kind: input, shape index: {}]   ;;  %s9336_s16 = inlined_call_operand.hbm [shape: bf16[1024,512], index: 16, kind: input, shape index: {}]   ;;  %s9337_s17 = inlined_call_operand.hbm [shape: bf16[960,256], index: 17, kind: input, shape index: {}]   ;;  %s9338_s18 = inlined_call_operand.vmem [shape: f32[8,3], index: 18, kind: output, shape index: {}]  }
   0x1   :  { %9342 = sst [smem:[#allocation42_spill]] %s9320_s0 }
   0x2   :  { %9343 = sst [smem:[#allocation43_spill]] %s9321_s1 }
   0x3   :  { %9344 = sst [smem:[#allocation44_spill]] %s9322_s2 }
   0x4   :  { %23 = vsyncpa [#allocation7], 0 }
   0x5   :  { %24 = vsyncpa [#allocation9], 0 }
   0x6   :  { %25 = vsyncpa [#allocation12], 0 }
   0x7   :  { %26 = vsyncpa [#allocation15], 0 }
   0x8   :  { %27 = vsyncpa [#allocation18], 0 }
   0x9   :  { %28 = vsyncpa [#allocation21], 0 }
   0xa   :  { %29 = vsyncpa [#allocation24], 0  ;;  %s8460_s27 = smov [#allocation8]   ;;  %s8461_s29 = smov [#allocation11]  }
   0xb   :  { %s52_s28 = sshll.u32 %s8460_s27, 4  ;;  %s73_s30 = sshll.u32 %s8461_s29, 4  ;;  %s53_s28 = int_to_ptr.vmem [resolvable:$true] %s52_s28  ;;  %s8591_s30 = int_to_ptr.vmem [resolvable:$true] %s73_s30 }
   0xc   :  { %s8154_s1 = scalar_lea.hbm %s9323_s3, 32 }
   0xd   :  { %p8155_p0 = scmp.ne.s32.totalorder %s9323_s3, %s8154_s1  ;;  %p8158_p1 = scmp.lt.u32.totalorder %s8154_s1, %s9323_s3 }
   0xf   :  { %p8160_p2 = pnand %p8158_p1, %p8155_p0 }
  0x11   :  { %8163 = shalt.err (!%p8160_p2)
}
  0x12   :  { %s8164_s23 = scalar_lea.vmem %s53_s28, 32  ;;  %p8169_p4 = scmp.lt.s32.totalorder %s53_s28, %s53_s28 }
  0x13   :  { %p8165_p3 = scmp.ne.s32.totalorder %s53_s28, %s8164_s23  ;;  %p8170_p5 = scmp.lt.s32.totalorder %s8164_s23, %s8164_s23 }
  0x15   :  { %p8171_p6 = por %p8170_p5, %p8169_p4 }
  0x17   :  { %p8172_p7 = pnand %p8171_p6, %p8165_p3 }
  0x19   :  { %8175 = shalt.err (!%p8172_p7)
}
  0x1a   :  { %55 = dma.hbm_to_vmem [thread:$0]  %s9323_s3, 32, %s53_s28, [#allocation9]  }
  0x1b   :  { %s8176_s29 = scalar_lea.hbm %s9325_s5, 2048 }
  0x1c   :  { %p8177_p8 = scmp.ne.s32.totalorder %s9325_s5, %s8176_s29  ;;  %p8180_p9 = scmp.lt.u32.totalorder %s8176_s29, %s9325_s5 }
  0x1e   :  { %p8182_p10 = pnand %p8180_p9, %p8177_p8 }
  0x20   :  { %8185 = shalt.err (!%p8182_p10)
}
  0x21   :  { %s8186_s21 = scalar_lea.vmem %s8591_s30, 2048  ;;  %p8191_p12 = scmp.lt.s32.totalorder %s8591_s30, %s8591_s30 }
  0x22   :  { %p8187_p11 = scmp.ne.s32.totalorder %s8591_s30, %s8186_s21  ;;  %p8192_p13 = scmp.lt.s32.totalorder %s8186_s21, %s8186_s21 }
  0x24   :  { %p8193_p0 = por %p8192_p13, %p8191_p12 }
  0x26   :  { %p8194_p1 = pnand %p8193_p0, %p8187_p11 }
  0x28   :  { %8197 = shalt.err (!%p8194_p1)
}
  0x29   :  { %s9340_s3 = smov 128   ;;  %s8463_s28 = smov 8  }
  0x2a   :  { %79 = dma.hbm_to_vmem [thread:$0]  %s9325_s5, 2048, %s8591_s30, [#allocation12], %s9340_s3, %s9340_s3, %s8463_s28  }
  0x2b   :  { %s8464_s23 = smov [#allocation14]   ;;  %s8198_s27 = scalar_lea.hbm %s9327_s7, 16384 }
  0x2c   :  { %s97_s24 = sshll.u32 %s8464_s23, 4  ;;  %p8199_p2 = scmp.ne.s32.totalorder %s9327_s7, %s8198_s27  ;;  %s98_s24 = int_to_ptr.vmem [resolvable:$true] %s97_s24 }
  0x2d   :  { %p8202_p3 = scmp.lt.u32.totalorder %s8198_s27, %s9327_s7 }
  0x2f   :  { %p8204_p4 = pnand %p8202_p3, %p8199_p2 }
  0x31   :  { %8207 = shalt.err (!%p8204_p4)
}
  0x32   :  { %s8208_s20 = scalar_lea.vmem %s98_s24, 16384  ;;  %p8213_p6 = scmp.lt.s32.totalorder %s98_s24, %s98_s24 }
  0x33   :  { %p8209_p5 = scmp.ne.s32.totalorder %s98_s24, %s8208_s20  ;;  %p8214_p7 = scmp.lt.s32.totalorder %s8208_s20, %s8208_s20 }
  0x35   :  { %p8215_p8 = por %p8214_p7, %p8213_p6 }
  0x37   :  { %p8216_p9 = pnand %p8215_p8, %p8209_p5 }
  0x39   :  { %8219 = shalt.err (!%p8216_p9)
}
  0x3a   :  { %s8465_s5 = smov 256   ;;  %s8466_s30 = smov 16  }
  0x3b   :  { %103 = dma.hbm_to_vmem [thread:$0]  %s9327_s7, 16384, %s98_s24, [#allocation15], %s8465_s5, %s8465_s5, %s8466_s30  }
  0x3c   :  { %s8467_s2 = smov [#allocation17]   ;;  %s8468_s25 = smov [#allocation20]  }
  0x3d   :  { %s119_s23 = sshll.u32 %s8467_s2, 4  ;;  %s143_s26 = sshll.u32 %s8468_s25, 4  ;;  %s120_s23 = int_to_ptr.vmem [resolvable:$true] %s119_s23  ;;  %s144_s26 = int_to_ptr.vmem [resolvable:$true] %s143_s26 }
  0x3e   :  { %s8220_s0 = scalar_lea.hbm %s9329_s9, 128 }
  0x3f   :  { %p8221_p10 = scmp.ne.s32.totalorder %s9329_s9, %s8220_s0  ;;  %p8224_p11 = scmp.lt.u32.totalorder %s8220_s0, %s9329_s9 }
  0x41   :  { %p8226_p12 = pnand %p8224_p11, %p8221_p10 }
  0x43   :  { %8229 = shalt.err (!%p8226_p12)
}
  0x44   :  { %s8230_s7 = scalar_lea.vmem %s120_s23, 128  ;;  %p8235_p0 = scmp.lt.s32.totalorder %s120_s23, %s120_s23 }
  0x45   :  { %p8231_p13 = scmp.ne.s32.totalorder %s120_s23, %s8230_s7  ;;  %p8236_p1 = scmp.lt.s32.totalorder %s8230_s7, %s8230_s7 }
  0x47   :  { %p8237_p2 = por %p8236_p1, %p8235_p0 }
  0x49   :  { %p8238_p3 = pnand %p8237_p2, %p8231_p13 }
  0x4b   :  { %8241 = shalt.err (!%p8238_p3)
}
  0x4c   :  { %s8469_s24 = smov 64   ;;  %s8470_s21 = smov 4  }
  0x4d   :  { %125 = dma.hbm_to_vmem [thread:$0]  %s9329_s9, 128, %s120_s23, [#allocation18], %s8469_s24, %s8469_s24, %s8470_s21  }
  0x4e   :  { %s8242_s27 = scalar_lea.hbm %s9331_s11, 512 }
  0x4f   :  { %p8243_p4 = scmp.ne.s32.totalorder %s9331_s11, %s8242_s27  ;;  %p8246_p5 = scmp.lt.u32.totalorder %s8242_s27, %s9331_s11 }
  0x51   :  { %p8248_p6 = pnand %p8246_p5, %p8243_p4 }
  0x53   :  { %8251 = shalt.err (!%p8248_p6)
}
  0x54   :  { %s8252_s20 = scalar_lea.vmem %s144_s26, 512  ;;  %p8257_p8 = scmp.lt.s32.totalorder %s144_s26, %s144_s26 }
  0x55   :  { %p8253_p7 = scmp.ne.s32.totalorder %s144_s26, %s8252_s20  ;;  %p8258_p9 = scmp.lt.s32.totalorder %s8252_s20, %s8252_s20 }
  0x57   :  { %p8259_p10 = por %p8258_p9, %p8257_p8 }
  0x59   :  { %p8260_p11 = pnand %p8259_p10, %p8253_p7 }
  0x5b   :  { %8263 = shalt.err (!%p8260_p11)
}
  0x5c   :  { %149 = dma.hbm_to_vmem [thread:$0]  %s9331_s11, 512, %s144_s26, [#allocation21], %s8469_s24, %s8469_s24, %s8470_s21  }
  0x5d   :  { %s8471_s7 = smov [#allocation23]   ;;  %s8472_s2 = smov [#allocation6]  }
  0x5e   :  { %s167_s22 = sshll.u32 %s8471_s7, 4  ;;  %s39_s3 = sshll.u32 %s8472_s2, 4  ;;  %s168_s22 = int_to_ptr.vmem [resolvable:$true] %s167_s22  ;;  %s40_s3 = int_to_ptr.vmem [resolvable:$true] %s39_s3 }
  0x5f   :  { %s8264_s29 = scalar_lea.hbm %s9333_s13, 8192 }
  0x60   :  { %p8265_p12 = scmp.ne.s32.totalorder %s9333_s13, %s8264_s29  ;;  %p8268_p13 = scmp.lt.u32.totalorder %s8264_s29, %s9333_s13 }
  0x62   :  { %p8270_p0 = pnand %p8268_p13, %p8265_p12 }
  0x64   :  { %8273 = shalt.err (!%p8270_p0)
}
  0x65   :  { %s8274_s11 = scalar_lea.vmem %s168_s22, 8192  ;;  %p8279_p2 = scmp.lt.s32.totalorder %s168_s22, %s168_s22 }
  0x66   :  { %p8275_p1 = scmp.ne.s32.totalorder %s168_s22, %s8274_s11  ;;  %p8280_p3 = scmp.lt.s32.totalorder %s8274_s11, %s8274_s11 }
  0x68   :  { %p8281_p4 = por %p8280_p3, %p8279_p2 }
  0x6a   :  { %p8282_p5 = pnand %p8281_p4, %p8275_p1 }
  0x6c   :  { %8285 = shalt.err (!%p8282_p5)
}
  0x6d   :  { %173 = dma.hbm_to_vmem [thread:$0]  %s9333_s13, 8192, %s168_s22, [#allocation24], %s8465_s5, %s8465_s5, %s8466_s30  }
  0x6e   :  { %s9345_s2 = sld [smem:[#allocation44_spill]] }
  0x74   :  { %s8286_s25 = scalar_lea.hbm %s9345_s2, 7168 }
  0x75   :  { %p8287_p6 = scmp.ne.s32.totalorder %s9345_s2, %s8286_s25  ;;  %p8290_p7 = scmp.lt.u32.totalorder %s8286_s25, %s9345_s2 }
  0x77   :  { %p8292_p8 = pnand %p8290_p7, %p8287_p6 }
  0x79   :  { %8295 = shalt.err (!%p8292_p8)
}
  0x7a   :  { %s8296_s1 = scalar_lea.vmem %s40_s3, 7168  ;;  %p8301_p10 = scmp.lt.s32.totalorder %s40_s3, %s40_s3 }
  0x7b   :  { %p8297_p9 = scmp.ne.s32.totalorder %s40_s3, %s8296_s1  ;;  %p8302_p11 = scmp.lt.s32.totalorder %s8296_s1, %s8296_s1 }
  0x7d   :  { %p8303_p12 = por %p8302_p11, %p8301_p10 }
  0x7f   :  { %p8304_p13 = pnand %p8303_p12, %p8297_p9 }
  0x81   :  { %8307 = shalt.err (!%p8304_p13)
}
  0x82   :  { %s8473_s13 = smov 1024   ;;  %s8474_s11 = smov [#allocation10]  }
  0x83   :  { %45 = dma.hbm_to_vmem [thread:$0]  %s9345_s2, 7168, %s40_s3, [#allocation7], %s8473_s13, %s8473_s13, %s8469_s24  }
  0x84   :  { %s61_s26 = sshll.u32 %s8474_s11, 4  ;;  %s8475_s9 = smov [#allocation13]   ;;  %s62_s26 = int_to_ptr.vmem [resolvable:$true] %s61_s26 }
  0x85   :  { %s85_s23 = sshll.u32 %s8475_s9, 4  ;;  %s8308_s27 = scalar_lea.hbm %s9324_s4, 512  ;;  %s8700_s23 = int_to_ptr.vmem [resolvable:$true] %s85_s23 }
  0x86   :  { %p8309_p0 = scmp.ne.s32.totalorder %s9324_s4, %s8308_s27  ;;  %p8312_p1 = scmp.lt.u32.totalorder %s8308_s27, %s9324_s4 }
  0x88   :  { %p8314_p2 = pnand %p8312_p1, %p8309_p0 }
  0x8a   :  { %8317 = shalt.err (!%p8314_p2)
}
  0x8b   :  { %s8318_s3 = scalar_lea.vmem %s62_s26, 512  ;;  %p8323_p4 = scmp.lt.s32.totalorder %s62_s26, %s62_s26 }
  0x8c   :  { %p8319_p3 = scmp.ne.s32.totalorder %s62_s26, %s8318_s3  ;;  %p8324_p5 = scmp.lt.s32.totalorder %s8318_s3, %s8318_s3 }
  0x8e   :  { %p8325_p6 = por %p8324_p5, %p8323_p4 }
  0x90   :  { %p8326_p7 = pnand %p8325_p6, %p8319_p3 }
  0x92   :  { %8329 = shalt.err (!%p8326_p7)
}
  0x93   :  { %67 = dma.hbm_to_vmem [thread:$0]  %s9324_s4, 512, %s62_s26, [#allocation9], %s8469_s24, %s8469_s24, %s8470_s21  }
  0x94   :  { %s8330_s9 = scalar_lea.hbm %s9326_s6, 8192 }
  0x95   :  { %p8331_p8 = scmp.ne.s32.totalorder %s9326_s6, %s8330_s9  ;;  %p8334_p9 = scmp.lt.u32.totalorder %s8330_s9, %s9326_s6 }
  0x97   :  { %p8336_p10 = pnand %p8334_p9, %p8331_p8 }
  0x99   :  { %8339 = shalt.err (!%p8336_p10)
}
  0x9a   :  { %s8340_s0 = scalar_lea.vmem %s8700_s23, 8192  ;;  %p8345_p12 = scmp.lt.s32.totalorder %s8700_s23, %s8700_s23 }
  0x9b   :  { %p8341_p11 = scmp.ne.s32.totalorder %s8700_s23, %s8340_s0  ;;  %p8346_p13 = scmp.lt.s32.totalorder %s8340_s0, %s8340_s0 }
  0x9d   :  { %p8347_p0 = por %p8346_p13, %p8345_p12 }
  0x9f   :  { %p8348_p1 = pnand %p8347_p0, %p8341_p11 }
  0xa1   :  { %8351 = shalt.err (!%p8348_p1)
}
  0xa2   :  { %91 = dma.hbm_to_vmem [thread:$0]  %s9326_s6, 8192, %s8700_s23, [#allocation12], %s8465_s5, %s8465_s5, %s8466_s30  }
  0xa3   :  { %s8476_s19 = smov [#allocation16]   ;;  %s8477_s3 = smov [#allocation19]  }
  0xa4   :  { %s110_s1 = sshll.u32 %s8476_s19, 4  ;;  %s131_s2 = sshll.u32 %s8477_s3, 4  ;;  %s111_s1 = int_to_ptr.vmem [resolvable:$true] %s110_s1  ;;  %s8737_s2 = int_to_ptr.vmem [resolvable:$true] %s131_s2 }
  0xa5   :  { %s8352_s11 = scalar_lea.hbm %s9328_s8, 16 }
  0xa6   :  { %p8353_p2 = scmp.ne.s32.totalorder %s9328_s8, %s8352_s11  ;;  %p8356_p3 = scmp.lt.u32.totalorder %s8352_s11, %s9328_s8 }
  0xa8   :  { %p8358_p4 = pnand %p8356_p3, %p8353_p2 }
  0xaa   :  { %8361 = shalt.err (!%p8358_p4)
}
  0xab   :  { %s8362_s6 = scalar_lea.vmem %s111_s1, 16  ;;  %s8366_s23 = scalar_lea.vmem %s111_s1, 32 }
  0xac   :  { %p8363_p5 = scmp.ne.s32.totalorder %s111_s1, %s8362_s6  ;;  %p8367_p6 = scmp.lt.s32.totalorder %s111_s1, %s111_s1 }
  0xad   :  { %p8368_p7 = scmp.lt.s32.totalorder %s8366_s23, %s8362_s6 }
  0xaf   :  { %p8369_p8 = por %p8368_p7, %p8367_p6 }
  0xb1   :  { %p8370_p9 = pnand %p8369_p8, %p8363_p5 }
  0xb3   :  { %8373 = shalt.err (!%p8370_p9)
}
  0xb4   :  { %113 = dma.hbm_to_vmem [thread:$0]  %s9328_s8, 16, %s111_s1, [#allocation15]  }
  0xb5   :  { %s8374_s19 = scalar_lea.hbm %s9330_s10, 256 }
  0xb6   :  { %p8375_p10 = scmp.ne.s32.totalorder %s9330_s10, %s8374_s19  ;;  %p8378_p11 = scmp.lt.u32.totalorder %s8374_s19, %s9330_s10 }
  0xb8   :  { %p8380_p12 = pnand %p8378_p11, %p8375_p10 }
  0xba   :  { %8383 = shalt.err (!%p8380_p12)
}
  0xbb   :  { %s8384_s9 = scalar_lea.vmem %s8737_s2, 256  ;;  %p8389_p0 = scmp.lt.s32.totalorder %s8737_s2, %s8737_s2 }
  0xbc   :  { %p8385_p13 = scmp.ne.s32.totalorder %s8737_s2, %s8384_s9  ;;  %p8390_p1 = scmp.lt.s32.totalorder %s8384_s9, %s8384_s9 }
  0xbe   :  { %p8391_p2 = por %p8390_p1, %p8389_p0 }
  0xc0   :  { %p8392_p3 = pnand %p8391_p2, %p8385_p13 }
  0xc2   :  { %8395 = shalt.err (!%p8392_p3)
}
  0xc3   :  { %137 = dma.hbm_to_vmem [thread:$0]  %s9330_s10, 256, %s8737_s2, [#allocation18], %s8469_s24, %s8469_s24, %s8470_s21  }
  0xc4   :  { %s8478_s7 = smov [#allocation22]   ;;  %s8479_s27 = smov [#allocation25]  }
  0xc5   :  { %s155_s25 = sshll.u32 %s8478_s7, 4  ;;  %s179_s6 = sshll.u32 %s8479_s27, 4  ;;  %s156_s25 = int_to_ptr.vmem [resolvable:$true] %s155_s25  ;;  %s8771_s6 = int_to_ptr.vmem [resolvable:$true] %s179_s6 }
  0xc6   :  { %s8396_s0 = scalar_lea.hbm %s9332_s12, 2048 }
  0xc7   :  { %p8397_p4 = scmp.ne.s32.totalorder %s9332_s12, %s8396_s0  ;;  %p8400_p5 = scmp.lt.u32.totalorder %s8396_s0, %s9332_s12 }
  0xc9   :  { %p8402_p6 = pnand %p8400_p5, %p8397_p4 }
  0xcb   :  { %8405 = shalt.err (!%p8402_p6)
}
  0xcc   :  { %s8406_s10 = scalar_lea.vmem %s156_s25, 2048  ;;  %p8411_p8 = scmp.lt.s32.totalorder %s156_s25, %s156_s25 }
  0xcd   :  { %p8407_p7 = scmp.ne.s32.totalorder %s156_s25, %s8406_s10  ;;  %p8412_p9 = scmp.lt.s32.totalorder %s8406_s10, %s8406_s10 }
  0xcf   :  { %p8413_p10 = por %p8412_p9, %p8411_p8 }
  0xd1   :  { %p8414_p11 = pnand %p8413_p10, %p8407_p7 }
  0xd3   :  { %8417 = shalt.err (!%p8414_p11)
}
  0xd4   :  { %s9346_s2 = smov 128   ;;  %s8418_s8 = scalar_lea.hbm %s9334_s14, 16384 }
  0xd5   :  { %161 = dma.hbm_to_vmem [thread:$0]  %s9332_s12, 2048, %s156_s25, [#allocation21], %s9346_s2, %s9346_s2, %s8463_s28  }
  0xd6   :  { %p8419_p12 = scmp.ne.s32.totalorder %s9334_s14, %s8418_s8  ;;  %p8422_p13 = scmp.lt.u32.totalorder %s8418_s8, %s9334_s14 }
  0xd8   :  { %p8424_p0 = pnand %p8422_p13, %p8419_p12 }
  0xda   :  { %8427 = shalt.err (!%p8424_p0)
}
  0xdb   :  { %s8428_s29 = scalar_lea.vmem %s8771_s6, 16384  ;;  %p8433_p2 = scmp.lt.s32.totalorder %s8771_s6, %s8771_s6 }
  0xdc   :  { %p8429_p1 = scmp.ne.s32.totalorder %s8771_s6, %s8428_s29  ;;  %p8434_p3 = scmp.lt.s32.totalorder %s8428_s29, %s8428_s29 }
  0xde   :  { %p8435_p4 = por %p8434_p3, %p8433_p2 }
  0xe0   :  { %p8436_p5 = pnand %p8435_p4, %p8429_p1 }
  0xe2   :  { %8439 = shalt.err (!%p8436_p5)
}
  0xe3   :  { %185 = dma.hbm_to_vmem [thread:$0]  %s9334_s14, 16384, %s8771_s6, [#allocation24], %s8465_s5, %s8465_s5, %s8466_s30  }
  0xe4   :  { %8440 = dma.done.wait [#allocation7], 7168  }
  0xe5   :  { %8441 = vsyncadd [#allocation7], 4294960128 }
  0xe6   :  { %8442 = dma.done.wait [#allocation9], 544  }
  0xe7   :  { %8443 = vsyncadd [#allocation9], 4294966752 }
  0xe8   :  { %8444 = dma.done.wait [#allocation12], 10240  }
  0xe9   :  { %8445 = vsyncadd [#allocation12], 4294957056 }
  0xea   :  { %8446 = dma.done.wait [#allocation15], 16400  }
  0xeb   :  { %8447 = vsyncadd [#allocation15], 4294950896 }
  0xec   :  { %8448 = dma.done.wait [#allocation18], 384  }
  0xed   :  { %8449 = vsyncadd [#allocation18], 4294966912 }
  0xee   :  { %8450 = dma.done.wait [#allocation21], 2560  }
  0xef   :  { %8451 = vsyncadd [#allocation21], 4294964736 }
  0xf0   :  { %8452 = dma.done.wait [#allocation24], 24576  }
  0xf1   :  { %8453 = vsyncadd [#allocation24], 4294942720  ;;  %s230_s0 = sld [smem:[#allocation0]]   ;;  %242 = sst [smem:[#allocation27]] %s8473_s13  ;;  %v8480_v0 = vmov 0   ;;  %v8482_v1 = vmov 2   ;;  %v339_v4 = vlaneseq }
  0xf2   :  { %7480 = vset.pattern.permute.xlu0 %v8480_v0  ;;  %244 = sst [smem:[#allocation27 + $0x1]] %s8473_s13  ;;  %s8481_s14 = smov [#allocation2]   ;;  %7482 = vset.pattern.permute.xlu1 %v8482_v1  ;;  %v8493_v3 = vmov 1   ;;  %vm366_vm0 = vcmask 523264   ;;  %v8494_v28 = vmov 0.0   ;;  %vm8495_vm1 = vmmov 0  }
  0xf3   :  { %s238_s30 = sshll.u32 %s8481_s14, 4  ;;  %246 = sst [smem:[#allocation27 + $0x2]] %s8463_s28  ;;  %v8852_v6 = vshrl.u32 %v339_v4, 7  ;;  %7316 = vmatprep.subr.bf16.mxu1 %v8494_v28  ;;  %7324 = vmatprep.mubr.msk.bf16.mxu1 %vm8495_vm1, %v8494_v28  ;;  %vm2246_vm2 = vcmask 130048   ;;  %vm2322_vm3 = vcmask 261120   ;;  %s239_s30 = int_to_ptr.vmem [resolvable:$true] %s238_s30 }
  0xf4   :  { %248 = sst [smem:[#allocation27 + $0x3]] %s8469_s24  ;;  %s8483_s13 = smov 2  }
  0xf5   :  { %250 = sst [smem:[#allocation27 + $0x4]] %s9346_s2  ;;  %s8484_s26 = smov 512   ;;  %v8855_v8 = vsub.s32 0, %v8852_v6  ;;  %v8858_v9 = vsub.s32 1, %v8852_v6  ;;  %v8861_v10 = vsub.s32 2, %v8852_v6 }
  0xf6   :  { %256 = sst [smem:[#allocation27 + $0x7]] %s8469_s24  ;;  %s8485_s19 = smov [#allocation5]  }
  0xf7   :  { %s6823_s6 = sshll.u32 %s230_s0, 26  ;;  %258 = sst [smem:[#allocation27 + $0x8]] %s8470_s21 }
  0xf8   :  { %s8816_s4 = sadd.s32 134217728, %s6823_s6  ;;  %252 = sst [smem:[#allocation27 + $0x5]] %s8483_s13 }
  0xf9   :  { %254 = sst [smem:[#allocation27 + $0x6]] %s8484_s26  ;;  %s8486_s28 = smov [#allocation26]  }
  0xfa   :  { %260 = dma.general %s9335_s15, 65536, %s239_s30, %s8485_s19, %s8486_s28, [#allocation27], %s8816_s4, 0  }
  0xfb   :  { %277 = sst [smem:[#allocation29]] %s8484_s26  ;;  %s8487_s22 = smov [#allocation3]  }
  0xfc   :  { %279 = sst [smem:[#allocation29 + $0x1]] %s8484_s26  ;;  %s273_s20 = sshll.u32 %s8487_s22, 4  ;;  %s274_s20 = int_to_ptr.vmem [resolvable:$true] %s273_s20 }
  0xfd   :  { %281 = sst [smem:[#allocation29 + $0x2]] %s8470_s21  ;;  %s8488_s15 = smov [#allocation5 + $0x1]  }
  0xfe   :  { %283 = sst [smem:[#allocation29 + $0x3]] %s8469_s24  ;;  %s8489_s11 = smov [#allocation28]  }
  0xff   :  { %285 = sst [smem:[#allocation29 + $0x4]] %s9346_s2  ;;  %s8490_s1 = smov [#allocation4]  }
 0x100   :  { %287 = sst [smem:[#allocation29 + $0x5]] %s8483_s13  ;;  %s308_s7 = sshll.u32 %s8490_s1, 4  ;;  %s309_s7 = int_to_ptr.vmem [resolvable:$true] %s308_s7 }
 0x101   :  { %289 = sst [smem:[#allocation29 + $0x6]] %s8465_s5  ;;  %s8492_s27 = smov [#allocation30]  }
 0x102   :  { %291 = sst [smem:[#allocation29 + $0x7]] %s8469_s24 }
 0x103   :  { %293 = sst [smem:[#allocation29 + $0x8]] %s8470_s21 }
 0x104   :  { %295 = dma.general %s9336_s16, 32768, %s274_s20, %s8488_s15, %s8489_s11, [#allocation29], %s8816_s4, 0  }
 0x105   :  { %312 = sst [smem:[#allocation31]] %s8465_s5  ;;  %s8491_s16 = smov [#allocation5 + $0x2]  }
 0x106   :  { %314 = sst [smem:[#allocation31 + $0x1]] %s8465_s5 }
 0x107   :  { %316 = sst [smem:[#allocation31 + $0x2]] %s8483_s13 }
 0x108   :  { %318 = sst [smem:[#allocation31 + $0x3]] %s8469_s24 }
 0x109   :  { %320 = sst [smem:[#allocation31 + $0x4]] %s9346_s2 }
 0x10a   :  { %322 = sst [smem:[#allocation31 + $0x5]] %s8483_s13 }
 0x10b   :  { %324 = sst [smem:[#allocation31 + $0x6]] %s9346_s2 }
 0x10c   :  { %326 = sst [smem:[#allocation31 + $0x7]] %s8469_s24 }
 0x10d   :  { %328 = sst [smem:[#allocation31 + $0x8]] %s8470_s21 }
 0x10e   :  { %330 = dma.general %s9337_s17, 15360, %s309_s7, %s8491_s16, %s8492_s27, [#allocation31], %s8816_s4, 0  }
 0x10f   :  { %s9347_s25 = sld [smem:[#allocation42_spill]]  ;;  %v332_v5 = vld [vmem:[#allocation8] sm:$0x3]  ;;  %v7485_v27 = vld [vmem:[#allocation10] sm:$0xff]   ;;  %v7486_v29 = vld [vmem:[#allocation10 + $0x8] sm:$0xff]   ;;  %s9348_s21 = sld [smem:[#allocation43_spill]] }
 0x110   :  { %v333_v7 = vunpack.c.l.bf16 %v332_v5  ;;  %v364_v20 = vld [vmem:[#allocation6] ss:$0 sm:$0xff]  ;;  %7317 = vmatpush3.bf16.msra.mxu1 %v7485_v27  ;;  %v7487_v30 = vld [vmem:[#allocation10 + $0x10] sm:$0xff]   ;;  %v384_v42 = vld [vmem:[#allocation6 + $0x1] ss:$0 sm:$0xff] }
 0x111   :  { %7318 = vmatprep.subr.bf16.mxu1 %v8494_v28  ;;  %v7488_v31 = vld [vmem:[#allocation10 + $0x18] sm:$0xff]   ;;  %v386_v44 = vld [vmem:[#allocation6 + $0x2] ss:$0 sm:$0xff]  ;;  %v7491_v50 = vld [vmem:[#allocation11 + $0x4] ss:$8 sps:$4 sm:$0xff]  }
 0x112   :  { %v342_v12 = vrot.slane %v333_v7, %v8855_v8  ;;  %v351_v13 = vrot.slane %v333_v7, %v8858_v9  ;;  %v361_v14 = vrot.slane %v333_v7, %v8861_v10  ;;  %v7489_v49 = vld [vmem:[#allocation11] ss:$8 sps:$4 sm:$0xff]   ;;  %v7494_v58 = vld [vmem:[#allocation11 + $0x14] ss:$8 sps:$4 sm:$0xff]   ;;  %v7492_v59 = vld [vmem:[#allocation11 + $0x10] ss:$8 sps:$4 sm:$0xff]  }
 0x113   :  { %v398_v51 = vld [vmem:[#allocation6 + $0x3] ss:$0 sm:$0xff]  ;;  %v7497_v60 = vld [vmem:[#allocation11 + $0x24] ss:$8 sps:$4 sm:$0xff]   ;;  %v7500_v62 = vld [vmem:[#allocation11 + $0x34] ss:$8 sps:$4 sm:$0xff]  }
 0x114   :  { %7319 = vmatpush3.bf16.msra.mxu1 %v7486_v29  ;;  %v7495_v61 = vld [vmem:[#allocation11 + $0x20] ss:$8 sps:$4 sm:$0xff]   ;;  %v7498_v63 = vld [vmem:[#allocation11 + $0x30] ss:$8 sps:$4 sm:$0xff]   ;;  %v7503_v1 = vld [vmem:[#allocation11 + $0x44] ss:$8 sps:$4 sm:$0xff]  }
 0x115   :  { %v331_v2 = vld [vmem:[%s9347_s25] sm:$0xff]  ;;  %7320 = vmatprep.subr.bf16.mxu1 %v8494_v28  ;;  %v7504_v4 = vld [vmem:[#allocation11 + $0x50] ss:$8 sps:$4 sm:$0xff]  }
 0x116   :  { %336 = vperm.xlu0 %7480, %v331_v2   ;;  %355 = vperm.xlu1 %7482, %v331_v2   ;;  %v7509_v5 = vld [vmem:[#allocation11 + $0x64] ss:$8 sps:$4 sm:$0xff]   ;;  %v7507_v7 = vld [vmem:[#allocation11 + $0x60] ss:$8 sps:$4 sm:$0xff]  }
 0x118   :  { %7321 = vmatpush3.bf16.msra.mxu1 %v7487_v30 }
 0x119   :  { %7322 = vmatprep.subr.bf16.mxu1 %v8494_v28 }
 0x11a   :  { %7481 = vset.pattern.permute.xlu0 %v8493_v3  ;;  %7483 = vset.pattern.permute.xlu1 %v8480_v0  ;;  %v7506_v3 = vld [vmem:[#allocation11 + $0x54] ss:$8 sps:$4 sm:$0xff]  }
 0x11b   :  { %345 = vperm.xlu0 %7481, %v331_v2   ;;  %v7501_v2 = vld [vmem:[#allocation11 + $0x40] ss:$8 sps:$4 sm:$0xff]  }
 0x11c   :  { %7323 = vmatpush3.bf16.msra.mxu1 %v7488_v31  ;;  %v7513_v31 = vld [vmem:[#allocation13 + $0x4] ss:$16 sps:$4 sm:$0xff]  }
 0x11d   :  { %596 = vmatprep.subr.bf16.mxu1 %v7491_v50  ;;  %1098 = vmatprep.subr.bf16.mxu0 %v7513_v31  ;;  %v7542_v50 = vld [vmem:[#allocation13 + $0x80] ss:$16 sps:$4 sm:$0xff]   ;;  %v7581_v31 = vld [vmem:[#allocation13 + $0x168] ss:$16 sps:$4 sm:$0xff]  }
 0x11f   :  { %7484 = vset.pattern.permute.xlu0 %v8480_v0 }
 0x195   :  { %v337_v11 = vpop.permute.xlu0 %336  ;;  %v356_v15 = vpop.permute.xlu1 %355 }
 0x196   :  { %v343_v17 = vmul.f32 %v342_v12, %v337_v11  ;;  %v362_v19 = vmul.f32 %v361_v14, %v356_v15  ;;  %v7512_v11 = vld [vmem:[#allocation11 + $0x74] ss:$8 sps:$4 sm:$0xff]   ;;  %v7510_v12 = vld [vmem:[#allocation11 + $0x70] ss:$8 sps:$4 sm:$0xff]  }
 0x19a   :  { %v346_v16 = vpop.permute.xlu0 %345 }
 0x19b   :  { %v352_v18 = vmul.f32 %v351_v13, %v346_v16 }
 0x19d   :  { %v353_v21 = vadd.f32 %v352_v18, %v343_v17 }
 0x19f   :  { %v363_v22 = vadd.f32 %v362_v19, %v353_v21 }
 0x1a1   :  { %v365_v23 = vadd.f32 %v364_v20, %v363_v22 }
 0x1a3   :  { %v367_v24 = vsel %vm366_vm0, %v365_v23, 0.0  ;;  %v372_v25 = vmul.f32 %v365_v23, %v365_v23 }
 0x1a4   :  { %368 = vadd.xlane.f32.xlu1 %v367_v24 }
 0x1a5   :  { %v373_v26 = vsel %vm366_vm0, %v372_v25, 0.0  ;;  %v483_v25 = vld [vmem:[#allocation6 + $0x5] ss:$0 sm:$0xff] }
 0x1a6   :  { %374 = vadd.xlane.f32.xlu0 %v373_v26 }
 0x231   :  { %v369_v32 = vpop.xlane.xlu1 %368 }
 0x232   :  { %v371_v33 = vmul.f32 0.015625, %v369_v32  ;;  %v7515_v32 = vld [vmem:[#allocation13 + $0x8] ss:$16 sps:$4 sm:$0xff]  }
 0x233   :  { %v375_v34 = vpop.xlane.xlu0 %374 }
 0x234   :  { %v377_v35 = vmul.f32 %v371_v33, %v371_v33  ;;  %v376_v36 = vmul.f32 0.015625, %v375_v34  ;;  %v382_v40 = vsub.f32 %v365_v23, %v371_v33  ;;  %v481_v23 = vld [vmem:[#allocation6 + $0x4] ss:$0 sm:$0xff]  ;;  %v7517_v33 = vld [vmem:[#allocation13 + $0xc] ss:$16 sps:$4 sm:$0xff]  }
 0x235   :  { %v7518_v34 = vld [vmem:[#allocation13] ss:$16 sps:$4 sm:$0xff]  }
 0x236   :  { %v378_v37 = vsub.f32 %v376_v36, %v377_v35  ;;  %v7519_v35 = vld [vmem:[#allocation13 + $0x24] ss:$16 sps:$4 sm:$0xff]   ;;  %v7523_v36 = vld [vmem:[#allocation13 + $0x2c] ss:$16 sps:$4 sm:$0xff]   ;;  %1099 = vmatpush1.bf16.msra.mxu0 %v7518_v34 }
 0x237   :  { %1100 = vmatprep.subr.bf16.mxu0 %v7519_v35  ;;  %v7585_v34 = vld [vmem:[#allocation13 + $0x184] ss:$16 sps:$4 sm:$0xff]   ;;  %v7589_v35 = vld [vmem:[#allocation13 + $0x18c] ss:$16 sps:$4 sm:$0xff]  }
 0x238   :  { %v379_v38 = vmax.f32 %v378_v37, 0.0  ;;  %v7521_v37 = vld [vmem:[#allocation13 + $0x28] ss:$16 sps:$4 sm:$0xff]  }
 0x23a   :  { %v380_v39 = vadd.f32 1e-05, %v379_v38  ;;  %v7524_v38 = vld [vmem:[#allocation13 + $0x20] ss:$16 sps:$4 sm:$0xff]  }
 0x23b   :  { %1101 = vmatpush1.bf16.msra.mxu0 %v7524_v38  ;;  %v7591_v38 = vld [vmem:[#allocation13 + $0x1a4] ss:$16 sps:$4 sm:$0xff]  }
 0x23c   :  { %8120 = vrsqrt.f32 %v380_v39  ;;  %v7525_v39 = vld [vmem:[#allocation13 + $0x44] ss:$16 sps:$4 sm:$0xff]  }
 0x23d   :  { %1102 = vmatprep.subr.bf16.mxu0 %v7525_v39  ;;  %v7595_v39 = vld [vmem:[#allocation13 + $0x1ac] ss:$16 sps:$4 sm:$0xff]  }
 0x246   :  { %v8121_v41 = vpop.eup %8120 }
 0x247   :  { %v383_v43 = vmul.f32 %v8121_v41, %v382_v40  ;;  %v7529_v40 = vld [vmem:[#allocation13 + $0x4c] ss:$16 sps:$4 sm:$0xff]   ;;  %v7527_v41 = vld [vmem:[#allocation13 + $0x48] ss:$16 sps:$4 sm:$0xff]  }
 0x249   :  { %v385_v45 = vmul.f32 %v384_v42, %v383_v43  ;;  %v7530_v42 = vld [vmem:[#allocation13 + $0x40] ss:$16 sps:$4 sm:$0xff]   ;;  %v7531_v43 = vld [vmem:[#allocation13 + $0x64] ss:$16 sps:$4 sm:$0xff]  }
 0x24a   :  { %1103 = vmatpush1.bf16.msra.mxu0 %v7530_v42  ;;  %v7597_v42 = vld [vmem:[#allocation13 + $0x1c4] ss:$16 sps:$4 sm:$0xff]  }
 0x24b   :  { %v387_v46 = vadd.f32 %v386_v44, %v385_v45  ;;  %v7535_v44 = vld [vmem:[#allocation13 + $0x6c] ss:$16 sps:$4 sm:$0xff]   ;;  %v7533_v45 = vld [vmem:[#allocation13 + $0x68] ss:$16 sps:$4 sm:$0xff]   ;;  %1104 = vmatprep.subr.bf16.mxu0 %v7531_v43 }
 0x24c   :  { %v7601_v43 = vld [vmem:[#allocation13 + $0x1cc] ss:$16 sps:$4 sm:$0xff]  }
 0x24d   :  { %v388_v47 = vmax.f32 %v387_v46, 0.0  ;;  %v7536_v46 = vld [vmem:[#allocation13 + $0x60] ss:$16 sps:$4 sm:$0xff]  }
 0x24e   :  { %1105 = vmatpush1.bf16.msra.mxu0 %v7536_v46  ;;  %v7603_v46 = vld [vmem:[#allocation13 + $0x1e4] ss:$16 sps:$4 sm:$0xff]  }
 0x24f   :  { %v397_v48 = vpack.c.bf16 %v388_v47, %v388_v47  ;;  %v7537_v47 = vld [vmem:[#allocation13 + $0x84] ss:$16 sps:$4 sm:$0xff]  }
 0x250   :  { %1106 = vmatprep.subr.bf16.mxu0 %v7537_v47  ;;  %v7607_v47 = vld [vmem:[#allocation13 + $0x1ec] ss:$16 sps:$4 sm:$0xff]  }
 0x251   :  { %7325 = vmatmul.mubr.msk.bf16.vlgmr.msra.gmra.mrb[0].mxu1 %vm366_vm0, %v397_v48  ;;  %v7541_v48 = vld [vmem:[#allocation13 + $0x8c] ss:$16 sps:$4 sm:$0xff]  }
 0x252   :  { %628 = vmatprep.mubr.bf16.mxu1 %v8480_v0  ;;  %597 = vmatpush1.bf16.msra.mxu1 %v7489_v49  ;;  %v7539_v49 = vld [vmem:[#allocation13 + $0x88] ss:$16 sps:$4 sm:$0xff]  }
 0x253   :  { %598 = vmatprep.subr.bf16.mxu1 %v7494_v58  ;;  %1107 = vmatpush1.bf16.msra.mxu0 %v7542_v50  ;;  %v7554_v58 = vld [vmem:[#allocation13 + $0xc0] ss:$16 sps:$4 sm:$0xff]  }
 0x256   :  { %599 = vmatpush1.bf16.msra.mxu1 %v7492_v59  ;;  %v7555_v59 = vld [vmem:[#allocation13 + $0xe4] ss:$16 sps:$4 sm:$0xff]  }
 0x257   :  { %600 = vmatprep.subr.bf16.mxu1 %v7497_v60  ;;  %v7559_v60 = vld [vmem:[#allocation13 + $0xec] ss:$16 sps:$4 sm:$0xff]  }
 0x25a   :  { %601 = vmatpush1.bf16.msra.mxu1 %v7495_v61  ;;  %v7557_v61 = vld [vmem:[#allocation13 + $0xe8] ss:$16 sps:$4 sm:$0xff]  }
 0x25b   :  { %602 = vmatprep.subr.bf16.mxu1 %v7500_v62  ;;  %v7560_v62 = vld [vmem:[#allocation13 + $0xe0] ss:$16 sps:$4 sm:$0xff]  }
 0x25e   :  { %603 = vmatpush1.bf16.msra.mxu1 %v7498_v63  ;;  %v504_v63 = vld [vmem:[#allocation6 + $0x6] ss:$8 sm:$0x3] }
 0x25f   :  { %604 = vmatprep.subr.bf16.mxu1 %v7503_v1  ;;  %v509_v1 = vrot.slane %v504_v63, %v8855_v8 }
 0x262   :  { %605 = vmatpush1.bf16.msra.mxu1 %v7501_v2  ;;  %v513_v2 = vrot.slane %v504_v63, %v8858_v9 }
 0x263   :  { %606 = vmatprep.subr.bf16.mxu1 %v7506_v3 }
 0x266   :  { %607 = vmatpush1.bf16.msra.mxu1 %v7504_v4 }
 0x267   :  { %608 = vmatprep.subr.bf16.mxu1 %v7509_v5 }
 0x26a   :  { %609 = vmatpush1.bf16.msra.mxu1 %v7507_v7 }
 0x26b   :  { %610 = vmatprep.subr.bf16.mxu1 %v7512_v11 }
 0x26e   :  { %611 = vmatpush1.bf16.msra.mxu1 %v7510_v12 }
 0x26f   :  { %1139 = vmatprep.subr.bf16.mxu1 %v7517_v33  ;;  %v7584_v33 = vld [vmem:[#allocation13 + $0x160] ss:$16 sps:$4 sm:$0xff]  }
 0x324   :  { %v460_v52 = vpop.f32.mrb[0].mxu1 }
 0x325   :  { %v461_v53 = vadd.f32 %v460_v52, %v398_v51  ;;  %v7326_v54 = vpop.f32.mrb[1].mxu1  ;;  %v7543_v51 = vld [vmem:[#allocation13 + $0xa4] ss:$16 sps:$4 sm:$0xff]   ;;  %v7547_v52 = vld [vmem:[#allocation13 + $0xac] ss:$16 sps:$4 sm:$0xff]  }
 0x326   :  { %v463_v55 = vpop.f32.mrb[2].mxu1  ;;  %v7548_v54 = vld [vmem:[#allocation13 + $0xa0] ss:$16 sps:$4 sm:$0xff]   ;;  %1108 = vmatprep.subr.bf16.mxu0 %v7543_v51 }
 0x327   :  { %466 = vadd.xlane.f32.xlu1 %v461_v53  ;;  %v7327_v56 = vpop.f32.mrb[3].mxu1  ;;  %v470_v57 = vmul.f32 %v461_v53, %v461_v53  ;;  %v7549_v55 = vld [vmem:[#allocation13 + $0xc4] ss:$16 sps:$4 sm:$0xff]   ;;  %1109 = vmatpush1.bf16.msra.mxu0 %v7548_v54 }
 0x328   :  { %v7553_v56 = vld [vmem:[#allocation13 + $0xcc] ss:$16 sps:$4 sm:$0xff]   ;;  %1110 = vmatprep.subr.bf16.mxu0 %v7549_v55 }
 0x329   :  { %471 = vadd.xlane.f32.xlu0 %v470_v57  ;;  %v7551_v57 = vld [vmem:[#allocation13 + $0xc8] ss:$16 sps:$4 sm:$0xff]  }
 0x32b   :  { %1111 = vmatpush1.bf16.msra.mxu0 %v7554_v58  ;;  %v658_v58 = vld [vmem:[#allocation6 + $0x7] ss:$8 sm:$0x3] }
 0x32c   :  { %1112 = vmatprep.subr.bf16.mxu0 %v7555_v59  ;;  %v673_v59 = vld [vmem:[#allocation6 + $0x40] ss:$8 sm:$0x3]  ;;  %v667_v63 = vrot.slane %v658_v58, %v8858_v9 }
 0x32f   :  { %1113 = vmatpush1.bf16.msra.mxu0 %v7560_v62  ;;  %v663_v62 = vrot.slane %v658_v58, %v8855_v8 }
 0x3b4   :  { %v467_v13 = vpop.xlane.xlu1 %466 }
 0x3b5   :  { %v469_v14 = vmul.f32 0.0078125, %v467_v13 }
 0x3b6   :  { %v472_v15 = vpop.xlane.xlu0 %471 }
 0x3b7   :  { %v474_v16 = vmul.f32 %v469_v14, %v469_v14  ;;  %v473_v17 = vmul.f32 0.0078125, %v472_v15  ;;  %v479_v21 = vsub.f32 %v461_v53, %v469_v14  ;;  %v7545_v53 = vld [vmem:[#allocation13 + $0xa8] ss:$16 sps:$4 sm:$0xff]  }
 0x3b9   :  { %v475_v18 = vsub.f32 %v473_v17, %v474_v16  ;;  %v7561_v17 = vld [vmem:[#allocation13 + $0x104] ss:$16 sps:$4 sm:$0xff]  }
 0x3ba   :  { %1114 = vmatprep.subr.bf16.mxu0 %v7561_v17 }
 0x3bb   :  { %v476_v19 = vmax.f32 %v475_v18, 0.0  ;;  %v7565_v18 = vld [vmem:[#allocation13 + $0x10c] ss:$16 sps:$4 sm:$0xff]  }
 0x3bd   :  { %v477_v20 = vadd.f32 1e-05, %v476_v19  ;;  %v7563_v19 = vld [vmem:[#allocation13 + $0x108] ss:$16 sps:$4 sm:$0xff]  }
 0x3bf   :  { %8122 = vrsqrt.f32 %v477_v20  ;;  %v7566_v20 = vld [vmem:[#allocation13 + $0x100] ss:$16 sps:$4 sm:$0xff]  }
 0x3c0   :  { %1115 = vmatpush1.bf16.msra.mxu0 %v7566_v20  ;;  %v7612_v20 = vld [vmem:[#allocation14 + $0x8] ss:$16 sps:$4 sm:$0xff]  }
 0x3c9   :  { %v8123_v22 = vpop.eup %8122 }
 0x3ca   :  { %v480_v24 = vmul.f32 %v8123_v22, %v479_v21  ;;  %v7567_v21 = vld [vmem:[#allocation13 + $0x124] ss:$16 sps:$4 sm:$0xff]   ;;  %v7571_v22 = vld [vmem:[#allocation13 + $0x12c] ss:$16 sps:$4 sm:$0xff]  }
 0x3cb   :  { %1116 = vmatprep.subr.bf16.mxu0 %v7567_v21  ;;  %v7614_v21 = vld [vmem:[#allocation14 + $0xc] ss:$16 sps:$4 sm:$0xff]  }
 0x3cc   :  { %v482_v26 = vmul.f32 %v481_v23, %v480_v24  ;;  %v7569_v23 = vld [vmem:[#allocation13 + $0x128] ss:$16 sps:$4 sm:$0xff]   ;;  %v7572_v24 = vld [vmem:[#allocation13 + $0x120] ss:$16 sps:$4 sm:$0xff]  }
 0x3cd   :  { %1117 = vmatpush1.bf16.msra.mxu0 %v7572_v24  ;;  %v7615_v24 = vld [vmem:[#allocation14 + $0x20] ss:$16 sps:$4 sm:$0xff]  }
 0x3ce   :  { %v484_v27 = vadd.f32 %v483_v25, %v482_v26  ;;  %v7573_v25 = vld [vmem:[#allocation13 + $0x144] ss:$16 sps:$4 sm:$0xff]   ;;  %v7577_v26 = vld [vmem:[#allocation13 + $0x14c] ss:$16 sps:$4 sm:$0xff]  }
 0x3cf   :  { %1118 = vmatprep.subr.bf16.mxu0 %v7573_v25  ;;  %v7618_v25 = vld [vmem:[#allocation14 + $0x28] ss:$16 sps:$4 sm:$0xff]  }
 0x3d0   :  { %v485_v29 = vmax.f32 %v484_v27, 0.0  ;;  %v7575_v27 = vld [vmem:[#allocation13 + $0x148] ss:$16 sps:$4 sm:$0xff]  }
 0x3d2   :  { %v502_v30 = vpack.c.bf16 %v485_v29, %v485_v29  ;;  %v7578_v29 = vld [vmem:[#allocation13 + $0x140] ss:$16 sps:$4 sm:$0xff]  }
 0x3d3   :  { %1119 = vmatpush1.bf16.msra.mxu0 %v7578_v29  ;;  %v7621_v29 = vld [vmem:[#allocation14 + $0x40] ss:$16 sps:$4 sm:$0xff]  }
 0x3d4   :  { %629 = vmatmul.mubr.bf16.vlgmr.msra.gmra.mrb[4].mxu1 %v502_v30  ;;  %v7579_v30 = vld [vmem:[#allocation13 + $0x164] ss:$16 sps:$4 sm:$0xff]  }
 0x3d5   :  { %1140 = vmatpush1.bf16.msra.mxu1 %v7515_v32  ;;  %v7583_v32 = vld [vmem:[#allocation13 + $0x16c] ss:$16 sps:$4 sm:$0xff]   ;;  %1120 = vmatprep.subr.bf16.mxu0 %v7579_v30  ;;  %v7624_v30 = vld [vmem:[#allocation14 + $0x48] ss:$16 sps:$4 sm:$0xff]  }
 0x3d6   :  { %1141 = vmatprep.subr.bf16.mxu1 %v7523_v36  ;;  %v7587_v36 = vld [vmem:[#allocation13 + $0x188] ss:$16 sps:$4 sm:$0xff]  }
 0x3d7   :  { %1121 = vmatpush1.bf16.msra.mxu0 %v7584_v33  ;;  %v7627_v33 = vld [vmem:[#allocation14 + $0x60] ss:$16 sps:$4 sm:$0xff]  }
 0x3d8   :  { %1122 = vmatprep.subr.bf16.mxu0 %v7585_v34  ;;  %v7630_v34 = vld [vmem:[#allocation14 + $0x68] ss:$16 sps:$4 sm:$0xff]  }
 0x3d9   :  { %1142 = vmatpush1.bf16.msra.mxu1 %v7521_v37  ;;  %v7590_v37 = vld [vmem:[#allocation13 + $0x180] ss:$16 sps:$4 sm:$0xff]  }
 0x3da   :  { %1143 = vmatprep.subr.bf16.mxu1 %v7529_v40  ;;  %v7593_v40 = vld [vmem:[#allocation13 + $0x1a8] ss:$16 sps:$4 sm:$0xff]  }
 0x3db   :  { %1123 = vmatpush1.bf16.msra.mxu0 %v7590_v37  ;;  %v7633_v37 = vld [vmem:[#allocation14 + $0x80] ss:$16 sps:$4 sm:$0xff]  }
 0x3dc   :  { %1124 = vmatprep.subr.bf16.mxu0 %v7591_v38  ;;  %v7636_v38 = vld [vmem:[#allocation14 + $0x88] ss:$16 sps:$4 sm:$0xff]  }
 0x3dd   :  { %1144 = vmatpush1.bf16.msra.mxu1 %v7527_v41  ;;  %v7596_v41 = vld [vmem:[#allocation13 + $0x1a0] ss:$16 sps:$4 sm:$0xff]  }
 0x3de   :  { %1145 = vmatprep.subr.bf16.mxu1 %v7535_v44  ;;  %v7599_v44 = vld [vmem:[#allocation13 + $0x1c8] ss:$16 sps:$4 sm:$0xff]  }
 0x3df   :  { %1125 = vmatpush1.bf16.msra.mxu0 %v7596_v41  ;;  %v7639_v41 = vld [vmem:[#allocation14 + $0xa0] ss:$16 sps:$4 sm:$0xff]  }
 0x3e0   :  { %1126 = vmatprep.subr.bf16.mxu0 %v7597_v42  ;;  %v7642_v42 = vld [vmem:[#allocation14 + $0xa8] ss:$16 sps:$4 sm:$0xff]  }
 0x3e1   :  { %1146 = vmatpush1.bf16.msra.mxu1 %v7533_v45  ;;  %v7602_v45 = vld [vmem:[#allocation13 + $0x1c0] ss:$16 sps:$4 sm:$0xff]  }
 0x3e2   :  { %1147 = vmatprep.subr.bf16.mxu1 %v7541_v48  ;;  %v7605_v48 = vld [vmem:[#allocation13 + $0x1e8] ss:$16 sps:$4 sm:$0xff]  }
 0x3e3   :  { %1127 = vmatpush1.bf16.msra.mxu0 %v7602_v45  ;;  %v7645_v45 = vld [vmem:[#allocation14 + $0xc0] ss:$16 sps:$4 sm:$0xff]  }
 0x3e4   :  { %1128 = vmatprep.subr.bf16.mxu0 %v7603_v46  ;;  %v7648_v46 = vld [vmem:[#allocation14 + $0xc8] ss:$16 sps:$4 sm:$0xff]  }
 0x3e5   :  { %1148 = vmatpush1.bf16.msra.mxu1 %v7539_v49  ;;  %v7608_v49 = vld [vmem:[#allocation13 + $0x1e0] ss:$16 sps:$4 sm:$0xff]  }
 0x3e6   :  { %1149 = vmatprep.subr.bf16.mxu1 %v7547_v52 }
 0x3e7   :  { %1129 = vmatpush1.bf16.msra.mxu0 %v7608_v49  ;;  %v7651_v49 = vld [vmem:[#allocation14 + $0xe0] ss:$16 sps:$4 sm:$0xff]  }
 0x3e9   :  { %1150 = vmatpush1.bf16.msra.mxu1 %v7545_v53 }
 0x3ea   :  { %1151 = vmatprep.subr.bf16.mxu1 %v7553_v56 }
 0x3ed   :  { %1152 = vmatpush1.bf16.msra.mxu1 %v7551_v57 }
 0x3ee   :  { %1153 = vmatprep.subr.bf16.mxu1 %v7559_v60 }
 0x3f1   :  { %1154 = vmatpush1.bf16.msra.mxu1 %v7557_v61 }
 0x3f2   :  { %1155 = vmatprep.subr.bf16.mxu1 %v7565_v18 }
 0x3f5   :  { %1156 = vmatpush1.bf16.msra.mxu1 %v7563_v19  ;;  %v7611_v19 = vld [vmem:[#allocation14 + $0x4] ss:$16 sps:$4 sm:$0xff]  }
 0x3f6   :  { %1157 = vmatprep.subr.bf16.mxu1 %v7571_v22  ;;  %v7617_v22 = vld [vmem:[#allocation14 + $0x24] ss:$16 sps:$4 sm:$0xff]   ;;  %2063 = vmatprep.subr.bf16.mxu0 %v7611_v19 }
 0x3f9   :  { %1158 = vmatpush1.bf16.msra.mxu1 %v7569_v23  ;;  %v7620_v23 = vld [vmem:[#allocation14 + $0x2c] ss:$16 sps:$4 sm:$0xff]  }
 0x3fa   :  { %1159 = vmatprep.subr.bf16.mxu1 %v7577_v26  ;;  %v7623_v26 = vld [vmem:[#allocation14 + $0x44] ss:$16 sps:$4 sm:$0xff]  }
 0x3fd   :  { %1160 = vmatpush1.bf16.msra.mxu1 %v7575_v27  ;;  %v7626_v27 = vld [vmem:[#allocation14 + $0x4c] ss:$16 sps:$4 sm:$0xff]  }
 0x3fe   :  { %1161 = vmatprep.subr.bf16.mxu1 %v7583_v32  ;;  %v7632_v32 = vld [vmem:[#allocation14 + $0x6c] ss:$16 sps:$4 sm:$0xff]  }
 0x401   :  { %1162 = vmatpush1.bf16.msra.mxu1 %v7581_v31  ;;  %v7629_v31 = vld [vmem:[#allocation14 + $0x64] ss:$16 sps:$4 sm:$0xff]  }
 0x402   :  { %1163 = vmatprep.subr.bf16.mxu1 %v7589_v35  ;;  %v7635_v35 = vld [vmem:[#allocation14 + $0x84] ss:$16 sps:$4 sm:$0xff]  }
 0x405   :  { %1164 = vmatpush1.bf16.msra.mxu1 %v7587_v36  ;;  %v7638_v36 = vld [vmem:[#allocation14 + $0x8c] ss:$16 sps:$4 sm:$0xff]  }
 0x406   :  { %1165 = vmatprep.subr.bf16.mxu1 %v7595_v39  ;;  %v7641_v39 = vld [vmem:[#allocation14 + $0xa4] ss:$16 sps:$4 sm:$0xff]  }
 0x409   :  { %1166 = vmatpush1.bf16.msra.mxu1 %v7593_v40  ;;  %v7644_v40 = vld [vmem:[#allocation14 + $0xac] ss:$16 sps:$4 sm:$0xff]  }
 0x40a   :  { %1167 = vmatprep.subr.bf16.mxu1 %v7601_v43  ;;  %v7647_v43 = vld [vmem:[#allocation14 + $0xc4] ss:$16 sps:$4 sm:$0xff]  }
 0x40d   :  { %1168 = vmatpush1.bf16.msra.mxu1 %v7599_v44  ;;  %v7650_v44 = vld [vmem:[#allocation14 + $0xcc] ss:$16 sps:$4 sm:$0xff]  }
 0x40e   :  { %1169 = vmatprep.subr.bf16.mxu1 %v7607_v47  ;;  %v7653_v47 = vld [vmem:[#allocation14 + $0xe4] ss:$16 sps:$4 sm:$0xff]  }
 0x411   :  { %1170 = vmatpush1.bf16.msra.mxu1 %v7605_v48  ;;  %v7656_v48 = vld [vmem:[#allocation14 + $0xec] ss:$16 sps:$4 sm:$0xff]  }
 0x412   :  { %2145 = vmatprep.subr.bf16.mxu1 %v7614_v21 }
 0x4a7   :  { %v630_v3 = vpop.f32.mrb[4].mxu1 }
 0x4a8   :  { %v8878_v4 = vadd.f32 %v630_v3, %v509_v1  ;;  %v632_v5 = vpop.f32.mrb[5].mxu1  ;;  %v678_v3 = vrot.slane %v673_v59, %v8855_v8 }
 0x4a9   :  { %v8880_v7 = vadd.f32 %v632_v5, %v513_v2  ;;  %v634_v11 = vpop.f32.mrb[6].mxu1  ;;  %v682_v5 = vrot.slane %v673_v59, %v8858_v9 }
 0x4aa   :  { %v635_v12 = vpop.f32.mrb[7].mxu1  ;;  %v642_v13 = vmul.f32 %v8878_v4, %v8878_v4 }
 0x4ab   :  { %v637_v14 = vadd.f32 %v8880_v7, %v8878_v4  ;;  %v643_v15 = vmul.f32 %v8880_v7, %v8880_v7 }
 0x4ad   :  { %638 = vadd.xlane.f32.xlu1 %v637_v14  ;;  %v644_v16 = vadd.f32 %v643_v15, %v642_v13 }
 0x4af   :  { %645 = vadd.xlane.f32.xlu0 %v644_v16 }
 0x53a   :  { %v639_v50 = vpop.xlane.xlu1 %638 }
 0x53b   :  { %v641_v51 = vmul.f32 0.00390625, %v639_v50  ;;  %v7654_v50 = vld [vmem:[#allocation14 + $0xe8] ss:$16 sps:$4 sm:$0xff]  }
 0x53c   :  { %v646_v52 = vpop.xlane.xlu0 %645 }
 0x53d   :  { %v647_v53 = vmul.f32 0.00390625, %v646_v52  ;;  %v648_v54 = vmul.f32 %v641_v51, %v641_v51  ;;  %v653_v60 = vsub.f32 %v8878_v4, %v641_v51  ;;  %v654_v61 = vsub.f32 %v8880_v7, %v641_v51  ;;  %v7609_v7 = vld [vmem:[#allocation14] ss:$16 sps:$4 sm:$0xff]   ;;  %v7659_v51 = vld [vmem:[#allocation14 + $0x104] ss:$16 sps:$4 sm:$0xff]  }
 0x53e   :  { %v7662_v52 = vld [vmem:[#allocation14 + $0x10c] ss:$16 sps:$4 sm:$0xff]  }
 0x53f   :  { %v649_v55 = vsub.f32 %v647_v53, %v648_v54  ;;  %v7657_v53 = vld [vmem:[#allocation14 + $0x100] ss:$16 sps:$4 sm:$0xff]   ;;  %v7660_v54 = vld [vmem:[#allocation14 + $0x108] ss:$16 sps:$4 sm:$0xff]  }
 0x541   :  { %v650_v56 = vmax.f32 %v649_v55, 0.0  ;;  %v756_v55 = vld [vmem:[#allocation6 + $0x41] ss:$8 sm:$0xf] }
 0x542   :  { %v769_v58 = vrot.slane %v756_v55, %v8861_v10  ;;  %v765_v59 = vrot.slane %v756_v55, %v8858_v9 }
 0x543   :  { %v651_v57 = vadd.f32 1e-05, %v650_v56  ;;  %v8895_v56 = vsub.s32 3, %v8852_v6 }
 0x545   :  { %8124 = vrsqrt.f32 %v651_v57  ;;  %v761_v57 = vrot.slane %v756_v55, %v8855_v8 }
 0x54f   :  { %v8125_v1 = vpop.eup %8124 }
 0x550   :  { %v656_v2 = vmul.f32 %v8125_v1, %v654_v61  ;;  %v655_v11 = vmul.f32 %v8125_v1, %v653_v60 }
 0x552   :  { %v671_v12 = vmul.f32 %v667_v63, %v656_v2  ;;  %v670_v13 = vmul.f32 %v663_v62, %v655_v11  ;;  %v773_v62 = vrot.slane %v756_v55, %v8895_v56  ;;  %v7710_v55 = vld [vmem:[#allocation14 + $0x20c] ss:$16 sps:$4 sm:$0xff]  }
 0x554   :  { %v686_v14 = vadd.f32 %v682_v5, %v671_v12  ;;  %v685_v15 = vadd.f32 %v678_v3, %v670_v13 }
 0x556   :  { %v688_v16 = vmax.f32 %v686_v14, 0.0  ;;  %v687_v17 = vmax.f32 %v685_v15, 0.0 }
 0x558   :  { %v754_v4 = vpack.c.bf16 %v688_v16, %v688_v16  ;;  %v753_v18 = vpack.c.bf16 %v687_v17, %v687_v17 }
 0x55a   :  { %1130 = vmatprep.mubr.bf16.mxu0 %v754_v4  ;;  %1171 = vmatprep.mubr.bf16.mxu1 %v754_v4 }
 0x55b   :  { %1131 = vmatmul.mubr.bf16.vlgmr.msra.gmra.mrb[0].mxu0 %v753_v18  ;;  %1172 = vmatmul.mubr.bf16.vlgmr.msra.gmra.mrb[8].mxu1 %v753_v18 }
 0x55c   :  { %2064 = vmatpush1.bf16.msra.mxu0 %v7609_v7  ;;  %2146 = vmatpush1.bf16.msra.mxu1 %v7612_v20 }
 0x55d   :  { %2065 = vmatprep.subr.bf16.mxu0 %v7617_v22  ;;  %2147 = vmatprep.subr.bf16.mxu1 %v7620_v23 }
 0x560   :  { %2066 = vmatpush1.bf16.msra.mxu0 %v7615_v24  ;;  %2148 = vmatpush1.bf16.msra.mxu1 %v7618_v25  ;;  %v2231_v24 = vld [vmem:[%s9348_s21] sm:$0xff] }
 0x561   :  { %2067 = vmatprep.subr.bf16.mxu0 %v7623_v26  ;;  %2149 = vmatprep.subr.bf16.mxu1 %v7626_v27  ;;  %v7665_v25 = vld [vmem:[#allocation14 + $0x124] ss:$16 sps:$4 sm:$0xff]   ;;  %v7668_v26 = vld [vmem:[#allocation14 + $0x12c] ss:$16 sps:$4 sm:$0xff]   ;;  %v7663_v27 = vld [vmem:[#allocation14 + $0x120] ss:$16 sps:$4 sm:$0xff]  }
 0x564   :  { %2068 = vmatpush1.bf16.msra.mxu0 %v7621_v29  ;;  %2150 = vmatpush1.bf16.msra.mxu1 %v7624_v30  ;;  %v7666_v29 = vld [vmem:[#allocation14 + $0x128] ss:$16 sps:$4 sm:$0xff]   ;;  %v7671_v30 = vld [vmem:[#allocation14 + $0x144] ss:$16 sps:$4 sm:$0xff]  }
 0x565   :  { %2069 = vmatprep.subr.bf16.mxu0 %v7629_v31  ;;  %2151 = vmatprep.subr.bf16.mxu1 %v7632_v32  ;;  %v7674_v31 = vld [vmem:[#allocation14 + $0x14c] ss:$16 sps:$4 sm:$0xff]   ;;  %v7669_v32 = vld [vmem:[#allocation14 + $0x140] ss:$16 sps:$4 sm:$0xff]  }
 0x568   :  { %2070 = vmatpush1.bf16.msra.mxu0 %v7627_v33  ;;  %2152 = vmatpush1.bf16.msra.mxu1 %v7630_v34  ;;  %v7672_v33 = vld [vmem:[#allocation14 + $0x148] ss:$16 sps:$4 sm:$0xff]   ;;  %v7677_v34 = vld [vmem:[#allocation14 + $0x164] ss:$16 sps:$4 sm:$0xff]  }
 0x569   :  { %2071 = vmatprep.subr.bf16.mxu0 %v7635_v35  ;;  %2153 = vmatprep.subr.bf16.mxu1 %v7638_v36  ;;  %v7680_v35 = vld [vmem:[#allocation14 + $0x16c] ss:$16 sps:$4 sm:$0xff]   ;;  %v7675_v36 = vld [vmem:[#allocation14 + $0x160] ss:$16 sps:$4 sm:$0xff]  }
 0x56c   :  { %2072 = vmatpush1.bf16.msra.mxu0 %v7633_v37  ;;  %2154 = vmatpush1.bf16.msra.mxu1 %v7636_v38  ;;  %v7678_v37 = vld [vmem:[#allocation14 + $0x168] ss:$16 sps:$4 sm:$0xff]   ;;  %v7681_v38 = vld [vmem:[#allocation14 + $0x180] ss:$16 sps:$4 sm:$0xff]  }
 0x56d   :  { %2073 = vmatprep.subr.bf16.mxu0 %v7641_v39  ;;  %2155 = vmatprep.subr.bf16.mxu1 %v7644_v40  ;;  %v7683_v39 = vld [vmem:[#allocation14 + $0x184] ss:$16 sps:$4 sm:$0xff]   ;;  %v7684_v40 = vld [vmem:[#allocation14 + $0x188] ss:$16 sps:$4 sm:$0xff]  }
 0x570   :  { %2074 = vmatpush1.bf16.msra.mxu0 %v7639_v41  ;;  %2156 = vmatpush1.bf16.msra.mxu1 %v7642_v42  ;;  %v7686_v41 = vld [vmem:[#allocation14 + $0x18c] ss:$16 sps:$4 sm:$0xff]   ;;  %v7689_v42 = vld [vmem:[#allocation14 + $0x1a4] ss:$16 sps:$4 sm:$0xff]  }
 0x571   :  { %2075 = vmatprep.subr.bf16.mxu0 %v7647_v43  ;;  %2157 = vmatprep.subr.bf16.mxu1 %v7650_v44  ;;  %v7692_v43 = vld [vmem:[#allocation14 + $0x1ac] ss:$16 sps:$4 sm:$0xff]   ;;  %v7687_v44 = vld [vmem:[#allocation14 + $0x1a0] ss:$16 sps:$4 sm:$0xff]  }
 0x574   :  { %2076 = vmatpush1.bf16.msra.mxu0 %v7645_v45  ;;  %2158 = vmatpush1.bf16.msra.mxu1 %v7648_v46  ;;  %v7690_v45 = vld [vmem:[#allocation14 + $0x1a8] ss:$16 sps:$4 sm:$0xff]   ;;  %v7695_v46 = vld [vmem:[#allocation14 + $0x1c4] ss:$16 sps:$4 sm:$0xff]  }
 0x575   :  { %2077 = vmatprep.subr.bf16.mxu0 %v7653_v47  ;;  %2159 = vmatprep.subr.bf16.mxu1 %v7656_v48  ;;  %v7698_v47 = vld [vmem:[#allocation14 + $0x1cc] ss:$16 sps:$4 sm:$0xff]   ;;  %v7693_v48 = vld [vmem:[#allocation14 + $0x1c0] ss:$16 sps:$4 sm:$0xff]  }
 0x578   :  { %2078 = vmatpush1.bf16.msra.mxu0 %v7651_v49  ;;  %2160 = vmatpush1.bf16.msra.mxu1 %v7654_v50  ;;  %v7696_v49 = vld [vmem:[#allocation14 + $0x1c8] ss:$16 sps:$4 sm:$0xff]   ;;  %v7701_v50 = vld [vmem:[#allocation14 + $0x1e4] ss:$16 sps:$4 sm:$0xff]  }
 0x579   :  { %2079 = vmatprep.subr.bf16.mxu0 %v7659_v51  ;;  %2161 = vmatprep.subr.bf16.mxu1 %v7662_v52  ;;  %v7704_v51 = vld [vmem:[#allocation14 + $0x1ec] ss:$16 sps:$4 sm:$0xff]   ;;  %v7699_v52 = vld [vmem:[#allocation14 + $0x1e0] ss:$16 sps:$4 sm:$0xff]  }
 0x57c   :  { %2080 = vmatpush1.bf16.msra.mxu0 %v7657_v53  ;;  %2162 = vmatpush1.bf16.msra.mxu1 %v7660_v54  ;;  %v7702_v53 = vld [vmem:[#allocation14 + $0x1e8] ss:$16 sps:$4 sm:$0xff]   ;;  %v7707_v54 = vld [vmem:[#allocation14 + $0x204] ss:$16 sps:$4 sm:$0xff]  }
 0x57d   :  { %2081 = vmatprep.subr.bf16.mxu0 %v7665_v25  ;;  %2163 = vmatprep.subr.bf16.mxu1 %v7668_v26 }
 0x580   :  { %2082 = vmatpush1.bf16.msra.mxu0 %v7663_v27  ;;  %2164 = vmatpush1.bf16.msra.mxu1 %v7666_v29 }
 0x581   :  { %2083 = vmatprep.subr.bf16.mxu0 %v7671_v30  ;;  %2165 = vmatprep.subr.bf16.mxu1 %v7674_v31 }
 0x584   :  { %2084 = vmatpush1.bf16.msra.mxu0 %v7669_v32  ;;  %2166 = vmatpush1.bf16.msra.mxu1 %v7672_v33 }
 0x585   :  { %2085 = vmatprep.subr.bf16.mxu0 %v7677_v34  ;;  %2167 = vmatprep.subr.bf16.mxu1 %v7680_v35 }
 0x588   :  { %2086 = vmatpush1.bf16.msra.mxu0 %v7675_v36  ;;  %2168 = vmatpush1.bf16.msra.mxu1 %v7678_v37 }
 0x589   :  { %2087 = vmatprep.subr.bf16.mxu0 %v7683_v39  ;;  %2169 = vmatprep.subr.bf16.mxu1 %v7686_v41 }
 0x58c   :  { %2088 = vmatpush1.bf16.msra.mxu0 %v7681_v38  ;;  %2170 = vmatpush1.bf16.msra.mxu1 %v7684_v40 }
 0x58d   :  { %2089 = vmatprep.subr.bf16.mxu0 %v7689_v42  ;;  %2171 = vmatprep.subr.bf16.mxu1 %v7692_v43 }
 0x590   :  { %2090 = vmatpush1.bf16.msra.mxu0 %v7687_v44  ;;  %2172 = vmatpush1.bf16.msra.mxu1 %v7690_v45 }
 0x591   :  { %2091 = vmatprep.subr.bf16.mxu0 %v7695_v46  ;;  %2173 = vmatprep.subr.bf16.mxu1 %v7698_v47 }
 0x594   :  { %2092 = vmatpush1.bf16.msra.mxu0 %v7693_v48  ;;  %2174 = vmatpush1.bf16.msra.mxu1 %v7696_v49  ;;  %v7705_v48 = vld [vmem:[#allocation14 + $0x200] ss:$16 sps:$4 sm:$0xff]   ;;  %v7708_v49 = vld [vmem:[#allocation14 + $0x208] ss:$16 sps:$4 sm:$0xff]  }
 0x595   :  { %2093 = vmatprep.subr.bf16.mxu0 %v7701_v50  ;;  %2175 = vmatprep.subr.bf16.mxu1 %v7704_v51  ;;  %v7713_v51 = vld [vmem:[#allocation14 + $0x224] ss:$16 sps:$4 sm:$0xff]  }
 0x598   :  { %2094 = vmatpush1.bf16.msra.mxu0 %v7699_v52  ;;  %2176 = vmatpush1.bf16.msra.mxu1 %v7702_v53  ;;  %v7716_v52 = vld [vmem:[#allocation14 + $0x22c] ss:$16 sps:$4 sm:$0xff]  }
 0x599   :  { %2104 = vmatprep.subr.bf16.mxu0 %v7707_v54  ;;  %2186 = vmatprep.subr.bf16.mxu1 %v7710_v55  ;;  %v7711_v54 = vld [vmem:[#allocation14 + $0x220] ss:$16 sps:$4 sm:$0xff]   ;;  %v7714_v55 = vld [vmem:[#allocation14 + $0x228] ss:$16 sps:$4 sm:$0xff]  }
 0x62e   :  { %v1132_v60 = vpop.f32.mrb[0].mxu0  ;;  %v1173_v61 = vpop.f32.mrb[8].mxu1 }
 0x62f   :  { %v8901_v63 = vadd.f32 %v1132_v60, %v761_v57  ;;  %v1134_v1 = vpop.f32.mrb[1].mxu0  ;;  %v1175_v2 = vpop.f32.mrb[9].mxu1  ;;  %v8903_v3 = vadd.f32 %v1173_v61, %v769_v58  ;;  %v2232_v57 = vld [vmem:[#allocation16] sm:$0x1] }
 0x630   :  { %v8905_v5 = vadd.f32 %v1134_v1, %v765_v59  ;;  %v1136_v11 = vpop.f32.mrb[2].mxu0  ;;  %v1177_v12 = vpop.f32.mrb[10].mxu1  ;;  %v8913_v4 = vadd.f32 %v1175_v2, %v773_v62  ;;  %v2233_v58 = vunpack.c.l.bf16 %v2232_v57  ;;  %v7719_v57 = vld [vmem:[#allocation14 + $0x244] ss:$16 sps:$4 sm:$0xff]  }
 0x631   :  { %v1187_v13 = vmul.f32 %v8901_v63, %v8901_v63  ;;  %v1137_v14 = vpop.f32.mrb[3].mxu0  ;;  %v1178_v15 = vpop.f32.mrb[11].mxu1  ;;  %v1189_v18 = vmul.f32 %v8903_v3, %v8903_v3  ;;  %v2244_v11 = vld [vmem:[#allocation6 + $0x47] ss:$0 sm:$0xff] }
 0x632   :  { %v1180_v16 = vadd.f32 %v8905_v5, %v8901_v63  ;;  %v1188_v17 = vmul.f32 %v8905_v5, %v8905_v5  ;;  %v1190_v21 = vmul.f32 %v8913_v4, %v8913_v4  ;;  %v2242_v61 = vrot.slane %v2233_v58, %v8855_v8  ;;  %v7722_v58 = vld [vmem:[#allocation14 + $0x24c] ss:$16 sps:$4 sm:$0xff]  }
 0x634   :  { %v1181_v7 = vadd.f32 %v1180_v16, %v8903_v3  ;;  %v1191_v19 = vadd.f32 %v1188_v17, %v1187_v13 }
 0x636   :  { %v1182_v20 = vadd.f32 %v1181_v7, %v8913_v4  ;;  %v1192_v22 = vadd.f32 %v1191_v19, %v1189_v18 }
 0x638   :  { %1183 = vadd.xlane.f32.xlu1 %v1182_v20  ;;  %v1193_v23 = vadd.f32 %v1192_v22, %v1190_v21  ;;  %v1211_v20 = vld [vmem:[#allocation6 + $0x42] ss:$8 sm:$0xf]  ;;  %v1238_v21 = vld [vmem:[#allocation6 + $0x43] ss:$8 sm:$0xf] }
 0x639   :  { %v1220_v22 = vrot.slane %v1211_v20, %v8858_v9  ;;  %v1224_v25 = vrot.slane %v1211_v20, %v8861_v10  ;;  %v1247_v32 = vrot.slane %v1238_v21, %v8858_v9  ;;  %v1243_v33 = vrot.slane %v1238_v21, %v8855_v8 }
 0x63a   :  { %1194 = vadd.xlane.f32.xlu0 %v1193_v23  ;;  %v1216_v23 = vrot.slane %v1211_v20, %v8855_v8  ;;  %v1255_v34 = vrot.slane %v1238_v21, %v8895_v56  ;;  %v1251_v35 = vrot.slane %v1238_v21, %v8861_v10  ;;  %v7741_v21 = vld [vmem:[#allocation14 + $0x2c0] ss:$16 sps:$4 sm:$0xff]  }
 0x649   :  { %2236 = vperm.xlu1 %7483, %v2231_v24   ;;  %v1228_v24 = vrot.slane %v1211_v20, %v8895_v56  ;;  %v7746_v20 = vld [vmem:[#allocation14 + $0x2cc] ss:$16 sps:$4 sm:$0xff]  }
 0x6c5   :  { %v1184_v59 = vpop.xlane.xlu1 %1183 }
 0x6c6   :  { %v1186_v60 = vmul.f32 0.001953125, %v1184_v59  ;;  %v7717_v59 = vld [vmem:[#allocation14 + $0x240] ss:$16 sps:$4 sm:$0xff]  }
 0x6c7   :  { %v1195_v62 = vpop.xlane.xlu0 %1194 }
 0x6c8   :  { %v1196_v1 = vmul.f32 0.001953125, %v1195_v62  ;;  %v1197_v2 = vmul.f32 %v1186_v60, %v1186_v60  ;;  %v1202_v26 = vsub.f32 %v8901_v63, %v1186_v60  ;;  %v1204_v27 = vsub.f32 %v8903_v3, %v1186_v60  ;;  %v7728_v62 = vld [vmem:[#allocation14 + $0x26c] ss:$16 sps:$4 sm:$0xff]  }
 0x6c9   :  { %v2237_v12 = vpop.permute.xlu1 %2236  ;;  %v1203_v29 = vsub.f32 %v8905_v5, %v1186_v60  ;;  %v1205_v30 = vsub.f32 %v8913_v4, %v1186_v60  ;;  %v7720_v60 = vld [vmem:[#allocation14 + $0x248] ss:$16 sps:$4 sm:$0xff]  }
 0x6ca   :  { %v1198_v13 = vsub.f32 %v1196_v1, %v1197_v2  ;;  %v2243_v14 = vmul.f32 %v2242_v61, %v2237_v12  ;;  %v7725_v61 = vld [vmem:[#allocation14 + $0x264] ss:$16 sps:$4 sm:$0xff]   ;;  %v7723_v1 = vld [vmem:[#allocation14 + $0x260] ss:$16 sps:$4 sm:$0xff]   ;;  %v7726_v2 = vld [vmem:[#allocation14 + $0x268] ss:$16 sps:$4 sm:$0xff]  }
 0x6cb   :  { %v7734_v12 = vld [vmem:[#allocation14 + $0x28c] ss:$16 sps:$4 sm:$0xff]  }
 0x6cc   :  { %v1199_v15 = vmax.f32 %v1198_v13, 0.0  ;;  %v8925_v16 = vadd.f32 %v2244_v11, %v2243_v14  ;;  %v7731_v11 = vld [vmem:[#allocation14 + $0x284] ss:$16 sps:$4 sm:$0xff]   ;;  %v7729_v13 = vld [vmem:[#allocation14 + $0x280] ss:$16 sps:$4 sm:$0xff]  }
 0x6cd   :  { %v7732_v14 = vld [vmem:[#allocation14 + $0x288] ss:$16 sps:$4 sm:$0xff]  }
 0x6ce   :  { %v1200_v17 = vadd.f32 1e-05, %v1199_v15  ;;  %v2247_v18 = vsel %vm2246_vm2, %v8925_v16, 0.0  ;;  %v2252_v7 = vmul.f32 %v8925_v16, %v8925_v16  ;;  %v7737_v15 = vld [vmem:[#allocation14 + $0x2a4] ss:$16 sps:$4 sm:$0xff]  }
 0x6cf   :  { %2248 = vadd.xlane.f32.xlu0 %v2247_v18  ;;  %v7735_v18 = vld [vmem:[#allocation14 + $0x2a0] ss:$16 sps:$4 sm:$0xff]  }
 0x6d0   :  { %8126 = vrsqrt.f32 %v1200_v17  ;;  %v2253_v19 = vsel %vm2246_vm2, %v2252_v7, 0.0  ;;  %v7740_v17 = vld [vmem:[#allocation14 + $0x2ac] ss:$16 sps:$4 sm:$0xff]   ;;  %v7738_v7 = vld [vmem:[#allocation14 + $0x2a8] ss:$16 sps:$4 sm:$0xff]  }
 0x6d3   :  { %2254 = vadd.xlane.f32.xlu0 %v2253_v19  ;;  %v7743_v19 = vld [vmem:[#allocation14 + $0x2c4] ss:$16 sps:$4 sm:$0xff]  }
 0x6da   :  { %v8127_v31 = vpop.eup %8126 }
 0x6db   :  { %v1207_v36 = vmul.f32 %v8127_v31, %v1203_v29  ;;  %v1206_v37 = vmul.f32 %v8127_v31, %v1202_v26  ;;  %v1209_v38 = vmul.f32 %v8127_v31, %v1205_v30  ;;  %v1208_v39 = vmul.f32 %v8127_v31, %v1204_v27  ;;  %v7750_v26 = vld [vmem:[#allocation14 + $0x2e8] ss:$16 sps:$4 sm:$0xff]   ;;  %v7755_v27 = vld [vmem:[#allocation14 + $0x304] ss:$16 sps:$4 sm:$0xff]   ;;  %v7758_v29 = vld [vmem:[#allocation14 + $0x30c] ss:$16 sps:$4 sm:$0xff]  }
 0x6dc   :  { %v7753_v30 = vld [vmem:[#allocation14 + $0x300] ss:$16 sps:$4 sm:$0xff]   ;;  %v7756_v31 = vld [vmem:[#allocation14 + $0x308] ss:$16 sps:$4 sm:$0xff]  }
 0x6dd   :  { %v1234_v63 = vmul.f32 %v1220_v22, %v1207_v36  ;;  %v1233_v40 = vmul.f32 %v1216_v23, %v1206_v37  ;;  %v1236_v3 = vmul.f32 %v1228_v24, %v1209_v38  ;;  %v1235_v41 = vmul.f32 %v1224_v25, %v1208_v39  ;;  %v7744_v22 = vld [vmem:[#allocation14 + $0x2c8] ss:$16 sps:$4 sm:$0xff]   ;;  %v7749_v23 = vld [vmem:[#allocation14 + $0x2e4] ss:$16 sps:$4 sm:$0xff]   ;;  %v7752_v24 = vld [vmem:[#allocation14 + $0x2ec] ss:$16 sps:$4 sm:$0xff]  }
 0x6de   :  { %v7747_v25 = vld [vmem:[#allocation14 + $0x2e0] ss:$16 sps:$4 sm:$0xff]   ;;  %v7767_v36 = vld [vmem:[#allocation14 + $0x344] ss:$16 sps:$4 sm:$0xff]   ;;  %v7770_v37 = vld [vmem:[#allocation14 + $0x34c] ss:$16 sps:$4 sm:$0xff]  }
 0x6df   :  { %v1261_v5 = vadd.f32 %v1247_v32, %v1234_v63  ;;  %v1260_v42 = vadd.f32 %v1243_v33, %v1233_v40  ;;  %v1263_v4 = vadd.f32 %v1255_v34, %v1236_v3  ;;  %v8944_v43 = vadd.f32 %v1251_v35, %v1235_v41  ;;  %v7761_v32 = vld [vmem:[#allocation14 + $0x324] ss:$16 sps:$4 sm:$0xff]   ;;  %v7764_v33 = vld [vmem:[#allocation14 + $0x32c] ss:$16 sps:$4 sm:$0xff]   ;;  %v7759_v34 = vld [vmem:[#allocation14 + $0x320] ss:$16 sps:$4 sm:$0xff]  }
 0x6e0   :  { %v7762_v35 = vld [vmem:[#allocation14 + $0x328] ss:$16 sps:$4 sm:$0xff]   ;;  %v7765_v38 = vld [vmem:[#allocation14 + $0x340] ss:$16 sps:$4 sm:$0xff]   ;;  %v7773_v63 = vld [vmem:[#allocation14 + $0x364] ss:$16 sps:$4 sm:$0xff]  }
 0x6e1   :  { %v1265_v44 = vmax.f32 %v1261_v5, 0.0  ;;  %v1264_v45 = vmax.f32 %v1260_v42, 0.0  ;;  %v1267_v46 = vmax.f32 %v1263_v4, 0.0  ;;  %v7768_v39 = vld [vmem:[#allocation14 + $0x348] ss:$16 sps:$4 sm:$0xff]  }
 0x6e2   :  { %v7776_v40 = vld [vmem:[#allocation14 + $0x36c] ss:$16 sps:$4 sm:$0xff]   ;;  %v7771_v3 = vld [vmem:[#allocation14 + $0x360] ss:$16 sps:$4 sm:$0xff]   ;;  %v7774_v41 = vld [vmem:[#allocation14 + $0x368] ss:$16 sps:$4 sm:$0xff]  }
 0x6e3   :  { %v1397_v47 = vpack.c.bf16 %v1265_v44, %v1265_v44  ;;  %v1396_v50 = vpack.c.bf16 %v1264_v45, %v1264_v45  ;;  %v1399_v53 = vpack.c.bf16 %v1267_v46, %v1267_v46  ;;  %v7779_v5 = vld [vmem:[#allocation14 + $0x384] ss:$16 sps:$4 sm:$0xff]   ;;  %v7782_v42 = vld [vmem:[#allocation14 + $0x38c] ss:$16 sps:$4 sm:$0xff]   ;;  %v7777_v4 = vld [vmem:[#allocation14 + $0x380] ss:$16 sps:$4 sm:$0xff]  }
 0x6e4   :  { %v7780_v44 = vld [vmem:[#allocation14 + $0x388] ss:$16 sps:$4 sm:$0xff]   ;;  %v7785_v45 = vld [vmem:[#allocation14 + $0x3a4] ss:$16 sps:$4 sm:$0xff]   ;;  %v7788_v46 = vld [vmem:[#allocation14 + $0x3ac] ss:$16 sps:$4 sm:$0xff]  }
 0x6e5   :  { %2095 = vmatprep.mubr.bf16.mxu0 %v1397_v47  ;;  %2177 = vmatprep.mubr.bf16.mxu1 %v1397_v47  ;;  %v7783_v47 = vld [vmem:[#allocation14 + $0x3a0] ss:$16 sps:$4 sm:$0xff]  }
 0x6e6   :  { %2096 = vmatmul.mubr.bf16.vlgmr.msra.gmra.mrb[4].mxu0 %v1396_v50  ;;  %2178 = vmatmul.mubr.bf16.vlgmr.msra.gmra.mrb[12].mxu1 %v1396_v50  ;;  %v7794_v50 = vld [vmem:[#allocation14 + $0x3cc] ss:$16 sps:$4 sm:$0xff]  }
 0x6e7   :  { %2105 = vmatpush1.bf16.msra.mxu0 %v7705_v48  ;;  %2187 = vmatpush1.bf16.msra.mxu1 %v7708_v49  ;;  %v7786_v48 = vld [vmem:[#allocation14 + $0x3a8] ss:$16 sps:$4 sm:$0xff]   ;;  %v7791_v49 = vld [vmem:[#allocation14 + $0x3c4] ss:$16 sps:$4 sm:$0xff]  }
 0x6e8   :  { %2136 = vmatprep.mubr.bf16.mxu0 %v1399_v53  ;;  %2218 = vmatprep.mubr.bf16.mxu1 %v1399_v53  ;;  %v7797_v53 = vld [vmem:[#allocation14 + $0x3e4] ss:$16 sps:$4 sm:$0xff]  }
 0x6e9   :  { %2106 = vmatprep.subr.bf16.mxu0 %v7713_v51  ;;  %2188 = vmatprep.subr.bf16.mxu1 %v7716_v52  ;;  %v7789_v51 = vld [vmem:[#allocation14 + $0x3c0] ss:$16 sps:$4 sm:$0xff]   ;;  %v7792_v52 = vld [vmem:[#allocation14 + $0x3c8] ss:$16 sps:$4 sm:$0xff]  }
 0x6eb   :  { %2107 = vmatpush1.bf16.msra.mxu0 %v7711_v54  ;;  %2189 = vmatpush1.bf16.msra.mxu1 %v7714_v55  ;;  %v7800_v54 = vld [vmem:[#allocation14 + $0x3ec] ss:$16 sps:$4 sm:$0xff]   ;;  %v7795_v55 = vld [vmem:[#allocation14 + $0x3e0] ss:$16 sps:$4 sm:$0xff]  }
 0x6ec   :  { %2108 = vmatprep.subr.bf16.mxu0 %v7719_v57  ;;  %2190 = vmatprep.subr.bf16.mxu1 %v7722_v58  ;;  %v7798_v57 = vld [vmem:[#allocation14 + $0x3e8] ss:$16 sps:$4 sm:$0xff]   ;;  %v1266_v58 = vmax.f32 %v8944_v43, 0.0 }
 0x6ef   :  { %2109 = vmatpush1.bf16.msra.mxu0 %v7717_v59  ;;  %2191 = vmatpush1.bf16.msra.mxu1 %v7720_v60  ;;  %v7801_v59 = vld [vmem:[#allocation17] sm:$0xff]   ;;  %v1398_v60 = vpack.c.bf16 %v1266_v58, %v1266_v58 }
 0x6f0   :  { %2110 = vmatprep.subr.bf16.mxu0 %v7725_v61  ;;  %2192 = vmatprep.subr.bf16.mxu1 %v7728_v62 }
 0x6f3   :  { %2111 = vmatpush1.bf16.msra.mxu0 %v7723_v1  ;;  %2193 = vmatpush1.bf16.msra.mxu1 %v7726_v2 }
 0x6f4   :  { %2112 = vmatprep.subr.bf16.mxu0 %v7731_v11  ;;  %2194 = vmatprep.subr.bf16.mxu1 %v7734_v12 }
 0x6f7   :  { %2113 = vmatpush1.bf16.msra.mxu0 %v7729_v13  ;;  %2195 = vmatpush1.bf16.msra.mxu1 %v7732_v14 }
 0x6f8   :  { %2114 = vmatprep.subr.bf16.mxu0 %v7737_v15  ;;  %2196 = vmatprep.subr.bf16.mxu1 %v7740_v17  ;;  %v2264_v17 = vld [vmem:[#allocation6 + $0x80] ss:$0 sm:$0xff] }
 0x6fb   :  { %2115 = vmatpush1.bf16.msra.mxu0 %v7735_v18  ;;  %2197 = vmatpush1.bf16.msra.mxu1 %v7738_v7  ;;  %v2266_v7 = vld [vmem:[#allocation6 + $0x81] ss:$0 sm:$0xff] }
 0x6fc   :  { %2116 = vmatprep.subr.bf16.mxu0 %v7743_v19  ;;  %2198 = vmatprep.subr.bf16.mxu1 %v7746_v20 }
 0x6ff   :  { %2117 = vmatpush1.bf16.msra.mxu0 %v7741_v21  ;;  %2199 = vmatpush1.bf16.msra.mxu1 %v7744_v22 }
 0x700   :  { %2118 = vmatprep.subr.bf16.mxu0 %v7749_v23  ;;  %2200 = vmatprep.subr.bf16.mxu1 %v7752_v24 }
 0x703   :  { %2119 = vmatpush1.bf16.msra.mxu0 %v7747_v25  ;;  %2201 = vmatpush1.bf16.msra.mxu1 %v7750_v26 }
 0x704   :  { %2120 = vmatprep.subr.bf16.mxu0 %v7755_v27  ;;  %2202 = vmatprep.subr.bf16.mxu1 %v7758_v29 }
 0x707   :  { %2121 = vmatpush1.bf16.msra.mxu0 %v7753_v30  ;;  %2203 = vmatpush1.bf16.msra.mxu1 %v7756_v31 }
 0x708   :  { %2122 = vmatprep.subr.bf16.mxu0 %v7761_v32  ;;  %2204 = vmatprep.subr.bf16.mxu1 %v7764_v33 }
 0x70b   :  { %2123 = vmatpush1.bf16.msra.mxu0 %v7759_v34  ;;  %2205 = vmatpush1.bf16.msra.mxu1 %v7762_v35 }
 0x70c   :  { %2124 = vmatprep.subr.bf16.mxu0 %v7767_v36  ;;  %2206 = vmatprep.subr.bf16.mxu1 %v7770_v37 }
 0x70f   :  { %2125 = vmatpush1.bf16.msra.mxu0 %v7765_v38  ;;  %2207 = vmatpush1.bf16.msra.mxu1 %v7768_v39 }
 0x710   :  { %2126 = vmatprep.subr.bf16.mxu0 %v7773_v63  ;;  %2208 = vmatprep.subr.bf16.mxu1 %v7776_v40 }
 0x713   :  { %2127 = vmatpush1.bf16.msra.mxu0 %v7771_v3  ;;  %2209 = vmatpush1.bf16.msra.mxu1 %v7774_v41  ;;  %v2272_v41 = vld [vmem:[#allocation6 + $0x82] ss:$0 sm:$0xff] }
 0x714   :  { %2128 = vmatprep.subr.bf16.mxu0 %v7779_v5  ;;  %2210 = vmatprep.subr.bf16.mxu1 %v7782_v42 }
 0x717   :  { %2129 = vmatpush1.bf16.msra.mxu0 %v7777_v4  ;;  %2211 = vmatpush1.bf16.msra.mxu1 %v7780_v44 }
 0x718   :  { %2130 = vmatprep.subr.bf16.mxu0 %v7785_v45  ;;  %2212 = vmatprep.subr.bf16.mxu1 %v7788_v46 }
 0x71b   :  { %2131 = vmatpush1.bf16.msra.mxu0 %v7783_v47  ;;  %2213 = vmatpush1.bf16.msra.mxu1 %v7786_v48 }
 0x71c   :  { %2132 = vmatprep.subr.bf16.mxu0 %v7791_v49  ;;  %2214 = vmatprep.subr.bf16.mxu1 %v7794_v50  ;;  %v7802_v49 = vld [vmem:[#allocation19] sm:$0xff]   ;;  %v7803_v50 = vld [vmem:[#allocation19 + $0x8] sm:$0xff]  }
 0x71f   :  { %2133 = vmatpush1.bf16.msra.mxu0 %v7789_v51  ;;  %2215 = vmatpush1.bf16.msra.mxu1 %v7792_v52 }
 0x720   :  { %2134 = vmatprep.subr.bf16.mxu0 %v7797_v53  ;;  %2216 = vmatprep.subr.bf16.mxu1 %v7800_v54 }
 0x723   :  { %2135 = vmatpush1.bf16.msra.mxu0 %v7795_v55  ;;  %2217 = vmatpush1.bf16.msra.mxu1 %v7798_v57 }
 0x724   :  { %7328 = vmatprep.subr.bf16.mxu0 %v8494_v28 }
 0x726   :  { %2137 = vmatmul.mubr.bf16.vlgmr.msra.gmra.mrb[4].mxu0 %v1398_v60  ;;  %2219 = vmatmul.mubr.bf16.vlgmr.msra.gmra.mrb[12].mxu1 %v1398_v60 }
 0x727   :  { %7329 = vmatpush3.bf16.msra.mxu0 %v7801_v59  ;;  %7330 = vmatprep.mubr.msk.bf16.mxu0 %vm8495_vm1, %v8494_v28 }
 0x728   :  { %7334 = vmatprep.subr.bf16.mxu0 %v8494_v28  ;;  %2665 = vmatprep.mubr.bf16.mxu1 %v8480_v0  ;;  %v1401_v0 = vld [vmem:[#allocation6 + $0x44] ss:$8 sm:$0xf] }
 0x729   :  { %v1406_v23 = vrot.slane %v1401_v0, %v8855_v8  ;;  %v1414_v24 = vrot.slane %v1401_v0, %v8861_v10  ;;  %v1418_v25 = vrot.slane %v1401_v0, %v8895_v56 }
 0x75c   :  { %v2249_v61 = vpop.xlane.xlu0 %2248 }
 0x75d   :  { %v2251_v62 = vmul.f32 0.0625, %v2249_v61 }
 0x75f   :  { %v2257_v43 = vmul.f32 %v2251_v62, %v2251_v62  ;;  %v2262_v14 = vsub.f32 %v8925_v16, %v2251_v62  ;;  %v1410_v16 = vrot.slane %v1401_v0, %v8858_v9  ;;  %v2340_v62 = vld [vmem:[#allocation6 + $0x83] ss:$0 sm:$0xff] }
 0x760   :  { %v2255_v1 = vpop.xlane.xlu0 %2254  ;;  %v7804_v0 = vld [vmem:[#allocation20] sm:$0xff]  }
 0x761   :  { %v2256_v2 = vmul.f32 0.0625, %v2255_v1 }
 0x763   :  { %v2258_v11 = vsub.f32 %v2256_v2, %v2257_v43  ;;  %v2342_v43 = vld [vmem:[#allocation6 + $0x84] ss:$0 sm:$0xff] }
 0x765   :  { %v2259_v12 = vmax.f32 %v2258_v11, 0.0 }
 0x767   :  { %v2260_v13 = vadd.f32 1e-05, %v2259_v12 }
 0x769   :  { %8128 = vrsqrt.f32 %v2260_v13 }
 0x773   :  { %v8129_v15 = vpop.eup %8128 }
 0x774   :  { %v2263_v18 = vmul.f32 %v8129_v15, %v2262_v14  ;;  %v2350_v14 = vld [vmem:[#allocation6 + $0x85] ss:$0 sm:$0xff] }
 0x776   :  { %v2265_v19 = vmul.f32 %v2264_v17, %v2263_v18 }
 0x778   :  { %v2267_v20 = vadd.f32 %v2266_v7, %v2265_v19 }
 0x77a   :  { %v2268_v21 = vmax.f32 %v2267_v20, 0.0 }
 0x77c   :  { %v2271_v22 = vpack.c.bf16 %v2268_v21, %v2268_v21 }
 0x77e   :  { %7331 = vmatmul.mubr.msk.bf16.vlgmr.msra.gmra.mrb[8].mxu0 %vm2246_vm2, %v2271_v22 }
 0x77f   :  { %7338 = vmatprep.mubr.msk.bf16.mxu0 %vm8495_vm1, %v8494_v28  ;;  %7335 = vmatpush3.bf16.msra.mxu0 %v7802_v49 }
 0x780   :  { %7336 = vmatprep.subr.bf16.mxu0 %v8494_v28 }
 0x783   :  { %7337 = vmatpush3.bf16.msra.mxu0 %v7803_v50 }
 0x784   :  { %7342 = vmatprep.subr.bf16.mxu0 %v8494_v28 }
 0x7f9   :  { %v2138_v26 = vpop.f32.mrb[4].mxu0  ;;  %v2220_v27 = vpop.f32.mrb[12].mxu1 }
 0x7fa   :  { %v8960_v29 = vadd.f32 %v2138_v26, %v1406_v23  ;;  %v8962_v30 = vadd.f32 %v2220_v27, %v1414_v24  ;;  %v2140_v31 = vpop.f32.mrb[5].mxu0  ;;  %v2222_v32 = vpop.f32.mrb[13].mxu1  ;;  %v7805_v23 = vld [vmem:[#allocation20 + $0x8] sm:$0xff]   ;;  %v7806_v24 = vld [vmem:[#allocation20 + $0x10] sm:$0xff]  }
 0x7fb   :  { %v8964_v33 = vadd.f32 %v2140_v31, %v1410_v16  ;;  %v8966_v34 = vadd.f32 %v2222_v32, %v1418_v25  ;;  %v2142_v35 = vpop.f32.mrb[6].mxu0  ;;  %v2224_v36 = vpop.f32.mrb[14].mxu1  ;;  %v7807_v16 = vld [vmem:[#allocation20 + $0x18] sm:$0xff]  }
 0x7fc   :  { %v2227_v37 = vmax.f32 %v8960_v29, 0.0  ;;  %v2229_v38 = vmax.f32 %v8962_v30, 0.0  ;;  %v2143_v39 = vpop.f32.mrb[7].mxu0  ;;  %v2225_v63 = vpop.f32.mrb[15].mxu1 }
 0x7fd   :  { %v2228_v40 = vmax.f32 %v8964_v33, 0.0  ;;  %v2230_v3 = vmax.f32 %v8966_v34, 0.0 }
 0x851   :  { %v2316_v5 = vpop.f32.mrb[8].mxu0 }
 0x852   :  { %v2317_v42 = vadd.f32 %v2316_v5, %v2272_v41  ;;  %v7332_v4 = vpop.f32.mrb[9].mxu0  ;;  %v2422_v5 = vld [vmem:[#allocation6 + $0x86] ss:$0 sm:$0xff] }
 0x853   :  { %v2319_v44 = vpop.f32.mrb[10].mxu0  ;;  %v2424_v4 = vld [vmem:[#allocation6 + $0x87] ss:$0 sm:$0xff] }
 0x854   :  { %v7333_v45 = vpop.f32.mrb[11].mxu0  ;;  %v2323_v46 = vsel %vm2322_vm3, %v2317_v42, 0.0  ;;  %v2328_v47 = vmul.f32 %v2317_v42, %v2317_v42 }
 0x855   :  { %2324 = vadd.xlane.f32.xlu0 %v2323_v46 }
 0x856   :  { %v2329_v48 = vsel %vm2322_vm3, %v2328_v47, 0.0 }
 0x859   :  { %2330 = vadd.xlane.f32.xlu0 %v2329_v48  ;;  %v2436_v48 = vld [vmem:[#allocation6 + $0xc0] ss:$0 sm:$0xff] }
 0x8e2   :  { %v2325_v51 = vpop.xlane.xlu0 %2324 }
 0x8e3   :  { %v2327_v52 = vmul.f32 0.03125, %v2325_v51 }
 0x8e5   :  { %v2333_v54 = vmul.f32 %v2327_v52, %v2327_v52  ;;  %v2338_v60 = vsub.f32 %v2317_v42, %v2327_v52 }
 0x8e6   :  { %v2331_v53 = vpop.xlane.xlu0 %2330 }
 0x8e7   :  { %v2332_v55 = vmul.f32 0.03125, %v2331_v53 }
 0x8e9   :  { %v2334_v57 = vsub.f32 %v2332_v55, %v2333_v54  ;;  %v7810_v55 = vld [vmem:[#allocation22 + $0x4] ss:$8 sps:$4 sm:$0xff]  }
 0x8ea   :  { %2633 = vmatprep.subr.bf16.mxu1 %v7810_v55  ;;  %v7861_v55 = vld [vmem:[#allocation23 + $0x8c] ss:$16 sps:$4 sm:$0xff]  }
 0x8eb   :  { %v2335_v58 = vmax.f32 %v2334_v57, 0.0  ;;  %v7808_v57 = vld [vmem:[#allocation22] ss:$8 sps:$4 sm:$0xff]  }
 0x8ec   :  { %2634 = vmatpush1.bf16.msra.mxu1 %v7808_v57  ;;  %v7856_v57 = vld [vmem:[#allocation23 + $0x80] ss:$16 sps:$4 sm:$0xff]  }
 0x8ed   :  { %v2336_v59 = vadd.f32 1e-05, %v2335_v58  ;;  %v7813_v58 = vld [vmem:[#allocation22 + $0x14] ss:$8 sps:$4 sm:$0xff]  }
 0x8ee   :  { %2635 = vmatprep.subr.bf16.mxu1 %v7813_v58  ;;  %v7859_v58 = vld [vmem:[#allocation23 + $0x88] ss:$16 sps:$4 sm:$0xff]  }
 0x8ef   :  { %8130 = vrsqrt.f32 %v2336_v59  ;;  %v7811_v59 = vld [vmem:[#allocation22 + $0x10] ss:$8 sps:$4 sm:$0xff]  }
 0x8f0   :  { %2636 = vmatpush1.bf16.msra.mxu1 %v7811_v59  ;;  %v7864_v59 = vld [vmem:[#allocation23 + $0xa4] ss:$16 sps:$4 sm:$0xff]  }
 0x8f9   :  { %v8131_v61 = vpop.eup %8130 }
 0x8fa   :  { %v2339_v1 = vmul.f32 %v8131_v61, %v2338_v60  ;;  %v7816_v60 = vld [vmem:[#allocation22 + $0x24] ss:$8 sps:$4 sm:$0xff]   ;;  %v7814_v61 = vld [vmem:[#allocation22 + $0x20] ss:$8 sps:$4 sm:$0xff]  }
 0x8fb   :  { %2637 = vmatprep.subr.bf16.mxu1 %v7816_v60  ;;  %v7867_v60 = vld [vmem:[#allocation23 + $0xac] ss:$16 sps:$4 sm:$0xff]  }
 0x8fc   :  { %v2341_v2 = vmul.f32 %v2340_v62, %v2339_v1  ;;  %2638 = vmatpush1.bf16.msra.mxu1 %v7814_v61  ;;  %v7817_v62 = vld [vmem:[#allocation22 + $0x30] ss:$8 sps:$4 sm:$0xff]   ;;  %v7819_v1 = vld [vmem:[#allocation22 + $0x34] ss:$8 sps:$4 sm:$0xff]  }
 0x8fd   :  { %2639 = vmatprep.subr.bf16.mxu1 %v7819_v1  ;;  %v7862_v61 = vld [vmem:[#allocation23 + $0xa0] ss:$16 sps:$4 sm:$0xff]   ;;  %v7870_v1 = vld [vmem:[#allocation23 + $0xc4] ss:$16 sps:$4 sm:$0xff]  }
 0x8fe   :  { %v2343_v11 = vadd.f32 %v2342_v43, %v2341_v2  ;;  %v7822_v43 = vld [vmem:[#allocation22 + $0x44] ss:$8 sps:$4 sm:$0xff]   ;;  %v7820_v2 = vld [vmem:[#allocation22 + $0x40] ss:$8 sps:$4 sm:$0xff]  }
 0x900   :  { %v2344_v12 = vmax.f32 %v2343_v11, 0.0  ;;  %2640 = vmatpush1.bf16.msra.mxu1 %v7817_v62  ;;  %v7825_v11 = vld [vmem:[#allocation22 + $0x54] ss:$8 sps:$4 sm:$0xff]   ;;  %v7865_v62 = vld [vmem:[#allocation23 + $0xa8] ss:$16 sps:$4 sm:$0xff]  }
 0x901   :  { %2641 = vmatprep.subr.bf16.mxu1 %v7822_v43  ;;  %v7873_v43 = vld [vmem:[#allocation23 + $0xcc] ss:$16 sps:$4 sm:$0xff]  }
 0x902   :  { %v2349_v13 = vpack.c.bf16 %v2344_v12, %v2344_v12  ;;  %v7823_v12 = vld [vmem:[#allocation22 + $0x50] ss:$8 sps:$4 sm:$0xff]  }
 0x904   :  { %7339 = vmatmul.mubr.msk.bf16.vlgmr.msra.gmra.mrb[12].mxu0 %vm2322_vm3, %v2349_v13  ;;  %2642 = vmatpush1.bf16.msra.mxu1 %v7820_v2  ;;  %v7828_v13 = vld [vmem:[#allocation22 + $0x64] ss:$8 sps:$4 sm:$0xff]   ;;  %v7868_v2 = vld [vmem:[#allocation23 + $0xc0] ss:$16 sps:$4 sm:$0xff]  }
 0x905   :  { %7350 = vmatprep.mubr.msk.bf16.mxu0 %vm8495_vm1, %v8494_v28  ;;  %7343 = vmatpush3.bf16.msra.mxu0 %v7804_v0 }
 0x906   :  { %7344 = vmatprep.subr.bf16.mxu0 %v8494_v28  ;;  %2643 = vmatprep.subr.bf16.mxu1 %v7825_v11  ;;  %v7871_v11 = vld [vmem:[#allocation23 + $0xc8] ss:$16 sps:$4 sm:$0xff]  }
 0x908   :  { %2644 = vmatpush1.bf16.msra.mxu1 %v7823_v12  ;;  %v7876_v12 = vld [vmem:[#allocation23 + $0xe4] ss:$16 sps:$4 sm:$0xff]  }
 0x909   :  { %7345 = vmatpush3.bf16.msra.mxu0 %v7805_v23  ;;  %2645 = vmatprep.subr.bf16.mxu1 %v7828_v13  ;;  %v7879_v13 = vld [vmem:[#allocation23 + $0xec] ss:$16 sps:$4 sm:$0xff]  }
 0x90a   :  { %7346 = vmatprep.subr.bf16.mxu0 %v8494_v28 }
 0x90d   :  { %7347 = vmatpush3.bf16.msra.mxu0 %v7806_v24 }
 0x90e   :  { %7348 = vmatprep.subr.bf16.mxu0 %v8494_v28 }
 0x911   :  { %7349 = vmatpush3.bf16.msra.mxu0 %v7807_v16 }
 0x9d7   :  { %v2400_v15 = vpop.f32.mrb[12].mxu0 }
 0x9d8   :  { %v2401_v17 = vadd.f32 %v2400_v15, %v2350_v14  ;;  %v7340_v18 = vpop.f32.mrb[13].mxu0  ;;  %v7826_v14 = vld [vmem:[#allocation22 + $0x60] ss:$8 sps:$4 sm:$0xff]   ;;  %v7831_v15 = vld [vmem:[#allocation22 + $0x74] ss:$8 sps:$4 sm:$0xff]  }
 0x9d9   :  { %v2403_v7 = vpop.f32.mrb[14].mxu0  ;;  %2646 = vmatpush1.bf16.msra.mxu1 %v7826_v14  ;;  %v7874_v14 = vld [vmem:[#allocation23 + $0xe0] ss:$16 sps:$4 sm:$0xff]  }
 0x9da   :  { %v7341_v19 = vpop.f32.mrb[15].mxu0  ;;  %v2406_v20 = vsel %vm366_vm0, %v2401_v17, 0.0  ;;  %v2410_v21 = vmul.f32 %v2401_v17, %v2401_v17  ;;  %2647 = vmatprep.subr.bf16.mxu1 %v7831_v15  ;;  %v7877_v15 = vld [vmem:[#allocation23 + $0xe8] ss:$16 sps:$4 sm:$0xff]  }
 0x9db   :  { %2407 = vadd.xlane.f32.xlu1 %v2406_v20 }
 0x9dc   :  { %v2411_v22 = vsel %vm366_vm0, %v2410_v21, 0.0 }
 0x9dd   :  { %2412 = vadd.xlane.f32.xlu0 %v2411_v22 }
 0xa68   :  { %v2408_v25 = vpop.xlane.xlu1 %2407 }
 0xa69   :  { %v2409_v26 = vmul.f32 0.015625, %v2408_v25  ;;  %v2518_v25 = vld [vmem:[#allocation6 + $0xc1] ss:$0 sm:$0xff] }
 0xa6a   :  { %v2413_v27 = vpop.xlane.xlu0 %2412 }
 0xa6b   :  { %v2415_v31 = vmul.f32 %v2409_v26, %v2409_v26  ;;  %v2414_v32 = vmul.f32 0.015625, %v2413_v27  ;;  %v2420_v63 = vsub.f32 %v2401_v17, %v2409_v26  ;;  %v7829_v17 = vld [vmem:[#allocation22 + $0x70] ss:$8 sps:$4 sm:$0xff]   ;;  %v2520_v27 = vld [vmem:[#allocation6 + $0xc2] ss:$0 sm:$0xff] }
 0xa6c   :  { %2648 = vmatpush1.bf16.msra.mxu1 %v7829_v17  ;;  %v2541_v17 = vld [vmem:[#allocation6 + $0xc3] ss:$8 sm:$0x3] }
 0xa6d   :  { %v2416_v35 = vsub.f32 %v2414_v32, %v2415_v31 }
 0xa6f   :  { %v2417_v36 = vmax.f32 %v2416_v35, 0.0 }
 0xa71   :  { %v2418_v39 = vadd.f32 1e-05, %v2417_v36 }
 0xa73   :  { %8132 = vrsqrt.f32 %v2418_v39  ;;  %v7832_v39 = vld [vmem:[#allocation23] ss:$16 sps:$4 sm:$0xff]  }
 0xa7d   :  { %v8133_v41 = vpop.eup %8132 }
 0xa7e   :  { %v2421_v42 = vmul.f32 %v8133_v41, %v2420_v63  ;;  %v7834_v63 = vld [vmem:[#allocation23 + $0x4] ss:$16 sps:$4 sm:$0xff]   ;;  %v7835_v41 = vld [vmem:[#allocation23 + $0x8] ss:$16 sps:$4 sm:$0xff]  }
 0xa7f   :  { %3134 = vmatprep.subr.bf16.mxu0 %v7834_v63  ;;  %v7886_v63 = vld [vmem:[#allocation23 + $0x120] ss:$16 sps:$4 sm:$0xff]  }
 0xa80   :  { %v2423_v44 = vmul.f32 %v2422_v5, %v2421_v42  ;;  %v7837_v5 = vld [vmem:[#allocation23 + $0xc] ss:$16 sps:$4 sm:$0xff]   ;;  %v7840_v42 = vld [vmem:[#allocation23 + $0x24] ss:$16 sps:$4 sm:$0xff]  }
 0xa81   :  { %3175 = vmatprep.subr.bf16.mxu1 %v7837_v5  ;;  %v7894_v5 = vld [vmem:[#allocation23 + $0x144] ss:$16 sps:$4 sm:$0xff]  }
 0xa82   :  { %v2425_v45 = vadd.f32 %v2424_v4, %v2423_v44  ;;  %v7843_v4 = vld [vmem:[#allocation23 + $0x2c] ss:$16 sps:$4 sm:$0xff]   ;;  %v7838_v44 = vld [vmem:[#allocation23 + $0x20] ss:$16 sps:$4 sm:$0xff]  }
 0xa84   :  { %v2426_v46 = vmax.f32 %v2425_v45, 0.0  ;;  %v7841_v45 = vld [vmem:[#allocation23 + $0x28] ss:$16 sps:$4 sm:$0xff]  }
 0xa86   :  { %v2435_v47 = vpack.c.bf16 %v2426_v46, %v2426_v46  ;;  %v7846_v46 = vld [vmem:[#allocation23 + $0x44] ss:$16 sps:$4 sm:$0xff]  }
 0xa88   :  { %7351 = vmatmul.mubr.msk.bf16.vlgmr.msra.gmra.mrb[16].mxu0 %vm366_vm0, %v2435_v47  ;;  %v7849_v47 = vld [vmem:[#allocation23 + $0x4c] ss:$16 sps:$4 sm:$0xff]  }
 0xa89   :  { %3135 = vmatpush1.bf16.msra.mxu0 %v7832_v39  ;;  %v7891_v39 = vld [vmem:[#allocation23 + $0x12c] ss:$16 sps:$4 sm:$0xff]  }
 0xa8a   :  { %3136 = vmatprep.subr.bf16.mxu0 %v7840_v42  ;;  %v7897_v42 = vld [vmem:[#allocation23 + $0x14c] ss:$16 sps:$4 sm:$0xff]  }
 0xa8d   :  { %3137 = vmatpush1.bf16.msra.mxu0 %v7838_v44  ;;  %v7895_v44 = vld [vmem:[#allocation23 + $0x148] ss:$16 sps:$4 sm:$0xff]  }
 0xa8e   :  { %3138 = vmatprep.subr.bf16.mxu0 %v7846_v46  ;;  %v7900_v46 = vld [vmem:[#allocation23 + $0x164] ss:$16 sps:$4 sm:$0xff]  }
 0xb5b   :  { %v2498_v49 = vpop.f32.mrb[16].mxu0 }
 0xb5c   :  { %v2499_v50 = vadd.f32 %v2498_v49, %v2436_v48  ;;  %v7352_v51 = vpop.f32.mrb[17].mxu0  ;;  %v7844_v48 = vld [vmem:[#allocation23 + $0x40] ss:$16 sps:$4 sm:$0xff]   ;;  %v7847_v49 = vld [vmem:[#allocation23 + $0x48] ss:$16 sps:$4 sm:$0xff]  }
 0xb5d   :  { %v2501_v52 = vpop.f32.mrb[18].mxu0  ;;  %v7855_v51 = vld [vmem:[#allocation23 + $0x6c] ss:$16 sps:$4 sm:$0xff]   ;;  %3139 = vmatpush1.bf16.msra.mxu0 %v7844_v48 }
 0xb5e   :  { %2504 = vadd.xlane.f32.xlu0 %v2499_v50  ;;  %v7353_v53 = vpop.f32.mrb[19].mxu0  ;;  %v2507_v54 = vmul.f32 %v2499_v50, %v2499_v50  ;;  %v7850_v52 = vld [vmem:[#allocation23 + $0x60] ss:$16 sps:$4 sm:$0xff]   ;;  %v7903_v48 = vld [vmem:[#allocation23 + $0x16c] ss:$16 sps:$4 sm:$0xff]  }
 0xb5f   :  { %v7853_v53 = vld [vmem:[#allocation23 + $0x68] ss:$16 sps:$4 sm:$0xff]  }
 0xb62   :  { %2508 = vadd.xlane.f32.xlu0 %v2507_v54  ;;  %v7858_v54 = vld [vmem:[#allocation23 + $0x84] ss:$16 sps:$4 sm:$0xff]  }
 0xbeb   :  { %v2505_v18 = vpop.xlane.xlu0 %2504 }
 0xbec   :  { %v2506_v7 = vmul.f32 0.0078125, %v2505_v18  ;;  %v2546_v18 = vrot.slane %v2541_v17, %v8855_v8 }
 0xbee   :  { %v2511_v20 = vmul.f32 %v2506_v7, %v2506_v7  ;;  %v2516_v24 = vsub.f32 %v2499_v50, %v2506_v7  ;;  %v7852_v50 = vld [vmem:[#allocation23 + $0x64] ss:$16 sps:$4 sm:$0xff]   ;;  %v2550_v7 = vrot.slane %v2541_v17, %v8858_v9 }
 0xbef   :  { %v2509_v19 = vpop.xlane.xlu0 %2508  ;;  %3140 = vmatprep.subr.bf16.mxu0 %v7852_v50  ;;  %v7909_v50 = vld [vmem:[#allocation23 + $0x18c] ss:$16 sps:$4 sm:$0xff]  }
 0xbf0   :  { %v2510_v21 = vmul.f32 0.0078125, %v2509_v19  ;;  %3141 = vmatpush1.bf16.msra.mxu0 %v7850_v52  ;;  %v7907_v52 = vld [vmem:[#allocation23 + $0x188] ss:$16 sps:$4 sm:$0xff]  }
 0xbf1   :  { %3142 = vmatprep.subr.bf16.mxu0 %v7858_v54  ;;  %v7915_v54 = vld [vmem:[#allocation23 + $0x1ac] ss:$16 sps:$4 sm:$0xff]  }
 0xbf2   :  { %v2512_v22 = vsub.f32 %v2510_v21, %v2511_v20 }
 0xbf4   :  { %v2513_v0 = vmax.f32 %v2512_v22, 0.0  ;;  %3143 = vmatpush1.bf16.msra.mxu0 %v7856_v57  ;;  %v7913_v57 = vld [vmem:[#allocation23 + $0x1a8] ss:$16 sps:$4 sm:$0xff]  }
 0xbf5   :  { %3144 = vmatprep.subr.bf16.mxu0 %v7864_v59  ;;  %v7921_v59 = vld [vmem:[#allocation23 + $0x1cc] ss:$16 sps:$4 sm:$0xff]  }
 0xbf6   :  { %v2514_v23 = vadd.f32 1e-05, %v2513_v0 }
 0xbf8   :  { %8134 = vrsqrt.f32 %v2514_v23  ;;  %3145 = vmatpush1.bf16.msra.mxu0 %v7862_v61  ;;  %v7919_v61 = vld [vmem:[#allocation23 + $0x1c8] ss:$16 sps:$4 sm:$0xff]  }
 0xbf9   :  { %3146 = vmatprep.subr.bf16.mxu0 %v7870_v1  ;;  %v7927_v1 = vld [vmem:[#allocation23 + $0x1ec] ss:$16 sps:$4 sm:$0xff]  }
 0xbfc   :  { %3147 = vmatpush1.bf16.msra.mxu0 %v7868_v2  ;;  %v7925_v2 = vld [vmem:[#allocation23 + $0x1e8] ss:$16 sps:$4 sm:$0xff]  }
 0xbfd   :  { %3148 = vmatprep.subr.bf16.mxu0 %v7876_v12 }
 0xc00   :  { %3149 = vmatpush1.bf16.msra.mxu0 %v7874_v14 }
 0xc02   :  { %v8135_v16 = vpop.eup %8134 }
 0xc03   :  { %v2517_v26 = vmul.f32 %v8135_v16, %v2516_v24 }
 0xc05   :  { %v2519_v31 = vmul.f32 %v2518_v25, %v2517_v26 }
 0xc07   :  { %v2521_v32 = vadd.f32 %v2520_v27, %v2519_v31  ;;  %v7882_v27 = vld [vmem:[#allocation23 + $0x104] ss:$16 sps:$4 sm:$0xff]   ;;  %v7885_v31 = vld [vmem:[#allocation23 + $0x10c] ss:$16 sps:$4 sm:$0xff]  }
 0xc08   :  { %3150 = vmatprep.subr.bf16.mxu0 %v7882_v27 }
 0xc09   :  { %v2522_v35 = vmax.f32 %v2521_v32, 0.0  ;;  %v7880_v32 = vld [vmem:[#allocation23 + $0x100] ss:$16 sps:$4 sm:$0xff]  }
 0xc0a   :  { %3151 = vmatpush1.bf16.msra.mxu0 %v7880_v32 }
 0xc0b   :  { %v2539_v36 = vpack.c.bf16 %v2522_v35, %v2522_v35  ;;  %v7883_v35 = vld [vmem:[#allocation23 + $0x108] ss:$16 sps:$4 sm:$0xff]  }
 0xc0d   :  { %2666 = vmatmul.mubr.bf16.vlgmr.msra.gmra.mrb[16].mxu1 %v2539_v36  ;;  %v7888_v36 = vld [vmem:[#allocation23 + $0x124] ss:$16 sps:$4 sm:$0xff]  }
 0xc0e   :  { %3176 = vmatpush1.bf16.msra.mxu1 %v7835_v41  ;;  %v7889_v41 = vld [vmem:[#allocation23 + $0x128] ss:$16 sps:$4 sm:$0xff]   ;;  %3152 = vmatprep.subr.bf16.mxu0 %v7888_v36 }
 0xc0f   :  { %3177 = vmatprep.subr.bf16.mxu1 %v7843_v4  ;;  %3153 = vmatpush1.bf16.msra.mxu0 %v7886_v63  ;;  %v7892_v4 = vld [vmem:[#allocation23 + $0x140] ss:$16 sps:$4 sm:$0xff]  }
 0xc10   :  { %3154 = vmatprep.subr.bf16.mxu0 %v7894_v5 }
 0xc12   :  { %3178 = vmatpush1.bf16.msra.mxu1 %v7841_v45  ;;  %v7898_v45 = vld [vmem:[#allocation23 + $0x160] ss:$16 sps:$4 sm:$0xff]  }
 0xc13   :  { %3179 = vmatprep.subr.bf16.mxu1 %v7849_v47  ;;  %3155 = vmatpush1.bf16.msra.mxu0 %v7892_v4  ;;  %v7901_v47 = vld [vmem:[#allocation23 + $0x168] ss:$16 sps:$4 sm:$0xff]   ;;  %v7930_v4 = vld [vmem:[#allocation25 + $0x4] ss:$16 sps:$4 sm:$0xff]  }
 0xc14   :  { %3156 = vmatprep.subr.bf16.mxu0 %v7900_v46  ;;  %v7936_v46 = vld [vmem:[#allocation25 + $0x24] ss:$16 sps:$4 sm:$0xff]  }
 0xc16   :  { %3180 = vmatpush1.bf16.msra.mxu1 %v7847_v49  ;;  %v7906_v49 = vld [vmem:[#allocation23 + $0x184] ss:$16 sps:$4 sm:$0xff]  }
 0xc17   :  { %3181 = vmatprep.subr.bf16.mxu1 %v7855_v51  ;;  %3157 = vmatpush1.bf16.msra.mxu0 %v7898_v45  ;;  %v7904_v51 = vld [vmem:[#allocation23 + $0x180] ss:$16 sps:$4 sm:$0xff]   ;;  %v7933_v45 = vld [vmem:[#allocation25 + $0xc] ss:$16 sps:$4 sm:$0xff]  }
 0xc18   :  { %3158 = vmatprep.subr.bf16.mxu0 %v7906_v49  ;;  %v7937_v49 = vld [vmem:[#allocation25 + $0x28] ss:$16 sps:$4 sm:$0xff]  }
 0xc1a   :  { %3182 = vmatpush1.bf16.msra.mxu1 %v7853_v53  ;;  %v7912_v53 = vld [vmem:[#allocation23 + $0x1a4] ss:$16 sps:$4 sm:$0xff]  }
 0xc1b   :  { %3183 = vmatprep.subr.bf16.mxu1 %v7861_v55  ;;  %3159 = vmatpush1.bf16.msra.mxu0 %v7904_v51  ;;  %v7910_v55 = vld [vmem:[#allocation23 + $0x1a0] ss:$16 sps:$4 sm:$0xff]   ;;  %v7945_v51 = vld [vmem:[#allocation25 + $0x4c] ss:$16 sps:$4 sm:$0xff]  }
 0xc1c   :  { %3160 = vmatprep.subr.bf16.mxu0 %v7912_v53  ;;  %v7943_v53 = vld [vmem:[#allocation25 + $0x48] ss:$16 sps:$4 sm:$0xff]  }
 0xc1e   :  { %3184 = vmatpush1.bf16.msra.mxu1 %v7859_v58  ;;  %v7918_v58 = vld [vmem:[#allocation23 + $0x1c4] ss:$16 sps:$4 sm:$0xff]  }
 0xc1f   :  { %3185 = vmatprep.subr.bf16.mxu1 %v7867_v60  ;;  %3161 = vmatpush1.bf16.msra.mxu0 %v7910_v55  ;;  %v7916_v60 = vld [vmem:[#allocation23 + $0x1c0] ss:$16 sps:$4 sm:$0xff]   ;;  %v7951_v55 = vld [vmem:[#allocation25 + $0x6c] ss:$16 sps:$4 sm:$0xff]  }
 0xc20   :  { %3162 = vmatprep.subr.bf16.mxu0 %v7918_v58  ;;  %v7949_v58 = vld [vmem:[#allocation25 + $0x68] ss:$16 sps:$4 sm:$0xff]  }
 0xc22   :  { %3186 = vmatpush1.bf16.msra.mxu1 %v7865_v62  ;;  %v7924_v62 = vld [vmem:[#allocation23 + $0x1e4] ss:$16 sps:$4 sm:$0xff]  }
 0xc23   :  { %3187 = vmatprep.subr.bf16.mxu1 %v7873_v43  ;;  %3163 = vmatpush1.bf16.msra.mxu0 %v7916_v60  ;;  %v7922_v43 = vld [vmem:[#allocation23 + $0x1e0] ss:$16 sps:$4 sm:$0xff]   ;;  %v7957_v60 = vld [vmem:[#allocation25 + $0x8c] ss:$16 sps:$4 sm:$0xff]  }
 0xc24   :  { %3164 = vmatprep.subr.bf16.mxu0 %v7924_v62  ;;  %v7955_v62 = vld [vmem:[#allocation25 + $0x88] ss:$16 sps:$4 sm:$0xff]  }
 0xc26   :  { %3188 = vmatpush1.bf16.msra.mxu1 %v7871_v11 }
 0xc27   :  { %3189 = vmatprep.subr.bf16.mxu1 %v7879_v13  ;;  %3165 = vmatpush1.bf16.msra.mxu0 %v7922_v43  ;;  %v7963_v43 = vld [vmem:[#allocation25 + $0xac] ss:$16 sps:$4 sm:$0xff]  }
 0xc28   :  { %4098 = vmatprep.subr.bf16.mxu0 %v7930_v4 }
 0xc2a   :  { %3190 = vmatpush1.bf16.msra.mxu1 %v7877_v15 }
 0xc2b   :  { %3191 = vmatprep.subr.bf16.mxu1 %v7885_v31 }
 0xc2e   :  { %3192 = vmatpush1.bf16.msra.mxu1 %v7883_v35 }
 0xc2f   :  { %3193 = vmatprep.subr.bf16.mxu1 %v7891_v39 }
 0xc32   :  { %3194 = vmatpush1.bf16.msra.mxu1 %v7889_v41 }
 0xc33   :  { %3195 = vmatprep.subr.bf16.mxu1 %v7897_v42 }
 0xc36   :  { %3196 = vmatpush1.bf16.msra.mxu1 %v7895_v44  ;;  %v7931_v44 = vld [vmem:[#allocation25 + $0x8] ss:$16 sps:$4 sm:$0xff]  }
 0xc37   :  { %3197 = vmatprep.subr.bf16.mxu1 %v7903_v48  ;;  %v7934_v48 = vld [vmem:[#allocation25 + $0x20] ss:$16 sps:$4 sm:$0xff]  }
 0xc3a   :  { %3198 = vmatpush1.bf16.msra.mxu1 %v7901_v47  ;;  %v7939_v47 = vld [vmem:[#allocation25 + $0x2c] ss:$16 sps:$4 sm:$0xff]  }
 0xc3b   :  { %3199 = vmatprep.subr.bf16.mxu1 %v7909_v50  ;;  %v7942_v50 = vld [vmem:[#allocation25 + $0x44] ss:$16 sps:$4 sm:$0xff]  }
 0xc3e   :  { %3200 = vmatpush1.bf16.msra.mxu1 %v7907_v52  ;;  %v7940_v52 = vld [vmem:[#allocation25 + $0x40] ss:$16 sps:$4 sm:$0xff]  }
 0xc3f   :  { %3201 = vmatprep.subr.bf16.mxu1 %v7915_v54  ;;  %v7948_v54 = vld [vmem:[#allocation25 + $0x64] ss:$16 sps:$4 sm:$0xff]  }
 0xc42   :  { %3202 = vmatpush1.bf16.msra.mxu1 %v7913_v57  ;;  %v7946_v57 = vld [vmem:[#allocation25 + $0x60] ss:$16 sps:$4 sm:$0xff]  }
 0xc43   :  { %3203 = vmatprep.subr.bf16.mxu1 %v7921_v59  ;;  %v7954_v59 = vld [vmem:[#allocation25 + $0x84] ss:$16 sps:$4 sm:$0xff]  }
 0xc46   :  { %3204 = vmatpush1.bf16.msra.mxu1 %v7919_v61  ;;  %v7952_v61 = vld [vmem:[#allocation25 + $0x80] ss:$16 sps:$4 sm:$0xff]  }
 0xc47   :  { %3205 = vmatprep.subr.bf16.mxu1 %v7927_v1  ;;  %v7960_v1 = vld [vmem:[#allocation25 + $0xa4] ss:$16 sps:$4 sm:$0xff]  }
 0xc4a   :  { %3206 = vmatpush1.bf16.msra.mxu1 %v7925_v2  ;;  %v7958_v2 = vld [vmem:[#allocation25 + $0xa0] ss:$16 sps:$4 sm:$0xff]  }
 0xc4b   :  { %4180 = vmatprep.subr.bf16.mxu1 %v7933_v45 }
 0xce0   :  { %v2667_v19 = vpop.f32.mrb[16].mxu1 }
 0xce1   :  { %v8987_v20 = vadd.f32 %v2667_v19, %v2546_v18  ;;  %v2669_v21 = vpop.f32.mrb[17].mxu1  ;;  %v2694_v19 = vld [vmem:[#allocation6 + $0xc4] ss:$8 sm:$0x3] }
 0xce2   :  { %v8989_v22 = vadd.f32 %v2669_v21, %v2550_v7  ;;  %v2671_v0 = vpop.f32.mrb[18].mxu1  ;;  %v2709_v21 = vld [vmem:[#allocation6 + $0xc5] ss:$8 sm:$0x3] }
 0xce3   :  { %v2672_v23 = vpop.f32.mrb[19].mxu1  ;;  %v2678_v16 = vmul.f32 %v8987_v20, %v8987_v20  ;;  %v2714_v27 = vrot.slane %v2709_v21, %v8855_v8  ;;  %v2718_v31 = vrot.slane %v2709_v21, %v8858_v9  ;;  %v2792_v21 = vld [vmem:[#allocation6 + $0xc6] ss:$8 sm:$0xf] }
 0xce4   :  { %v2674_v24 = vadd.f32 %v8989_v22, %v8987_v20  ;;  %v2679_v25 = vmul.f32 %v8989_v22, %v8989_v22 }
 0xce6   :  { %2675 = vadd.xlane.f32.xlu0 %v2674_v24  ;;  %v2680_v26 = vadd.f32 %v2679_v25, %v2678_v16  ;;  %v2699_v24 = vrot.slane %v2694_v19, %v8855_v8  ;;  %v2703_v16 = vrot.slane %v2694_v19, %v8858_v9  ;;  %v7973_v19 = vld [vmem:[#allocation25 + $0xe8] ss:$16 sps:$4 sm:$0xff]  }
 0xcea   :  { %2681 = vadd.xlane.f32.xlu0 %v2680_v26 }
 0xd73   :  { %v2676_v11 = vpop.xlane.xlu0 %2675 }
 0xd74   :  { %v2677_v12 = vmul.f32 0.00390625, %v2676_v11  ;;  %v7961_v11 = vld [vmem:[#allocation25 + $0xa8] ss:$16 sps:$4 sm:$0xff]  }
 0xd76   :  { %v2684_v14 = vmul.f32 %v2677_v12, %v2677_v12  ;;  %v2689_v0 = vsub.f32 %v8987_v20, %v2677_v12  ;;  %v2690_v23 = vsub.f32 %v8989_v22, %v2677_v12  ;;  %v7928_v22 = vld [vmem:[#allocation25] ss:$16 sps:$4 sm:$0xff]   ;;  %v7966_v12 = vld [vmem:[#allocation25 + $0xc4] ss:$16 sps:$4 sm:$0xff]  }
 0xd77   :  { %v2682_v13 = vpop.xlane.xlu0 %2681 }
 0xd78   :  { %v2683_v15 = vmul.f32 0.00390625, %v2682_v13  ;;  %v7969_v13 = vld [vmem:[#allocation25 + $0xcc] ss:$16 sps:$4 sm:$0xff]  }
 0xd7a   :  { %v2685_v17 = vsub.f32 %v2683_v15, %v2684_v14  ;;  %v7964_v14 = vld [vmem:[#allocation25 + $0xc0] ss:$16 sps:$4 sm:$0xff]   ;;  %v7967_v15 = vld [vmem:[#allocation25 + $0xc8] ss:$16 sps:$4 sm:$0xff]  }
 0xd7c   :  { %v2686_v18 = vmax.f32 %v2685_v17, 0.0  ;;  %v7972_v17 = vld [vmem:[#allocation25 + $0xe4] ss:$16 sps:$4 sm:$0xff]  }
 0xd7e   :  { %v2687_v7 = vadd.f32 1e-05, %v2686_v18  ;;  %v7975_v18 = vld [vmem:[#allocation25 + $0xec] ss:$16 sps:$4 sm:$0xff]  }
 0xd80   :  { %8136 = vrsqrt.f32 %v2687_v7  ;;  %v7970_v7 = vld [vmem:[#allocation25 + $0xe0] ss:$16 sps:$4 sm:$0xff]  }
 0xd8a   :  { %v8137_v25 = vpop.eup %8136 }
 0xd8b   :  { %v2692_v26 = vmul.f32 %v8137_v25, %v2690_v23  ;;  %v2691_v32 = vmul.f32 %v8137_v25, %v2689_v0  ;;  %v2797_v0 = vrot.slane %v2792_v21, %v8855_v8  ;;  %v2805_v23 = vrot.slane %v2792_v21, %v8861_v10 }
 0xd8d   :  { %v2707_v35 = vmul.f32 %v2703_v16, %v2692_v26  ;;  %v2706_v36 = vmul.f32 %v2699_v24, %v2691_v32  ;;  %v2801_v24 = vrot.slane %v2792_v21, %v8858_v9 }
 0xd8f   :  { %v2722_v39 = vadd.f32 %v2718_v31, %v2707_v35  ;;  %v2721_v63 = vadd.f32 %v2714_v27, %v2706_v36  ;;  %v2809_v36 = vrot.slane %v2792_v21, %v8895_v56  ;;  %v8009_v21 = vld [vmem:[#allocation25 + $0x1a8] ss:$16 sps:$4 sm:$0xff]  }
 0xd91   :  { %v2724_v41 = vmax.f32 %v2722_v39, 0.0  ;;  %v2723_v5 = vmax.f32 %v2721_v63, 0.0 }
 0xd93   :  { %v2790_v20 = vpack.c.bf16 %v2724_v41, %v2724_v41  ;;  %v2789_v42 = vpack.c.bf16 %v2723_v5, %v2723_v5 }
 0xd95   :  { %3166 = vmatprep.mubr.bf16.mxu0 %v2790_v20  ;;  %3207 = vmatprep.mubr.bf16.mxu1 %v2790_v20 }
 0xd96   :  { %3167 = vmatmul.mubr.bf16.vlgmr.msra.gmra.mrb[20].mxu0 %v2789_v42  ;;  %3208 = vmatmul.mubr.bf16.vlgmr.msra.gmra.mrb[20].mxu1 %v2789_v42 }
 0xd97   :  { %4099 = vmatpush1.bf16.msra.mxu0 %v7928_v22  ;;  %4181 = vmatpush1.bf16.msra.mxu1 %v7931_v44 }
 0xd98   :  { %4100 = vmatprep.subr.bf16.mxu0 %v7936_v46  ;;  %4182 = vmatprep.subr.bf16.mxu1 %v7939_v47 }
 0xd9b   :  { %4101 = vmatpush1.bf16.msra.mxu0 %v7934_v48  ;;  %4183 = vmatpush1.bf16.msra.mxu1 %v7937_v49 }
 0xd9c   :  { %4102 = vmatprep.subr.bf16.mxu0 %v7942_v50  ;;  %4184 = vmatprep.subr.bf16.mxu1 %v7945_v51  ;;  %v7978_v51 = vld [vmem:[#allocation25 + $0x104] ss:$16 sps:$4 sm:$0xff]  }
 0xd9f   :  { %4103 = vmatpush1.bf16.msra.mxu0 %v7940_v52  ;;  %4185 = vmatpush1.bf16.msra.mxu1 %v7943_v53  ;;  %v7981_v52 = vld [vmem:[#allocation25 + $0x10c] ss:$16 sps:$4 sm:$0xff]   ;;  %v7976_v53 = vld [vmem:[#allocation25 + $0x100] ss:$16 sps:$4 sm:$0xff]  }
 0xda0   :  { %4104 = vmatprep.subr.bf16.mxu0 %v7948_v54  ;;  %4186 = vmatprep.subr.bf16.mxu1 %v7951_v55  ;;  %v7979_v54 = vld [vmem:[#allocation25 + $0x108] ss:$16 sps:$4 sm:$0xff]   ;;  %v7984_v55 = vld [vmem:[#allocation25 + $0x124] ss:$16 sps:$4 sm:$0xff]  }
 0xda3   :  { %4105 = vmatpush1.bf16.msra.mxu0 %v7946_v57  ;;  %4187 = vmatpush1.bf16.msra.mxu1 %v7949_v58  ;;  %v7987_v57 = vld [vmem:[#allocation25 + $0x12c] ss:$16 sps:$4 sm:$0xff]   ;;  %v7982_v58 = vld [vmem:[#allocation25 + $0x120] ss:$16 sps:$4 sm:$0xff]  }
 0xda4   :  { %4106 = vmatprep.subr.bf16.mxu0 %v7954_v59  ;;  %4188 = vmatprep.subr.bf16.mxu1 %v7957_v60  ;;  %v7985_v59 = vld [vmem:[#allocation25 + $0x128] ss:$16 sps:$4 sm:$0xff]   ;;  %v7990_v60 = vld [vmem:[#allocation25 + $0x144] ss:$16 sps:$4 sm:$0xff]  }
 0xda7   :  { %4107 = vmatpush1.bf16.msra.mxu0 %v7952_v61  ;;  %4189 = vmatpush1.bf16.msra.mxu1 %v7955_v62  ;;  %v7993_v61 = vld [vmem:[#allocation25 + $0x14c] ss:$16 sps:$4 sm:$0xff]   ;;  %v7988_v62 = vld [vmem:[#allocation25 + $0x140] ss:$16 sps:$4 sm:$0xff]  }
 0xda8   :  { %4108 = vmatprep.subr.bf16.mxu0 %v7960_v1  ;;  %4190 = vmatprep.subr.bf16.mxu1 %v7963_v43  ;;  %v7991_v1 = vld [vmem:[#allocation25 + $0x148] ss:$16 sps:$4 sm:$0xff]   ;;  %v7994_v43 = vld [vmem:[#allocation25 + $0x160] ss:$16 sps:$4 sm:$0xff]  }
 0xdab   :  { %4109 = vmatpush1.bf16.msra.mxu0 %v7958_v2  ;;  %4191 = vmatpush1.bf16.msra.mxu1 %v7961_v11  ;;  %v7996_v2 = vld [vmem:[#allocation25 + $0x164] ss:$16 sps:$4 sm:$0xff]   ;;  %v7997_v11 = vld [vmem:[#allocation25 + $0x168] ss:$16 sps:$4 sm:$0xff]  }
 0xdac   :  { %4110 = vmatprep.subr.bf16.mxu0 %v7966_v12  ;;  %4192 = vmatprep.subr.bf16.mxu1 %v7969_v13  ;;  %v7999_v12 = vld [vmem:[#allocation25 + $0x16c] ss:$16 sps:$4 sm:$0xff]   ;;  %v8002_v13 = vld [vmem:[#allocation25 + $0x184] ss:$16 sps:$4 sm:$0xff]  }
 0xdaf   :  { %4111 = vmatpush1.bf16.msra.mxu0 %v7964_v14  ;;  %4193 = vmatpush1.bf16.msra.mxu1 %v7967_v15  ;;  %v8005_v14 = vld [vmem:[#allocation25 + $0x18c] ss:$16 sps:$4 sm:$0xff]   ;;  %v8000_v15 = vld [vmem:[#allocation25 + $0x180] ss:$16 sps:$4 sm:$0xff]  }
 0xdb0   :  { %4112 = vmatprep.subr.bf16.mxu0 %v7972_v17  ;;  %4194 = vmatprep.subr.bf16.mxu1 %v7975_v18  ;;  %v8003_v17 = vld [vmem:[#allocation25 + $0x188] ss:$16 sps:$4 sm:$0xff]   ;;  %v8008_v18 = vld [vmem:[#allocation25 + $0x1a4] ss:$16 sps:$4 sm:$0xff]  }
 0xdb3   :  { %4113 = vmatpush1.bf16.msra.mxu0 %v7970_v7  ;;  %4195 = vmatpush1.bf16.msra.mxu1 %v7973_v19  ;;  %v8011_v7 = vld [vmem:[#allocation25 + $0x1ac] ss:$16 sps:$4 sm:$0xff]   ;;  %v8006_v19 = vld [vmem:[#allocation25 + $0x1a0] ss:$16 sps:$4 sm:$0xff]  }
 0xdb4   :  { %4114 = vmatprep.subr.bf16.mxu0 %v7978_v51  ;;  %4196 = vmatprep.subr.bf16.mxu1 %v7981_v52 }
 0xdb7   :  { %4115 = vmatpush1.bf16.msra.mxu0 %v7976_v53  ;;  %4197 = vmatpush1.bf16.msra.mxu1 %v7979_v54 }
 0xdb8   :  { %4116 = vmatprep.subr.bf16.mxu0 %v7984_v55  ;;  %4198 = vmatprep.subr.bf16.mxu1 %v7987_v57 }
 0xdbb   :  { %4117 = vmatpush1.bf16.msra.mxu0 %v7982_v58  ;;  %4199 = vmatpush1.bf16.msra.mxu1 %v7985_v59 }
 0xdbc   :  { %4118 = vmatprep.subr.bf16.mxu0 %v7990_v60  ;;  %4200 = vmatprep.subr.bf16.mxu1 %v7993_v61 }
 0xdbf   :  { %4119 = vmatpush1.bf16.msra.mxu0 %v7988_v62  ;;  %4201 = vmatpush1.bf16.msra.mxu1 %v7991_v1 }
 0xdc0   :  { %4120 = vmatprep.subr.bf16.mxu0 %v7996_v2  ;;  %4202 = vmatprep.subr.bf16.mxu1 %v7999_v12 }
 0xdc3   :  { %4121 = vmatpush1.bf16.msra.mxu0 %v7994_v43  ;;  %4203 = vmatpush1.bf16.msra.mxu1 %v7997_v11 }
 0xdc4   :  { %4122 = vmatprep.subr.bf16.mxu0 %v8002_v13  ;;  %4204 = vmatprep.subr.bf16.mxu1 %v8005_v14 }
 0xdc7   :  { %4123 = vmatpush1.bf16.msra.mxu0 %v8000_v15  ;;  %4205 = vmatpush1.bf16.msra.mxu1 %v8003_v17 }
 0xdc8   :  { %4124 = vmatprep.subr.bf16.mxu0 %v8008_v18  ;;  %4206 = vmatprep.subr.bf16.mxu1 %v8011_v7 }
 0xdcb   :  { %4125 = vmatpush1.bf16.msra.mxu0 %v8006_v19  ;;  %4207 = vmatpush1.bf16.msra.mxu1 %v8009_v21  ;;  %v8024_v21 = vld [vmem:[#allocation25 + $0x200] ss:$16 sps:$4 sm:$0xff]  }
 0xe69   :  { %v3168_v16 = vpop.f32.mrb[20].mxu0  ;;  %v3209_v25 = vpop.f32.mrb[20].mxu1 }
 0xe6a   :  { %v9006_v26 = vadd.f32 %v3168_v16, %v2797_v0  ;;  %v3170_v27 = vpop.f32.mrb[21].mxu0  ;;  %v3211_v31 = vpop.f32.mrb[21].mxu1  ;;  %v9008_v32 = vadd.f32 %v3209_v25, %v2805_v23  ;;  %v8014_v0 = vld [vmem:[#allocation25 + $0x1c4] ss:$16 sps:$4 sm:$0xff]   ;;  %v8017_v23 = vld [vmem:[#allocation25 + $0x1cc] ss:$16 sps:$4 sm:$0xff]  }
 0xe6b   :  { %v9010_v35 = vadd.f32 %v3170_v27, %v2801_v24  ;;  %v3172_v39 = vpop.f32.mrb[22].mxu0  ;;  %v3213_v63 = vpop.f32.mrb[22].mxu1  ;;  %v9021_v44 = vadd.f32 %v3211_v31, %v2809_v36  ;;  %v8012_v24 = vld [vmem:[#allocation25 + $0x1c0] ss:$16 sps:$4 sm:$0xff]   ;;  %4126 = vmatprep.subr.bf16.mxu0 %v8014_v0  ;;  %v8015_v16 = vld [vmem:[#allocation25 + $0x1c8] ss:$16 sps:$4 sm:$0xff]   ;;  %4208 = vmatprep.subr.bf16.mxu1 %v8017_v23 }
 0xe6c   :  { %v3222_v41 = vmul.f32 %v9006_v26, %v9006_v26  ;;  %v3173_v5 = vpop.f32.mrb[23].mxu0  ;;  %v3214_v20 = vpop.f32.mrb[23].mxu1  ;;  %v3224_v4 = vmul.f32 %v9008_v32, %v9008_v32  ;;  %v8020_v25 = vld [vmem:[#allocation25 + $0x1e4] ss:$16 sps:$4 sm:$0xff]   ;;  %v8023_v27 = vld [vmem:[#allocation25 + $0x1ec] ss:$16 sps:$4 sm:$0xff]   ;;  %4127 = vmatpush1.bf16.msra.mxu0 %v8012_v24  ;;  %4209 = vmatpush1.bf16.msra.mxu1 %v8015_v16 }
 0xe6d   :  { %v3216_v42 = vadd.f32 %v9010_v35, %v9006_v26  ;;  %v3223_v22 = vmul.f32 %v9010_v35, %v9010_v35  ;;  %v3225_v49 = vmul.f32 %v9021_v44, %v9021_v44  ;;  %v8018_v31 = vld [vmem:[#allocation25 + $0x1e0] ss:$16 sps:$4 sm:$0xff]   ;;  %4128 = vmatprep.subr.bf16.mxu0 %v8020_v25  ;;  %v8021_v36 = vld [vmem:[#allocation25 + $0x1e8] ss:$16 sps:$4 sm:$0xff]   ;;  %4210 = vmatprep.subr.bf16.mxu1 %v8023_v27  ;;  %v8026_v39 = vld [vmem:[#allocation25 + $0x204] ss:$16 sps:$4 sm:$0xff]  }
 0xe6e   :  { %v8029_v63 = vld [vmem:[#allocation25 + $0x20c] ss:$16 sps:$4 sm:$0xff]   ;;  %v8027_v0 = vld [vmem:[#allocation25 + $0x208] ss:$16 sps:$4 sm:$0xff]   ;;  %v8032_v24 = vld [vmem:[#allocation25 + $0x224] ss:$16 sps:$4 sm:$0xff]  }
 0xe6f   :  { %v3217_v45 = vadd.f32 %v3216_v42, %v9008_v32  ;;  %v3226_v46 = vadd.f32 %v3223_v22, %v3222_v41  ;;  %v8035_v16 = vld [vmem:[#allocation25 + $0x22c] ss:$16 sps:$4 sm:$0xff]   ;;  %v8030_v27 = vld [vmem:[#allocation25 + $0x220] ss:$16 sps:$4 sm:$0xff]  }
 0xe70   :  { %4129 = vmatpush1.bf16.msra.mxu0 %v8018_v31  ;;  %4211 = vmatpush1.bf16.msra.mxu1 %v8021_v36  ;;  %v8033_v31 = vld [vmem:[#allocation25 + $0x228] ss:$16 sps:$4 sm:$0xff]   ;;  %v8038_v36 = vld [vmem:[#allocation25 + $0x244] ss:$16 sps:$4 sm:$0xff]  }
 0xe71   :  { %v3218_v47 = vadd.f32 %v3217_v45, %v9021_v44  ;;  %v3227_v48 = vadd.f32 %v3226_v46, %v3224_v4  ;;  %4139 = vmatprep.subr.bf16.mxu0 %v8026_v39  ;;  %4221 = vmatprep.subr.bf16.mxu1 %v8029_v63  ;;  %v8041_v39 = vld [vmem:[#allocation25 + $0x24c] ss:$16 sps:$4 sm:$0xff]   ;;  %v8036_v63 = vld [vmem:[#allocation25 + $0x240] ss:$16 sps:$4 sm:$0xff]  }
 0xe73   :  { %3219 = vadd.xlane.f32.xlu0 %v3218_v47  ;;  %v3228_v50 = vadd.f32 %v3227_v48, %v3225_v49  ;;  %v3246_v47 = vld [vmem:[#allocation6 + $0xc7] ss:$8 sm:$0xf]  ;;  %v3273_v48 = vld [vmem:[#allocation6 + $0x100] ss:$8 sm:$0xf] }
 0xe74   :  { %v3255_v49 = vrot.slane %v3246_v47, %v8858_v9  ;;  %v3263_v51 = vrot.slane %v3246_v47, %v8895_v56  ;;  %v3259_v52 = vrot.slane %v3246_v47, %v8861_v10  ;;  %v3282_v59 = vrot.slane %v3273_v48, %v8858_v9 }
 0xe75   :  { %v3278_v60 = vrot.slane %v3273_v48, %v8855_v8  ;;  %v3290_v61 = vrot.slane %v3273_v48, %v8895_v56  ;;  %v3286_v62 = vrot.slane %v3273_v48, %v8861_v10  ;;  %v8056_v48 = vld [vmem:[#allocation25 + $0x2a4] ss:$16 sps:$4 sm:$0xff]  }
 0xe77   :  { %3229 = vadd.xlane.f32.xlu0 %v3228_v50  ;;  %v3251_v50 = vrot.slane %v3246_v47, %v8855_v8  ;;  %v8051_v47 = vld [vmem:[#allocation25 + $0x288] ss:$16 sps:$4 sm:$0xff]  }
 0xf00   :  { %v3220_v41 = vpop.xlane.xlu0 %3219 }
 0xf01   :  { %v3221_v5 = vmul.f32 0.001953125, %v3220_v41  ;;  %v8039_v41 = vld [vmem:[#allocation25 + $0x248] ss:$16 sps:$4 sm:$0xff]  }
 0xf03   :  { %v3232_v42 = vmul.f32 %v3221_v5, %v3221_v5  ;;  %v3237_v53 = vsub.f32 %v9006_v26, %v3221_v5  ;;  %v3239_v54 = vsub.f32 %v9008_v32, %v3221_v5  ;;  %v3238_v55 = vsub.f32 %v9010_v35, %v3221_v5 }
 0xf04   :  { %v3230_v20 = vpop.xlane.xlu0 %3229  ;;  %v3240_v57 = vsub.f32 %v9021_v44, %v3221_v5  ;;  %v8044_v5 = vld [vmem:[#allocation25 + $0x264] ss:$16 sps:$4 sm:$0xff]  }
 0xf05   :  { %v3231_v22 = vmul.f32 0.001953125, %v3230_v20  ;;  %v8047_v20 = vld [vmem:[#allocation25 + $0x26c] ss:$16 sps:$4 sm:$0xff]  }
 0xf07   :  { %v3233_v4 = vsub.f32 %v3231_v22, %v3232_v42  ;;  %v8042_v42 = vld [vmem:[#allocation25 + $0x260] ss:$16 sps:$4 sm:$0xff]   ;;  %v8045_v22 = vld [vmem:[#allocation25 + $0x268] ss:$16 sps:$4 sm:$0xff]  }
 0xf09   :  { %v3234_v45 = vmax.f32 %v3233_v4, 0.0  ;;  %v8050_v4 = vld [vmem:[#allocation25 + $0x284] ss:$16 sps:$4 sm:$0xff]  }
 0xf0b   :  { %v3235_v46 = vadd.f32 1e-05, %v3234_v45  ;;  %v8053_v45 = vld [vmem:[#allocation25 + $0x28c] ss:$16 sps:$4 sm:$0xff]  }
 0xf0d   :  { %8138 = vrsqrt.f32 %v3235_v46  ;;  %v8048_v46 = vld [vmem:[#allocation25 + $0x280] ss:$16 sps:$4 sm:$0xff]  }
 0xf17   :  { %v8139_v58 = vpop.eup %8138 }
 0xf18   :  { %v3242_v1 = vmul.f32 %v8139_v58, %v3238_v55  ;;  %v3241_v43 = vmul.f32 %v8139_v58, %v3237_v53  ;;  %v3244_v2 = vmul.f32 %v8139_v58, %v3240_v57  ;;  %v3243_v11 = vmul.f32 %v8139_v58, %v3239_v54  ;;  %v8065_v53 = vld [vmem:[#allocation25 + $0x2cc] ss:$16 sps:$4 sm:$0xff]   ;;  %v8060_v54 = vld [vmem:[#allocation25 + $0x2c0] ss:$16 sps:$4 sm:$0xff]   ;;  %v8063_v55 = vld [vmem:[#allocation25 + $0x2c8] ss:$16 sps:$4 sm:$0xff]  }
 0xf19   :  { %v8068_v57 = vld [vmem:[#allocation25 + $0x2e4] ss:$16 sps:$4 sm:$0xff]   ;;  %v8071_v58 = vld [vmem:[#allocation25 + $0x2ec] ss:$16 sps:$4 sm:$0xff]  }
 0xf1a   :  { %v3269_v26 = vmul.f32 %v3255_v49, %v3242_v1  ;;  %v3268_v12 = vmul.f32 %v3251_v50, %v3241_v43  ;;  %v3271_v32 = vmul.f32 %v3263_v51, %v3244_v2  ;;  %v3270_v13 = vmul.f32 %v3259_v52, %v3243_v11  ;;  %v8059_v49 = vld [vmem:[#allocation25 + $0x2ac] ss:$16 sps:$4 sm:$0xff]   ;;  %v8054_v50 = vld [vmem:[#allocation25 + $0x2a0] ss:$16 sps:$4 sm:$0xff]   ;;  %v8057_v51 = vld [vmem:[#allocation25 + $0x2a8] ss:$16 sps:$4 sm:$0xff]  }
 0xf1b   :  { %v8062_v52 = vld [vmem:[#allocation25 + $0x2c4] ss:$16 sps:$4 sm:$0xff]   ;;  %v8072_v1 = vld [vmem:[#allocation25 + $0x300] ss:$16 sps:$4 sm:$0xff]   ;;  %v8075_v43 = vld [vmem:[#allocation25 + $0x308] ss:$16 sps:$4 sm:$0xff]  }
 0xf1c   :  { %v3296_v35 = vadd.f32 %v3282_v59, %v3269_v26  ;;  %v3295_v14 = vadd.f32 %v3278_v60, %v3268_v12  ;;  %v3298_v44 = vadd.f32 %v3290_v61, %v3271_v32  ;;  %v9039_v15 = vadd.f32 %v3286_v62, %v3270_v13  ;;  %v8066_v59 = vld [vmem:[#allocation25 + $0x2e0] ss:$16 sps:$4 sm:$0xff]   ;;  %v8069_v60 = vld [vmem:[#allocation25 + $0x2e8] ss:$16 sps:$4 sm:$0xff]   ;;  %v8074_v61 = vld [vmem:[#allocation25 + $0x304] ss:$16 sps:$4 sm:$0xff]  }
 0xf1d   :  { %v8077_v62 = vld [vmem:[#allocation25 + $0x30c] ss:$16 sps:$4 sm:$0xff]   ;;  %v8080_v2 = vld [vmem:[#allocation25 + $0x324] ss:$16 sps:$4 sm:$0xff]   ;;  %v8078_v26 = vld [vmem:[#allocation25 + $0x320] ss:$16 sps:$4 sm:$0xff]  }
 0xf1e   :  { %v3300_v17 = vmax.f32 %v3296_v35, 0.0  ;;  %v3299_v18 = vmax.f32 %v3295_v14, 0.0  ;;  %v3302_v7 = vmax.f32 %v3298_v44, 0.0  ;;  %v8083_v11 = vld [vmem:[#allocation25 + $0x32c] ss:$16 sps:$4 sm:$0xff]  }
 0xf1f   :  { %v8081_v12 = vld [vmem:[#allocation25 + $0x328] ss:$16 sps:$4 sm:$0xff]   ;;  %v8086_v32 = vld [vmem:[#allocation25 + $0x344] ss:$16 sps:$4 sm:$0xff]   ;;  %v8089_v13 = vld [vmem:[#allocation25 + $0x34c] ss:$16 sps:$4 sm:$0xff]  }
 0xf20   :  { %v3432_v19 = vpack.c.bf16 %v3300_v17, %v3300_v17  ;;  %v3431_v23 = vpack.c.bf16 %v3299_v18, %v3299_v18  ;;  %v3434_v25 = vpack.c.bf16 %v3302_v7, %v3302_v7  ;;  %v8084_v35 = vld [vmem:[#allocation25 + $0x340] ss:$16 sps:$4 sm:$0xff]   ;;  %v8087_v14 = vld [vmem:[#allocation25 + $0x348] ss:$16 sps:$4 sm:$0xff]   ;;  %v8092_v44 = vld [vmem:[#allocation25 + $0x364] ss:$16 sps:$4 sm:$0xff]  }
 0xf21   :  { %v8095_v17 = vld [vmem:[#allocation25 + $0x36c] ss:$16 sps:$4 sm:$0xff]   ;;  %v8090_v18 = vld [vmem:[#allocation25 + $0x360] ss:$16 sps:$4 sm:$0xff]   ;;  %v8093_v7 = vld [vmem:[#allocation25 + $0x368] ss:$16 sps:$4 sm:$0xff]  }
 0xf22   :  { %4130 = vmatprep.mubr.bf16.mxu0 %v3432_v19  ;;  %4212 = vmatprep.mubr.bf16.mxu1 %v3432_v19  ;;  %v8098_v19 = vld [vmem:[#allocation25 + $0x384] ss:$16 sps:$4 sm:$0xff]  }
 0xf23   :  { %4131 = vmatmul.mubr.bf16.vlgmr.msra.gmra.mrb[24].mxu0 %v3431_v23  ;;  %4213 = vmatmul.mubr.bf16.vlgmr.msra.gmra.mrb[24].mxu1 %v3431_v23  ;;  %v8099_v23 = vld [vmem:[#allocation25 + $0x388] ss:$16 sps:$4 sm:$0xff]  }
 0xf24   :  { %4140 = vmatpush1.bf16.msra.mxu0 %v8024_v21  ;;  %4222 = vmatpush1.bf16.msra.mxu1 %v8027_v0  ;;  %v8101_v21 = vld [vmem:[#allocation25 + $0x38c] ss:$16 sps:$4 sm:$0xff]   ;;  %v8096_v0 = vld [vmem:[#allocation25 + $0x380] ss:$16 sps:$4 sm:$0xff]  }
 0xf25   :  { %4171 = vmatprep.mubr.bf16.mxu0 %v3434_v25  ;;  %4253 = vmatprep.mubr.bf16.mxu1 %v3434_v25  ;;  %v8102_v25 = vld [vmem:[#allocation25 + $0x3a0] ss:$16 sps:$4 sm:$0xff]  }
 0xf26   :  { %4141 = vmatprep.subr.bf16.mxu0 %v8032_v24  ;;  %4223 = vmatprep.subr.bf16.mxu1 %v8035_v16  ;;  %v8104_v24 = vld [vmem:[#allocation25 + $0x3a4] ss:$16 sps:$4 sm:$0xff]   ;;  %v8107_v16 = vld [vmem:[#allocation25 + $0x3ac] ss:$16 sps:$4 sm:$0xff]  }
 0xf28   :  { %4142 = vmatpush1.bf16.msra.mxu0 %v8030_v27  ;;  %4224 = vmatpush1.bf16.msra.mxu1 %v8033_v31  ;;  %v8105_v27 = vld [vmem:[#allocation25 + $0x3a8] ss:$16 sps:$4 sm:$0xff]   ;;  %v8110_v31 = vld [vmem:[#allocation25 + $0x3c4] ss:$16 sps:$4 sm:$0xff]  }
 0xf29   :  { %4143 = vmatprep.subr.bf16.mxu0 %v8038_v36  ;;  %4225 = vmatprep.subr.bf16.mxu1 %v8041_v39  ;;  %v8113_v36 = vld [vmem:[#allocation25 + $0x3cc] ss:$16 sps:$4 sm:$0xff]   ;;  %v8108_v39 = vld [vmem:[#allocation25 + $0x3c0] ss:$16 sps:$4 sm:$0xff]  }
 0xf2c   :  { %4144 = vmatpush1.bf16.msra.mxu0 %v8036_v63  ;;  %4226 = vmatpush1.bf16.msra.mxu1 %v8039_v41  ;;  %v8111_v63 = vld [vmem:[#allocation25 + $0x3c8] ss:$16 sps:$4 sm:$0xff]   ;;  %v8116_v41 = vld [vmem:[#allocation25 + $0x3e4] ss:$16 sps:$4 sm:$0xff]  }
 0xf2d   :  { %4145 = vmatprep.subr.bf16.mxu0 %v8044_v5  ;;  %4227 = vmatprep.subr.bf16.mxu1 %v8047_v20  ;;  %v8119_v5 = vld [vmem:[#allocation25 + $0x3ec] ss:$16 sps:$4 sm:$0xff]   ;;  %v8114_v20 = vld [vmem:[#allocation25 + $0x3e0] ss:$16 sps:$4 sm:$0xff]  }
 0xf30   :  { %4146 = vmatpush1.bf16.msra.mxu0 %v8042_v42  ;;  %4228 = vmatpush1.bf16.msra.mxu1 %v8045_v22  ;;  %v8117_v42 = vld [vmem:[#allocation25 + $0x3e8] ss:$16 sps:$4 sm:$0xff]   ;;  %v3301_v22 = vmax.f32 %v9039_v15, 0.0 }
 0xf31   :  { %4147 = vmatprep.subr.bf16.mxu0 %v8050_v4  ;;  %4229 = vmatprep.subr.bf16.mxu1 %v8053_v45  ;;  %v3436_v45 = vld [vmem:[#allocation6 + $0x101] ss:$8 sm:$0xf] }
 0xf32   :  { %v3433_v4 = vpack.c.bf16 %v3301_v22, %v3301_v22 }
 0xf34   :  { %4148 = vmatpush1.bf16.msra.mxu0 %v8048_v46  ;;  %4230 = vmatpush1.bf16.msra.mxu1 %v8051_v47  ;;  %v3441_v46 = vrot.slane %v3436_v45, %v8855_v8  ;;  %v3449_v47 = vrot.slane %v3436_v45, %v8861_v10 }
 0xf35   :  { %4149 = vmatprep.subr.bf16.mxu0 %v8056_v48  ;;  %4231 = vmatprep.subr.bf16.mxu1 %v8059_v49  ;;  %v3445_v48 = vrot.slane %v3436_v45, %v8858_v9  ;;  %v3453_v49 = vrot.slane %v3436_v45, %v8895_v56 }
 0xf38   :  { %4150 = vmatpush1.bf16.msra.mxu0 %v8054_v50  ;;  %4232 = vmatpush1.bf16.msra.mxu1 %v8057_v51 }
 0xf39   :  { %4151 = vmatprep.subr.bf16.mxu0 %v8062_v52  ;;  %4233 = vmatprep.subr.bf16.mxu1 %v8065_v53 }
 0xf3c   :  { %4152 = vmatpush1.bf16.msra.mxu0 %v8060_v54  ;;  %4234 = vmatpush1.bf16.msra.mxu1 %v8063_v55 }
 0xf3d   :  { %4153 = vmatprep.subr.bf16.mxu0 %v8068_v57  ;;  %4235 = vmatprep.subr.bf16.mxu1 %v8071_v58 }
 0xf40   :  { %4154 = vmatpush1.bf16.msra.mxu0 %v8066_v59  ;;  %4236 = vmatpush1.bf16.msra.mxu1 %v8069_v60 }
 0xf41   :  { %4155 = vmatprep.subr.bf16.mxu0 %v8074_v61  ;;  %4237 = vmatprep.subr.bf16.mxu1 %v8077_v62 }
 0xf44   :  { %4156 = vmatpush1.bf16.msra.mxu0 %v8072_v1  ;;  %4238 = vmatpush1.bf16.msra.mxu1 %v8075_v43 }
 0xf45   :  { %4157 = vmatprep.subr.bf16.mxu0 %v8080_v2  ;;  %4239 = vmatprep.subr.bf16.mxu1 %v8083_v11 }
 0xf48   :  { %4158 = vmatpush1.bf16.msra.mxu0 %v8078_v26  ;;  %4240 = vmatpush1.bf16.msra.mxu1 %v8081_v12 }
 0xf49   :  { %4159 = vmatprep.subr.bf16.mxu0 %v8086_v32  ;;  %4241 = vmatprep.subr.bf16.mxu1 %v8089_v13 }
 0xf4c   :  { %4160 = vmatpush1.bf16.msra.mxu0 %v8084_v35  ;;  %4242 = vmatpush1.bf16.msra.mxu1 %v8087_v14 }
 0xf4d   :  { %4161 = vmatprep.subr.bf16.mxu0 %v8092_v44  ;;  %4243 = vmatprep.subr.bf16.mxu1 %v8095_v17 }
 0xf50   :  { %4162 = vmatpush1.bf16.msra.mxu0 %v8090_v18  ;;  %4244 = vmatpush1.bf16.msra.mxu1 %v8093_v7 }
 0xf51   :  { %4163 = vmatprep.subr.bf16.mxu0 %v8098_v19  ;;  %4245 = vmatprep.subr.bf16.mxu1 %v8101_v21 }
 0xf54   :  { %4164 = vmatpush1.bf16.msra.mxu0 %v8096_v0  ;;  %4246 = vmatpush1.bf16.msra.mxu1 %v8099_v23 }
 0xf55   :  { %4165 = vmatprep.subr.bf16.mxu0 %v8104_v24  ;;  %4247 = vmatprep.subr.bf16.mxu1 %v8107_v16 }
 0xf58   :  { %4166 = vmatpush1.bf16.msra.mxu0 %v8102_v25  ;;  %4248 = vmatpush1.bf16.msra.mxu1 %v8105_v27 }
 0xf59   :  { %4167 = vmatprep.subr.bf16.mxu0 %v8110_v31  ;;  %4249 = vmatprep.subr.bf16.mxu1 %v8113_v36 }
 0xf5c   :  { %4168 = vmatpush1.bf16.msra.mxu0 %v8108_v39  ;;  %4250 = vmatpush1.bf16.msra.mxu1 %v8111_v63 }
 0xf5d   :  { %4169 = vmatprep.subr.bf16.mxu0 %v8116_v41  ;;  %4251 = vmatprep.subr.bf16.mxu1 %v8119_v5 }
 0xf60   :  { %4170 = vmatpush1.bf16.msra.mxu0 %v8114_v20  ;;  %4252 = vmatpush1.bf16.msra.mxu1 %v8117_v42 }
 0xf63   :  { %4172 = vmatmul.mubr.bf16.vlgmr.msra.gmra.mrb[24].mxu0 %v3433_v4  ;;  %4254 = vmatmul.mubr.bf16.vlgmr.msra.gmra.mrb[24].mxu1 %v3433_v4 }
0x1036   :  { %v4173_v50 = vpop.f32.mrb[24].mxu0  ;;  %v4255_v51 = vpop.f32.mrb[24].mxu1 }
0x1037   :  { %v9046_v52 = vadd.f32 %v4173_v50, %v3441_v46  ;;  %v9048_v53 = vadd.f32 %v4255_v51, %v3449_v47  ;;  %v4175_v15 = vpop.f32.mrb[25].mxu0  ;;  %v4257_v54 = vpop.f32.mrb[25].mxu1 }
0x1038   :  { %v7391_v55 = vadd.f32 %v4175_v15, %v3445_v48  ;;  %v7393_v57 = vadd.f32 %v4257_v54, %v3453_v49  ;;  %v4177_v58 = vpop.f32.mrb[26].mxu0  ;;  %v4259_v59 = vpop.f32.mrb[26].mxu1 }
0x1039   :  { %v4262_v60 = vmax.f32 %v9046_v52, 0.0  ;;  %v4264_v61 = vmax.f32 %v9048_v53, 0.0  ;;  %v4178_v62 = vpop.f32.mrb[27].mxu0  ;;  %v4260_v1 = vpop.f32.mrb[27].mxu1 }
0x103a   :  { %v4263_v43 = vmax.f32 %v7391_v55, 0.0  ;;  %v4265_v2 = vmax.f32 %v7393_v57, 0.0 }
0x103b   :  { %8454 = dma.done.wait [#allocation5], 65536 }
0x103c   :  { %8455 = vsyncadd [#allocation5], 4294901760  ;;  %v9052_v11 = vpack.c.bf16 %v4263_v43, %v4263_v43  ;;  %v9054_v26 = vpack.c.bf16 %v4265_v2, %v4265_v2  ;;  %v4535_v12 = vld [vmem:[#allocation2 + $0x808] sm:$0xff]  ;;  %v4534_v13 = vld [vmem:[#allocation2 + $0x800] sm:$0xff] }
0x103d   :  { %v4663_v32 = vld [vmem:[#allocation2 + $0xc08] sm:$0xff]  ;;  %4790 = vmatprep.subr.bf16.mxu0 %v4535_v12  ;;  %v4662_v35 = vld [vmem:[#allocation2 + $0xc00] sm:$0xff]  ;;  %v4544_v52 = vld [vmem:[#allocation2 + $0x850] sm:$0xff] }
0x103e   :  { %4822 = vmatprep.mubr.bf16.mxu0 %v9052_v11  ;;  %4863 = vmatprep.mubr.bf16.mxu1 %v9054_v26  ;;  %v4543_v14 = vld [vmem:[#allocation2 + $0x848] sm:$0xff]  ;;  %v4542_v17 = vld [vmem:[#allocation2 + $0x840] sm:$0xff]  ;;  %v4672_v53 = vld [vmem:[#allocation2 + $0xc50] sm:$0xff] }
0x103f   :  { %4831 = vmatprep.subr.bf16.mxu1 %v4663_v32  ;;  %v4671_v44 = vld [vmem:[#allocation2 + $0xc48] sm:$0xff]  ;;  %4791 = vmatpush1.bf16.msra.mxu0 %v4534_v13  ;;  %v4670_v18 = vld [vmem:[#allocation2 + $0xc40] sm:$0xff]  ;;  %v4284_v29 = vld [vmem:[#allocation2 + $0x50] sm:$0xff] }
0x1040   :  { %4832 = vmatpush1.bf16.msra.mxu1 %v4662_v35  ;;  %4792 = vmatprep.subr.bf16.mxu0 %v4543_v14  ;;  %v4551_v7 = vld [vmem:[#allocation2 + $0x888] sm:$0xff]  ;;  %v4550_v21 = vld [vmem:[#allocation2 + $0x880] sm:$0xff]  ;;  %v4412_v30 = vld [vmem:[#allocation2 + $0x450] sm:$0xff] }
0x1041   :  { %4833 = vmatprep.subr.bf16.mxu1 %v4671_v44  ;;  %v4679_v19 = vld [vmem:[#allocation2 + $0xc88] sm:$0xff]  ;;  %v4678_v0 = vld [vmem:[#allocation2 + $0xc80] sm:$0xff] }
0x1042   :  { %v4559_v23 = vld [vmem:[#allocation2 + $0x8c8] sm:$0xff]  ;;  %v4558_v16 = vld [vmem:[#allocation2 + $0x8c0] sm:$0xff] }
0x1043   :  { %4793 = vmatpush1.bf16.msra.mxu0 %v4542_v17  ;;  %v4687_v24 = vld [vmem:[#allocation2 + $0xcc8] sm:$0xff]  ;;  %v4686_v25 = vld [vmem:[#allocation2 + $0xcc0] sm:$0xff] }
0x1044   :  { %4834 = vmatpush1.bf16.msra.mxu1 %v4670_v18  ;;  %4794 = vmatprep.subr.bf16.mxu0 %v4551_v7  ;;  %v4567_v27 = vld [vmem:[#allocation2 + $0x908] sm:$0xff]  ;;  %v4566_v36 = vld [vmem:[#allocation2 + $0x900] sm:$0xff] }
0x1045   :  { %4835 = vmatprep.subr.bf16.mxu1 %v4679_v19  ;;  %v4695_v31 = vld [vmem:[#allocation2 + $0xd08] sm:$0xff]  ;;  %v4694_v39 = vld [vmem:[#allocation2 + $0xd00] sm:$0xff] }
0x1046   :  { %v4575_v63 = vld [vmem:[#allocation2 + $0x948] sm:$0xff]  ;;  %v4574_v5 = vld [vmem:[#allocation2 + $0x940] sm:$0xff] }
0x1047   :  { %4795 = vmatpush1.bf16.msra.mxu0 %v4550_v21  ;;  %v4703_v41 = vld [vmem:[#allocation2 + $0xd48] sm:$0xff]  ;;  %v4702_v20 = vld [vmem:[#allocation2 + $0xd40] sm:$0xff] }
0x1048   :  { %4836 = vmatpush1.bf16.msra.mxu1 %v4678_v0  ;;  %4796 = vmatprep.subr.bf16.mxu0 %v4559_v23  ;;  %v4583_v42 = vld [vmem:[#allocation2 + $0x988] sm:$0xff]  ;;  %v4582_v4 = vld [vmem:[#allocation2 + $0x980] sm:$0xff] }
0x1049   :  { %4837 = vmatprep.subr.bf16.mxu1 %v4687_v24  ;;  %v4711_v22 = vld [vmem:[#allocation2 + $0xd88] sm:$0xff]  ;;  %v4710_v45 = vld [vmem:[#allocation2 + $0xd80] sm:$0xff] }
0x104a   :  { %v4591_v46 = vld [vmem:[#allocation2 + $0x9c8] sm:$0xff]  ;;  %v4590_v48 = vld [vmem:[#allocation2 + $0x9c0] sm:$0xff] }
0x104b   :  { %4797 = vmatpush1.bf16.msra.mxu0 %v4558_v16  ;;  %v4719_v47 = vld [vmem:[#allocation2 + $0xdc8] sm:$0xff]  ;;  %v4718_v49 = vld [vmem:[#allocation2 + $0xdc0] sm:$0xff] }
0x104c   :  { %4838 = vmatpush1.bf16.msra.mxu1 %v4686_v25  ;;  %4798 = vmatprep.subr.bf16.mxu0 %v4567_v27  ;;  %v4599_v50 = vld [vmem:[#allocation2 + $0xa08] sm:$0xff]  ;;  %v4598_v15 = vld [vmem:[#allocation2 + $0xa00] sm:$0xff] }
0x104d   :  { %4839 = vmatprep.subr.bf16.mxu1 %v4695_v31  ;;  %v4727_v51 = vld [vmem:[#allocation2 + $0xe08] sm:$0xff]  ;;  %v4726_v54 = vld [vmem:[#allocation2 + $0xe00] sm:$0xff] }
0x104e   :  { %v4607_v55 = vld [vmem:[#allocation2 + $0xa48] sm:$0xff]  ;;  %v4606_v58 = vld [vmem:[#allocation2 + $0xa40] sm:$0xff] }
0x104f   :  { %4799 = vmatpush1.bf16.msra.mxu0 %v4566_v36  ;;  %v4735_v57 = vld [vmem:[#allocation2 + $0xe48] sm:$0xff]  ;;  %v4734_v59 = vld [vmem:[#allocation2 + $0xe40] sm:$0xff] }
0x1050   :  { %4840 = vmatpush1.bf16.msra.mxu1 %v4694_v39  ;;  %4800 = vmatprep.subr.bf16.mxu0 %v4575_v63  ;;  %v4615_v62 = vld [vmem:[#allocation2 + $0xa88] sm:$0xff]  ;;  %v4614_v43 = vld [vmem:[#allocation2 + $0xa80] sm:$0xff]  ;;  %v4537_v63 = vld [vmem:[#allocation2 + $0x818] sm:$0xff] }
0x1051   :  { %4841 = vmatprep.subr.bf16.mxu1 %v4703_v41  ;;  %v4743_v1 = vld [vmem:[#allocation2 + $0xe88] sm:$0xff]  ;;  %v4742_v2 = vld [vmem:[#allocation2 + $0xe80] sm:$0xff]  ;;  %v4665_v41 = vld [vmem:[#allocation2 + $0xc18] sm:$0xff] }
0x1052   :  { %v4623_v12 = vld [vmem:[#allocation2 + $0xac8] sm:$0xff]  ;;  %v4622_v13 = vld [vmem:[#allocation2 + $0xac0] sm:$0xff] }
0x1053   :  { %4801 = vmatpush1.bf16.msra.mxu0 %v4574_v5  ;;  %v4751_v32 = vld [vmem:[#allocation2 + $0xec8] sm:$0xff]  ;;  %v4750_v35 = vld [vmem:[#allocation2 + $0xec0] sm:$0xff]  ;;  %v9061_v5 = vpack.c.bf16 %v4262_v60, %v4262_v60  ;;  %v4553_v60 = vld [vmem:[#allocation2 + $0x898] sm:$0xff] }
0x1054   :  { %4842 = vmatpush1.bf16.msra.mxu1 %v4702_v20  ;;  %4802 = vmatprep.subr.bf16.mxu0 %v4583_v42  ;;  %v4631_v14 = vld [vmem:[#allocation2 + $0xb08] sm:$0xff]  ;;  %v4630_v17 = vld [vmem:[#allocation2 + $0xb00] sm:$0xff]  ;;  %v9066_v20 = vpack.c.bf16 %v4264_v61, %v4264_v61  ;;  %v4536_v42 = vld [vmem:[#allocation2 + $0x810] sm:$0xff] }
0x1055   :  { %4843 = vmatprep.subr.bf16.mxu1 %v4711_v22  ;;  %v4759_v44 = vld [vmem:[#allocation2 + $0xf08] sm:$0xff]  ;;  %v4758_v18 = vld [vmem:[#allocation2 + $0xf00] sm:$0xff]  ;;  %v4664_v22 = vld [vmem:[#allocation2 + $0xc10] sm:$0xff] }
0x1056   :  { %v4639_v7 = vld [vmem:[#allocation2 + $0xb48] sm:$0xff]  ;;  %v4638_v21 = vld [vmem:[#allocation2 + $0xb40] sm:$0xff]  ;;  %v4681_v61 = vld [vmem:[#allocation2 + $0xc98] sm:$0xff] }
0x1057   :  { %4803 = vmatpush1.bf16.msra.mxu0 %v4582_v4  ;;  %v4767_v19 = vld [vmem:[#allocation2 + $0xf48] sm:$0xff]  ;;  %v4766_v0 = vld [vmem:[#allocation2 + $0xf40] sm:$0xff]  ;;  %v4545_v4 = vld [vmem:[#allocation2 + $0x858] sm:$0xff] }
0x1058   :  { %4844 = vmatpush1.bf16.msra.mxu1 %v4710_v45  ;;  %4804 = vmatprep.subr.bf16.mxu0 %v4591_v46  ;;  %v4647_v23 = vld [vmem:[#allocation2 + $0xb88] sm:$0xff]  ;;  %v4646_v16 = vld [vmem:[#allocation2 + $0xb80] sm:$0xff]  ;;  %v4673_v45 = vld [vmem:[#allocation2 + $0xc58] sm:$0xff] }
0x1059   :  { %4845 = vmatprep.subr.bf16.mxu1 %v4719_v47  ;;  %v4775_v24 = vld [vmem:[#allocation2 + $0xf88] sm:$0xff]  ;;  %v4774_v25 = vld [vmem:[#allocation2 + $0xf80] sm:$0xff]  ;;  %v4552_v46 = vld [vmem:[#allocation2 + $0x890] sm:$0xff] }
0x105a   :  { %v4655_v27 = vld [vmem:[#allocation2 + $0xbc8] sm:$0xff]  ;;  %v4654_v36 = vld [vmem:[#allocation2 + $0xbc0] sm:$0xff]  ;;  %v4680_v47 = vld [vmem:[#allocation2 + $0xc90] sm:$0xff] }
0x105b   :  { %4805 = vmatpush1.bf16.msra.mxu0 %v4590_v48  ;;  %v4783_v31 = vld [vmem:[#allocation2 + $0xfc8] sm:$0xff]  ;;  %v4782_v39 = vld [vmem:[#allocation2 + $0xfc0] sm:$0xff]  ;;  %v4561_v48 = vld [vmem:[#allocation2 + $0x8d8] sm:$0xff] }
0x105c   :  { %4846 = vmatpush1.bf16.msra.mxu1 %v4718_v49  ;;  %4806 = vmatprep.subr.bf16.mxu0 %v4599_v50  ;;  %v4689_v49 = vld [vmem:[#allocation2 + $0xcd8] sm:$0xff]  ;;  %v4560_v50 = vld [vmem:[#allocation2 + $0x8d0] sm:$0xff]  ;;  %v4419_v33 = vld [vmem:[#allocation2 + $0x488] sm:$0xff] }
0x105d   :  { %4847 = vmatprep.subr.bf16.mxu1 %v4727_v51  ;;  %v4688_v51 = vld [vmem:[#allocation2 + $0xcd0] sm:$0xff]  ;;  %v4290_v34 = vld [vmem:[#allocation2 + $0x80] sm:$0xff] }
0x105f   :  { %4807 = vmatpush1.bf16.msra.mxu0 %v4598_v15  ;;  %v4569_v15 = vld [vmem:[#allocation2 + $0x918] sm:$0xff] }
0x1060   :  { %4848 = vmatpush1.bf16.msra.mxu1 %v4726_v54  ;;  %4808 = vmatprep.subr.bf16.mxu0 %v4607_v55  ;;  %v4697_v54 = vld [vmem:[#allocation2 + $0xd18] sm:$0xff]  ;;  %v4568_v55 = vld [vmem:[#allocation2 + $0x910] sm:$0xff] }
0x1061   :  { %4849 = vmatprep.subr.bf16.mxu1 %v4735_v57  ;;  %v4696_v57 = vld [vmem:[#allocation2 + $0xd10] sm:$0xff] }
0x1063   :  { %4809 = vmatpush1.bf16.msra.mxu0 %v4606_v58  ;;  %v4577_v58 = vld [vmem:[#allocation2 + $0x958] sm:$0xff] }
0x1064   :  { %4850 = vmatpush1.bf16.msra.mxu1 %v4734_v59  ;;  %4810 = vmatprep.subr.bf16.mxu0 %v4615_v62  ;;  %v4705_v59 = vld [vmem:[#allocation2 + $0xd58] sm:$0xff]  ;;  %v4576_v62 = vld [vmem:[#allocation2 + $0x950] sm:$0xff] }
0x1065   :  { %4851 = vmatprep.subr.bf16.mxu1 %v4743_v1  ;;  %v4704_v1 = vld [vmem:[#allocation2 + $0xd50] sm:$0xff] }
0x1067   :  { %4811 = vmatpush1.bf16.msra.mxu0 %v4614_v43  ;;  %v4585_v43 = vld [vmem:[#allocation2 + $0x998] sm:$0xff] }
0x1068   :  { %4852 = vmatpush1.bf16.msra.mxu1 %v4742_v2  ;;  %4812 = vmatprep.subr.bf16.mxu0 %v4623_v12  ;;  %v4713_v2 = vld [vmem:[#allocation2 + $0xd98] sm:$0xff]  ;;  %v4584_v12 = vld [vmem:[#allocation2 + $0x990] sm:$0xff] }
0x1069   :  { %4853 = vmatprep.subr.bf16.mxu1 %v4751_v32  ;;  %v4712_v32 = vld [vmem:[#allocation2 + $0xd90] sm:$0xff] }
0x106b   :  { %4813 = vmatpush1.bf16.msra.mxu0 %v4622_v13  ;;  %v4593_v13 = vld [vmem:[#allocation2 + $0x9d8] sm:$0xff] }
0x106c   :  { %4854 = vmatpush1.bf16.msra.mxu1 %v4750_v35  ;;  %4814 = vmatprep.subr.bf16.mxu0 %v4631_v14  ;;  %v4721_v35 = vld [vmem:[#allocation2 + $0xdd8] sm:$0xff]  ;;  %v4592_v14 = vld [vmem:[#allocation2 + $0x9d0] sm:$0xff] }
0x106d   :  { %4855 = vmatprep.subr.bf16.mxu1 %v4759_v44  ;;  %v4720_v44 = vld [vmem:[#allocation2 + $0xdd0] sm:$0xff] }
0x106f   :  { %4815 = vmatpush1.bf16.msra.mxu0 %v4630_v17  ;;  %v4601_v17 = vld [vmem:[#allocation2 + $0xa18] sm:$0xff] }
0x1070   :  { %4856 = vmatpush1.bf16.msra.mxu1 %v4758_v18  ;;  %4816 = vmatprep.subr.bf16.mxu0 %v4639_v7  ;;  %v4729_v18 = vld [vmem:[#allocation2 + $0xe18] sm:$0xff]  ;;  %v4600_v7 = vld [vmem:[#allocation2 + $0xa10] sm:$0xff] }
0x1071   :  { %4857 = vmatprep.subr.bf16.mxu1 %v4767_v19  ;;  %v4728_v19 = vld [vmem:[#allocation2 + $0xe10] sm:$0xff] }
0x1073   :  { %4817 = vmatpush1.bf16.msra.mxu0 %v4638_v21  ;;  %v4609_v21 = vld [vmem:[#allocation2 + $0xa58] sm:$0xff] }
0x1074   :  { %4858 = vmatpush1.bf16.msra.mxu1 %v4766_v0  ;;  %4818 = vmatprep.subr.bf16.mxu0 %v4647_v23  ;;  %v4737_v0 = vld [vmem:[#allocation2 + $0xe58] sm:$0xff]  ;;  %v4608_v23 = vld [vmem:[#allocation2 + $0xa50] sm:$0xff] }
0x1075   :  { %4859 = vmatprep.subr.bf16.mxu1 %v4775_v24  ;;  %v4736_v24 = vld [vmem:[#allocation2 + $0xe50] sm:$0xff] }
0x1077   :  { %4819 = vmatpush1.bf16.msra.mxu0 %v4646_v16  ;;  %v4617_v16 = vld [vmem:[#allocation2 + $0xa98] sm:$0xff] }
0x1078   :  { %4860 = vmatpush1.bf16.msra.mxu1 %v4774_v25  ;;  %4820 = vmatprep.subr.bf16.mxu0 %v4655_v27  ;;  %v4745_v25 = vld [vmem:[#allocation2 + $0xe98] sm:$0xff]  ;;  %v4616_v27 = vld [vmem:[#allocation2 + $0xa90] sm:$0xff] }
0x1079   :  { %4861 = vmatprep.subr.bf16.mxu1 %v4783_v31  ;;  %v4744_v31 = vld [vmem:[#allocation2 + $0xe90] sm:$0xff] }
0x107b   :  { %4821 = vmatpush1.bf16.msra.mxu0 %v4654_v36  ;;  %v4625_v36 = vld [vmem:[#allocation2 + $0xad8] sm:$0xff] }
0x107c   :  { %4862 = vmatpush1.bf16.msra.mxu1 %v4782_v39  ;;  %4872 = vmatprep.subr.bf16.mxu0 %v4537_v63  ;;  %v4753_v39 = vld [vmem:[#allocation2 + $0xed8] sm:$0xff]  ;;  %v4624_v63 = vld [vmem:[#allocation2 + $0xad0] sm:$0xff] }
0x107d   :  { %4913 = vmatprep.subr.bf16.mxu1 %v4665_v41  ;;  %v4752_v41 = vld [vmem:[#allocation2 + $0xed0] sm:$0xff] }
0x107e   :  { %4823 = vmatmul.mubr.bf16.vlgmr.msra.gmra.mrb[28].mxu0 %v9061_v5 }
0x107f   :  { %4864 = vmatmul.mubr.bf16.vlgmr.msra.gmra.mrb[28].mxu1 %v9066_v20  ;;  %4873 = vmatpush1.bf16.msra.mxu0 %v4536_v42  ;;  %v4633_v42 = vld [vmem:[#allocation2 + $0xb18] sm:$0xff] }
0x1080   :  { %4914 = vmatpush1.bf16.msra.mxu1 %v4664_v22  ;;  %4874 = vmatprep.subr.bf16.mxu0 %v4545_v4  ;;  %v4761_v22 = vld [vmem:[#allocation2 + $0xf18] sm:$0xff]  ;;  %v4632_v4 = vld [vmem:[#allocation2 + $0xb10] sm:$0xff] }
0x1081   :  { %4915 = vmatprep.subr.bf16.mxu1 %v4673_v45  ;;  %4904 = vmatprep.mubr.bf16.mxu0 %v9052_v11  ;;  %v4760_v45 = vld [vmem:[#allocation2 + $0xf10] sm:$0xff] }
0x1082   :  { %4945 = vmatprep.mubr.bf16.mxu1 %v9054_v26 }
0x1083   :  { %4875 = vmatpush1.bf16.msra.mxu0 %v4544_v52  ;;  %v4641_v52 = vld [vmem:[#allocation2 + $0xb58] sm:$0xff] }
0x1084   :  { %4916 = vmatpush1.bf16.msra.mxu1 %v4672_v53  ;;  %4876 = vmatprep.subr.bf16.mxu0 %v4553_v60  ;;  %v4769_v53 = vld [vmem:[#allocation2 + $0xf58] sm:$0xff]  ;;  %v4640_v60 = vld [vmem:[#allocation2 + $0xb50] sm:$0xff] }
0x1085   :  { %4917 = vmatprep.subr.bf16.mxu1 %v4681_v61  ;;  %v4768_v61 = vld [vmem:[#allocation2 + $0xf50] sm:$0xff] }
0x1087   :  { %4877 = vmatpush1.bf16.msra.mxu0 %v4552_v46  ;;  %v4649_v46 = vld [vmem:[#allocation2 + $0xb98] sm:$0xff] }
0x1088   :  { %4918 = vmatpush1.bf16.msra.mxu1 %v4680_v47  ;;  %4878 = vmatprep.subr.bf16.mxu0 %v4561_v48  ;;  %v4777_v47 = vld [vmem:[#allocation2 + $0xf98] sm:$0xff]  ;;  %v4648_v48 = vld [vmem:[#allocation2 + $0xb90] sm:$0xff] }
0x1089   :  { %4919 = vmatprep.subr.bf16.mxu1 %v4689_v49  ;;  %v4776_v49 = vld [vmem:[#allocation2 + $0xf90] sm:$0xff] }
0x108b   :  { %4879 = vmatpush1.bf16.msra.mxu0 %v4560_v50  ;;  %v4657_v50 = vld [vmem:[#allocation2 + $0xbd8] sm:$0xff] }
0x108c   :  { %4920 = vmatpush1.bf16.msra.mxu1 %v4688_v51  ;;  %4880 = vmatprep.subr.bf16.mxu0 %v4569_v15  ;;  %v4785_v51 = vld [vmem:[#allocation2 + $0xfd8] sm:$0xff]  ;;  %v4656_v15 = vld [vmem:[#allocation2 + $0xbd0] sm:$0xff] }
0x108d   :  { %4921 = vmatprep.subr.bf16.mxu1 %v4697_v54  ;;  %v4784_v54 = vld [vmem:[#allocation2 + $0xfd0] sm:$0xff] }
0x108f   :  { %4881 = vmatpush1.bf16.msra.mxu0 %v4568_v55  ;;  %v4539_v55 = vld [vmem:[#allocation2 + $0x828] sm:$0xff] }
0x1090   :  { %4922 = vmatpush1.bf16.msra.mxu1 %v4696_v57  ;;  %4882 = vmatprep.subr.bf16.mxu0 %v4577_v58  ;;  %v4667_v57 = vld [vmem:[#allocation2 + $0xc28] sm:$0xff]  ;;  %v4538_v58 = vld [vmem:[#allocation2 + $0x820] sm:$0xff] }
0x1091   :  { %4923 = vmatprep.subr.bf16.mxu1 %v4705_v59  ;;  %v4666_v59 = vld [vmem:[#allocation2 + $0xc20] sm:$0xff] }
0x1093   :  { %4883 = vmatpush1.bf16.msra.mxu0 %v4576_v62  ;;  %v4547_v62 = vld [vmem:[#allocation2 + $0x868] sm:$0xff] }
0x1094   :  { %4924 = vmatpush1.bf16.msra.mxu1 %v4704_v1  ;;  %4884 = vmatprep.subr.bf16.mxu0 %v4585_v43  ;;  %v4675_v1 = vld [vmem:[#allocation2 + $0xc68] sm:$0xff]  ;;  %v4546_v43 = vld [vmem:[#allocation2 + $0x860] sm:$0xff] }
0x1095   :  { %4925 = vmatprep.subr.bf16.mxu1 %v4713_v2  ;;  %v4674_v2 = vld [vmem:[#allocation2 + $0xc60] sm:$0xff] }
0x1097   :  { %4885 = vmatpush1.bf16.msra.mxu0 %v4584_v12  ;;  %v4555_v12 = vld [vmem:[#allocation2 + $0x8a8] sm:$0xff] }
0x1098   :  { %4926 = vmatpush1.bf16.msra.mxu1 %v4712_v32  ;;  %4886 = vmatprep.subr.bf16.mxu0 %v4593_v13  ;;  %v4683_v32 = vld [vmem:[#allocation2 + $0xca8] sm:$0xff]  ;;  %v4554_v13 = vld [vmem:[#allocation2 + $0x8a0] sm:$0xff] }
0x1099   :  { %4927 = vmatprep.subr.bf16.mxu1 %v4721_v35  ;;  %v4682_v35 = vld [vmem:[#allocation2 + $0xca0] sm:$0xff] }
0x109b   :  { %4887 = vmatpush1.bf16.msra.mxu0 %v4592_v14  ;;  %v4563_v14 = vld [vmem:[#allocation2 + $0x8e8] sm:$0xff] }
0x109c   :  { %4928 = vmatpush1.bf16.msra.mxu1 %v4720_v44  ;;  %4888 = vmatprep.subr.bf16.mxu0 %v4601_v17  ;;  %v4691_v44 = vld [vmem:[#allocation2 + $0xce8] sm:$0xff]  ;;  %v4562_v17 = vld [vmem:[#allocation2 + $0x8e0] sm:$0xff] }
0x109d   :  { %4929 = vmatprep.subr.bf16.mxu1 %v4729_v18  ;;  %v4690_v18 = vld [vmem:[#allocation2 + $0xce0] sm:$0xff] }
0x109f   :  { %4889 = vmatpush1.bf16.msra.mxu0 %v4600_v7  ;;  %v4571_v7 = vld [vmem:[#allocation2 + $0x928] sm:$0xff] }
0x10a0   :  { %4930 = vmatpush1.bf16.msra.mxu1 %v4728_v19  ;;  %4890 = vmatprep.subr.bf16.mxu0 %v4609_v21  ;;  %v4699_v19 = vld [vmem:[#allocation2 + $0xd28] sm:$0xff]  ;;  %v4570_v21 = vld [vmem:[#allocation2 + $0x920] sm:$0xff] }
0x10a1   :  { %4931 = vmatprep.subr.bf16.mxu1 %v4737_v0  ;;  %v4698_v0 = vld [vmem:[#allocation2 + $0xd20] sm:$0xff] }
0x10a3   :  { %4891 = vmatpush1.bf16.msra.mxu0 %v4608_v23  ;;  %v4579_v23 = vld [vmem:[#allocation2 + $0x968] sm:$0xff] }
0x10a4   :  { %4932 = vmatpush1.bf16.msra.mxu1 %v4736_v24  ;;  %4892 = vmatprep.subr.bf16.mxu0 %v4617_v16  ;;  %v4707_v24 = vld [vmem:[#allocation2 + $0xd68] sm:$0xff]  ;;  %v4578_v16 = vld [vmem:[#allocation2 + $0x960] sm:$0xff] }
0x10a5   :  { %4933 = vmatprep.subr.bf16.mxu1 %v4745_v25  ;;  %v4706_v25 = vld [vmem:[#allocation2 + $0xd60] sm:$0xff] }
0x10a7   :  { %4893 = vmatpush1.bf16.msra.mxu0 %v4616_v27  ;;  %v4587_v27 = vld [vmem:[#allocation2 + $0x9a8] sm:$0xff] }
0x10a8   :  { %4934 = vmatpush1.bf16.msra.mxu1 %v4744_v31  ;;  %4894 = vmatprep.subr.bf16.mxu0 %v4625_v36  ;;  %v4715_v31 = vld [vmem:[#allocation2 + $0xda8] sm:$0xff]  ;;  %v4586_v36 = vld [vmem:[#allocation2 + $0x9a0] sm:$0xff] }
0x10a9   :  { %4935 = vmatprep.subr.bf16.mxu1 %v4753_v39  ;;  %v4714_v39 = vld [vmem:[#allocation2 + $0xda0] sm:$0xff] }
0x10ab   :  { %4895 = vmatpush1.bf16.msra.mxu0 %v4624_v63  ;;  %v4595_v63 = vld [vmem:[#allocation2 + $0x9e8] sm:$0xff] }
0x10ac   :  { %4936 = vmatpush1.bf16.msra.mxu1 %v4752_v41  ;;  %4896 = vmatprep.subr.bf16.mxu0 %v4633_v42  ;;  %v4723_v41 = vld [vmem:[#allocation2 + $0xde8] sm:$0xff]  ;;  %v4594_v42 = vld [vmem:[#allocation2 + $0x9e0] sm:$0xff] }
0x10ad   :  { %4937 = vmatprep.subr.bf16.mxu1 %v4761_v22  ;;  %v4722_v22 = vld [vmem:[#allocation2 + $0xde0] sm:$0xff] }
0x10af   :  { %4897 = vmatpush1.bf16.msra.mxu0 %v4632_v4  ;;  %v4603_v4 = vld [vmem:[#allocation2 + $0xa28] sm:$0xff] }
0x10b0   :  { %4938 = vmatpush1.bf16.msra.mxu1 %v4760_v45  ;;  %4898 = vmatprep.subr.bf16.mxu0 %v4641_v52  ;;  %v4731_v45 = vld [vmem:[#allocation2 + $0xe28] sm:$0xff]  ;;  %v4602_v52 = vld [vmem:[#allocation2 + $0xa20] sm:$0xff] }
0x10b1   :  { %4939 = vmatprep.subr.bf16.mxu1 %v4769_v53  ;;  %v4730_v53 = vld [vmem:[#allocation2 + $0xe20] sm:$0xff] }
0x10b3   :  { %4899 = vmatpush1.bf16.msra.mxu0 %v4640_v60  ;;  %v4611_v60 = vld [vmem:[#allocation2 + $0xa68] sm:$0xff] }
0x10b4   :  { %4940 = vmatpush1.bf16.msra.mxu1 %v4768_v61  ;;  %4900 = vmatprep.subr.bf16.mxu0 %v4649_v46  ;;  %v4739_v61 = vld [vmem:[#allocation2 + $0xe68] sm:$0xff]  ;;  %v4610_v46 = vld [vmem:[#allocation2 + $0xa60] sm:$0xff] }
0x10b5   :  { %4941 = vmatprep.subr.bf16.mxu1 %v4777_v47  ;;  %v4738_v47 = vld [vmem:[#allocation2 + $0xe60] sm:$0xff] }
0x10b7   :  { %4901 = vmatpush1.bf16.msra.mxu0 %v4648_v48  ;;  %v4619_v48 = vld [vmem:[#allocation2 + $0xaa8] sm:$0xff] }
0x10b8   :  { %4942 = vmatpush1.bf16.msra.mxu1 %v4776_v49  ;;  %4902 = vmatprep.subr.bf16.mxu0 %v4657_v50  ;;  %v4747_v49 = vld [vmem:[#allocation2 + $0xea8] sm:$0xff]  ;;  %v4618_v50 = vld [vmem:[#allocation2 + $0xaa0] sm:$0xff] }
0x10b9   :  { %4943 = vmatprep.subr.bf16.mxu1 %v4785_v51  ;;  %v4746_v51 = vld [vmem:[#allocation2 + $0xea0] sm:$0xff] }
0x10bb   :  { %4903 = vmatpush1.bf16.msra.mxu0 %v4656_v15  ;;  %v4627_v15 = vld [vmem:[#allocation2 + $0xae8] sm:$0xff] }
0x10bc   :  { %4944 = vmatpush1.bf16.msra.mxu1 %v4784_v54  ;;  %4954 = vmatprep.subr.bf16.mxu0 %v4539_v55  ;;  %v4755_v54 = vld [vmem:[#allocation2 + $0xee8] sm:$0xff]  ;;  %v4626_v55 = vld [vmem:[#allocation2 + $0xae0] sm:$0xff] }
0x10bd   :  { %4995 = vmatprep.subr.bf16.mxu1 %v4667_v57  ;;  %v4754_v57 = vld [vmem:[#allocation2 + $0xee0] sm:$0xff] }
0x10be   :  { %4905 = vmatmul.mubr.bf16.vlgmr.msra.gmra.mrb[32].mxu0 %v9061_v5 }
0x10bf   :  { %4946 = vmatmul.mubr.bf16.vlgmr.msra.gmra.mrb[32].mxu1 %v9066_v20  ;;  %4955 = vmatpush1.bf16.msra.mxu0 %v4538_v58  ;;  %v4635_v58 = vld [vmem:[#allocation2 + $0xb28] sm:$0xff] }
0x10c0   :  { %4996 = vmatpush1.bf16.msra.mxu1 %v4666_v59  ;;  %4956 = vmatprep.subr.bf16.mxu0 %v4547_v62  ;;  %v4763_v59 = vld [vmem:[#allocation2 + $0xf28] sm:$0xff]  ;;  %v4634_v62 = vld [vmem:[#allocation2 + $0xb20] sm:$0xff] }
0x10c1   :  { %4997 = vmatprep.subr.bf16.mxu1 %v4675_v1  ;;  %4986 = vmatprep.mubr.bf16.mxu0 %v9052_v11  ;;  %v4762_v1 = vld [vmem:[#allocation2 + $0xf20] sm:$0xff] }
0x10c2   :  { %5027 = vmatprep.mubr.bf16.mxu1 %v9054_v26 }
0x10c3   :  { %4957 = vmatpush1.bf16.msra.mxu0 %v4546_v43  ;;  %v4643_v43 = vld [vmem:[#allocation2 + $0xb68] sm:$0xff] }
0x10c4   :  { %4998 = vmatpush1.bf16.msra.mxu1 %v4674_v2  ;;  %4958 = vmatprep.subr.bf16.mxu0 %v4555_v12  ;;  %v4771_v2 = vld [vmem:[#allocation2 + $0xf68] sm:$0xff]  ;;  %v4642_v12 = vld [vmem:[#allocation2 + $0xb60] sm:$0xff] }
0x10c5   :  { %4999 = vmatprep.subr.bf16.mxu1 %v4683_v32  ;;  %v4770_v32 = vld [vmem:[#allocation2 + $0xf60] sm:$0xff] }
0x10c7   :  { %4959 = vmatpush1.bf16.msra.mxu0 %v4554_v13  ;;  %v4651_v13 = vld [vmem:[#allocation2 + $0xba8] sm:$0xff] }
0x10c8   :  { %5000 = vmatpush1.bf16.msra.mxu1 %v4682_v35  ;;  %4960 = vmatprep.subr.bf16.mxu0 %v4563_v14  ;;  %v4779_v35 = vld [vmem:[#allocation2 + $0xfa8] sm:$0xff]  ;;  %v4650_v14 = vld [vmem:[#allocation2 + $0xba0] sm:$0xff] }
0x10c9   :  { %5001 = vmatprep.subr.bf16.mxu1 %v4691_v44  ;;  %v4778_v44 = vld [vmem:[#allocation2 + $0xfa0] sm:$0xff] }
0x10cb   :  { %4961 = vmatpush1.bf16.msra.mxu0 %v4562_v17  ;;  %v4659_v17 = vld [vmem:[#allocation2 + $0xbe8] sm:$0xff] }
0x10cc   :  { %5002 = vmatpush1.bf16.msra.mxu1 %v4690_v18  ;;  %4962 = vmatprep.subr.bf16.mxu0 %v4571_v7  ;;  %v4787_v18 = vld [vmem:[#allocation2 + $0xfe8] sm:$0xff]  ;;  %v4658_v7 = vld [vmem:[#allocation2 + $0xbe0] sm:$0xff] }
0x10cd   :  { %5003 = vmatprep.subr.bf16.mxu1 %v4699_v19  ;;  %v4786_v19 = vld [vmem:[#allocation2 + $0xfe0] sm:$0xff] }
0x10cf   :  { %4963 = vmatpush1.bf16.msra.mxu0 %v4570_v21  ;;  %v4541_v21 = vld [vmem:[#allocation2 + $0x838] sm:$0xff] }
0x10d0   :  { %5004 = vmatpush1.bf16.msra.mxu1 %v4698_v0  ;;  %4964 = vmatprep.subr.bf16.mxu0 %v4579_v23  ;;  %v4669_v0 = vld [vmem:[#allocation2 + $0xc38] sm:$0xff]  ;;  %v4540_v23 = vld [vmem:[#allocation2 + $0x830] sm:$0xff] }
0x10d1   :  { %5005 = vmatprep.subr.bf16.mxu1 %v4707_v24  ;;  %v4668_v24 = vld [vmem:[#allocation2 + $0xc30] sm:$0xff] }
0x10d3   :  { %4965 = vmatpush1.bf16.msra.mxu0 %v4578_v16  ;;  %v4549_v16 = vld [vmem:[#allocation2 + $0x878] sm:$0xff] }
0x10d4   :  { %5006 = vmatpush1.bf16.msra.mxu1 %v4706_v25  ;;  %4966 = vmatprep.subr.bf16.mxu0 %v4587_v27  ;;  %v4677_v25 = vld [vmem:[#allocation2 + $0xc78] sm:$0xff]  ;;  %v4548_v27 = vld [vmem:[#allocation2 + $0x870] sm:$0xff] }
0x10d5   :  { %5007 = vmatprep.subr.bf16.mxu1 %v4715_v31  ;;  %v4676_v31 = vld [vmem:[#allocation2 + $0xc70] sm:$0xff] }
0x10d7   :  { %4967 = vmatpush1.bf16.msra.mxu0 %v4586_v36  ;;  %v4557_v36 = vld [vmem:[#allocation2 + $0x8b8] sm:$0xff] }
0x10d8   :  { %5008 = vmatpush1.bf16.msra.mxu1 %v4714_v39  ;;  %4968 = vmatprep.subr.bf16.mxu0 %v4595_v63  ;;  %v4685_v39 = vld [vmem:[#allocation2 + $0xcb8] sm:$0xff]  ;;  %v4556_v63 = vld [vmem:[#allocation2 + $0x8b0] sm:$0xff] }
0x10d9   :  { %5009 = vmatprep.subr.bf16.mxu1 %v4723_v41  ;;  %v4684_v41 = vld [vmem:[#allocation2 + $0xcb0] sm:$0xff] }
0x10db   :  { %4969 = vmatpush1.bf16.msra.mxu0 %v4594_v42  ;;  %v4565_v42 = vld [vmem:[#allocation2 + $0x8f8] sm:$0xff] }
0x10dc   :  { %5010 = vmatpush1.bf16.msra.mxu1 %v4722_v22  ;;  %4970 = vmatprep.subr.bf16.mxu0 %v4603_v4  ;;  %v4693_v22 = vld [vmem:[#allocation2 + $0xcf8] sm:$0xff]  ;;  %v4564_v4 = vld [vmem:[#allocation2 + $0x8f0] sm:$0xff] }
0x10dd   :  { %5011 = vmatprep.subr.bf16.mxu1 %v4731_v45  ;;  %v4692_v45 = vld [vmem:[#allocation2 + $0xcf0] sm:$0xff] }
0x10df   :  { %4971 = vmatpush1.bf16.msra.mxu0 %v4602_v52  ;;  %v4573_v52 = vld [vmem:[#allocation2 + $0x938] sm:$0xff] }
0x10e0   :  { %5012 = vmatpush1.bf16.msra.mxu1 %v4730_v53  ;;  %4972 = vmatprep.subr.bf16.mxu0 %v4611_v60  ;;  %v4701_v53 = vld [vmem:[#allocation2 + $0xd38] sm:$0xff] }
0x10e1   :  { %5013 = vmatprep.subr.bf16.mxu1 %v4739_v61  ;;  %v4581_v60 = vld [vmem:[#allocation2 + $0x978] sm:$0xff] }
0x10e2   :  { %v4709_v61 = vld [vmem:[#allocation2 + $0xd78] sm:$0xff] }
0x10e3   :  { %4973 = vmatpush1.bf16.msra.mxu0 %v4610_v46  ;;  %v4580_v46 = vld [vmem:[#allocation2 + $0x970] sm:$0xff] }
0x10e4   :  { %5014 = vmatpush1.bf16.msra.mxu1 %v4738_v47  ;;  %4974 = vmatprep.subr.bf16.mxu0 %v4619_v48  ;;  %v4708_v47 = vld [vmem:[#allocation2 + $0xd70] sm:$0xff]  ;;  %v4589_v48 = vld [vmem:[#allocation2 + $0x9b8] sm:$0xff] }
0x10e5   :  { %5015 = vmatprep.subr.bf16.mxu1 %v4747_v49  ;;  %v4717_v49 = vld [vmem:[#allocation2 + $0xdb8] sm:$0xff] }
0x10e7   :  { %4975 = vmatpush1.bf16.msra.mxu0 %v4618_v50  ;;  %v4588_v50 = vld [vmem:[#allocation2 + $0x9b0] sm:$0xff] }
0x10e8   :  { %5016 = vmatpush1.bf16.msra.mxu1 %v4746_v51  ;;  %4976 = vmatprep.subr.bf16.mxu0 %v4627_v15  ;;  %v4716_v51 = vld [vmem:[#allocation2 + $0xdb0] sm:$0xff]  ;;  %v4597_v15 = vld [vmem:[#allocation2 + $0x9f8] sm:$0xff] }
0x10e9   :  { %5017 = vmatprep.subr.bf16.mxu1 %v4755_v54  ;;  %v4725_v54 = vld [vmem:[#allocation2 + $0xdf8] sm:$0xff] }
0x10eb   :  { %4977 = vmatpush1.bf16.msra.mxu0 %v4626_v55  ;;  %v4596_v55 = vld [vmem:[#allocation2 + $0x9f0] sm:$0xff] }
0x10ec   :  { %5018 = vmatpush1.bf16.msra.mxu1 %v4754_v57  ;;  %4978 = vmatprep.subr.bf16.mxu0 %v4635_v58  ;;  %v4724_v57 = vld [vmem:[#allocation2 + $0xdf0] sm:$0xff]  ;;  %v4605_v58 = vld [vmem:[#allocation2 + $0xa38] sm:$0xff] }
0x10ed   :  { %5019 = vmatprep.subr.bf16.mxu1 %v4763_v59  ;;  %v4733_v59 = vld [vmem:[#allocation2 + $0xe38] sm:$0xff] }
0x10ef   :  { %4979 = vmatpush1.bf16.msra.mxu0 %v4634_v62  ;;  %v4604_v62 = vld [vmem:[#allocation2 + $0xa30] sm:$0xff] }
0x10f0   :  { %5020 = vmatpush1.bf16.msra.mxu1 %v4762_v1  ;;  %4980 = vmatprep.subr.bf16.mxu0 %v4643_v43  ;;  %v4732_v1 = vld [vmem:[#allocation2 + $0xe30] sm:$0xff]  ;;  %v4613_v43 = vld [vmem:[#allocation2 + $0xa78] sm:$0xff] }
0x10f1   :  { %5021 = vmatprep.subr.bf16.mxu1 %v4771_v2  ;;  %v4741_v2 = vld [vmem:[#allocation2 + $0xe78] sm:$0xff] }
0x10f3   :  { %4981 = vmatpush1.bf16.msra.mxu0 %v4642_v12  ;;  %v4612_v12 = vld [vmem:[#allocation2 + $0xa70] sm:$0xff] }
0x10f4   :  { %5022 = vmatpush1.bf16.msra.mxu1 %v4770_v32  ;;  %4982 = vmatprep.subr.bf16.mxu0 %v4651_v13  ;;  %v4740_v32 = vld [vmem:[#allocation2 + $0xe70] sm:$0xff]  ;;  %v4621_v13 = vld [vmem:[#allocation2 + $0xab8] sm:$0xff] }
0x10f5   :  { %5023 = vmatprep.subr.bf16.mxu1 %v4779_v35  ;;  %v4749_v35 = vld [vmem:[#allocation2 + $0xeb8] sm:$0xff] }
0x10f7   :  { %4983 = vmatpush1.bf16.msra.mxu0 %v4650_v14  ;;  %v4620_v14 = vld [vmem:[#allocation2 + $0xab0] sm:$0xff] }
0x10f8   :  { %5024 = vmatpush1.bf16.msra.mxu1 %v4778_v44  ;;  %4984 = vmatprep.subr.bf16.mxu0 %v4659_v17  ;;  %v4748_v44 = vld [vmem:[#allocation2 + $0xeb0] sm:$0xff]  ;;  %v4629_v17 = vld [vmem:[#allocation2 + $0xaf8] sm:$0xff] }
0x10f9   :  { %5025 = vmatprep.subr.bf16.mxu1 %v4787_v18  ;;  %v4757_v18 = vld [vmem:[#allocation2 + $0xef8] sm:$0xff] }
0x10fb   :  { %4985 = vmatpush1.bf16.msra.mxu0 %v4658_v7  ;;  %v4628_v7 = vld [vmem:[#allocation2 + $0xaf0] sm:$0xff] }
0x10fc   :  { %5026 = vmatpush1.bf16.msra.mxu1 %v4786_v19  ;;  %5036 = vmatprep.subr.bf16.mxu0 %v4541_v21  ;;  %v4756_v19 = vld [vmem:[#allocation2 + $0xef0] sm:$0xff]  ;;  %v4637_v21 = vld [vmem:[#allocation2 + $0xb38] sm:$0xff] }
0x10fd   :  { %5077 = vmatprep.subr.bf16.mxu1 %v4669_v0  ;;  %v4765_v0 = vld [vmem:[#allocation2 + $0xf38] sm:$0xff] }
0x10fe   :  { %4987 = vmatmul.mubr.bf16.vlgmr.msra.gmra.mrb[36].mxu0 %v9061_v5 }
0x10ff   :  { %5028 = vmatmul.mubr.bf16.vlgmr.msra.gmra.mrb[36].mxu1 %v9066_v20  ;;  %5037 = vmatpush1.bf16.msra.mxu0 %v4540_v23  ;;  %v4636_v23 = vld [vmem:[#allocation2 + $0xb30] sm:$0xff] }
0x1100   :  { %5078 = vmatpush1.bf16.msra.mxu1 %v4668_v24  ;;  %5038 = vmatprep.subr.bf16.mxu0 %v4549_v16  ;;  %v4764_v24 = vld [vmem:[#allocation2 + $0xf30] sm:$0xff]  ;;  %v4645_v16 = vld [vmem:[#allocation2 + $0xb78] sm:$0xff] }
0x1101   :  { %5079 = vmatprep.subr.bf16.mxu1 %v4677_v25  ;;  %5068 = vmatprep.mubr.bf16.mxu0 %v9052_v11  ;;  %v4572_v11 = vld [vmem:[#allocation2 + $0x930] sm:$0xff]  ;;  %v4773_v25 = vld [vmem:[#allocation2 + $0xf78] sm:$0xff] }
0x1102   :  { %5109 = vmatprep.mubr.bf16.mxu1 %v9054_v26  ;;  %v4700_v26 = vld [vmem:[#allocation2 + $0xd30] sm:$0xff] }
0x1103   :  { %5039 = vmatpush1.bf16.msra.mxu0 %v4548_v27  ;;  %v4644_v27 = vld [vmem:[#allocation2 + $0xb70] sm:$0xff] }
0x1104   :  { %5080 = vmatpush1.bf16.msra.mxu1 %v4676_v31  ;;  %5040 = vmatprep.subr.bf16.mxu0 %v4557_v36  ;;  %v4772_v31 = vld [vmem:[#allocation2 + $0xf70] sm:$0xff]  ;;  %v4653_v36 = vld [vmem:[#allocation2 + $0xbb8] sm:$0xff] }
0x1105   :  { %5081 = vmatprep.subr.bf16.mxu1 %v4685_v39  ;;  %v4781_v39 = vld [vmem:[#allocation2 + $0xfb8] sm:$0xff] }
0x1107   :  { %5041 = vmatpush1.bf16.msra.mxu0 %v4556_v63  ;;  %v4652_v63 = vld [vmem:[#allocation2 + $0xbb0] sm:$0xff] }
0x1108   :  { %5082 = vmatpush1.bf16.msra.mxu1 %v4684_v41  ;;  %5042 = vmatprep.subr.bf16.mxu0 %v4565_v42  ;;  %v4780_v41 = vld [vmem:[#allocation2 + $0xfb0] sm:$0xff]  ;;  %v4661_v42 = vld [vmem:[#allocation2 + $0xbf8] sm:$0xff] }
0x1109   :  { %5083 = vmatprep.subr.bf16.mxu1 %v4693_v22  ;;  %v4789_v22 = vld [vmem:[#allocation2 + $0xff8] sm:$0xff] }
0x110b   :  { %5043 = vmatpush1.bf16.msra.mxu0 %v4564_v4  ;;  %v4660_v4 = vld [vmem:[#allocation2 + $0xbf0] sm:$0xff] }
0x110c   :  { %5084 = vmatpush1.bf16.msra.mxu1 %v4692_v45  ;;  %5044 = vmatprep.subr.bf16.mxu0 %v4573_v52  ;;  %v4788_v45 = vld [vmem:[#allocation2 + $0xff0] sm:$0xff]  ;;  %v4275_v52 = vld [vmem:[#allocation2 + $0x8] sm:$0xff] }
0x110d   :  { %5085 = vmatprep.subr.bf16.mxu1 %v4701_v53  ;;  %v4403_v53 = vld [vmem:[#allocation2 + $0x408] sm:$0xff] }
0x110f   :  { %5045 = vmatpush1.bf16.msra.mxu0 %v4572_v11  ;;  %v4274_v11 = vld [vmem:[#allocation2] sm:$0xff] }
0x1110   :  { %5086 = vmatpush1.bf16.msra.mxu1 %v4700_v26  ;;  %5046 = vmatprep.subr.bf16.mxu0 %v4581_v60  ;;  %v4402_v26 = vld [vmem:[#allocation2 + $0x400] sm:$0xff]  ;;  %v4283_v60 = vld [vmem:[#allocation2 + $0x48] sm:$0xff] }
0x1111   :  { %5087 = vmatprep.subr.bf16.mxu1 %v4709_v61  ;;  %v4411_v61 = vld [vmem:[#allocation2 + $0x448] sm:$0xff] }
0x1113   :  { %5047 = vmatpush1.bf16.msra.mxu0 %v4580_v46  ;;  %v9083_v46 = vpack.c.bf16 %v2228_v40, %v2228_v40  ;;  %v4418_v40 = vld [vmem:[#allocation2 + $0x480] sm:$0xff] }
0x1114   :  { %5088 = vmatpush1.bf16.msra.mxu1 %v4708_v47  ;;  %5048 = vmatprep.subr.bf16.mxu0 %v4589_v48  ;;  %v9088_v47 = vpack.c.bf16 %v2230_v3, %v2230_v3  ;;  %v4282_v48 = vld [vmem:[#allocation2 + $0x40] sm:$0xff]  ;;  %v4299_v3 = vld [vmem:[#allocation2 + $0xc8] sm:$0xff] }
0x1115   :  { %5089 = vmatprep.subr.bf16.mxu1 %v4717_v49  ;;  %v4410_v49 = vld [vmem:[#allocation2 + $0x440] sm:$0xff] }
0x1117   :  { %5049 = vmatpush1.bf16.msra.mxu0 %v4588_v50  ;;  %v4291_v50 = vld [vmem:[#allocation2 + $0x88] sm:$0xff] }
0x1118   :  { %5090 = vmatpush1.bf16.msra.mxu1 %v4716_v51  ;;  %5050 = vmatprep.subr.bf16.mxu0 %v4597_v15  ;;  %v4426_v51 = vld [vmem:[#allocation2 + $0x4c0] sm:$0xff]  ;;  %v4307_v15 = vld [vmem:[#allocation2 + $0x108] sm:$0xff] }
0x1119   :  { %5091 = vmatprep.subr.bf16.mxu1 %v4725_v54  ;;  %v4435_v54 = vld [vmem:[#allocation2 + $0x508] sm:$0xff] }
0x111b   :  { %5051 = vmatpush1.bf16.msra.mxu0 %v4596_v55  ;;  %v4306_v55 = vld [vmem:[#allocation2 + $0x100] sm:$0xff] }
0x111c   :  { %5092 = vmatpush1.bf16.msra.mxu1 %v4724_v57  ;;  %5052 = vmatprep.subr.bf16.mxu0 %v4605_v58  ;;  %v4434_v57 = vld [vmem:[#allocation2 + $0x500] sm:$0xff]  ;;  %v4315_v58 = vld [vmem:[#allocation2 + $0x148] sm:$0xff] }
0x111d   :  { %5093 = vmatprep.subr.bf16.mxu1 %v4733_v59  ;;  %v4443_v59 = vld [vmem:[#allocation2 + $0x548] sm:$0xff] }
0x111f   :  { %5053 = vmatpush1.bf16.msra.mxu0 %v4604_v62  ;;  %v4314_v62 = vld [vmem:[#allocation2 + $0x140] sm:$0xff] }
0x1120   :  { %5094 = vmatpush1.bf16.msra.mxu1 %v4732_v1  ;;  %5054 = vmatprep.subr.bf16.mxu0 %v4613_v43  ;;  %v4442_v1 = vld [vmem:[#allocation2 + $0x540] sm:$0xff] }
0x1121   :  { %5095 = vmatprep.subr.bf16.mxu1 %v4741_v2 }
0x1123   :  { %5055 = vmatpush1.bf16.msra.mxu0 %v4612_v12  ;;  %v4323_v12 = vld [vmem:[#allocation2 + $0x188] sm:$0xff] }
0x1124   :  { %5096 = vmatpush1.bf16.msra.mxu1 %v4740_v32  ;;  %5056 = vmatprep.subr.bf16.mxu0 %v4621_v13  ;;  %v4451_v32 = vld [vmem:[#allocation2 + $0x588] sm:$0xff] }
0x1125   :  { %5097 = vmatprep.subr.bf16.mxu1 %v4749_v35 }
0x1127   :  { %5057 = vmatpush1.bf16.msra.mxu0 %v4620_v14 }
0x1128   :  { %5098 = vmatpush1.bf16.msra.mxu1 %v4748_v44  ;;  %5058 = vmatprep.subr.bf16.mxu0 %v4629_v17 }
0x1129   :  { %5099 = vmatprep.subr.bf16.mxu1 %v4757_v18 }
0x112b   :  { %5059 = vmatpush1.bf16.msra.mxu0 %v4628_v7 }
0x112c   :  { %5100 = vmatpush1.bf16.msra.mxu1 %v4756_v19  ;;  %5060 = vmatprep.subr.bf16.mxu0 %v4637_v21  ;;  %v4322_v21 = vld [vmem:[#allocation2 + $0x180] sm:$0xff] }
0x112d   :  { %5101 = vmatprep.subr.bf16.mxu1 %v4765_v0  ;;  %v4450_v0 = vld [vmem:[#allocation2 + $0x580] sm:$0xff] }
0x112f   :  { %5061 = vmatpush1.bf16.msra.mxu0 %v4636_v23  ;;  %v4331_v23 = vld [vmem:[#allocation2 + $0x1c8] sm:$0xff] }
0x1130   :  { %5102 = vmatpush1.bf16.msra.mxu1 %v4764_v24  ;;  %5062 = vmatprep.subr.bf16.mxu0 %v4645_v16  ;;  %v4459_v24 = vld [vmem:[#allocation2 + $0x5c8] sm:$0xff]  ;;  %v4330_v16 = vld [vmem:[#allocation2 + $0x1c0] sm:$0xff] }
0x1131   :  { %5103 = vmatprep.subr.bf16.mxu1 %v4773_v25  ;;  %v4458_v25 = vld [vmem:[#allocation2 + $0x5c0] sm:$0xff] }
0x1133   :  { %5063 = vmatpush1.bf16.msra.mxu0 %v4644_v27  ;;  %v4339_v27 = vld [vmem:[#allocation2 + $0x208] sm:$0xff] }
0x1134   :  { %5104 = vmatpush1.bf16.msra.mxu1 %v4772_v31  ;;  %5064 = vmatprep.subr.bf16.mxu0 %v4653_v36  ;;  %v4467_v31 = vld [vmem:[#allocation2 + $0x608] sm:$0xff]  ;;  %v4338_v36 = vld [vmem:[#allocation2 + $0x200] sm:$0xff] }
0x1135   :  { %5105 = vmatprep.subr.bf16.mxu1 %v4781_v39  ;;  %v4466_v39 = vld [vmem:[#allocation2 + $0x600] sm:$0xff] }
0x1137   :  { %5065 = vmatpush1.bf16.msra.mxu0 %v4652_v63  ;;  %v4347_v63 = vld [vmem:[#allocation2 + $0x248] sm:$0xff] }
0x1138   :  { %5106 = vmatpush1.bf16.msra.mxu1 %v4780_v41  ;;  %5066 = vmatprep.subr.bf16.mxu0 %v4661_v42  ;;  %v4475_v41 = vld [vmem:[#allocation2 + $0x648] sm:$0xff]  ;;  %v4346_v42 = vld [vmem:[#allocation2 + $0x240] sm:$0xff] }
0x1139   :  { %5107 = vmatprep.subr.bf16.mxu1 %v4789_v22  ;;  %v4474_v22 = vld [vmem:[#allocation2 + $0x640] sm:$0xff] }
0x113b   :  { %5067 = vmatpush1.bf16.msra.mxu0 %v4660_v4  ;;  %v4355_v4 = vld [vmem:[#allocation2 + $0x288] sm:$0xff] }
0x113c   :  { %5108 = vmatpush1.bf16.msra.mxu1 %v4788_v45  ;;  %5118 = vmatprep.subr.bf16.mxu0 %v4275_v52  ;;  %v4483_v45 = vld [vmem:[#allocation2 + $0x688] sm:$0xff]  ;;  %v4354_v52 = vld [vmem:[#allocation2 + $0x280] sm:$0xff] }
0x113d   :  { %5159 = vmatprep.subr.bf16.mxu1 %v4403_v53  ;;  %v4482_v53 = vld [vmem:[#allocation2 + $0x680] sm:$0xff] }
0x113e   :  { %5069 = vmatmul.mubr.bf16.vlgmr.msra.gmra.mrb[40].mxu0 %v9061_v5  ;;  %v4427_v5 = vld [vmem:[#allocation2 + $0x4c8] sm:$0xff] }
0x113f   :  { %5110 = vmatmul.mubr.bf16.vlgmr.msra.gmra.mrb[40].mxu1 %v9066_v20  ;;  %5119 = vmatpush1.bf16.msra.mxu0 %v4274_v11  ;;  %v4298_v20 = vld [vmem:[#allocation2 + $0xc0] sm:$0xff]  ;;  %v4363_v11 = vld [vmem:[#allocation2 + $0x2c8] sm:$0xff] }
0x1140   :  { %5160 = vmatpush1.bf16.msra.mxu1 %v4402_v26  ;;  %5120 = vmatprep.subr.bf16.mxu0 %v4283_v60  ;;  %v4491_v26 = vld [vmem:[#allocation2 + $0x6c8] sm:$0xff]  ;;  %v4362_v60 = vld [vmem:[#allocation2 + $0x2c0] sm:$0xff] }
0x1141   :  { %5161 = vmatprep.subr.bf16.mxu1 %v4411_v61  ;;  %5150 = vmatprep.mubr.bf16.mxu0 %v9083_v46  ;;  %v4490_v61 = vld [vmem:[#allocation2 + $0x6c0] sm:$0xff] }
0x1142   :  { %5191 = vmatprep.mubr.bf16.mxu1 %v9088_v47 }
0x1143   :  { %5121 = vmatpush1.bf16.msra.mxu0 %v4282_v48  ;;  %v4371_v48 = vld [vmem:[#allocation2 + $0x308] sm:$0xff] }
0x1144   :  { %5162 = vmatpush1.bf16.msra.mxu1 %v4410_v49  ;;  %5122 = vmatprep.subr.bf16.mxu0 %v4291_v50  ;;  %v4499_v49 = vld [vmem:[#allocation2 + $0x708] sm:$0xff]  ;;  %v4370_v50 = vld [vmem:[#allocation2 + $0x300] sm:$0xff] }
0x1145   :  { %5163 = vmatprep.subr.bf16.mxu1 %v4419_v33  ;;  %v4498_v33 = vld [vmem:[#allocation2 + $0x700] sm:$0xff] }
0x1147   :  { %5123 = vmatpush1.bf16.msra.mxu0 %v4290_v34  ;;  %v4379_v34 = vld [vmem:[#allocation2 + $0x348] sm:$0xff] }
0x1148   :  { %5164 = vmatpush1.bf16.msra.mxu1 %v4418_v40  ;;  %5124 = vmatprep.subr.bf16.mxu0 %v4299_v3  ;;  %v4507_v40 = vld [vmem:[#allocation2 + $0x748] sm:$0xff]  ;;  %v4378_v3 = vld [vmem:[#allocation2 + $0x340] sm:$0xff] }
0x1149   :  { %5165 = vmatprep.subr.bf16.mxu1 %v4427_v5  ;;  %v4506_v5 = vld [vmem:[#allocation2 + $0x740] sm:$0xff] }
0x114b   :  { %5125 = vmatpush1.bf16.msra.mxu0 %v4298_v20  ;;  %v4387_v20 = vld [vmem:[#allocation2 + $0x388] sm:$0xff] }
0x114c   :  { %5166 = vmatpush1.bf16.msra.mxu1 %v4426_v51  ;;  %5126 = vmatprep.subr.bf16.mxu0 %v4307_v15  ;;  %v4515_v51 = vld [vmem:[#allocation2 + $0x788] sm:$0xff]  ;;  %v4386_v15 = vld [vmem:[#allocation2 + $0x380] sm:$0xff] }
0x114d   :  { %5167 = vmatprep.subr.bf16.mxu1 %v4435_v54  ;;  %v4514_v54 = vld [vmem:[#allocation2 + $0x780] sm:$0xff] }
0x114f   :  { %5127 = vmatpush1.bf16.msra.mxu0 %v4306_v55  ;;  %v4395_v55 = vld [vmem:[#allocation2 + $0x3c8] sm:$0xff] }
0x1150   :  { %5168 = vmatpush1.bf16.msra.mxu1 %v4434_v57  ;;  %5128 = vmatprep.subr.bf16.mxu0 %v4315_v58  ;;  %v4523_v57 = vld [vmem:[#allocation2 + $0x7c8] sm:$0xff]  ;;  %v4394_v58 = vld [vmem:[#allocation2 + $0x3c0] sm:$0xff] }
0x1151   :  { %5169 = vmatprep.subr.bf16.mxu1 %v4443_v59  ;;  %v4824_v43 = vpop.f32.mrb[28].mxu0  ;;  %v4522_v59 = vld [vmem:[#allocation2 + $0x7c0] sm:$0xff] }
0x1152   :  { %v4865_v2 = vpop.f32.mrb[28].mxu1  ;;  %v4826_v35 = vpop.f32.mrb[29].mxu0 }
0x1153   :  { %v9094_v13 = vadd.f32 %v4865_v2, %v4824_v43  ;;  %v4867_v14 = vpop.f32.mrb[29].mxu1  ;;  %v4828_v17 = vpop.f32.mrb[30].mxu0  ;;  %5129 = vmatpush1.bf16.msra.mxu0 %v4314_v62  ;;  %v4277_v62 = vld [vmem:[#allocation2 + $0x18] sm:$0xff]  ;;  %v9101_v43 = vpack.c.bf16 %v2227_v37, %v2227_v37  ;;  %v9106_v2 = vpack.c.bf16 %v2229_v38, %v2229_v38 }
0x1154   :  { %v9096_v44 = vadd.f32 %v4867_v14, %v4826_v35  ;;  %v4869_v18 = vpop.f32.mrb[30].mxu1  ;;  %5170 = vmatpush1.bf16.msra.mxu1 %v4442_v1  ;;  %v4829_v7 = vpop.f32.mrb[31].mxu0  ;;  %5130 = vmatprep.subr.bf16.mxu0 %v4323_v12  ;;  %v4405_v1 = vld [vmem:[#allocation2 + $0x418] sm:$0xff]  ;;  %v4276_v12 = vld [vmem:[#allocation2 + $0x10] sm:$0xff] }
0x1155   :  { %v4870_v19 = vpop.f32.mrb[31].mxu1  ;;  %5171 = vmatprep.subr.bf16.mxu1 %v4451_v32  ;;  %v4404_v32 = vld [vmem:[#allocation2 + $0x410] sm:$0xff]  ;;  %v4285_v35 = vld [vmem:[#allocation2 + $0x58] sm:$0xff] }
0x1156   :  { %v4413_v14 = vld [vmem:[#allocation2 + $0x458] sm:$0xff]  ;;  %v4292_v17 = vld [vmem:[#allocation2 + $0x90] sm:$0xff] }
0x1157   :  { %5131 = vmatpush1.bf16.msra.mxu0 %v4322_v21  ;;  %v4293_v37 = vld [vmem:[#allocation2 + $0x98] sm:$0xff]  ;;  %v4420_v18 = vld [vmem:[#allocation2 + $0x490] sm:$0xff] }
0x1158   :  { %5172 = vmatpush1.bf16.msra.mxu1 %v4450_v0  ;;  %5132 = vmatprep.subr.bf16.mxu0 %v4331_v23  ;;  %v4421_v38 = vld [vmem:[#allocation2 + $0x498] sm:$0xff]  ;;  %v4300_v21 = vld [vmem:[#allocation2 + $0xd0] sm:$0xff] }
0x1159   :  { %5173 = vmatprep.subr.bf16.mxu1 %v4459_v24  ;;  %v4301_v7 = vld [vmem:[#allocation2 + $0xd8] sm:$0xff]  ;;  %v4428_v0 = vld [vmem:[#allocation2 + $0x4d0] sm:$0xff] }
0x115a   :  { %v4429_v19 = vld [vmem:[#allocation2 + $0x4d8] sm:$0xff] }
0x115b   :  { %5133 = vmatpush1.bf16.msra.mxu0 %v4330_v16  ;;  %v4309_v23 = vld [vmem:[#allocation2 + $0x118] sm:$0xff]  ;;  %v4308_v16 = vld [vmem:[#allocation2 + $0x110] sm:$0xff] }
0x115c   :  { %5174 = vmatpush1.bf16.msra.mxu1 %v4458_v25  ;;  %5134 = vmatprep.subr.bf16.mxu0 %v4339_v27  ;;  %v4437_v24 = vld [vmem:[#allocation2 + $0x518] sm:$0xff]  ;;  %v4436_v25 = vld [vmem:[#allocation2 + $0x510] sm:$0xff] }
0x115d   :  { %5175 = vmatprep.subr.bf16.mxu1 %v4467_v31  ;;  %v4317_v27 = vld [vmem:[#allocation2 + $0x158] sm:$0xff] }
0x115e   :  { %v4445_v31 = vld [vmem:[#allocation2 + $0x558] sm:$0xff] }
0x115f   :  { %5135 = vmatpush1.bf16.msra.mxu0 %v4338_v36  ;;  %v4316_v36 = vld [vmem:[#allocation2 + $0x150] sm:$0xff] }
0x1160   :  { %5176 = vmatpush1.bf16.msra.mxu1 %v4466_v39  ;;  %5136 = vmatprep.subr.bf16.mxu0 %v4347_v63  ;;  %v4444_v39 = vld [vmem:[#allocation2 + $0x550] sm:$0xff] }
0x1161   :  { %5177 = vmatprep.subr.bf16.mxu1 %v4475_v41 }
0x1163   :  { %5137 = vmatpush1.bf16.msra.mxu0 %v4346_v42  ;;  %v4325_v42 = vld [vmem:[#allocation2 + $0x198] sm:$0xff] }
0x1164   :  { %5178 = vmatpush1.bf16.msra.mxu1 %v4474_v22  ;;  %5138 = vmatprep.subr.bf16.mxu0 %v4355_v4  ;;  %v4453_v22 = vld [vmem:[#allocation2 + $0x598] sm:$0xff] }
0x1165   :  { %5179 = vmatprep.subr.bf16.mxu1 %v4483_v45 }
0x1167   :  { %5139 = vmatpush1.bf16.msra.mxu0 %v4354_v52 }
0x1168   :  { %5180 = vmatpush1.bf16.msra.mxu1 %v4482_v53  ;;  %5140 = vmatprep.subr.bf16.mxu0 %v4363_v11 }
0x1169   :  { %5181 = vmatprep.subr.bf16.mxu1 %v4491_v26 }
0x116b   :  { %5141 = vmatpush1.bf16.msra.mxu0 %v4362_v60 }
0x116c   :  { %5182 = vmatpush1.bf16.msra.mxu1 %v4490_v61  ;;  %5142 = vmatprep.subr.bf16.mxu0 %v4371_v48  ;;  %v4324_v48 = vld [vmem:[#allocation2 + $0x190] sm:$0xff] }
0x116d   :  { %5183 = vmatprep.subr.bf16.mxu1 %v4499_v49  ;;  %v4452_v49 = vld [vmem:[#allocation2 + $0x590] sm:$0xff] }
0x116f   :  { %5143 = vmatpush1.bf16.msra.mxu0 %v4370_v50  ;;  %v4333_v50 = vld [vmem:[#allocation2 + $0x1d8] sm:$0xff] }
0x1170   :  { %5184 = vmatpush1.bf16.msra.mxu1 %v4498_v33  ;;  %5144 = vmatprep.subr.bf16.mxu0 %v4379_v34  ;;  %v4461_v33 = vld [vmem:[#allocation2 + $0x5d8] sm:$0xff]  ;;  %v4332_v34 = vld [vmem:[#allocation2 + $0x1d0] sm:$0xff] }
0x1171   :  { %5185 = vmatprep.subr.bf16.mxu1 %v4507_v40  ;;  %v4460_v40 = vld [vmem:[#allocation2 + $0x5d0] sm:$0xff] }
0x1173   :  { %5145 = vmatpush1.bf16.msra.mxu0 %v4378_v3  ;;  %v4341_v3 = vld [vmem:[#allocation2 + $0x218] sm:$0xff] }
0x1174   :  { %5186 = vmatpush1.bf16.msra.mxu1 %v4506_v5  ;;  %5146 = vmatprep.subr.bf16.mxu0 %v4387_v20  ;;  %v4469_v5 = vld [vmem:[#allocation2 + $0x618] sm:$0xff]  ;;  %v4340_v20 = vld [vmem:[#allocation2 + $0x210] sm:$0xff] }
0x1175   :  { %5187 = vmatprep.subr.bf16.mxu1 %v4515_v51  ;;  %v4468_v51 = vld [vmem:[#allocation2 + $0x610] sm:$0xff] }
0x1177   :  { %5147 = vmatpush1.bf16.msra.mxu0 %v4386_v15  ;;  %v4349_v15 = vld [vmem:[#allocation2 + $0x258] sm:$0xff] }
0x1178   :  { %5188 = vmatpush1.bf16.msra.mxu1 %v4514_v54  ;;  %5148 = vmatprep.subr.bf16.mxu0 %v4395_v55  ;;  %v4477_v54 = vld [vmem:[#allocation2 + $0x658] sm:$0xff]  ;;  %v4348_v55 = vld [vmem:[#allocation2 + $0x250] sm:$0xff] }
0x1179   :  { %5189 = vmatprep.subr.bf16.mxu1 %v4523_v57  ;;  %v4476_v57 = vld [vmem:[#allocation2 + $0x650] sm:$0xff] }
0x117b   :  { %5149 = vmatpush1.bf16.msra.mxu0 %v4394_v58  ;;  %v4357_v58 = vld [vmem:[#allocation2 + $0x298] sm:$0xff] }
0x117c   :  { %5190 = vmatpush1.bf16.msra.mxu1 %v4522_v59  ;;  %5200 = vmatprep.subr.bf16.mxu0 %v4277_v62  ;;  %v4485_v59 = vld [vmem:[#allocation2 + $0x698] sm:$0xff]  ;;  %v4356_v62 = vld [vmem:[#allocation2 + $0x290] sm:$0xff] }
0x117d   :  { %5241 = vmatprep.subr.bf16.mxu1 %v4405_v1  ;;  %v4484_v1 = vld [vmem:[#allocation2 + $0x690] sm:$0xff] }
0x117e   :  { %5151 = vmatmul.mubr.bf16.vlgmr.msra.gmra.mrb[44].mxu0 %v9101_v43 }
0x117f   :  { %5192 = vmatmul.mubr.bf16.vlgmr.msra.gmra.mrb[44].mxu1 %v9106_v2  ;;  %5201 = vmatpush1.bf16.msra.mxu0 %v4276_v12  ;;  %v4365_v12 = vld [vmem:[#allocation2 + $0x2d8] sm:$0xff] }
0x1180   :  { %5242 = vmatpush1.bf16.msra.mxu1 %v4404_v32  ;;  %5202 = vmatprep.subr.bf16.mxu0 %v4285_v35  ;;  %v4493_v32 = vld [vmem:[#allocation2 + $0x6d8] sm:$0xff]  ;;  %v4364_v35 = vld [vmem:[#allocation2 + $0x2d0] sm:$0xff] }
0x1181   :  { %5243 = vmatprep.subr.bf16.mxu1 %v4413_v14  ;;  %5232 = vmatprep.mubr.bf16.mxu0 %v9083_v46  ;;  %v4492_v14 = vld [vmem:[#allocation2 + $0x6d0] sm:$0xff] }
0x1182   :  { %5273 = vmatprep.mubr.bf16.mxu1 %v9088_v47 }
0x1183   :  { %5203 = vmatpush1.bf16.msra.mxu0 %v4284_v29  ;;  %v4373_v29 = vld [vmem:[#allocation2 + $0x318] sm:$0xff] }
0x1184   :  { %5244 = vmatpush1.bf16.msra.mxu1 %v4412_v30  ;;  %5204 = vmatprep.subr.bf16.mxu0 %v4293_v37  ;;  %v4501_v30 = vld [vmem:[#allocation2 + $0x718] sm:$0xff]  ;;  %v4372_v37 = vld [vmem:[#allocation2 + $0x310] sm:$0xff] }
0x1185   :  { %5245 = vmatprep.subr.bf16.mxu1 %v4421_v38  ;;  %v4500_v38 = vld [vmem:[#allocation2 + $0x710] sm:$0xff] }
0x1187   :  { %5205 = vmatpush1.bf16.msra.mxu0 %v4292_v17  ;;  %v4381_v17 = vld [vmem:[#allocation2 + $0x358] sm:$0xff] }
0x1188   :  { %5246 = vmatpush1.bf16.msra.mxu1 %v4420_v18  ;;  %5206 = vmatprep.subr.bf16.mxu0 %v4301_v7  ;;  %v4509_v18 = vld [vmem:[#allocation2 + $0x758] sm:$0xff]  ;;  %v4380_v7 = vld [vmem:[#allocation2 + $0x350] sm:$0xff] }
0x1189   :  { %5247 = vmatprep.subr.bf16.mxu1 %v4429_v19  ;;  %v4508_v19 = vld [vmem:[#allocation2 + $0x750] sm:$0xff] }
0x118b   :  { %5207 = vmatpush1.bf16.msra.mxu0 %v4300_v21  ;;  %v4389_v21 = vld [vmem:[#allocation2 + $0x398] sm:$0xff] }
0x118c   :  { %5248 = vmatpush1.bf16.msra.mxu1 %v4428_v0  ;;  %5208 = vmatprep.subr.bf16.mxu0 %v4309_v23  ;;  %v4517_v0 = vld [vmem:[#allocation2 + $0x798] sm:$0xff]  ;;  %v4388_v23 = vld [vmem:[#allocation2 + $0x390] sm:$0xff] }
0x118d   :  { %5249 = vmatprep.subr.bf16.mxu1 %v4437_v24  ;;  %v4516_v24 = vld [vmem:[#allocation2 + $0x790] sm:$0xff] }
0x118f   :  { %5209 = vmatpush1.bf16.msra.mxu0 %v4308_v16  ;;  %v4397_v16 = vld [vmem:[#allocation2 + $0x3d8] sm:$0xff] }
0x1190   :  { %5250 = vmatpush1.bf16.msra.mxu1 %v4436_v25  ;;  %5210 = vmatprep.subr.bf16.mxu0 %v4317_v27  ;;  %v4525_v25 = vld [vmem:[#allocation2 + $0x7d8] sm:$0xff]  ;;  %v4396_v27 = vld [vmem:[#allocation2 + $0x3d0] sm:$0xff] }
0x1191   :  { %5251 = vmatprep.subr.bf16.mxu1 %v4445_v31  ;;  %v4906_v63 = vpop.f32.mrb[32].mxu0  ;;  %v4524_v31 = vld [vmem:[#allocation2 + $0x7d0] sm:$0xff] }
0x1192   :  { %v4947_v41 = vpop.f32.mrb[32].mxu1  ;;  %v4908_v45 = vpop.f32.mrb[33].mxu0 }
0x1193   :  { %v9112_v4 = vadd.f32 %v4947_v41, %v4906_v63  ;;  %v4949_v52 = vpop.f32.mrb[33].mxu1  ;;  %v4910_v11 = vpop.f32.mrb[34].mxu0  ;;  %5211 = vmatpush1.bf16.msra.mxu0 %v4316_v36  ;;  %v4279_v36 = vld [vmem:[#allocation2 + $0x28] sm:$0xff]  ;;  %v4278_v63 = vld [vmem:[#allocation2 + $0x20] sm:$0xff] }
0x1194   :  { %v9114_v53 = vadd.f32 %v4949_v52, %v4908_v45  ;;  %v4951_v26 = vpop.f32.mrb[34].mxu1  ;;  %5252 = vmatpush1.bf16.msra.mxu1 %v4444_v39  ;;  %v4911_v60 = vpop.f32.mrb[35].mxu0  ;;  %5212 = vmatprep.subr.bf16.mxu0 %v4325_v42  ;;  %v4407_v39 = vld [vmem:[#allocation2 + $0x428] sm:$0xff]  ;;  %v4406_v41 = vld [vmem:[#allocation2 + $0x420] sm:$0xff] }
0x1195   :  { %v4952_v61 = vpop.f32.mrb[35].mxu1  ;;  %5253 = vmatprep.subr.bf16.mxu1 %v4453_v22  ;;  %v4287_v42 = vld [vmem:[#allocation2 + $0x68] sm:$0xff]  ;;  %v4286_v45 = vld [vmem:[#allocation2 + $0x60] sm:$0xff] }
0x1196   :  { %v4415_v22 = vld [vmem:[#allocation2 + $0x468] sm:$0xff]  ;;  %v4414_v52 = vld [vmem:[#allocation2 + $0x460] sm:$0xff] }
0x1197   :  { %5213 = vmatpush1.bf16.msra.mxu0 %v4324_v48  ;;  %v4295_v11 = vld [vmem:[#allocation2 + $0xa8] sm:$0xff]  ;;  %v4294_v60 = vld [vmem:[#allocation2 + $0xa0] sm:$0xff] }
0x1198   :  { %5254 = vmatpush1.bf16.msra.mxu1 %v4452_v49  ;;  %5214 = vmatprep.subr.bf16.mxu0 %v4333_v50  ;;  %v4423_v26 = vld [vmem:[#allocation2 + $0x4a8] sm:$0xff]  ;;  %v4422_v61 = vld [vmem:[#allocation2 + $0x4a0] sm:$0xff] }
0x1199   :  { %5255 = vmatprep.subr.bf16.mxu1 %v4461_v33  ;;  %v4303_v48 = vld [vmem:[#allocation2 + $0xe8] sm:$0xff]  ;;  %v4302_v50 = vld [vmem:[#allocation2 + $0xe0] sm:$0xff] }
0x119a   :  { %v4431_v49 = vld [vmem:[#allocation2 + $0x4e8] sm:$0xff]  ;;  %v4430_v33 = vld [vmem:[#allocation2 + $0x4e0] sm:$0xff] }
0x119b   :  { %5215 = vmatpush1.bf16.msra.mxu0 %v4332_v34  ;;  %v4311_v34 = vld [vmem:[#allocation2 + $0x128] sm:$0xff] }
0x119c   :  { %5256 = vmatpush1.bf16.msra.mxu1 %v4460_v40  ;;  %5216 = vmatprep.subr.bf16.mxu0 %v4341_v3  ;;  %v4439_v40 = vld [vmem:[#allocation2 + $0x528] sm:$0xff]  ;;  %v4310_v3 = vld [vmem:[#allocation2 + $0x120] sm:$0xff] }
0x119d   :  { %5257 = vmatprep.subr.bf16.mxu1 %v4469_v5  ;;  %v4438_v5 = vld [vmem:[#allocation2 + $0x520] sm:$0xff] }
0x119f   :  { %5217 = vmatpush1.bf16.msra.mxu0 %v4340_v20  ;;  %v4319_v20 = vld [vmem:[#allocation2 + $0x168] sm:$0xff] }
0x11a0   :  { %5258 = vmatpush1.bf16.msra.mxu1 %v4468_v51  ;;  %5218 = vmatprep.subr.bf16.mxu0 %v4349_v15  ;;  %v4447_v51 = vld [vmem:[#allocation2 + $0x568] sm:$0xff]  ;;  %v4318_v15 = vld [vmem:[#allocation2 + $0x160] sm:$0xff] }
0x11a1   :  { %5259 = vmatprep.subr.bf16.mxu1 %v4477_v54  ;;  %v4446_v54 = vld [vmem:[#allocation2 + $0x560] sm:$0xff] }
0x11a3   :  { %5219 = vmatpush1.bf16.msra.mxu0 %v4348_v55 }
0x11a4   :  { %5260 = vmatpush1.bf16.msra.mxu1 %v4476_v57  ;;  %5220 = vmatprep.subr.bf16.mxu0 %v4357_v58  ;;  %v4327_v58 = vld [vmem:[#allocation2 + $0x1a8] sm:$0xff] }
0x11a5   :  { %5261 = vmatprep.subr.bf16.mxu1 %v4485_v59  ;;  %v4455_v59 = vld [vmem:[#allocation2 + $0x5a8] sm:$0xff] }
0x11a7   :  { %5221 = vmatpush1.bf16.msra.mxu0 %v4356_v62 }
0x11a8   :  { %5262 = vmatpush1.bf16.msra.mxu1 %v4484_v1  ;;  %5222 = vmatprep.subr.bf16.mxu0 %v4365_v12 }
0x11a9   :  { %5263 = vmatprep.subr.bf16.mxu1 %v4493_v32 }
0x11ab   :  { %5223 = vmatpush1.bf16.msra.mxu0 %v4364_v35 }
0x11ac   :  { %5264 = vmatpush1.bf16.msra.mxu1 %v4492_v14  ;;  %5224 = vmatprep.subr.bf16.mxu0 %v4373_v29 }
0x11ad   :  { %5265 = vmatprep.subr.bf16.mxu1 %v4501_v30 }
0x11af   :  { %5225 = vmatpush1.bf16.msra.mxu0 %v4372_v37  ;;  %v4326_v37 = vld [vmem:[#allocation2 + $0x1a0] sm:$0xff] }
0x11b0   :  { %5266 = vmatpush1.bf16.msra.mxu1 %v4500_v38  ;;  %5226 = vmatprep.subr.bf16.mxu0 %v4381_v17  ;;  %v4454_v38 = vld [vmem:[#allocation2 + $0x5a0] sm:$0xff]  ;;  %v4335_v17 = vld [vmem:[#allocation2 + $0x1e8] sm:$0xff] }
0x11b1   :  { %5267 = vmatprep.subr.bf16.mxu1 %v4509_v18  ;;  %v4463_v18 = vld [vmem:[#allocation2 + $0x5e8] sm:$0xff] }
0x11b3   :  { %5227 = vmatpush1.bf16.msra.mxu0 %v4380_v7  ;;  %v4334_v7 = vld [vmem:[#allocation2 + $0x1e0] sm:$0xff] }
0x11b4   :  { %5268 = vmatpush1.bf16.msra.mxu1 %v4508_v19  ;;  %5228 = vmatprep.subr.bf16.mxu0 %v4389_v21  ;;  %v4462_v19 = vld [vmem:[#allocation2 + $0x5e0] sm:$0xff]  ;;  %v4343_v21 = vld [vmem:[#allocation2 + $0x228] sm:$0xff] }
0x11b5   :  { %5269 = vmatprep.subr.bf16.mxu1 %v4517_v0  ;;  %v4471_v0 = vld [vmem:[#allocation2 + $0x628] sm:$0xff] }
0x11b7   :  { %5229 = vmatpush1.bf16.msra.mxu0 %v4388_v23  ;;  %v4342_v23 = vld [vmem:[#allocation2 + $0x220] sm:$0xff] }
0x11b8   :  { %5270 = vmatpush1.bf16.msra.mxu1 %v4516_v24  ;;  %5230 = vmatprep.subr.bf16.mxu0 %v4397_v16  ;;  %v4470_v24 = vld [vmem:[#allocation2 + $0x620] sm:$0xff]  ;;  %v4351_v16 = vld [vmem:[#allocation2 + $0x268] sm:$0xff] }
0x11b9   :  { %5271 = vmatprep.subr.bf16.mxu1 %v4525_v25  ;;  %v4479_v25 = vld [vmem:[#allocation2 + $0x668] sm:$0xff] }
0x11bb   :  { %5231 = vmatpush1.bf16.msra.mxu0 %v4396_v27  ;;  %v4350_v27 = vld [vmem:[#allocation2 + $0x260] sm:$0xff] }
0x11bc   :  { %5272 = vmatpush1.bf16.msra.mxu1 %v4524_v31  ;;  %5282 = vmatprep.subr.bf16.mxu0 %v4279_v36  ;;  %v4478_v31 = vld [vmem:[#allocation2 + $0x660] sm:$0xff]  ;;  %v4359_v36 = vld [vmem:[#allocation2 + $0x2a8] sm:$0xff] }
0x11bd   :  { %5323 = vmatprep.subr.bf16.mxu1 %v4407_v39  ;;  %v4487_v39 = vld [vmem:[#allocation2 + $0x6a8] sm:$0xff] }
0x11be   :  { %5233 = vmatmul.mubr.bf16.vlgmr.msra.gmra.mrb[48].mxu0 %v9101_v43 }
0x11bf   :  { %5274 = vmatmul.mubr.bf16.vlgmr.msra.gmra.mrb[48].mxu1 %v9106_v2  ;;  %5283 = vmatpush1.bf16.msra.mxu0 %v4278_v63  ;;  %v4358_v63 = vld [vmem:[#allocation2 + $0x2a0] sm:$0xff] }
0x11c0   :  { %5324 = vmatpush1.bf16.msra.mxu1 %v4406_v41  ;;  %5284 = vmatprep.subr.bf16.mxu0 %v4287_v42  ;;  %v4486_v41 = vld [vmem:[#allocation2 + $0x6a0] sm:$0xff]  ;;  %v4367_v42 = vld [vmem:[#allocation2 + $0x2e8] sm:$0xff] }
0x11c1   :  { %5325 = vmatprep.subr.bf16.mxu1 %v4415_v22  ;;  %5314 = vmatprep.mubr.bf16.mxu0 %v9083_v46  ;;  %v4495_v22 = vld [vmem:[#allocation2 + $0x6e8] sm:$0xff] }
0x11c2   :  { %5355 = vmatprep.mubr.bf16.mxu1 %v9088_v47 }
0x11c3   :  { %5285 = vmatpush1.bf16.msra.mxu0 %v4286_v45  ;;  %v4366_v45 = vld [vmem:[#allocation2 + $0x2e0] sm:$0xff] }
0x11c4   :  { %5326 = vmatpush1.bf16.msra.mxu1 %v4414_v52  ;;  %5286 = vmatprep.subr.bf16.mxu0 %v4295_v11  ;;  %v4494_v52 = vld [vmem:[#allocation2 + $0x6e0] sm:$0xff]  ;;  %v4375_v11 = vld [vmem:[#allocation2 + $0x328] sm:$0xff] }
0x11c5   :  { %5327 = vmatprep.subr.bf16.mxu1 %v4423_v26  ;;  %v4503_v26 = vld [vmem:[#allocation2 + $0x728] sm:$0xff] }
0x11c7   :  { %5287 = vmatpush1.bf16.msra.mxu0 %v4294_v60  ;;  %v4374_v60 = vld [vmem:[#allocation2 + $0x320] sm:$0xff] }
0x11c8   :  { %5328 = vmatpush1.bf16.msra.mxu1 %v4422_v61  ;;  %5288 = vmatprep.subr.bf16.mxu0 %v4303_v48  ;;  %v4502_v61 = vld [vmem:[#allocation2 + $0x720] sm:$0xff]  ;;  %v4383_v48 = vld [vmem:[#allocation2 + $0x368] sm:$0xff] }
0x11c9   :  { %5329 = vmatprep.subr.bf16.mxu1 %v4431_v49  ;;  %v4511_v49 = vld [vmem:[#allocation2 + $0x768] sm:$0xff] }
0x11cb   :  { %5289 = vmatpush1.bf16.msra.mxu0 %v4302_v50  ;;  %v4382_v50 = vld [vmem:[#allocation2 + $0x360] sm:$0xff] }
0x11cc   :  { %5330 = vmatpush1.bf16.msra.mxu1 %v4430_v33  ;;  %5290 = vmatprep.subr.bf16.mxu0 %v4311_v34  ;;  %v4510_v33 = vld [vmem:[#allocation2 + $0x760] sm:$0xff]  ;;  %v4391_v34 = vld [vmem:[#allocation2 + $0x3a8] sm:$0xff] }
0x11cd   :  { %5331 = vmatprep.subr.bf16.mxu1 %v4439_v40  ;;  %v4519_v40 = vld [vmem:[#allocation2 + $0x7a8] sm:$0xff] }
0x11cf   :  { %5291 = vmatpush1.bf16.msra.mxu0 %v4310_v3  ;;  %v4390_v3 = vld [vmem:[#allocation2 + $0x3a0] sm:$0xff] }
0x11d0   :  { %5332 = vmatpush1.bf16.msra.mxu1 %v4438_v5  ;;  %5292 = vmatprep.subr.bf16.mxu0 %v4319_v20  ;;  %v4518_v5 = vld [vmem:[#allocation2 + $0x7a0] sm:$0xff]  ;;  %v4399_v20 = vld [vmem:[#allocation2 + $0x3e8] sm:$0xff] }
0x11d1   :  { %5333 = vmatprep.subr.bf16.mxu1 %v4447_v51  ;;  %v4988_v55 = vpop.f32.mrb[36].mxu0  ;;  %v4527_v51 = vld [vmem:[#allocation2 + $0x7e8] sm:$0xff] }
0x11d2   :  { %v5029_v57 = vpop.f32.mrb[36].mxu1  ;;  %v4990_v1 = vpop.f32.mrb[37].mxu0 }
0x11d3   :  { %v9120_v62 = vadd.f32 %v5029_v57, %v4988_v55  ;;  %v5031_v12 = vpop.f32.mrb[37].mxu1  ;;  %v4992_v35 = vpop.f32.mrb[38].mxu0  ;;  %5293 = vmatpush1.bf16.msra.mxu0 %v4318_v15  ;;  %v4398_v15 = vld [vmem:[#allocation2 + $0x3e0] sm:$0xff]  ;;  %v4281_v55 = vld [vmem:[#allocation2 + $0x38] sm:$0xff] }
0x11d4   :  { %v9122_v32 = vadd.f32 %v5031_v12, %v4990_v1  ;;  %v5033_v14 = vpop.f32.mrb[38].mxu1  ;;  %5334 = vmatpush1.bf16.msra.mxu1 %v4446_v54  ;;  %v4993_v29 = vpop.f32.mrb[39].mxu0  ;;  %5294 = vmatprep.subr.bf16.mxu0 %v4327_v58  ;;  %v4526_v54 = vld [vmem:[#allocation2 + $0x7e0] sm:$0xff]  ;;  %v4409_v57 = vld [vmem:[#allocation2 + $0x438] sm:$0xff]  ;;  %v4280_v58 = vld [vmem:[#allocation2 + $0x30] sm:$0xff] }
0x11d5   :  { %v5034_v30 = vpop.f32.mrb[39].mxu1  ;;  %5335 = vmatprep.subr.bf16.mxu1 %v4455_v59  ;;  %v4408_v59 = vld [vmem:[#allocation2 + $0x430] sm:$0xff]  ;;  %v4289_v1 = vld [vmem:[#allocation2 + $0x78] sm:$0xff] }
0x11d6   :  { %v4417_v12 = vld [vmem:[#allocation2 + $0x478] sm:$0xff]  ;;  %v4288_v35 = vld [vmem:[#allocation2 + $0x70] sm:$0xff] }
0x11d7   :  { %5295 = vmatpush1.bf16.msra.mxu0 %v4326_v37  ;;  %v4416_v14 = vld [vmem:[#allocation2 + $0x470] sm:$0xff]  ;;  %v4297_v29 = vld [vmem:[#allocation2 + $0xb8] sm:$0xff] }
0x11d8   :  { %5336 = vmatpush1.bf16.msra.mxu1 %v4454_v38  ;;  %5296 = vmatprep.subr.bf16.mxu0 %v4335_v17  ;;  %v4425_v30 = vld [vmem:[#allocation2 + $0x4b8] sm:$0xff]  ;;  %v4296_v37 = vld [vmem:[#allocation2 + $0xb0] sm:$0xff] }
0x11d9   :  { %5337 = vmatprep.subr.bf16.mxu1 %v4463_v18  ;;  %v4424_v38 = vld [vmem:[#allocation2 + $0x4b0] sm:$0xff]  ;;  %v4305_v17 = vld [vmem:[#allocation2 + $0xf8] sm:$0xff] }
0x11da   :  { %v4433_v18 = vld [vmem:[#allocation2 + $0x4f8] sm:$0xff] }
0x11db   :  { %5297 = vmatpush1.bf16.msra.mxu0 %v4334_v7  ;;  %v4304_v7 = vld [vmem:[#allocation2 + $0xf0] sm:$0xff] }
0x11dc   :  { %5338 = vmatpush1.bf16.msra.mxu1 %v4462_v19  ;;  %5298 = vmatprep.subr.bf16.mxu0 %v4343_v21  ;;  %v4432_v19 = vld [vmem:[#allocation2 + $0x4f0] sm:$0xff]  ;;  %v4313_v21 = vld [vmem:[#allocation2 + $0x138] sm:$0xff] }
0x11dd   :  { %5339 = vmatprep.subr.bf16.mxu1 %v4471_v0  ;;  %v4441_v0 = vld [vmem:[#allocation2 + $0x538] sm:$0xff] }
0x11df   :  { %5299 = vmatpush1.bf16.msra.mxu0 %v4342_v23  ;;  %v4321_v23 = vld [vmem:[#allocation2 + $0x178] sm:$0xff] }
0x11e0   :  { %5340 = vmatpush1.bf16.msra.mxu1 %v4470_v24  ;;  %5300 = vmatprep.subr.bf16.mxu0 %v4351_v16  ;;  %v4449_v24 = vld [vmem:[#allocation2 + $0x578] sm:$0xff]  ;;  %v4320_v16 = vld [vmem:[#allocation2 + $0x170] sm:$0xff] }
0x11e1   :  { %5341 = vmatprep.subr.bf16.mxu1 %v4479_v25  ;;  %v4448_v25 = vld [vmem:[#allocation2 + $0x570] sm:$0xff] }
0x11e3   :  { %5301 = vmatpush1.bf16.msra.mxu0 %v4350_v27 }
0x11e4   :  { %5342 = vmatpush1.bf16.msra.mxu1 %v4478_v31  ;;  %5302 = vmatprep.subr.bf16.mxu0 %v4359_v36  ;;  %v4329_v36 = vld [vmem:[#allocation2 + $0x1b8] sm:$0xff] }
0x11e5   :  { %5343 = vmatprep.subr.bf16.mxu1 %v4487_v39  ;;  %v4457_v39 = vld [vmem:[#allocation2 + $0x5b8] sm:$0xff] }
0x11e7   :  { %5303 = vmatpush1.bf16.msra.mxu0 %v4358_v63 }
0x11e8   :  { %5344 = vmatpush1.bf16.msra.mxu1 %v4486_v41  ;;  %5304 = vmatprep.subr.bf16.mxu0 %v4367_v42 }
0x11e9   :  { %5345 = vmatprep.subr.bf16.mxu1 %v4495_v22 }
0x11eb   :  { %5305 = vmatpush1.bf16.msra.mxu0 %v4366_v45 }
0x11ec   :  { %5346 = vmatpush1.bf16.msra.mxu1 %v4494_v52  ;;  %5306 = vmatprep.subr.bf16.mxu0 %v4375_v11 }
0x11ed   :  { %5347 = vmatprep.subr.bf16.mxu1 %v4503_v26 }
0x11ef   :  { %5307 = vmatpush1.bf16.msra.mxu0 %v4374_v60  ;;  %v4328_v60 = vld [vmem:[#allocation2 + $0x1b0] sm:$0xff] }
0x11f0   :  { %5348 = vmatpush1.bf16.msra.mxu1 %v4502_v61  ;;  %5308 = vmatprep.subr.bf16.mxu0 %v4383_v48  ;;  %v4456_v61 = vld [vmem:[#allocation2 + $0x5b0] sm:$0xff]  ;;  %v4337_v48 = vld [vmem:[#allocation2 + $0x1f8] sm:$0xff] }
0x11f1   :  { %5349 = vmatprep.subr.bf16.mxu1 %v4511_v49  ;;  %v4465_v49 = vld [vmem:[#allocation2 + $0x5f8] sm:$0xff] }
0x11f3   :  { %5309 = vmatpush1.bf16.msra.mxu0 %v4382_v50  ;;  %v4336_v50 = vld [vmem:[#allocation2 + $0x1f0] sm:$0xff] }
0x11f4   :  { %5350 = vmatpush1.bf16.msra.mxu1 %v4510_v33  ;;  %5310 = vmatprep.subr.bf16.mxu0 %v4391_v34  ;;  %v4464_v33 = vld [vmem:[#allocation2 + $0x5f0] sm:$0xff]  ;;  %v4345_v34 = vld [vmem:[#allocation2 + $0x238] sm:$0xff] }
0x11f5   :  { %5351 = vmatprep.subr.bf16.mxu1 %v4519_v40  ;;  %v4473_v40 = vld [vmem:[#allocation2 + $0x638] sm:$0xff] }
0x11f7   :  { %5311 = vmatpush1.bf16.msra.mxu0 %v4390_v3  ;;  %v4344_v3 = vld [vmem:[#allocation2 + $0x230] sm:$0xff] }
0x11f8   :  { %5352 = vmatpush1.bf16.msra.mxu1 %v4518_v5  ;;  %5312 = vmatprep.subr.bf16.mxu0 %v4399_v20  ;;  %v4472_v5 = vld [vmem:[#allocation2 + $0x630] sm:$0xff]  ;;  %v4353_v20 = vld [vmem:[#allocation2 + $0x278] sm:$0xff] }
0x11f9   :  { %5353 = vmatprep.subr.bf16.mxu1 %v4527_v51  ;;  %v4481_v51 = vld [vmem:[#allocation2 + $0x678] sm:$0xff] }
0x11fb   :  { %5313 = vmatpush1.bf16.msra.mxu0 %v4398_v15  ;;  %v4352_v15 = vld [vmem:[#allocation2 + $0x270] sm:$0xff] }
0x11fc   :  { %5354 = vmatpush1.bf16.msra.mxu1 %v4526_v54  ;;  %5364 = vmatprep.subr.bf16.mxu0 %v4281_v55  ;;  %v4480_v54 = vld [vmem:[#allocation2 + $0x670] sm:$0xff]  ;;  %v4361_v55 = vld [vmem:[#allocation2 + $0x2b8] sm:$0xff] }
0x11fd   :  { %5405 = vmatprep.subr.bf16.mxu1 %v4409_v57  ;;  %v4489_v57 = vld [vmem:[#allocation2 + $0x6b8] sm:$0xff] }
0x11fe   :  { %5315 = vmatmul.mubr.bf16.vlgmr.msra.gmra.mrb[52].mxu0 %v9101_v43 }
0x11ff   :  { %5356 = vmatmul.mubr.bf16.vlgmr.msra.gmra.mrb[52].mxu1 %v9106_v2  ;;  %5365 = vmatpush1.bf16.msra.mxu0 %v4280_v58  ;;  %v4360_v58 = vld [vmem:[#allocation2 + $0x2b0] sm:$0xff] }
0x1200   :  { %5406 = vmatpush1.bf16.msra.mxu1 %v4408_v59  ;;  %5366 = vmatprep.subr.bf16.mxu0 %v4289_v1  ;;  %v4488_v59 = vld [vmem:[#allocation2 + $0x6b0] sm:$0xff]  ;;  %v4369_v1 = vld [vmem:[#allocation2 + $0x2f8] sm:$0xff] }
0x1201   :  { %5407 = vmatprep.subr.bf16.mxu1 %v4417_v12  ;;  %5396 = vmatprep.mubr.bf16.mxu0 %v9083_v46  ;;  %v4312_v46 = vld [vmem:[#allocation2 + $0x130] sm:$0xff]  ;;  %v4497_v12 = vld [vmem:[#allocation2 + $0x6f8] sm:$0xff] }
0x1202   :  { %5437 = vmatprep.mubr.bf16.mxu1 %v9088_v47  ;;  %v4440_v47 = vld [vmem:[#allocation2 + $0x530] sm:$0xff] }
0x1203   :  { %5367 = vmatpush1.bf16.msra.mxu0 %v4288_v35  ;;  %v4368_v35 = vld [vmem:[#allocation2 + $0x2f0] sm:$0xff] }
0x1204   :  { %5408 = vmatpush1.bf16.msra.mxu1 %v4416_v14  ;;  %5368 = vmatprep.subr.bf16.mxu0 %v4297_v29  ;;  %v4496_v14 = vld [vmem:[#allocation2 + $0x6f0] sm:$0xff]  ;;  %v4377_v29 = vld [vmem:[#allocation2 + $0x338] sm:$0xff] }
0x1205   :  { %5409 = vmatprep.subr.bf16.mxu1 %v4425_v30  ;;  %v4505_v30 = vld [vmem:[#allocation2 + $0x738] sm:$0xff] }
0x1207   :  { %5369 = vmatpush1.bf16.msra.mxu0 %v4296_v37  ;;  %v4376_v37 = vld [vmem:[#allocation2 + $0x330] sm:$0xff] }
0x1208   :  { %5410 = vmatpush1.bf16.msra.mxu1 %v4424_v38  ;;  %5370 = vmatprep.subr.bf16.mxu0 %v4305_v17  ;;  %v4504_v38 = vld [vmem:[#allocation2 + $0x730] sm:$0xff]  ;;  %v4385_v17 = vld [vmem:[#allocation2 + $0x378] sm:$0xff] }
0x1209   :  { %5411 = vmatprep.subr.bf16.mxu1 %v4433_v18  ;;  %v4513_v18 = vld [vmem:[#allocation2 + $0x778] sm:$0xff] }
0x120b   :  { %5371 = vmatpush1.bf16.msra.mxu0 %v4304_v7  ;;  %v4384_v7 = vld [vmem:[#allocation2 + $0x370] sm:$0xff] }
0x120c   :  { %5412 = vmatpush1.bf16.msra.mxu1 %v4432_v19  ;;  %5372 = vmatprep.subr.bf16.mxu0 %v4313_v21  ;;  %v4512_v19 = vld [vmem:[#allocation2 + $0x770] sm:$0xff]  ;;  %v4393_v21 = vld [vmem:[#allocation2 + $0x3b8] sm:$0xff] }
0x120d   :  { %5413 = vmatprep.subr.bf16.mxu1 %v4441_v0  ;;  %v4521_v0 = vld [vmem:[#allocation2 + $0x7b8] sm:$0xff] }
0x120f   :  { %5373 = vmatpush1.bf16.msra.mxu0 %v4312_v46  ;;  %v4392_v46 = vld [vmem:[#allocation2 + $0x3b0] sm:$0xff] }
0x1210   :  { %5414 = vmatpush1.bf16.msra.mxu1 %v4440_v47  ;;  %5374 = vmatprep.subr.bf16.mxu0 %v4321_v23  ;;  %v4520_v47 = vld [vmem:[#allocation2 + $0x7b0] sm:$0xff]  ;;  %v4401_v23 = vld [vmem:[#allocation2 + $0x3f8] sm:$0xff] }
0x1211   :  { %5415 = vmatprep.subr.bf16.mxu1 %v4449_v24  ;;  %v5070_v27 = vpop.f32.mrb[40].mxu0  ;;  %v4529_v24 = vld [vmem:[#allocation2 + $0x7f8] sm:$0xff] }
0x1212   :  { %v5111_v31 = vpop.f32.mrb[40].mxu1  ;;  %v5072_v41 = vpop.f32.mrb[41].mxu0 }
0x1213   :  { %v9128_v63 = vadd.f32 %v5111_v31, %v5070_v27  ;;  %v5113_v42 = vpop.f32.mrb[41].mxu1  ;;  %v5074_v45 = vpop.f32.mrb[42].mxu0  ;;  %5375 = vmatpush1.bf16.msra.mxu0 %v4320_v16  ;;  %v4400_v16 = vld [vmem:[#allocation2 + $0x3f0] sm:$0xff] }
0x1214   :  { %v9130_v22 = vadd.f32 %v5113_v42, %v5072_v41  ;;  %v5115_v52 = vpop.f32.mrb[42].mxu1  ;;  %5416 = vmatpush1.bf16.msra.mxu1 %v4448_v25  ;;  %v5075_v11 = vpop.f32.mrb[43].mxu0  ;;  %5376 = vmatprep.subr.bf16.mxu0 %v4329_v36  ;;  %v4528_v25 = vld [vmem:[#allocation2 + $0x7f0] sm:$0xff] }
0x1215   :  { %v5116_v26 = vpop.f32.mrb[43].mxu1  ;;  %5417 = vmatprep.subr.bf16.mxu1 %v4457_v39 }
0x1217   :  { %5377 = vmatpush1.bf16.msra.mxu0 %v4328_v60 }
0x1218   :  { %5418 = vmatpush1.bf16.msra.mxu1 %v4456_v61  ;;  %5378 = vmatprep.subr.bf16.mxu0 %v4337_v48 }
0x1219   :  { %5419 = vmatprep.subr.bf16.mxu1 %v4465_v49 }
0x121b   :  { %5379 = vmatpush1.bf16.msra.mxu0 %v4336_v50 }
0x121c   :  { %5420 = vmatpush1.bf16.msra.mxu1 %v4464_v33  ;;  %5380 = vmatprep.subr.bf16.mxu0 %v4345_v34 }
0x121d   :  { %5421 = vmatprep.subr.bf16.mxu1 %v4473_v40 }
0x121f   :  { %5381 = vmatpush1.bf16.msra.mxu0 %v4344_v3 }
0x1220   :  { %5422 = vmatpush1.bf16.msra.mxu1 %v4472_v5  ;;  %5382 = vmatprep.subr.bf16.mxu0 %v4353_v20 }
0x1221   :  { %5423 = vmatprep.subr.bf16.mxu1 %v4481_v51 }
0x1223   :  { %5383 = vmatpush1.bf16.msra.mxu0 %v4352_v15 }
0x1224   :  { %5424 = vmatpush1.bf16.msra.mxu1 %v4480_v54  ;;  %5384 = vmatprep.subr.bf16.mxu0 %v4361_v55 }
0x1225   :  { %5425 = vmatprep.subr.bf16.mxu1 %v4489_v57 }
0x1227   :  { %5385 = vmatpush1.bf16.msra.mxu0 %v4360_v58 }
0x1228   :  { %5426 = vmatpush1.bf16.msra.mxu1 %v4488_v59  ;;  %5386 = vmatprep.subr.bf16.mxu0 %v4369_v1 }
0x1229   :  { %5427 = vmatprep.subr.bf16.mxu1 %v4497_v12 }
0x122b   :  { %5387 = vmatpush1.bf16.msra.mxu0 %v4368_v35  ;;  %v5447_v35 = vld [vmem:[#allocation6 + $0x104] ss:$8 sm:$0xf] }
0x122c   :  { %5428 = vmatpush1.bf16.msra.mxu1 %v4496_v14  ;;  %5388 = vmatprep.subr.bf16.mxu0 %v4377_v29  ;;  %v5448_v14 = vld [vmem:[#allocation6 + $0x104] ss:$8 sm:$0xf0] }
0x122d   :  { %5429 = vmatprep.subr.bf16.mxu1 %v4505_v30  ;;  %v5449_v29 = vor.u32 %v5448_v14, %v5447_v35 }
0x122f   :  { %5389 = vmatpush1.bf16.msra.mxu0 %v4376_v37  ;;  %v5454_v30 = vrot.slane %v5449_v29, %v8855_v8  ;;  %v5458_v37 = vrot.slane %v5449_v29, %v8858_v9 }
0x1230   :  { %5430 = vmatpush1.bf16.msra.mxu1 %v4504_v38  ;;  %5390 = vmatprep.subr.bf16.mxu0 %v4385_v17  ;;  %v5462_v38 = vrot.slane %v5449_v29, %v8861_v10 }
0x1231   :  { %5431 = vmatprep.subr.bf16.mxu1 %v4513_v18 }
0x1233   :  { %5391 = vmatpush1.bf16.msra.mxu0 %v4384_v7  ;;  %v5466_v7 = vrot.slane %v5449_v29, %v8895_v56 }
0x1234   :  { %5432 = vmatpush1.bf16.msra.mxu1 %v4512_v19  ;;  %5392 = vmatprep.subr.bf16.mxu0 %v4393_v21 }
0x1235   :  { %5433 = vmatprep.subr.bf16.mxu1 %v4521_v0 }
0x1237   :  { %5393 = vmatpush1.bf16.msra.mxu0 %v4392_v46  ;;  %v9159_v46 = vsub.s32 5, %v8852_v6 }
0x1238   :  { %5434 = vmatpush1.bf16.msra.mxu1 %v4520_v47  ;;  %5394 = vmatprep.subr.bf16.mxu0 %v4401_v23 }
0x1239   :  { %5435 = vmatprep.subr.bf16.mxu1 %v4529_v24 }
0x123b   :  { %5395 = vmatpush1.bf16.msra.mxu0 %v4400_v16 }
0x123c   :  { %5436 = vmatpush1.bf16.msra.mxu1 %v4528_v25 }
0x123e   :  { %5397 = vmatmul.mubr.bf16.vlgmr.msra.gmra.mrb[56].mxu0 %v9101_v43 }
0x123f   :  { %5438 = vmatmul.mubr.bf16.vlgmr.msra.gmra.mrb[56].mxu1 %v9106_v2 }
0x1251   :  { %v5152_v27 = vpop.f32.mrb[44].mxu0 }
0x1252   :  { %v5193_v31 = vpop.f32.mrb[44].mxu1  ;;  %v5153_v36 = vadd.f32 %v5152_v27, %v9094_v13  ;;  %v5154_v39 = vpop.f32.mrb[45].mxu0 }
0x1253   :  { %v5195_v41 = vpop.f32.mrb[45].mxu1  ;;  %v5155_v42 = vadd.f32 %v5154_v39, %v9096_v44  ;;  %v5156_v45 = vpop.f32.mrb[46].mxu0 }
0x1254   :  { %v5197_v52 = vpop.f32.mrb[46].mxu1  ;;  %v5194_v11 = vadd.f32 %v5193_v31, %v5153_v36  ;;  %v5157_v26 = vpop.f32.mrb[47].mxu0  ;;  %v5474_v31 = vrot.slane %v5449_v29, %v9159_v46 }
0x1255   :  { %v5198_v60 = vpop.f32.mrb[47].mxu1  ;;  %v5196_v61 = vadd.f32 %v5195_v41, %v5155_v42  ;;  %v9174_v41 = vsub.s32 6, %v8852_v6  ;;  %v9177_v42 = vsub.s32 7, %v8852_v6 }
0x1257   :  { %v9145_v17 = vadd.f32 %v5458_v37, %v5196_v61 }
0x1259   :  { %v5511_v21 = vmul.f32 %v9145_v17, %v9145_v17 }
0x1291   :  { %v5234_v48 = vpop.f32.mrb[48].mxu0 }
0x1292   :  { %v5275_v49 = vpop.f32.mrb[48].mxu1  ;;  %v5235_v43 = vadd.f32 %v5234_v48, %v9112_v4  ;;  %v5236_v50 = vpop.f32.mrb[49].mxu0 }
0x1293   :  { %v5277_v2 = vpop.f32.mrb[49].mxu1  ;;  %v5237_v33 = vadd.f32 %v5236_v50, %v9114_v53  ;;  %v5238_v34 = vpop.f32.mrb[50].mxu0 }
0x1294   :  { %v5279_v13 = vpop.f32.mrb[50].mxu1  ;;  %v5276_v40 = vadd.f32 %v5275_v49, %v5235_v43  ;;  %v5239_v3 = vpop.f32.mrb[51].mxu0  ;;  %v5478_v49 = vrot.slane %v5449_v29, %v9174_v41 }
0x1295   :  { %v5280_v5 = vpop.f32.mrb[51].mxu1  ;;  %v5278_v44 = vadd.f32 %v5277_v2, %v5237_v33  ;;  %v5482_v33 = vrot.slane %v5449_v29, %v9177_v42 }
0x1296   :  { %v9150_v18 = vadd.f32 %v5462_v38, %v5276_v40  ;;  %v5550_v38 = vld [vmem:[#allocation6 + $0x105] ss:$8 sm:$0xf] }
0x1297   :  { %v9165_v24 = vadd.f32 %v5466_v7, %v5278_v44  ;;  %v5551_v7 = vld [vmem:[#allocation6 + $0x105] ss:$8 sm:$0xf0] }
0x1298   :  { %v5512_v23 = vmul.f32 %v9150_v18, %v9150_v18 }
0x1299   :  { %v5513_v39 = vmul.f32 %v9165_v24, %v9165_v24 }
0x12d1   :  { %v5316_v20 = vpop.f32.mrb[52].mxu0 }
0x12d2   :  { %v5357_v51 = vpop.f32.mrb[52].mxu1  ;;  %v5317_v15 = vadd.f32 %v5316_v20, %v9120_v62  ;;  %v5318_v54 = vpop.f32.mrb[53].mxu0  ;;  %v9143_v62 = vadd.f32 %v5454_v30, %v5194_v11 }
0x12d3   :  { %v5359_v55 = vpop.f32.mrb[53].mxu1  ;;  %v5319_v57 = vadd.f32 %v5318_v54, %v9122_v32  ;;  %v5320_v58 = vpop.f32.mrb[54].mxu0  ;;  %v9148_v32 = vsub.s32 4, %v8852_v6 }
0x12d4   :  { %v5361_v4 = vpop.f32.mrb[54].mxu1  ;;  %v5358_v59 = vadd.f32 %v5357_v51, %v5317_v15  ;;  %v5321_v1 = vpop.f32.mrb[55].mxu0  ;;  %v5510_v19 = vmul.f32 %v9143_v62, %v9143_v62  ;;  %v5499_v47 = vadd.f32 %v9145_v17, %v9143_v62 }
0x12d5   :  { %v5362_v12 = vpop.f32.mrb[55].mxu1  ;;  %v5360_v53 = vadd.f32 %v5359_v55, %v5319_v57  ;;  %v5470_v0 = vrot.slane %v5449_v29, %v9148_v32 }
0x12d6   :  { %v5518_v16 = vadd.f32 %v5511_v21, %v5510_v19  ;;  %v5500_v25 = vadd.f32 %v5499_v47, %v9150_v18  ;;  %v5603_v21 = vld [vmem:[#allocation6 + $0x106] ss:$8 sm:$0xf]  ;;  %v5552_v47 = vor.u32 %v5551_v7, %v5550_v38 }
0x12d7   :  { %v9168_v27 = vadd.f32 %v5470_v0, %v5358_v59  ;;  %v9182_v11 = vadd.f32 %v5474_v31, %v5360_v53  ;;  %v5604_v0 = vld [vmem:[#allocation6 + $0x106] ss:$8 sm:$0xf0] }
0x12d8   :  { %v5519_v36 = vadd.f32 %v5518_v16, %v5512_v23  ;;  %v5501_v45 = vadd.f32 %v5500_v25, %v9165_v24  ;;  %v5605_v23 = vor.u32 %v5604_v0, %v5603_v21  ;;  %v5557_v16 = vrot.slane %v5552_v47, %v8855_v8 }
0x12d9   :  { %v5514_v52 = vmul.f32 %v9168_v27, %v9168_v27  ;;  %v5515_v40 = vmul.f32 %v9182_v11, %v9182_v11  ;;  %v5561_v25 = vrot.slane %v5552_v47, %v8858_v9  ;;  %v5565_v31 = vrot.slane %v5552_v47, %v8861_v10 }
0x12da   :  { %v5520_v61 = vadd.f32 %v5519_v36, %v5513_v39  ;;  %v5502_v2 = vadd.f32 %v5501_v45, %v9168_v27  ;;  %v5569_v36 = vrot.slane %v5552_v47, %v8895_v56  ;;  %v5573_v39 = vrot.slane %v5552_v47, %v9148_v32 }
0x12db   :  { %v5610_v45 = vrot.slane %v5605_v23, %v8855_v8 }
0x12dc   :  { %v5521_v20 = vadd.f32 %v5520_v61, %v5514_v52  ;;  %v5503_v15 = vadd.f32 %v5502_v2, %v9182_v11  ;;  %v5614_v52 = vrot.slane %v5605_v23, %v8858_v9  ;;  %v5626_v61 = vrot.slane %v5605_v23, %v9148_v32 }
0x12dd   :  { %v5585_v2 = vrot.slane %v5552_v47, %v9177_v42 }
0x12de   :  { %v5522_v58 = vadd.f32 %v5521_v20, %v5515_v40 }
0x1311   :  { %v5398_v26 = vpop.f32.mrb[56].mxu0 }
0x1312   :  { %v5439_v60 = vpop.f32.mrb[56].mxu1  ;;  %v5399_v48 = vadd.f32 %v5398_v26, %v9128_v63  ;;  %v5400_v43 = vpop.f32.mrb[57].mxu0  ;;  %v5618_v26 = vrot.slane %v5605_v23, %v8861_v10 }
0x1313   :  { %v5441_v50 = vpop.f32.mrb[57].mxu1  ;;  %v5401_v6 = vadd.f32 %v5400_v43, %v9130_v22  ;;  %v5402_v34 = vpop.f32.mrb[58].mxu0  ;;  %v5581_v43 = vrot.slane %v5552_v47, %v9174_v41 }
0x1314   :  { %v5443_v13 = vpop.f32.mrb[58].mxu1  ;;  %v5440_v3 = vadd.f32 %v5439_v60, %v5399_v48  ;;  %v5403_v5 = vpop.f32.mrb[59].mxu0  ;;  %v5622_v60 = vrot.slane %v5605_v23, %v8895_v56  ;;  %v5577_v48 = vrot.slane %v5552_v47, %v9159_v46 }
0x1315   :  { %v5444_v44 = vpop.f32.mrb[59].mxu1  ;;  %v5442_v63 = vadd.f32 %v5441_v50, %v5401_v6  ;;  %v5634_v50 = vrot.slane %v5605_v23, %v9174_v41  ;;  %v5638_v6 = vrot.slane %v5605_v23, %v9177_v42 }
0x1316   :  { %v5497_v51 = vadd.f32 %v5478_v49, %v5440_v3  ;;  %v5630_v49 = vrot.slane %v5605_v23, %v9159_v46 }
0x1317   :  { %v5498_v54 = vadd.f32 %v5482_v33, %v5442_v63 }
0x1318   :  { %v5504_v55 = vadd.f32 %v5503_v15, %v5497_v51  ;;  %v5516_v57 = vmul.f32 %v5497_v51, %v5497_v51 }
0x1319   :  { %v5517_v4 = vmul.f32 %v5498_v54, %v5498_v54 }
0x131a   :  { %v5505_v22 = vadd.f32 %v5504_v55, %v5498_v54  ;;  %v5523_v59 = vadd.f32 %v5522_v58, %v5516_v57 }
0x131c   :  { %5506 = vadd.xlane.f32.xlu0 %v5505_v22  ;;  %v5524_v1 = vadd.f32 %v5523_v59, %v5517_v4 }
0x1320   :  { %5525 = vadd.xlane.f32.xlu0 %v5524_v1 }
0x13a9   :  { %v5507_v12 = vpop.xlane.xlu0 %5506 }
0x13aa   :  { %v5509_v53 = vmul.f32 0.0009765625, %v5507_v12 }
0x13ac   :  { %v5528_v14 = vmul.f32 %v5509_v53, %v5509_v53  ;;  %v5533_v33 = vsub.f32 %v9143_v62, %v5509_v53  ;;  %v5534_v34 = vsub.f32 %v9145_v17, %v5509_v53  ;;  %v5535_v13 = vsub.f32 %v9150_v18, %v5509_v53 }
0x13ad   :  { %v5526_v35 = vpop.xlane.xlu0 %5525  ;;  %v5536_v32 = vsub.f32 %v9165_v24, %v5509_v53  ;;  %v5537_v3 = vsub.f32 %v9168_v27, %v5509_v53  ;;  %v5538_v46 = vsub.f32 %v9182_v11, %v5509_v53  ;;  %v5539_v5 = vsub.f32 %v5497_v51, %v5509_v53 }
0x13ae   :  { %v5527_v29 = vmul.f32 0.0009765625, %v5526_v35  ;;  %v5540_v44 = vsub.f32 %v5498_v54, %v5509_v53 }
0x13b0   :  { %v5529_v30 = vsub.f32 %v5527_v29, %v5528_v14 }
0x13b2   :  { %v5530_v37 = vmax.f32 %v5529_v30, 0.0 }
0x13b4   :  { %v5531_v19 = vadd.f32 1e-05, %v5530_v37 }
0x13b6   :  { %8140 = vrsqrt.f32 %v5531_v19 }
0x13c0   :  { %v8141_v40 = vpop.eup %8140 }
0x13c1   :  { %v5541_v41 = vmul.f32 %v8141_v40, %v5533_v33  ;;  %v5542_v20 = vmul.f32 %v8141_v40, %v5534_v34  ;;  %v5543_v63 = vmul.f32 %v8141_v40, %v5535_v13  ;;  %v5544_v15 = vmul.f32 %v8141_v40, %v5536_v32 }
0x13c2   :  { %v5545_v42 = vmul.f32 %v8141_v40, %v5537_v3  ;;  %v5546_v55 = vmul.f32 %v8141_v40, %v5538_v46  ;;  %v5547_v62 = vmul.f32 %v8141_v40, %v5539_v5  ;;  %v5548_v57 = vmul.f32 %v8141_v40, %v5540_v44 }
0x13c3   :  { %v5594_v17 = vmul.f32 %v5557_v16, %v5541_v41  ;;  %v5595_v58 = vmul.f32 %v5561_v25, %v5542_v20  ;;  %v5596_v18 = vmul.f32 %v5565_v31, %v5543_v63  ;;  %v5597_v22 = vmul.f32 %v5569_v36, %v5544_v15 }
0x13c4   :  { %v5598_v24 = vmul.f32 %v5573_v39, %v5545_v42  ;;  %v5599_v4 = vmul.f32 %v5577_v48, %v5546_v55  ;;  %v5600_v59 = vmul.f32 %v5581_v43, %v5547_v62  ;;  %v5601_v27 = vmul.f32 %v5585_v2, %v5548_v57 }
0x13c5   :  { %v9214_v1 = vadd.f32 %v5610_v45, %v5594_v17  ;;  %v5648_v11 = vadd.f32 %v5614_v52, %v5595_v58  ;;  %v9216_v51 = vadd.f32 %v5618_v26, %v5596_v18  ;;  %v9218_v54 = vadd.f32 %v5622_v60, %v5597_v22 }
0x13c6   :  { %v9220_v12 = vadd.f32 %v5626_v61, %v5598_v24  ;;  %v9222_v53 = vadd.f32 %v5630_v49, %v5599_v4  ;;  %v9224_v35 = vadd.f32 %v5634_v50, %v5600_v59  ;;  %v9226_v14 = vadd.f32 %v5638_v6, %v5601_v27 }
0x13c7   :  { %v5655_v29 = vmax.f32 %v9214_v1, 0.0  ;;  %v5656_v30 = vmax.f32 %v5648_v11, 0.0  ;;  %v5657_v37 = vmax.f32 %v9216_v51, 0.0  ;;  %v5658_v38 = vmax.f32 %v9218_v54, 0.0 }
0x13c8   :  { %v5659_v7 = vmax.f32 %v9220_v12, 0.0  ;;  %v5660_v19 = vmax.f32 %v9222_v53, 0.0  ;;  %v5661_v21 = vmax.f32 %v9224_v35, 0.0  ;;  %v5662_v0 = vmax.f32 %v9226_v14, 0.0 }
0x13c9   :  { %8456 = dma.done.wait [#allocation5 + $0x1], 32768 }
0x13ca   :  { %8457 = vsyncadd [#allocation5 + $0x1], 4294934528  ;;  %v5923_v47 = vpack.c.bf16 %v5656_v30, %v5656_v30  ;;  %v5667_v23 = vld [vmem:[#allocation3 + $0x8] sm:$0xff]  ;;  %v5669_v16 = vld [vmem:[#allocation3 + $0x18] sm:$0xff] }
0x13cb   :  { %v5666_v25 = vld [vmem:[#allocation3] sm:$0xff]  ;;  %5953 = vmatprep.subr.bf16.mxu0 %v5667_v23  ;;  %6117 = vmatprep.subr.bf16.mxu1 %v5669_v16  ;;  %v5668_v31 = vld [vmem:[#allocation3 + $0x10] sm:$0xff]  ;;  %v5671_v36 = vld [vmem:[#allocation3 + $0x28] sm:$0xff] }
0x13cc   :  { %5985 = vmatprep.mubr.bf16.mxu0 %v5923_v47  ;;  %6149 = vmatprep.mubr.bf16.mxu1 %v5923_v47  ;;  %v5673_v39 = vld [vmem:[#allocation3 + $0x38] sm:$0xff]  ;;  %v5670_v45 = vld [vmem:[#allocation3 + $0x20] sm:$0xff]  ;;  %v5672_v52 = vld [vmem:[#allocation3 + $0x30] sm:$0xff] }
0x13cd   :  { %5954 = vmatpush1.bf16.msra.mxu0 %v5666_v25  ;;  %6118 = vmatpush1.bf16.msra.mxu1 %v5668_v31  ;;  %v5675_v26 = vld [vmem:[#allocation3 + $0x48] sm:$0xff]  ;;  %v5677_v60 = vld [vmem:[#allocation3 + $0x58] sm:$0xff]  ;;  %v5674_v61 = vld [vmem:[#allocation3 + $0x40] sm:$0xff] }
0x13ce   :  { %5955 = vmatprep.subr.bf16.mxu0 %v5671_v36  ;;  %6119 = vmatprep.subr.bf16.mxu1 %v5673_v39  ;;  %v5676_v48 = vld [vmem:[#allocation3 + $0x50] sm:$0xff]  ;;  %v5679_v49 = vld [vmem:[#allocation3 + $0x68] sm:$0xff]  ;;  %v5681_v43 = vld [vmem:[#allocation3 + $0x78] sm:$0xff] }
0x13cf   :  { %v5678_v50 = vld [vmem:[#allocation3 + $0x60] sm:$0xff]  ;;  %v5680_v2 = vld [vmem:[#allocation3 + $0x70] sm:$0xff]  ;;  %v5683_v6 = vld [vmem:[#allocation3 + $0x88] sm:$0xff] }
0x13d0   :  { %v5685_v33 = vld [vmem:[#allocation3 + $0x98] sm:$0xff]  ;;  %v5682_v34 = vld [vmem:[#allocation3 + $0x80] sm:$0xff]  ;;  %v5684_v13 = vld [vmem:[#allocation3 + $0x90] sm:$0xff] }
0x13d1   :  { %5956 = vmatpush1.bf16.msra.mxu0 %v5670_v45  ;;  %6120 = vmatpush1.bf16.msra.mxu1 %v5672_v52  ;;  %v5687_v32 = vld [vmem:[#allocation3 + $0xa8] sm:$0xff]  ;;  %v5689_v40 = vld [vmem:[#allocation3 + $0xb8] sm:$0xff]  ;;  %v5686_v3 = vld [vmem:[#allocation3 + $0xa0] sm:$0xff] }
0x13d2   :  { %5957 = vmatprep.subr.bf16.mxu0 %v5675_v26  ;;  %6121 = vmatprep.subr.bf16.mxu1 %v5677_v60  ;;  %v5688_v46 = vld [vmem:[#allocation3 + $0xb0] sm:$0xff]  ;;  %v5691_v5 = vld [vmem:[#allocation3 + $0xc8] sm:$0xff]  ;;  %v5693_v44 = vld [vmem:[#allocation3 + $0xd8] sm:$0xff] }
0x13d3   :  { %v5690_v41 = vld [vmem:[#allocation3 + $0xc0] sm:$0xff]  ;;  %v5692_v20 = vld [vmem:[#allocation3 + $0xd0] sm:$0xff]  ;;  %v5695_v63 = vld [vmem:[#allocation3 + $0xe8] sm:$0xff] }
0x13d4   :  { %v5697_v15 = vld [vmem:[#allocation3 + $0xf8] sm:$0xff]  ;;  %v5694_v42 = vld [vmem:[#allocation3 + $0xe0] sm:$0xff]  ;;  %v5696_v55 = vld [vmem:[#allocation3 + $0xf0] sm:$0xff] }
0x13d5   :  { %5958 = vmatpush1.bf16.msra.mxu0 %v5674_v61  ;;  %6122 = vmatpush1.bf16.msra.mxu1 %v5676_v48  ;;  %v5699_v62 = vld [vmem:[#allocation3 + $0x108] sm:$0xff]  ;;  %v5701_v57 = vld [vmem:[#allocation3 + $0x118] sm:$0xff]  ;;  %v5698_v17 = vld [vmem:[#allocation3 + $0x100] sm:$0xff] }
0x13d6   :  { %5959 = vmatprep.subr.bf16.mxu0 %v5679_v49  ;;  %6123 = vmatprep.subr.bf16.mxu1 %v5681_v43  ;;  %v5700_v58 = vld [vmem:[#allocation3 + $0x110] sm:$0xff]  ;;  %v5703_v18 = vld [vmem:[#allocation3 + $0x128] sm:$0xff]  ;;  %v5705_v22 = vld [vmem:[#allocation3 + $0x138] sm:$0xff] }
0x13d7   :  { %v5702_v24 = vld [vmem:[#allocation3 + $0x120] sm:$0xff]  ;;  %v5704_v4 = vld [vmem:[#allocation3 + $0x130] sm:$0xff]  ;;  %v5707_v59 = vld [vmem:[#allocation3 + $0x148] sm:$0xff] }
0x13d8   :  { %v5709_v27 = vld [vmem:[#allocation3 + $0x158] sm:$0xff]  ;;  %v5706_v11 = vld [vmem:[#allocation3 + $0x140] sm:$0xff]  ;;  %v5708_v30 = vld [vmem:[#allocation3 + $0x150] sm:$0xff] }
0x13d9   :  { %5960 = vmatpush1.bf16.msra.mxu0 %v5678_v50  ;;  %6124 = vmatpush1.bf16.msra.mxu1 %v5680_v2  ;;  %v5711_v47 = vld [vmem:[#allocation3 + $0x168] sm:$0xff]  ;;  %v5713_v23 = vld [vmem:[#allocation3 + $0x178] sm:$0xff]  ;;  %v5710_v16 = vld [vmem:[#allocation3 + $0x160] sm:$0xff] }
0x13da   :  { %5961 = vmatprep.subr.bf16.mxu0 %v5683_v6  ;;  %6125 = vmatprep.subr.bf16.mxu1 %v5685_v33  ;;  %v5712_v25 = vld [vmem:[#allocation3 + $0x170] sm:$0xff]  ;;  %v5715_v31 = vld [vmem:[#allocation3 + $0x188] sm:$0xff]  ;;  %v5717_v36 = vld [vmem:[#allocation3 + $0x198] sm:$0xff] }
0x13db   :  { %v5714_v39 = vld [vmem:[#allocation3 + $0x180] sm:$0xff]  ;;  %v5716_v45 = vld [vmem:[#allocation3 + $0x190] sm:$0xff]  ;;  %v5719_v52 = vld [vmem:[#allocation3 + $0x1a8] sm:$0xff] }
0x13dc   :  { %v5721_v26 = vld [vmem:[#allocation3 + $0x1b8] sm:$0xff]  ;;  %v5718_v60 = vld [vmem:[#allocation3 + $0x1a0] sm:$0xff]  ;;  %v5720_v61 = vld [vmem:[#allocation3 + $0x1b0] sm:$0xff] }
0x13dd   :  { %5962 = vmatpush1.bf16.msra.mxu0 %v5682_v34  ;;  %6126 = vmatpush1.bf16.msra.mxu1 %v5684_v13  ;;  %v5723_v48 = vld [vmem:[#allocation3 + $0x1c8] sm:$0xff]  ;;  %v5725_v49 = vld [vmem:[#allocation3 + $0x1d8] sm:$0xff]  ;;  %v5722_v43 = vld [vmem:[#allocation3 + $0x1c0] sm:$0xff] }
0x13de   :  { %5963 = vmatprep.subr.bf16.mxu0 %v5687_v32  ;;  %6127 = vmatprep.subr.bf16.mxu1 %v5689_v40  ;;  %v5724_v50 = vld [vmem:[#allocation3 + $0x1d0] sm:$0xff]  ;;  %v5727_v2 = vld [vmem:[#allocation3 + $0x1e8] sm:$0xff]  ;;  %v5729_v6 = vld [vmem:[#allocation3 + $0x1f8] sm:$0xff]  ;;  %v5922_v40 = vpack.c.bf16 %v5655_v29, %v5655_v29 }
0x13df   :  { %v5726_v33 = vld [vmem:[#allocation3 + $0x1e0] sm:$0xff]  ;;  %v5728_v34 = vld [vmem:[#allocation3 + $0x1f0] sm:$0xff]  ;;  %v5731_v13 = vld [vmem:[#allocation3 + $0x208] sm:$0xff] }
0x13e0   :  { %v5733_v32 = vld [vmem:[#allocation3 + $0x218] sm:$0xff]  ;;  %v5734_v1 = vld [vmem:[#allocation3 + $0x220] sm:$0xff]  ;;  %v5736_v29 = vld [vmem:[#allocation3 + $0x230] sm:$0xff] }
0x13e1   :  { %5964 = vmatpush1.bf16.msra.mxu0 %v5686_v3  ;;  %6128 = vmatpush1.bf16.msra.mxu1 %v5688_v46  ;;  %v5730_v3 = vld [vmem:[#allocation3 + $0x200] sm:$0xff]  ;;  %v5732_v46 = vld [vmem:[#allocation3 + $0x210] sm:$0xff] }
0x13e2   :  { %5965 = vmatprep.subr.bf16.mxu0 %v5691_v5  ;;  %6129 = vmatprep.subr.bf16.mxu1 %v5693_v44  ;;  %v5735_v5 = vld [vmem:[#allocation3 + $0x228] sm:$0xff]  ;;  %v5737_v44 = vld [vmem:[#allocation3 + $0x238] sm:$0xff]  ;;  %v5740_v54 = vld [vmem:[#allocation3 + $0x250] sm:$0xff] }
0x13e3   :  { %v5798_v51 = vld [vmem:[#allocation3 + $0x420] sm:$0xff]  ;;  %v5804_v53 = vld [vmem:[#allocation3 + $0x450] sm:$0xff] }
0x13e4   :  { %v5862_v12 = vld [vmem:[#allocation3 + $0x620] sm:$0xff]  ;;  %v5868_v14 = vld [vmem:[#allocation3 + $0x650] sm:$0xff] }
0x13e5   :  { %5966 = vmatpush1.bf16.msra.mxu0 %v5690_v41  ;;  %6130 = vmatpush1.bf16.msra.mxu1 %v5692_v20  ;;  %v5925_v41 = vpack.c.bf16 %v5658_v38, %v5658_v38  ;;  %v5739_v20 = vld [vmem:[#allocation3 + $0x248] sm:$0xff]  ;;  %v5745_v38 = vld [vmem:[#allocation3 + $0x278] sm:$0xff] }
0x13e6   :  { %5967 = vmatprep.subr.bf16.mxu0 %v5695_v63  ;;  %6131 = vmatprep.subr.bf16.mxu1 %v5697_v15  ;;  %v5741_v63 = vld [vmem:[#allocation3 + $0x258] sm:$0xff]  ;;  %v5738_v15 = vld [vmem:[#allocation3 + $0x240] sm:$0xff] }
0x13e9   :  { %5968 = vmatpush1.bf16.msra.mxu0 %v5694_v42  ;;  %6132 = vmatpush1.bf16.msra.mxu1 %v5696_v55  ;;  %v5743_v42 = vld [vmem:[#allocation3 + $0x268] sm:$0xff]  ;;  %v5742_v55 = vld [vmem:[#allocation3 + $0x260] sm:$0xff] }
0x13ea   :  { %5969 = vmatprep.subr.bf16.mxu0 %v5699_v62  ;;  %6133 = vmatprep.subr.bf16.mxu1 %v5701_v57  ;;  %v5744_v62 = vld [vmem:[#allocation3 + $0x270] sm:$0xff]  ;;  %v5747_v57 = vld [vmem:[#allocation3 + $0x288] sm:$0xff] }
0x13ed   :  { %5970 = vmatpush1.bf16.msra.mxu0 %v5698_v17  ;;  %6134 = vmatpush1.bf16.msra.mxu1 %v5700_v58  ;;  %v5749_v17 = vld [vmem:[#allocation3 + $0x298] sm:$0xff]  ;;  %v5746_v58 = vld [vmem:[#allocation3 + $0x280] sm:$0xff] }
0x13ee   :  { %5971 = vmatprep.subr.bf16.mxu0 %v5703_v18  ;;  %6135 = vmatprep.subr.bf16.mxu1 %v5705_v22  ;;  %v5748_v18 = vld [vmem:[#allocation3 + $0x290] sm:$0xff]  ;;  %v5751_v22 = vld [vmem:[#allocation3 + $0x2a8] sm:$0xff] }
0x13f1   :  { %5972 = vmatpush1.bf16.msra.mxu0 %v5702_v24  ;;  %6136 = vmatpush1.bf16.msra.mxu1 %v5704_v4  ;;  %v5753_v24 = vld [vmem:[#allocation3 + $0x2b8] sm:$0xff]  ;;  %v5750_v4 = vld [vmem:[#allocation3 + $0x2a0] sm:$0xff] }
0x13f2   :  { %5973 = vmatprep.subr.bf16.mxu0 %v5707_v59  ;;  %6137 = vmatprep.subr.bf16.mxu1 %v5709_v27  ;;  %v5752_v59 = vld [vmem:[#allocation3 + $0x2b0] sm:$0xff]  ;;  %v5755_v27 = vld [vmem:[#allocation3 + $0x2c8] sm:$0xff] }
0x13f5   :  { %5974 = vmatpush1.bf16.msra.mxu0 %v5706_v11  ;;  %6138 = vmatpush1.bf16.msra.mxu1 %v5708_v30  ;;  %v5757_v11 = vld [vmem:[#allocation3 + $0x2d8] sm:$0xff]  ;;  %v5754_v30 = vld [vmem:[#allocation3 + $0x2c0] sm:$0xff] }
0x13f6   :  { %5975 = vmatprep.subr.bf16.mxu0 %v5711_v47  ;;  %6139 = vmatprep.subr.bf16.mxu1 %v5713_v23  ;;  %v5756_v47 = vld [vmem:[#allocation3 + $0x2d0] sm:$0xff]  ;;  %v5759_v23 = vld [vmem:[#allocation3 + $0x2e8] sm:$0xff] }
0x13f9   :  { %5976 = vmatpush1.bf16.msra.mxu0 %v5710_v16  ;;  %6140 = vmatpush1.bf16.msra.mxu1 %v5712_v25  ;;  %v5761_v16 = vld [vmem:[#allocation3 + $0x2f8] sm:$0xff]  ;;  %v5758_v25 = vld [vmem:[#allocation3 + $0x2e0] sm:$0xff] }
0x13fa   :  { %5977 = vmatprep.subr.bf16.mxu0 %v5715_v31  ;;  %6141 = vmatprep.subr.bf16.mxu1 %v5717_v36  ;;  %v5760_v31 = vld [vmem:[#allocation3 + $0x2f0] sm:$0xff]  ;;  %v5763_v36 = vld [vmem:[#allocation3 + $0x308] sm:$0xff] }
0x13fd   :  { %5978 = vmatpush1.bf16.msra.mxu0 %v5714_v39  ;;  %6142 = vmatpush1.bf16.msra.mxu1 %v5716_v45  ;;  %v5765_v39 = vld [vmem:[#allocation3 + $0x318] sm:$0xff]  ;;  %v5762_v45 = vld [vmem:[#allocation3 + $0x300] sm:$0xff] }
0x13fe   :  { %5979 = vmatprep.subr.bf16.mxu0 %v5719_v52  ;;  %6143 = vmatprep.subr.bf16.mxu1 %v5721_v26  ;;  %v5764_v52 = vld [vmem:[#allocation3 + $0x310] sm:$0xff]  ;;  %v5767_v26 = vld [vmem:[#allocation3 + $0x328] sm:$0xff] }
0x1401   :  { %5980 = vmatpush1.bf16.msra.mxu0 %v5718_v60  ;;  %6144 = vmatpush1.bf16.msra.mxu1 %v5720_v61  ;;  %v5769_v60 = vld [vmem:[#allocation3 + $0x338] sm:$0xff]  ;;  %v5766_v61 = vld [vmem:[#allocation3 + $0x320] sm:$0xff] }
0x1402   :  { %5981 = vmatprep.subr.bf16.mxu0 %v5723_v48  ;;  %6145 = vmatprep.subr.bf16.mxu1 %v5725_v49  ;;  %v5768_v48 = vld [vmem:[#allocation3 + $0x330] sm:$0xff]  ;;  %v5771_v49 = vld [vmem:[#allocation3 + $0x348] sm:$0xff] }
0x1405   :  { %5982 = vmatpush1.bf16.msra.mxu0 %v5722_v43  ;;  %6146 = vmatpush1.bf16.msra.mxu1 %v5724_v50  ;;  %v5773_v43 = vld [vmem:[#allocation3 + $0x358] sm:$0xff]  ;;  %v5770_v50 = vld [vmem:[#allocation3 + $0x340] sm:$0xff] }
0x1406   :  { %5983 = vmatprep.subr.bf16.mxu0 %v5727_v2  ;;  %6147 = vmatprep.subr.bf16.mxu1 %v5729_v6  ;;  %v5772_v2 = vld [vmem:[#allocation3 + $0x350] sm:$0xff]  ;;  %v5775_v6 = vld [vmem:[#allocation3 + $0x368] sm:$0xff] }
0x1409   :  { %5984 = vmatpush1.bf16.msra.mxu0 %v5726_v33  ;;  %6148 = vmatpush1.bf16.msra.mxu1 %v5728_v34  ;;  %v5777_v33 = vld [vmem:[#allocation3 + $0x378] sm:$0xff]  ;;  %v5774_v34 = vld [vmem:[#allocation3 + $0x360] sm:$0xff] }
0x140a   :  { %5994 = vmatprep.subr.bf16.mxu0 %v5731_v13  ;;  %6158 = vmatprep.subr.bf16.mxu1 %v5733_v32  ;;  %v5776_v13 = vld [vmem:[#allocation3 + $0x370] sm:$0xff]  ;;  %v5779_v32 = vld [vmem:[#allocation3 + $0x388] sm:$0xff] }
0x140c   :  { %5986 = vmatmul.mubr.bf16.vlgmr.msra.gmra.mrb[60].mxu0 %v5922_v40  ;;  %6150 = vmatmul.mubr.bf16.vlgmr.msra.gmra.mrb[60].mxu1 %v5922_v40  ;;  %v5781_v40 = vld [vmem:[#allocation3 + $0x398] sm:$0xff] }
0x140d   :  { %5995 = vmatpush1.bf16.msra.mxu0 %v5730_v3  ;;  %6159 = vmatpush1.bf16.msra.mxu1 %v5732_v46  ;;  %v5778_v3 = vld [vmem:[#allocation3 + $0x380] sm:$0xff]  ;;  %v5780_v46 = vld [vmem:[#allocation3 + $0x390] sm:$0xff] }
0x140e   :  { %5996 = vmatprep.subr.bf16.mxu0 %v5735_v5  ;;  %6160 = vmatprep.subr.bf16.mxu1 %v5737_v44  ;;  %v5783_v5 = vld [vmem:[#allocation3 + $0x3a8] sm:$0xff]  ;;  %v5785_v44 = vld [vmem:[#allocation3 + $0x3b8] sm:$0xff] }
0x140f   :  { %6026 = vmatprep.mubr.bf16.mxu0 %v5925_v41  ;;  %6190 = vmatprep.mubr.bf16.mxu1 %v5925_v41  ;;  %v5782_v41 = vld [vmem:[#allocation3 + $0x3a0] sm:$0xff] }
0x1411   :  { %5997 = vmatpush1.bf16.msra.mxu0 %v5734_v1  ;;  %6161 = vmatpush1.bf16.msra.mxu1 %v5736_v29  ;;  %v5784_v1 = vld [vmem:[#allocation3 + $0x3b0] sm:$0xff]  ;;  %v5787_v29 = vld [vmem:[#allocation3 + $0x3c8] sm:$0xff] }
0x1412   :  { %5998 = vmatprep.subr.bf16.mxu0 %v5739_v20  ;;  %6162 = vmatprep.subr.bf16.mxu1 %v5741_v63  ;;  %v5789_v20 = vld [vmem:[#allocation3 + $0x3d8] sm:$0xff]  ;;  %v5786_v63 = vld [vmem:[#allocation3 + $0x3c0] sm:$0xff] }
0x1415   :  { %5999 = vmatpush1.bf16.msra.mxu0 %v5738_v15  ;;  %6163 = vmatpush1.bf16.msra.mxu1 %v5740_v54  ;;  %v5788_v15 = vld [vmem:[#allocation3 + $0x3d0] sm:$0xff]  ;;  %v5791_v54 = vld [vmem:[#allocation3 + $0x3e8] sm:$0xff] }
0x1416   :  { %6000 = vmatprep.subr.bf16.mxu0 %v5743_v42  ;;  %6164 = vmatprep.subr.bf16.mxu1 %v5745_v38  ;;  %v5793_v42 = vld [vmem:[#allocation3 + $0x3f8] sm:$0xff]  ;;  %v5790_v38 = vld [vmem:[#allocation3 + $0x3e0] sm:$0xff] }
0x1419   :  { %6001 = vmatpush1.bf16.msra.mxu0 %v5742_v55  ;;  %6165 = vmatpush1.bf16.msra.mxu1 %v5744_v62  ;;  %v5792_v55 = vld [vmem:[#allocation3 + $0x3f0] sm:$0xff]  ;;  %v5795_v62 = vld [vmem:[#allocation3 + $0x408] sm:$0xff] }
0x141a   :  { %6002 = vmatprep.subr.bf16.mxu0 %v5747_v57  ;;  %6166 = vmatprep.subr.bf16.mxu1 %v5749_v17  ;;  %v5797_v57 = vld [vmem:[#allocation3 + $0x418] sm:$0xff]  ;;  %v5924_v17 = vpack.c.bf16 %v5657_v37, %v5657_v37  ;;  %v5800_v37 = vld [vmem:[#allocation3 + $0x430] sm:$0xff] }
0x141d   :  { %6003 = vmatpush1.bf16.msra.mxu0 %v5746_v58  ;;  %6167 = vmatpush1.bf16.msra.mxu1 %v5748_v18  ;;  %v5794_v58 = vld [vmem:[#allocation3 + $0x400] sm:$0xff]  ;;  %v5796_v18 = vld [vmem:[#allocation3 + $0x410] sm:$0xff] }
0x141e   :  { %6004 = vmatprep.subr.bf16.mxu0 %v5751_v22  ;;  %6168 = vmatprep.subr.bf16.mxu1 %v5753_v24  ;;  %v5799_v22 = vld [vmem:[#allocation3 + $0x428] sm:$0xff]  ;;  %v5801_v24 = vld [vmem:[#allocation3 + $0x438] sm:$0xff] }
0x1421   :  { %6005 = vmatpush1.bf16.msra.mxu0 %v5750_v4  ;;  %6169 = vmatpush1.bf16.msra.mxu1 %v5752_v59  ;;  %v5927_v4 = vpack.c.bf16 %v5660_v19, %v5660_v19  ;;  %v5803_v59 = vld [vmem:[#allocation3 + $0x448] sm:$0xff]  ;;  %v5809_v19 = vld [vmem:[#allocation3 + $0x478] sm:$0xff] }
0x1422   :  { %6006 = vmatprep.subr.bf16.mxu0 %v5755_v27  ;;  %6170 = vmatprep.subr.bf16.mxu1 %v5757_v11  ;;  %v5805_v27 = vld [vmem:[#allocation3 + $0x458] sm:$0xff]  ;;  %v5802_v11 = vld [vmem:[#allocation3 + $0x440] sm:$0xff] }
0x1425   :  { %6007 = vmatpush1.bf16.msra.mxu0 %v5754_v30  ;;  %6171 = vmatpush1.bf16.msra.mxu1 %v5756_v47  ;;  %v5807_v30 = vld [vmem:[#allocation3 + $0x468] sm:$0xff]  ;;  %v5806_v47 = vld [vmem:[#allocation3 + $0x460] sm:$0xff] }
0x1426   :  { %6008 = vmatprep.subr.bf16.mxu0 %v5759_v23  ;;  %6172 = vmatprep.subr.bf16.mxu1 %v5761_v16  ;;  %v5808_v23 = vld [vmem:[#allocation3 + $0x470] sm:$0xff]  ;;  %v5811_v16 = vld [vmem:[#allocation3 + $0x488] sm:$0xff] }
0x1429   :  { %6009 = vmatpush1.bf16.msra.mxu0 %v5758_v25  ;;  %6173 = vmatpush1.bf16.msra.mxu1 %v5760_v31  ;;  %v5813_v25 = vld [vmem:[#allocation3 + $0x498] sm:$0xff]  ;;  %v5810_v31 = vld [vmem:[#allocation3 + $0x480] sm:$0xff] }
0x142a   :  { %6010 = vmatprep.subr.bf16.mxu0 %v5763_v36  ;;  %6174 = vmatprep.subr.bf16.mxu1 %v5765_v39  ;;  %v5812_v36 = vld [vmem:[#allocation3 + $0x490] sm:$0xff]  ;;  %v5815_v39 = vld [vmem:[#allocation3 + $0x4a8] sm:$0xff] }
0x142d   :  { %6011 = vmatpush1.bf16.msra.mxu0 %v5762_v45  ;;  %6175 = vmatpush1.bf16.msra.mxu1 %v5764_v52  ;;  %v5817_v45 = vld [vmem:[#allocation3 + $0x4b8] sm:$0xff]  ;;  %v5814_v52 = vld [vmem:[#allocation3 + $0x4a0] sm:$0xff] }
0x142e   :  { %6012 = vmatprep.subr.bf16.mxu0 %v5767_v26  ;;  %6176 = vmatprep.subr.bf16.mxu1 %v5769_v60  ;;  %v5816_v26 = vld [vmem:[#allocation3 + $0x4b0] sm:$0xff]  ;;  %v5819_v60 = vld [vmem:[#allocation3 + $0x4c8] sm:$0xff] }
0x1431   :  { %6013 = vmatpush1.bf16.msra.mxu0 %v5766_v61  ;;  %6177 = vmatpush1.bf16.msra.mxu1 %v5768_v48  ;;  %v5821_v61 = vld [vmem:[#allocation3 + $0x4d8] sm:$0xff]  ;;  %v5818_v48 = vld [vmem:[#allocation3 + $0x4c0] sm:$0xff] }
0x1432   :  { %6014 = vmatprep.subr.bf16.mxu0 %v5771_v49  ;;  %6178 = vmatprep.subr.bf16.mxu1 %v5773_v43  ;;  %v5820_v49 = vld [vmem:[#allocation3 + $0x4d0] sm:$0xff]  ;;  %v5823_v43 = vld [vmem:[#allocation3 + $0x4e8] sm:$0xff] }
0x1435   :  { %6015 = vmatpush1.bf16.msra.mxu0 %v5770_v50  ;;  %6179 = vmatpush1.bf16.msra.mxu1 %v5772_v2  ;;  %v5825_v50 = vld [vmem:[#allocation3 + $0x4f8] sm:$0xff]  ;;  %v5822_v2 = vld [vmem:[#allocation3 + $0x4e0] sm:$0xff] }
0x1436   :  { %6016 = vmatprep.subr.bf16.mxu0 %v5775_v6  ;;  %6180 = vmatprep.subr.bf16.mxu1 %v5777_v33  ;;  %v5824_v6 = vld [vmem:[#allocation3 + $0x4f0] sm:$0xff]  ;;  %v5827_v33 = vld [vmem:[#allocation3 + $0x508] sm:$0xff] }
0x1439   :  { %6017 = vmatpush1.bf16.msra.mxu0 %v5774_v34  ;;  %6181 = vmatpush1.bf16.msra.mxu1 %v5776_v13  ;;  %v5829_v34 = vld [vmem:[#allocation3 + $0x518] sm:$0xff]  ;;  %v5826_v13 = vld [vmem:[#allocation3 + $0x500] sm:$0xff] }
0x143a   :  { %6018 = vmatprep.subr.bf16.mxu0 %v5779_v32  ;;  %6182 = vmatprep.subr.bf16.mxu1 %v5781_v40  ;;  %v5828_v32 = vld [vmem:[#allocation3 + $0x510] sm:$0xff]  ;;  %v5831_v40 = vld [vmem:[#allocation3 + $0x528] sm:$0xff] }
0x143d   :  { %6019 = vmatpush1.bf16.msra.mxu0 %v5778_v3  ;;  %6183 = vmatpush1.bf16.msra.mxu1 %v5780_v46  ;;  %v5833_v3 = vld [vmem:[#allocation3 + $0x538] sm:$0xff]  ;;  %v5830_v46 = vld [vmem:[#allocation3 + $0x520] sm:$0xff] }
0x143e   :  { %6020 = vmatprep.subr.bf16.mxu0 %v5783_v5  ;;  %6184 = vmatprep.subr.bf16.mxu1 %v5785_v44  ;;  %v5832_v5 = vld [vmem:[#allocation3 + $0x530] sm:$0xff]  ;;  %v5835_v44 = vld [vmem:[#allocation3 + $0x548] sm:$0xff] }
0x1441   :  { %6021 = vmatpush1.bf16.msra.mxu0 %v5782_v41  ;;  %6185 = vmatpush1.bf16.msra.mxu1 %v5784_v1  ;;  %v5837_v41 = vld [vmem:[#allocation3 + $0x558] sm:$0xff]  ;;  %v5834_v1 = vld [vmem:[#allocation3 + $0x540] sm:$0xff] }
0x1442   :  { %6022 = vmatprep.subr.bf16.mxu0 %v5787_v29  ;;  %6186 = vmatprep.subr.bf16.mxu1 %v5789_v20  ;;  %v5836_v29 = vld [vmem:[#allocation3 + $0x550] sm:$0xff]  ;;  %v5839_v20 = vld [vmem:[#allocation3 + $0x568] sm:$0xff] }
0x1445   :  { %6023 = vmatpush1.bf16.msra.mxu0 %v5786_v63  ;;  %6187 = vmatpush1.bf16.msra.mxu1 %v5788_v15  ;;  %v5841_v63 = vld [vmem:[#allocation3 + $0x578] sm:$0xff]  ;;  %v5838_v15 = vld [vmem:[#allocation3 + $0x560] sm:$0xff] }
0x1446   :  { %6024 = vmatprep.subr.bf16.mxu0 %v5791_v54  ;;  %6188 = vmatprep.subr.bf16.mxu1 %v5793_v42  ;;  %v5840_v54 = vld [vmem:[#allocation3 + $0x570] sm:$0xff]  ;;  %v5843_v42 = vld [vmem:[#allocation3 + $0x588] sm:$0xff] }
0x1449   :  { %6025 = vmatpush1.bf16.msra.mxu0 %v5790_v38  ;;  %6189 = vmatpush1.bf16.msra.mxu1 %v5792_v55  ;;  %v5845_v38 = vld [vmem:[#allocation3 + $0x598] sm:$0xff]  ;;  %v5842_v55 = vld [vmem:[#allocation3 + $0x580] sm:$0xff] }
0x144a   :  { %6035 = vmatprep.subr.bf16.mxu0 %v5795_v62  ;;  %6199 = vmatprep.subr.bf16.mxu1 %v5797_v57  ;;  %v5844_v62 = vld [vmem:[#allocation3 + $0x590] sm:$0xff]  ;;  %v5847_v57 = vld [vmem:[#allocation3 + $0x5a8] sm:$0xff] }
0x144c   :  { %6027 = vmatmul.mubr.bf16.vlgmr.msra.gmra.mrb[60].mxu0 %v5924_v17  ;;  %6191 = vmatmul.mubr.bf16.vlgmr.msra.gmra.mrb[60].mxu1 %v5924_v17  ;;  %v5849_v17 = vld [vmem:[#allocation3 + $0x5b8] sm:$0xff] }
0x144d   :  { %6036 = vmatpush1.bf16.msra.mxu0 %v5794_v58  ;;  %6200 = vmatpush1.bf16.msra.mxu1 %v5796_v18  ;;  %v5846_v58 = vld [vmem:[#allocation3 + $0x5a0] sm:$0xff]  ;;  %v5848_v18 = vld [vmem:[#allocation3 + $0x5b0] sm:$0xff] }
0x144e   :  { %6037 = vmatprep.subr.bf16.mxu0 %v5799_v22  ;;  %6201 = vmatprep.subr.bf16.mxu1 %v5801_v24  ;;  %v5851_v22 = vld [vmem:[#allocation3 + $0x5c8] sm:$0xff]  ;;  %v5853_v24 = vld [vmem:[#allocation3 + $0x5d8] sm:$0xff] }
0x144f   :  { %6067 = vmatprep.mubr.bf16.mxu0 %v5927_v4  ;;  %6231 = vmatprep.mubr.bf16.mxu1 %v5927_v4  ;;  %v5850_v4 = vld [vmem:[#allocation3 + $0x5c0] sm:$0xff] }
0x1451   :  { %6038 = vmatpush1.bf16.msra.mxu0 %v5798_v51  ;;  %6202 = vmatpush1.bf16.msra.mxu1 %v5800_v37  ;;  %v5852_v51 = vld [vmem:[#allocation3 + $0x5d0] sm:$0xff]  ;;  %v5855_v37 = vld [vmem:[#allocation3 + $0x5e8] sm:$0xff] }
0x1452   :  { %6039 = vmatprep.subr.bf16.mxu0 %v5803_v59  ;;  %6203 = vmatprep.subr.bf16.mxu1 %v5805_v27  ;;  %v5857_v59 = vld [vmem:[#allocation3 + $0x5f8] sm:$0xff]  ;;  %v5854_v27 = vld [vmem:[#allocation3 + $0x5e0] sm:$0xff] }
0x1455   :  { %6040 = vmatpush1.bf16.msra.mxu0 %v5802_v11  ;;  %6204 = vmatpush1.bf16.msra.mxu1 %v5804_v53  ;;  %v5856_v11 = vld [vmem:[#allocation3 + $0x5f0] sm:$0xff]  ;;  %v5859_v53 = vld [vmem:[#allocation3 + $0x608] sm:$0xff] }
0x1456   :  { %6041 = vmatprep.subr.bf16.mxu0 %v5807_v30  ;;  %6205 = vmatprep.subr.bf16.mxu1 %v5809_v19  ;;  %v5861_v30 = vld [vmem:[#allocation3 + $0x618] sm:$0xff]  ;;  %v5926_v19 = vpack.c.bf16 %v5659_v7, %v5659_v7  ;;  %v5864_v7 = vld [vmem:[#allocation3 + $0x630] sm:$0xff] }
0x1459   :  { %6042 = vmatpush1.bf16.msra.mxu0 %v5806_v47  ;;  %6206 = vmatpush1.bf16.msra.mxu1 %v5808_v23  ;;  %v5858_v47 = vld [vmem:[#allocation3 + $0x600] sm:$0xff]  ;;  %v5860_v23 = vld [vmem:[#allocation3 + $0x610] sm:$0xff] }
0x145a   :  { %6043 = vmatprep.subr.bf16.mxu0 %v5811_v16  ;;  %6207 = vmatprep.subr.bf16.mxu1 %v5813_v25  ;;  %v5863_v16 = vld [vmem:[#allocation3 + $0x628] sm:$0xff]  ;;  %v5865_v25 = vld [vmem:[#allocation3 + $0x638] sm:$0xff] }
0x145d   :  { %6044 = vmatpush1.bf16.msra.mxu0 %v5810_v31  ;;  %6208 = vmatpush1.bf16.msra.mxu1 %v5812_v36  ;;  %v5929_v31 = vpack.c.bf16 %v5662_v0, %v5662_v0  ;;  %v5867_v36 = vld [vmem:[#allocation3 + $0x648] sm:$0xff]  ;;  %v5873_v0 = vld [vmem:[#allocation3 + $0x678] sm:$0xff] }
0x145e   :  { %6045 = vmatprep.subr.bf16.mxu0 %v5815_v39  ;;  %6209 = vmatprep.subr.bf16.mxu1 %v5817_v45  ;;  %v5869_v39 = vld [vmem:[#allocation3 + $0x658] sm:$0xff]  ;;  %v5866_v45 = vld [vmem:[#allocation3 + $0x640] sm:$0xff] }
0x1461   :  { %6046 = vmatpush1.bf16.msra.mxu0 %v5814_v52  ;;  %6210 = vmatpush1.bf16.msra.mxu1 %v5816_v26  ;;  %v5871_v52 = vld [vmem:[#allocation3 + $0x668] sm:$0xff]  ;;  %v5870_v26 = vld [vmem:[#allocation3 + $0x660] sm:$0xff] }
0x1462   :  { %6047 = vmatprep.subr.bf16.mxu0 %v5819_v60  ;;  %6211 = vmatprep.subr.bf16.mxu1 %v5821_v61  ;;  %v5872_v60 = vld [vmem:[#allocation3 + $0x670] sm:$0xff]  ;;  %v5875_v61 = vld [vmem:[#allocation3 + $0x688] sm:$0xff] }
0x1465   :  { %6048 = vmatpush1.bf16.msra.mxu0 %v5818_v48  ;;  %6212 = vmatpush1.bf16.msra.mxu1 %v5820_v49  ;;  %v5877_v48 = vld [vmem:[#allocation3 + $0x698] sm:$0xff]  ;;  %v5874_v49 = vld [vmem:[#allocation3 + $0x680] sm:$0xff] }
0x1466   :  { %6049 = vmatprep.subr.bf16.mxu0 %v5823_v43  ;;  %6213 = vmatprep.subr.bf16.mxu1 %v5825_v50  ;;  %v5876_v43 = vld [vmem:[#allocation3 + $0x690] sm:$0xff]  ;;  %v5879_v50 = vld [vmem:[#allocation3 + $0x6a8] sm:$0xff] }
0x1469   :  { %6050 = vmatpush1.bf16.msra.mxu0 %v5822_v2  ;;  %6214 = vmatpush1.bf16.msra.mxu1 %v5824_v6  ;;  %v5881_v2 = vld [vmem:[#allocation3 + $0x6b8] sm:$0xff]  ;;  %v5878_v6 = vld [vmem:[#allocation3 + $0x6a0] sm:$0xff] }
0x146a   :  { %6051 = vmatprep.subr.bf16.mxu0 %v5827_v33  ;;  %6215 = vmatprep.subr.bf16.mxu1 %v5829_v34  ;;  %v5880_v33 = vld [vmem:[#allocation3 + $0x6b0] sm:$0xff]  ;;  %v5883_v34 = vld [vmem:[#allocation3 + $0x6c8] sm:$0xff] }
0x146d   :  { %6052 = vmatpush1.bf16.msra.mxu0 %v5826_v13  ;;  %6216 = vmatpush1.bf16.msra.mxu1 %v5828_v32  ;;  %v5885_v13 = vld [vmem:[#allocation3 + $0x6d8] sm:$0xff]  ;;  %v5882_v32 = vld [vmem:[#allocation3 + $0x6c0] sm:$0xff] }
0x146e   :  { %6053 = vmatprep.subr.bf16.mxu0 %v5831_v40  ;;  %6217 = vmatprep.subr.bf16.mxu1 %v5833_v3  ;;  %v5884_v40 = vld [vmem:[#allocation3 + $0x6d0] sm:$0xff]  ;;  %v5887_v3 = vld [vmem:[#allocation3 + $0x6e8] sm:$0xff] }
0x1471   :  { %6054 = vmatpush1.bf16.msra.mxu0 %v5830_v46  ;;  %6218 = vmatpush1.bf16.msra.mxu1 %v5832_v5  ;;  %v5889_v46 = vld [vmem:[#allocation3 + $0x6f8] sm:$0xff]  ;;  %v5886_v5 = vld [vmem:[#allocation3 + $0x6e0] sm:$0xff] }
0x1472   :  { %6055 = vmatprep.subr.bf16.mxu0 %v5835_v44  ;;  %6219 = vmatprep.subr.bf16.mxu1 %v5837_v41  ;;  %v5888_v44 = vld [vmem:[#allocation3 + $0x6f0] sm:$0xff]  ;;  %v5891_v41 = vld [vmem:[#allocation3 + $0x708] sm:$0xff] }
0x1475   :  { %6056 = vmatpush1.bf16.msra.mxu0 %v5834_v1  ;;  %6220 = vmatpush1.bf16.msra.mxu1 %v5836_v29  ;;  %v5893_v1 = vld [vmem:[#allocation3 + $0x718] sm:$0xff]  ;;  %v5890_v29 = vld [vmem:[#allocation3 + $0x700] sm:$0xff] }
0x1476   :  { %6057 = vmatprep.subr.bf16.mxu0 %v5839_v20  ;;  %6221 = vmatprep.subr.bf16.mxu1 %v5841_v63  ;;  %v5892_v20 = vld [vmem:[#allocation3 + $0x710] sm:$0xff]  ;;  %v5895_v63 = vld [vmem:[#allocation3 + $0x728] sm:$0xff] }
0x1479   :  { %6058 = vmatpush1.bf16.msra.mxu0 %v5838_v15  ;;  %6222 = vmatpush1.bf16.msra.mxu1 %v5840_v54  ;;  %v5897_v15 = vld [vmem:[#allocation3 + $0x738] sm:$0xff]  ;;  %v5894_v54 = vld [vmem:[#allocation3 + $0x720] sm:$0xff] }
0x147a   :  { %6059 = vmatprep.subr.bf16.mxu0 %v5843_v42  ;;  %6223 = vmatprep.subr.bf16.mxu1 %v5845_v38  ;;  %v5896_v42 = vld [vmem:[#allocation3 + $0x730] sm:$0xff]  ;;  %v5899_v38 = vld [vmem:[#allocation3 + $0x748] sm:$0xff] }
0x147d   :  { %6060 = vmatpush1.bf16.msra.mxu0 %v5842_v55  ;;  %6224 = vmatpush1.bf16.msra.mxu1 %v5844_v62  ;;  %v5901_v55 = vld [vmem:[#allocation3 + $0x758] sm:$0xff]  ;;  %v5898_v62 = vld [vmem:[#allocation3 + $0x740] sm:$0xff] }
0x147e   :  { %6061 = vmatprep.subr.bf16.mxu0 %v5847_v57  ;;  %6225 = vmatprep.subr.bf16.mxu1 %v5849_v17  ;;  %v5900_v57 = vld [vmem:[#allocation3 + $0x750] sm:$0xff]  ;;  %v5903_v17 = vld [vmem:[#allocation3 + $0x768] sm:$0xff] }
0x1481   :  { %6062 = vmatpush1.bf16.msra.mxu0 %v5846_v58  ;;  %6226 = vmatpush1.bf16.msra.mxu1 %v5848_v18  ;;  %v5905_v58 = vld [vmem:[#allocation3 + $0x778] sm:$0xff]  ;;  %v5902_v18 = vld [vmem:[#allocation3 + $0x760] sm:$0xff] }
0x1482   :  { %6063 = vmatprep.subr.bf16.mxu0 %v5851_v22  ;;  %6227 = vmatprep.subr.bf16.mxu1 %v5853_v24  ;;  %v5904_v22 = vld [vmem:[#allocation3 + $0x770] sm:$0xff]  ;;  %v5907_v24 = vld [vmem:[#allocation3 + $0x788] sm:$0xff] }
0x1485   :  { %6064 = vmatpush1.bf16.msra.mxu0 %v5850_v4  ;;  %6228 = vmatpush1.bf16.msra.mxu1 %v5852_v51  ;;  %v5909_v4 = vld [vmem:[#allocation3 + $0x798] sm:$0xff]  ;;  %v5906_v51 = vld [vmem:[#allocation3 + $0x780] sm:$0xff] }
0x1486   :  { %6065 = vmatprep.subr.bf16.mxu0 %v5855_v37  ;;  %6229 = vmatprep.subr.bf16.mxu1 %v5857_v59  ;;  %v5908_v37 = vld [vmem:[#allocation3 + $0x790] sm:$0xff]  ;;  %v5911_v59 = vld [vmem:[#allocation3 + $0x7a8] sm:$0xff] }
0x1489   :  { %6066 = vmatpush1.bf16.msra.mxu0 %v5854_v27  ;;  %6230 = vmatpush1.bf16.msra.mxu1 %v5856_v11  ;;  %v5913_v27 = vld [vmem:[#allocation3 + $0x7b8] sm:$0xff]  ;;  %v5910_v11 = vld [vmem:[#allocation3 + $0x7a0] sm:$0xff] }
0x148a   :  { %6076 = vmatprep.subr.bf16.mxu0 %v5859_v53  ;;  %6240 = vmatprep.subr.bf16.mxu1 %v5861_v30  ;;  %v5912_v53 = vld [vmem:[#allocation3 + $0x7b0] sm:$0xff]  ;;  %v5915_v30 = vld [vmem:[#allocation3 + $0x7c8] sm:$0xff] }
0x148c   :  { %6068 = vmatmul.mubr.bf16.vlgmr.msra.gmra.mrb[60].mxu0 %v5926_v19  ;;  %6232 = vmatmul.mubr.bf16.vlgmr.msra.gmra.mrb[60].mxu1 %v5926_v19  ;;  %v5917_v19 = vld [vmem:[#allocation3 + $0x7d8] sm:$0xff] }
0x148d   :  { %6077 = vmatpush1.bf16.msra.mxu0 %v5858_v47  ;;  %6241 = vmatpush1.bf16.msra.mxu1 %v5860_v23  ;;  %v5914_v47 = vld [vmem:[#allocation3 + $0x7c0] sm:$0xff]  ;;  %v5916_v23 = vld [vmem:[#allocation3 + $0x7d0] sm:$0xff] }
0x148e   :  { %6078 = vmatprep.subr.bf16.mxu0 %v5863_v16  ;;  %6242 = vmatprep.subr.bf16.mxu1 %v5865_v25  ;;  %v5919_v16 = vld [vmem:[#allocation3 + $0x7e8] sm:$0xff]  ;;  %v5921_v25 = vld [vmem:[#allocation3 + $0x7f8] sm:$0xff] }
0x148f   :  { %6108 = vmatprep.mubr.bf16.mxu0 %v5929_v31  ;;  %6272 = vmatprep.mubr.bf16.mxu1 %v5929_v31  ;;  %v5918_v31 = vld [vmem:[#allocation3 + $0x7e0] sm:$0xff] }
0x1491   :  { %6079 = vmatpush1.bf16.msra.mxu0 %v5862_v12  ;;  %6243 = vmatpush1.bf16.msra.mxu1 %v5864_v7  ;;  %v5920_v12 = vld [vmem:[#allocation3 + $0x7f0] sm:$0xff]  ;;  %v5928_v7 = vpack.c.bf16 %v5661_v21, %v5661_v21 }
0x1492   :  { %6080 = vmatprep.subr.bf16.mxu0 %v5867_v36  ;;  %6244 = vmatprep.subr.bf16.mxu1 %v5869_v39  ;;  %v5931_v36 = vld [vmem:[#allocation6 + $0x107] ss:$8 sm:$0xf] }
0x1493   :  { %v5936_v39 = vrot.slane %v5931_v36, %v8855_v8  ;;  %v5948_v21 = vrot.slane %v5931_v36, %v8895_v56 }
0x1495   :  { %6081 = vmatpush1.bf16.msra.mxu0 %v5866_v45  ;;  %6245 = vmatpush1.bf16.msra.mxu1 %v5868_v14  ;;  %v5944_v45 = vrot.slane %v5931_v36, %v8861_v10  ;;  %v5940_v14 = vrot.slane %v5931_v36, %v8858_v9 }
0x1496   :  { %6082 = vmatprep.subr.bf16.mxu0 %v5871_v52  ;;  %6246 = vmatprep.subr.bf16.mxu1 %v5873_v0 }
0x1499   :  { %6083 = vmatpush1.bf16.msra.mxu0 %v5870_v26  ;;  %6247 = vmatpush1.bf16.msra.mxu1 %v5872_v60 }
0x149a   :  { %6084 = vmatprep.subr.bf16.mxu0 %v5875_v61  ;;  %6248 = vmatprep.subr.bf16.mxu1 %v5877_v48 }
0x149d   :  { %6085 = vmatpush1.bf16.msra.mxu0 %v5874_v49  ;;  %6249 = vmatpush1.bf16.msra.mxu1 %v5876_v43 }
0x149e   :  { %6086 = vmatprep.subr.bf16.mxu0 %v5879_v50  ;;  %6250 = vmatprep.subr.bf16.mxu1 %v5881_v2 }
0x14a1   :  { %6087 = vmatpush1.bf16.msra.mxu0 %v5878_v6  ;;  %6251 = vmatpush1.bf16.msra.mxu1 %v5880_v33 }
0x14a2   :  { %6088 = vmatprep.subr.bf16.mxu0 %v5883_v34  ;;  %6252 = vmatprep.subr.bf16.mxu1 %v5885_v13 }
0x14a5   :  { %6089 = vmatpush1.bf16.msra.mxu0 %v5882_v32  ;;  %6253 = vmatpush1.bf16.msra.mxu1 %v5884_v40 }
0x14a6   :  { %6090 = vmatprep.subr.bf16.mxu0 %v5887_v3  ;;  %6254 = vmatprep.subr.bf16.mxu1 %v5889_v46 }
0x14a9   :  { %6091 = vmatpush1.bf16.msra.mxu0 %v5886_v5  ;;  %6255 = vmatpush1.bf16.msra.mxu1 %v5888_v44 }
0x14aa   :  { %6092 = vmatprep.subr.bf16.mxu0 %v5891_v41  ;;  %6256 = vmatprep.subr.bf16.mxu1 %v5893_v1 }
0x14ad   :  { %6093 = vmatpush1.bf16.msra.mxu0 %v5890_v29  ;;  %6257 = vmatpush1.bf16.msra.mxu1 %v5892_v20 }
0x14ae   :  { %6094 = vmatprep.subr.bf16.mxu0 %v5895_v63  ;;  %6258 = vmatprep.subr.bf16.mxu1 %v5897_v15 }
0x14b1   :  { %6095 = vmatpush1.bf16.msra.mxu0 %v5894_v54  ;;  %6259 = vmatpush1.bf16.msra.mxu1 %v5896_v42 }
0x14b2   :  { %6096 = vmatprep.subr.bf16.mxu0 %v5899_v38  ;;  %6260 = vmatprep.subr.bf16.mxu1 %v5901_v55  ;;  %v6311_v55 = vld [vmem:[#allocation6 + $0x140] ss:$8 sm:$0xf] }
0x14b5   :  { %6097 = vmatpush1.bf16.msra.mxu0 %v5898_v62  ;;  %6261 = vmatpush1.bf16.msra.mxu1 %v5900_v57  ;;  %v6338_v62 = vld [vmem:[#allocation6 + $0x141] ss:$8 sm:$0xf]  ;;  %v6316_v57 = vrot.slane %v6311_v55, %v8855_v8 }
0x14b6   :  { %6098 = vmatprep.subr.bf16.mxu0 %v5903_v17  ;;  %6262 = vmatprep.subr.bf16.mxu1 %v5905_v58  ;;  %v6320_v17 = vrot.slane %v6311_v55, %v8858_v9  ;;  %v6324_v58 = vrot.slane %v6311_v55, %v8861_v10 }
0x14b9   :  { %6099 = vmatpush1.bf16.msra.mxu0 %v5902_v18  ;;  %6263 = vmatpush1.bf16.msra.mxu1 %v5904_v22  ;;  %v6328_v18 = vrot.slane %v6311_v55, %v8895_v56 }
0x14ba   :  { %6100 = vmatprep.subr.bf16.mxu0 %v5907_v24  ;;  %6264 = vmatprep.subr.bf16.mxu1 %v5909_v4 }
0x14bd   :  { %6101 = vmatpush1.bf16.msra.mxu0 %v5906_v51  ;;  %6265 = vmatpush1.bf16.msra.mxu1 %v5908_v37 }
0x14be   :  { %6102 = vmatprep.subr.bf16.mxu0 %v5911_v59  ;;  %6266 = vmatprep.subr.bf16.mxu1 %v5913_v27  ;;  %v6343_v59 = vrot.slane %v6338_v62, %v8855_v8  ;;  %v6347_v27 = vrot.slane %v6338_v62, %v8858_v9 }
0x14c1   :  { %6103 = vmatpush1.bf16.msra.mxu0 %v5910_v11  ;;  %6267 = vmatpush1.bf16.msra.mxu1 %v5912_v53  ;;  %v6351_v11 = vrot.slane %v6338_v62, %v8861_v10  ;;  %v6355_v53 = vrot.slane %v6338_v62, %v8895_v56 }
0x14c2   :  { %6104 = vmatprep.subr.bf16.mxu0 %v5915_v30  ;;  %6268 = vmatprep.subr.bf16.mxu1 %v5917_v19 }
0x14c5   :  { %6105 = vmatpush1.bf16.msra.mxu0 %v5914_v47  ;;  %6269 = vmatpush1.bf16.msra.mxu1 %v5916_v23 }
0x14c6   :  { %6106 = vmatprep.subr.bf16.mxu0 %v5919_v16  ;;  %6270 = vmatprep.subr.bf16.mxu1 %v5921_v25 }
0x14c9   :  { %6107 = vmatpush1.bf16.msra.mxu0 %v5918_v31  ;;  %6271 = vmatpush1.bf16.msra.mxu1 %v5920_v12 }
0x14cc   :  { %6109 = vmatmul.mubr.bf16.vlgmr.msra.gmra.mrb[60].mxu0 %v5928_v7  ;;  %6273 = vmatmul.mubr.bf16.vlgmr.msra.gmra.mrb[60].mxu1 %v5928_v7 }
0x159f   :  { %v6110_v52 = vpop.f32.mrb[60].mxu0  ;;  %v6274_v0 = vpop.f32.mrb[60].mxu1 }
0x15a0   :  { %v7394_v26 = vadd.f32 %v6110_v52, %v5936_v39  ;;  %v6112_v60 = vpop.f32.mrb[61].mxu0  ;;  %v6276_v61 = vpop.f32.mrb[61].mxu1  ;;  %v7396_v48 = vadd.f32 %v6274_v0, %v5944_v45 }
0x15a1   :  { %v7395_v35 = vadd.f32 %v6112_v60, %v5940_v14  ;;  %v6114_v49 = vpop.f32.mrb[62].mxu0  ;;  %v6278_v43 = vpop.f32.mrb[62].mxu1  ;;  %v7397_v32 = vadd.f32 %v6276_v61, %v5948_v21 }
0x15a2   :  { %v6287_v50 = vmul.f32 %v7394_v26, %v7394_v26  ;;  %v6115_v2 = vpop.f32.mrb[63].mxu0  ;;  %v6279_v6 = vpop.f32.mrb[63].mxu1  ;;  %v6289_v13 = vmul.f32 %v7396_v48, %v7396_v48 }
0x15a3   :  { %v6288_v33 = vmul.f32 %v7395_v35, %v7395_v35  ;;  %v6281_v34 = vadd.f32 %v7395_v35, %v7394_v26  ;;  %v6290_v44 = vmul.f32 %v7397_v32, %v7397_v32 }
0x15a5   :  { %v6282_v40 = vadd.f32 %v7396_v48, %v6281_v34  ;;  %v6291_v3 = vadd.f32 %v6288_v33, %v6287_v50 }
0x15a7   :  { %v6283_v46 = vadd.f32 %v7397_v32, %v6282_v40  ;;  %v6292_v5 = vadd.f32 %v6291_v3, %v6289_v13 }
0x15a9   :  { %6284 = vadd.xlane.f32.xlu0 %v6283_v46  ;;  %v6293_v41 = vadd.f32 %v6292_v5, %v6290_v44 }
0x15ad   :  { %6294 = vadd.xlane.f32.xlu0 %v6293_v41 }
0x1636   :  { %v6285_v1 = vpop.xlane.xlu0 %6284 }
0x1637   :  { %v6286_v29 = vmul.f32 0.001953125, %v6285_v1 }
0x1639   :  { %v6297_v63 = vmul.f32 %v6286_v29, %v6286_v29  ;;  %v6302_v22 = vsub.f32 %v7394_v26, %v6286_v29  ;;  %v6303_v24 = vsub.f32 %v7395_v35, %v6286_v29  ;;  %v6304_v4 = vsub.f32 %v7396_v48, %v6286_v29 }
0x163a   :  { %v6295_v20 = vpop.xlane.xlu0 %6294  ;;  %v6305_v51 = vsub.f32 %v7397_v32, %v6286_v29 }
0x163b   :  { %v6296_v15 = vmul.f32 0.001953125, %v6295_v20 }
0x163d   :  { %v6298_v54 = vsub.f32 %v6296_v15, %v6297_v63 }
0x163f   :  { %v6299_v42 = vmax.f32 %v6298_v54, 0.0 }
0x1641   :  { %v6300_v38 = vadd.f32 1e-05, %v6299_v42 }
0x1643   :  { %8142 = vrsqrt.f32 %v6300_v38 }
0x164d   :  { %v8143_v37 = vpop.eup %8142 }
0x164e   :  { %v6306_v30 = vmul.f32 %v8143_v37, %v6302_v22  ;;  %v6307_v19 = vmul.f32 %v8143_v37, %v6303_v24  ;;  %v6308_v47 = vmul.f32 %v8143_v37, %v6304_v4  ;;  %v6309_v23 = vmul.f32 %v8143_v37, %v6305_v51 }
0x1650   :  { %v6333_v16 = vmul.f32 %v6316_v57, %v6306_v30  ;;  %v6334_v25 = vmul.f32 %v6320_v17, %v6307_v19  ;;  %v6335_v31 = vmul.f32 %v6324_v58, %v6308_v47  ;;  %v6336_v12 = vmul.f32 %v6328_v18, %v6309_v23 }
0x1652   :  { %v9268_v7 = vadd.f32 %v6343_v59, %v6333_v16  ;;  %v6361_v36 = vadd.f32 %v6347_v27, %v6334_v25  ;;  %v9270_v39 = vadd.f32 %v6351_v11, %v6335_v31  ;;  %v9272_v45 = vadd.f32 %v6355_v53, %v6336_v12 }
0x1654   :  { %v6364_v14 = vmax.f32 %v9268_v7, 0.0  ;;  %v6365_v10 = vmax.f32 %v6361_v36, 0.0  ;;  %v6366_v56 = vmax.f32 %v9270_v39, 0.0  ;;  %v6367_v52 = vmax.f32 %v9272_v45, 0.0 }
0x1655   :  { %8458 = dma.done.wait [#allocation5 + $0x2], 15360 }
0x1656   :  { %8459 = vsyncadd [#allocation5 + $0x2], 4294951936  ;;  %v6437_v0 = vpack.c.bf16 %v6365_v10, %v6365_v10  ;;  %v6373_v26 = vld [vmem:[#allocation4 + $0x8] sm:$0xff]  ;;  %v6372_v60 = vld [vmem:[#allocation4] sm:$0xff]  ;;  %v6436_v58 = vpack.c.bf16 %v6364_v14, %v6364_v14  ;;  %v6439_v18 = vpack.c.bf16 %v6367_v52, %v6367_v52  ;;  %vm6790_vm4 = vcmask 23552  }
0x1657   :  { %v6375_v61 = vld [vmem:[#allocation4 + $0x18] sm:$0xff]  ;;  %6453 = vmatprep.subr.bf16.mxu0 %v6373_v26  ;;  %v6374_v48 = vld [vmem:[#allocation4 + $0x10] sm:$0xff]  ;;  %v6377_v35 = vld [vmem:[#allocation4 + $0x28] sm:$0xff] }
0x1658   :  { %6485 = vmatprep.mubr.bf16.mxu0 %v6437_v0  ;;  %6454 = vmatpush1.bf16.msra.mxu0 %v6372_v60  ;;  %v6376_v21 = vld [vmem:[#allocation4 + $0x20] sm:$0xff]  ;;  %v6379_v49 = vld [vmem:[#allocation4 + $0x38] sm:$0xff]  ;;  %v6378_v43 = vld [vmem:[#allocation4 + $0x30] sm:$0xff] }
0x1659   :  { %6455 = vmatprep.subr.bf16.mxu0 %v6375_v61  ;;  %v6381_v50 = vld [vmem:[#allocation4 + $0x48] sm:$0xff]  ;;  %v6380_v2 = vld [vmem:[#allocation4 + $0x40] sm:$0xff]  ;;  %v6383_v6 = vld [vmem:[#allocation4 + $0x58] sm:$0xff] }
0x165a   :  { %v6382_v33 = vld [vmem:[#allocation4 + $0x50] sm:$0xff]  ;;  %v6385_v34 = vld [vmem:[#allocation4 + $0x68] sm:$0xff]  ;;  %v6384_v13 = vld [vmem:[#allocation4 + $0x60] sm:$0xff] }
0x165b   :  { %v6387_v32 = vld [vmem:[#allocation4 + $0x78] sm:$0xff]  ;;  %v6386_v40 = vld [vmem:[#allocation4 + $0x70] sm:$0xff]  ;;  %v6389_v3 = vld [vmem:[#allocation4 + $0x88] sm:$0xff] }
0x165c   :  { %6456 = vmatpush1.bf16.msra.mxu0 %v6374_v48  ;;  %v6388_v46 = vld [vmem:[#allocation4 + $0x80] sm:$0xff]  ;;  %v6391_v5 = vld [vmem:[#allocation4 + $0x98] sm:$0xff]  ;;  %v6390_v44 = vld [vmem:[#allocation4 + $0x90] sm:$0xff] }
0x165d   :  { %6457 = vmatprep.subr.bf16.mxu0 %v6377_v35  ;;  %v6393_v41 = vld [vmem:[#allocation4 + $0xa8] sm:$0xff]  ;;  %v6392_v1 = vld [vmem:[#allocation4 + $0xa0] sm:$0xff]  ;;  %v6395_v29 = vld [vmem:[#allocation4 + $0xb8] sm:$0xff] }
0x165e   :  { %v6394_v20 = vld [vmem:[#allocation4 + $0xb0] sm:$0xff]  ;;  %v6397_v63 = vld [vmem:[#allocation4 + $0xc8] sm:$0xff]  ;;  %v6396_v15 = vld [vmem:[#allocation4 + $0xc0] sm:$0xff] }
0x165f   :  { %v6399_v54 = vld [vmem:[#allocation4 + $0xd8] sm:$0xff]  ;;  %v6398_v42 = vld [vmem:[#allocation4 + $0xd0] sm:$0xff]  ;;  %v6401_v38 = vld [vmem:[#allocation4 + $0xe8] sm:$0xff] }
0x1660   :  { %6458 = vmatpush1.bf16.msra.mxu0 %v6376_v21  ;;  %v6400_v55 = vld [vmem:[#allocation4 + $0xe0] sm:$0xff]  ;;  %v6403_v62 = vld [vmem:[#allocation4 + $0xf8] sm:$0xff]  ;;  %v6402_v57 = vld [vmem:[#allocation4 + $0xf0] sm:$0xff] }
0x1661   :  { %6459 = vmatprep.subr.bf16.mxu0 %v6379_v49  ;;  %v6405_v17 = vld [vmem:[#allocation4 + $0x108] sm:$0xff]  ;;  %v6404_v22 = vld [vmem:[#allocation4 + $0x100] sm:$0xff]  ;;  %v6407_v24 = vld [vmem:[#allocation4 + $0x118] sm:$0xff] }
0x1662   :  { %v6406_v4 = vld [vmem:[#allocation4 + $0x110] sm:$0xff]  ;;  %v6409_v51 = vld [vmem:[#allocation4 + $0x128] sm:$0xff]  ;;  %v6408_v37 = vld [vmem:[#allocation4 + $0x120] sm:$0xff] }
0x1663   :  { %v6411_v59 = vld [vmem:[#allocation4 + $0x138] sm:$0xff]  ;;  %v6410_v27 = vld [vmem:[#allocation4 + $0x130] sm:$0xff]  ;;  %v6413_v11 = vld [vmem:[#allocation4 + $0x148] sm:$0xff] }
0x1664   :  { %6460 = vmatpush1.bf16.msra.mxu0 %v6378_v43  ;;  %v6412_v53 = vld [vmem:[#allocation4 + $0x140] sm:$0xff]  ;;  %v6415_v30 = vld [vmem:[#allocation4 + $0x158] sm:$0xff]  ;;  %v6414_v19 = vld [vmem:[#allocation4 + $0x150] sm:$0xff]  ;;  %v6438_v43 = vpack.c.bf16 %v6366_v56, %v6366_v56 }
0x1665   :  { %6461 = vmatprep.subr.bf16.mxu0 %v6381_v50  ;;  %v6417_v47 = vld [vmem:[#allocation4 + $0x168] sm:$0xff]  ;;  %v6416_v23 = vld [vmem:[#allocation4 + $0x160] sm:$0xff]  ;;  %v6419_v16 = vld [vmem:[#allocation4 + $0x178] sm:$0xff] }
0x1666   :  { %v6418_v25 = vld [vmem:[#allocation4 + $0x170] sm:$0xff]  ;;  %v6421_v31 = vld [vmem:[#allocation4 + $0x188] sm:$0xff]  ;;  %v6420_v12 = vld [vmem:[#allocation4 + $0x180] sm:$0xff] }
0x1667   :  { %v6423_v7 = vld [vmem:[#allocation4 + $0x198] sm:$0xff]  ;;  %v6422_v36 = vld [vmem:[#allocation4 + $0x190] sm:$0xff]  ;;  %v6425_v45 = vld [vmem:[#allocation4 + $0x1a8] sm:$0xff] }
0x1668   :  { %6462 = vmatpush1.bf16.msra.mxu0 %v6380_v2  ;;  %v6424_v14 = vld [vmem:[#allocation4 + $0x1a0] sm:$0xff]  ;;  %v6427_v10 = vld [vmem:[#allocation4 + $0x1b8] sm:$0xff]  ;;  %v6426_v52 = vld [vmem:[#allocation4 + $0x1b0] sm:$0xff] }
0x1669   :  { %6463 = vmatprep.subr.bf16.mxu0 %v6383_v6  ;;  %v6429_v0 = vld [vmem:[#allocation4 + $0x1c8] sm:$0xff]  ;;  %v6428_v26 = vld [vmem:[#allocation4 + $0x1c0] sm:$0xff]  ;;  %v6431_v60 = vld [vmem:[#allocation4 + $0x1d8] sm:$0xff] }
0x166a   :  { %v6430_v61 = vld [vmem:[#allocation4 + $0x1d0] sm:$0xff]  ;;  %v6433_v48 = vld [vmem:[#allocation4 + $0x1e8] sm:$0xff]  ;;  %v6432_v35 = vld [vmem:[#allocation4 + $0x1e0] sm:$0xff] }
0x166b   :  { %v6435_v21 = vld [vmem:[#allocation4 + $0x1f8] sm:$0xff]  ;;  %v6434_v49 = vld [vmem:[#allocation4 + $0x1f0] sm:$0xff]  ;;  %v6441_v50 = vld [vmem:[#allocation6 + $0x142] ss:$8 sm:$0x3] }
0x166c   :  { %6464 = vmatpush1.bf16.msra.mxu0 %v6382_v33  ;;  %v6446_v2 = vrot.slane %v6441_v50, %v8855_v8  ;;  %v6450_v6 = vrot.slane %v6441_v50, %v8858_v9 }
0x166d   :  { %6465 = vmatprep.subr.bf16.mxu0 %v6385_v34 }
0x1670   :  { %6466 = vmatpush1.bf16.msra.mxu0 %v6384_v13 }
0x1671   :  { %6467 = vmatprep.subr.bf16.mxu0 %v6387_v32 }
0x1674   :  { %6468 = vmatpush1.bf16.msra.mxu0 %v6386_v40 }
0x1675   :  { %6469 = vmatprep.subr.bf16.mxu0 %v6389_v3 }
0x1678   :  { %6470 = vmatpush1.bf16.msra.mxu0 %v6388_v46 }
0x1679   :  { %6471 = vmatprep.subr.bf16.mxu0 %v6391_v5 }
0x167c   :  { %6472 = vmatpush1.bf16.msra.mxu0 %v6390_v44  ;;  %v6594_v44 = vld [vmem:[#allocation4 + $0x280] sm:$0xff] }
0x167d   :  { %6473 = vmatprep.subr.bf16.mxu0 %v6393_v41  ;;  %7280 = vmatprep.subr.bf16.mxu1 %v6594_v44  ;;  %v6586_v41 = vld [vmem:[#allocation4 + $0x200] sm:$0xff] }
0x167e   :  { %7281 = vmatpush3.bf16.msra.mxu1 %v6586_v41 }
0x1680   :  { %6474 = vmatpush1.bf16.msra.mxu0 %v6392_v1  ;;  %v6595_v1 = vld [vmem:[#allocation4 + $0x290] sm:$0xff] }
0x1681   :  { %6475 = vmatprep.subr.bf16.mxu0 %v6395_v29  ;;  %7282 = vmatprep.subr.bf16.mxu1 %v6595_v1  ;;  %v6587_v29 = vld [vmem:[#allocation4 + $0x210] sm:$0xff] }
0x1682   :  { %7283 = vmatpush3.bf16.msra.mxu1 %v6587_v29 }
0x1684   :  { %6476 = vmatpush1.bf16.msra.mxu0 %v6394_v20  ;;  %v6596_v20 = vld [vmem:[#allocation4 + $0x2a0] sm:$0xff] }
0x1685   :  { %6477 = vmatprep.subr.bf16.mxu0 %v6397_v63  ;;  %7284 = vmatprep.subr.bf16.mxu1 %v6596_v20  ;;  %v6588_v63 = vld [vmem:[#allocation4 + $0x220] sm:$0xff] }
0x1686   :  { %7285 = vmatpush3.bf16.msra.mxu1 %v6588_v63 }
0x1688   :  { %6478 = vmatpush1.bf16.msra.mxu0 %v6396_v15  ;;  %v6597_v15 = vld [vmem:[#allocation4 + $0x2b0] sm:$0xff] }
0x1689   :  { %6479 = vmatprep.subr.bf16.mxu0 %v6399_v54  ;;  %v6589_v54 = vld [vmem:[#allocation4 + $0x230] sm:$0xff]  ;;  %7286 = vmatprep.subr.bf16.mxu1 %v6597_v15  ;;  %v6659_v15 = vld [vmem:[#allocation6 + $0x146] ss:$0 sm:$0xff] }
0x168a   :  { %7287 = vmatpush3.bf16.msra.mxu1 %v6589_v54 }
0x168c   :  { %6480 = vmatpush1.bf16.msra.mxu0 %v6398_v42  ;;  %v6598_v42 = vld [vmem:[#allocation4 + $0x2c0] sm:$0xff] }
0x168d   :  { %6481 = vmatprep.subr.bf16.mxu0 %v6401_v38  ;;  %7288 = vmatprep.subr.bf16.mxu1 %v6598_v42  ;;  %v6590_v38 = vld [vmem:[#allocation4 + $0x240] sm:$0xff] }
0x168e   :  { %7289 = vmatpush3.bf16.msra.mxu1 %v6590_v38  ;;  %v6661_v42 = vld [vmem:[#allocation6 + $0x147] ss:$0 sm:$0xff] }
0x1690   :  { %6482 = vmatpush1.bf16.msra.mxu0 %v6400_v55  ;;  %v6599_v55 = vld [vmem:[#allocation4 + $0x2d0] sm:$0xff] }
0x1691   :  { %6483 = vmatprep.subr.bf16.mxu0 %v6403_v62  ;;  %7290 = vmatprep.subr.bf16.mxu1 %v6599_v55  ;;  %v6591_v62 = vld [vmem:[#allocation4 + $0x250] sm:$0xff] }
0x1692   :  { %7291 = vmatpush3.bf16.msra.mxu1 %v6591_v62 }
0x1694   :  { %6484 = vmatpush1.bf16.msra.mxu0 %v6402_v57  ;;  %v6600_v57 = vld [vmem:[#allocation4 + $0x2e0] sm:$0xff] }
0x1695   :  { %6494 = vmatprep.subr.bf16.mxu0 %v6405_v17  ;;  %7292 = vmatprep.subr.bf16.mxu1 %v6600_v57  ;;  %v6592_v17 = vld [vmem:[#allocation4 + $0x260] sm:$0xff] }
0x1696   :  { %7293 = vmatpush3.bf16.msra.mxu1 %v6592_v17  ;;  %v6673_v17 = vld [vmem:[#allocation6 + $0x180] ss:$0 sm:$0xff] }
0x1697   :  { %6486 = vmatmul.mubr.bf16.vlgmr.msra.gmra.mrb[64].mxu0 %v6436_v58  ;;  %v6601_v58 = vld [vmem:[#allocation4 + $0x2f0] sm:$0xff] }
0x1698   :  { %6495 = vmatpush1.bf16.msra.mxu0 %v6404_v22  ;;  %6526 = vmatprep.mubr.bf16.mxu0 %v6439_v18  ;;  %v6593_v18 = vld [vmem:[#allocation4 + $0x270] sm:$0xff] }
0x1699   :  { %6496 = vmatprep.subr.bf16.mxu0 %v6407_v24  ;;  %7294 = vmatprep.subr.bf16.mxu1 %v6601_v58 }
0x169a   :  { %7295 = vmatpush3.bf16.msra.mxu1 %v6593_v18 }
0x169b   :  { %7354 = vmatprep.subr.bf16.mxu1 %v8494_v28 }
0x169c   :  { %6497 = vmatpush1.bf16.msra.mxu0 %v6406_v4 }
0x169d   :  { %6498 = vmatprep.subr.bf16.mxu0 %v6409_v51 }
0x16a0   :  { %6499 = vmatpush1.bf16.msra.mxu0 %v6408_v37 }
0x16a1   :  { %6500 = vmatprep.subr.bf16.mxu0 %v6411_v59 }
0x16a4   :  { %6501 = vmatpush1.bf16.msra.mxu0 %v6410_v27 }
0x16a5   :  { %6502 = vmatprep.subr.bf16.mxu0 %v6413_v11 }
0x16a8   :  { %6503 = vmatpush1.bf16.msra.mxu0 %v6412_v53  ;;  %v6555_v53 = vld [vmem:[#allocation6 + $0x143] ss:$8 sm:$0x3] }
0x16a9   :  { %6504 = vmatprep.subr.bf16.mxu0 %v6415_v30  ;;  %v6570_v30 = vld [vmem:[#allocation6 + $0x144] ss:$8 sm:$0x3] }
0x16ac   :  { %6505 = vmatpush1.bf16.msra.mxu0 %v6414_v19 }
0x16ad   :  { %6506 = vmatprep.subr.bf16.mxu0 %v6417_v47 }
0x16b0   :  { %6507 = vmatpush1.bf16.msra.mxu0 %v6416_v23  ;;  %v6560_v23 = vrot.slane %v6555_v53, %v8855_v8 }
0x16b1   :  { %6508 = vmatprep.subr.bf16.mxu0 %v6419_v16  ;;  %v6564_v16 = vrot.slane %v6555_v53, %v8858_v9  ;;  %v6737_v53 = vld [vmem:[#allocation4 + $0x3a0] sm:$0xff] }
0x16b4   :  { %6509 = vmatpush1.bf16.msra.mxu0 %v6418_v25 }
0x16b5   :  { %6510 = vmatprep.subr.bf16.mxu0 %v6421_v31 }
0x16b8   :  { %6511 = vmatpush1.bf16.msra.mxu0 %v6420_v12  ;;  %v6575_v12 = vrot.slane %v6570_v30, %v8855_v8 }
0x16b9   :  { %6512 = vmatprep.subr.bf16.mxu0 %v6423_v7  ;;  %v6579_v7 = vrot.slane %v6570_v30, %v8858_v9  ;;  %v6738_v30 = vld [vmem:[#allocation4 + $0x3b0] sm:$0xff] }
0x16bc   :  { %6513 = vmatpush1.bf16.msra.mxu0 %v6422_v36 }
0x16bd   :  { %6514 = vmatprep.subr.bf16.mxu0 %v6425_v45 }
0x16c0   :  { %6515 = vmatpush1.bf16.msra.mxu0 %v6424_v14 }
0x16c1   :  { %6516 = vmatprep.subr.bf16.mxu0 %v6427_v10 }
0x16c4   :  { %6517 = vmatpush1.bf16.msra.mxu0 %v6426_v52 }
0x16c5   :  { %6518 = vmatprep.subr.bf16.mxu0 %v6429_v0 }
0x16c8   :  { %6519 = vmatpush1.bf16.msra.mxu0 %v6428_v26 }
0x16c9   :  { %6520 = vmatprep.subr.bf16.mxu0 %v6431_v60 }
0x16cc   :  { %6521 = vmatpush1.bf16.msra.mxu0 %v6430_v61 }
0x16cd   :  { %6522 = vmatprep.subr.bf16.mxu0 %v6433_v48 }
0x16d0   :  { %6523 = vmatpush1.bf16.msra.mxu0 %v6432_v35  ;;  %v6604_v35 = vld [vmem:[#allocation6 + $0x145] ss:$0 sm:$0xff] }
0x16d1   :  { %6524 = vmatprep.subr.bf16.mxu0 %v6435_v21 }
0x16d4   :  { %6525 = vmatpush1.bf16.msra.mxu0 %v6434_v49 }
0x16d7   :  { %6527 = vmatmul.mubr.bf16.vlgmr.msra.gmra.mrb[64].mxu0 %v6438_v43 }
0x17aa   :  { %v6528_v33 = vpop.f32.mrb[64].mxu0 }
0x17ab   :  { %v9288_v34 = vadd.f32 %v6528_v33, %v6446_v2  ;;  %v6530_v13 = vpop.f32.mrb[65].mxu0  ;;  %v6664_v2 = vld [vmem:[#allocation4 + $0x300] sm:$0xff] }
0x17ac   :  { %v7399_v32 = vadd.f32 %v6530_v13, %v6450_v6  ;;  %v6532_v40 = vpop.f32.mrb[66].mxu0  ;;  %v6665_v6 = vld [vmem:[#allocation4 + $0x310] sm:$0xff]  ;;  %v6666_v33 = vld [vmem:[#allocation4 + $0x320] sm:$0xff] }
0x17ad   :  { %v6533_v3 = vpop.f32.mrb[67].mxu0  ;;  %v6539_v39 = vmul.f32 %v9288_v34, %v9288_v34  ;;  %v6668_v13 = vld [vmem:[#allocation4 + $0x340] sm:$0xff] }
0x17ae   :  { %v6535_v46 = vadd.f32 %v7399_v32, %v9288_v34  ;;  %v6540_v56 = vmul.f32 %v7399_v32, %v7399_v32  ;;  %v6670_v40 = vld [vmem:[#allocation4 + $0x360] sm:$0xff]  ;;  %v6671_v3 = vld [vmem:[#allocation4 + $0x370] sm:$0xff] }
0x17b0   :  { %6536 = vadd.xlane.f32.xlu0 %v6535_v46  ;;  %v6541_v5 = vadd.f32 %v6540_v56, %v6539_v39 }
0x17b4   :  { %6542 = vadd.xlane.f32.xlu0 %v6541_v5 }
0x183d   :  { %v6537_v22 = vpop.xlane.xlu0 %6536 }
0x183e   :  { %v6538_v24 = vmul.f32 0.00390625, %v6537_v22 }
0x1840   :  { %v6545_v51 = vmul.f32 %v6538_v24, %v6538_v24  ;;  %v6550_v19 = vsub.f32 %v9288_v34, %v6538_v24  ;;  %v6551_v47 = vsub.f32 %v7399_v32, %v6538_v24  ;;  %v6667_v34 = vld [vmem:[#allocation4 + $0x330] sm:$0xff] }
0x1841   :  { %v6543_v4 = vpop.xlane.xlu0 %6542  ;;  %v6669_v32 = vld [vmem:[#allocation4 + $0x350] sm:$0xff] }
0x1842   :  { %v6544_v37 = vmul.f32 0.00390625, %v6543_v4 }
0x1844   :  { %v6546_v59 = vsub.f32 %v6544_v37, %v6545_v51 }
0x1846   :  { %v6547_v27 = vmax.f32 %v6546_v59, 0.0 }
0x1848   :  { %v6548_v11 = vadd.f32 1e-05, %v6547_v27  ;;  %v6735_v27 = vld [vmem:[#allocation4 + $0x380] sm:$0xff] }
0x184a   :  { %8144 = vrsqrt.f32 %v6548_v11  ;;  %v6736_v11 = vld [vmem:[#allocation4 + $0x390] sm:$0xff] }
0x1854   :  { %v8145_v25 = vpop.eup %8144 }
0x1855   :  { %v6553_v31 = vmul.f32 %v8145_v25, %v6551_v47  ;;  %v6552_v36 = vmul.f32 %v8145_v25, %v6550_v19 }
0x1857   :  { %v6568_v45 = vmul.f32 %v6564_v16, %v6553_v31  ;;  %v6567_v14 = vmul.f32 %v6560_v23, %v6552_v36 }
0x1859   :  { %v6583_v10 = vadd.f32 %v6579_v7, %v6568_v45  ;;  %v6582_v52 = vadd.f32 %v6575_v12, %v6567_v14  ;;  %v6730_v14 = vld [vmem:[#allocation6 + $0x181] ss:$0 sm:$0xff] }
0x185b   :  { %v6585_v0 = vmax.f32 %v6583_v10, 0.0  ;;  %v6584_v26 = vmax.f32 %v6582_v52, 0.0  ;;  %v6732_v52 = vld [vmem:[#allocation6 + $0x182] ss:$0 sm:$0xff] }
0x185d   :  { %v6603_v60 = vpack.c.bf16 %v6585_v0, %v6585_v0  ;;  %v6602_v61 = vpack.c.bf16 %v6584_v26, %v6584_v26 }
0x185f   :  { %6637 = vmatprep.mubr.bf16.mxu1 %v6603_v60 }
0x1860   :  { %6638 = vmatmul.mubr.bf16.vlgmr.msra.gmra.mrb[64].mxu1 %v6602_v61  ;;  %v6740_v61 = vld [vmem:[#allocation6 + $0x183] ss:$0 sm:$0xff] }
0x1861   :  { %7370 = vmatprep.mubr.msk.bf16.mxu1 %vm8495_vm1, %v8494_v28  ;;  %7355 = vmatpush3.bf16.msra.mxu1 %v6664_v2 }
0x1862   :  { %7356 = vmatprep.subr.bf16.mxu1 %v8494_v28 }
0x1865   :  { %7357 = vmatpush3.bf16.msra.mxu1 %v6665_v6 }
0x1866   :  { %7358 = vmatprep.subr.bf16.mxu1 %v8494_v28 }
0x1869   :  { %7359 = vmatpush3.bf16.msra.mxu1 %v6666_v33 }
0x186a   :  { %7360 = vmatprep.subr.bf16.mxu1 %v8494_v28 }
0x186d   :  { %7361 = vmatpush3.bf16.msra.mxu1 %v6667_v34 }
0x186e   :  { %7362 = vmatprep.subr.bf16.mxu1 %v8494_v28 }
0x1871   :  { %7363 = vmatpush3.bf16.msra.mxu1 %v6668_v13 }
0x1872   :  { %7364 = vmatprep.subr.bf16.mxu1 %v8494_v28 }
0x1875   :  { %7365 = vmatpush3.bf16.msra.mxu1 %v6669_v32 }
0x1876   :  { %7366 = vmatprep.subr.bf16.mxu1 %v8494_v28 }
0x1879   :  { %7367 = vmatpush3.bf16.msra.mxu1 %v6670_v40 }
0x187a   :  { %7368 = vmatprep.subr.bf16.mxu1 %v8494_v28 }
0x187d   :  { %7369 = vmatpush3.bf16.msra.mxu1 %v6671_v3 }
0x187e   :  { %7374 = vmatprep.subr.bf16.mxu1 %v8494_v28 }
0x1933   :  { %v7296_v48 = vpop.f32.mrb[64].mxu1 }
0x1934   :  { %v7297_v21 = vpop.f32.mrb[65].mxu1 }
0x1935   :  { %v7298_v8 = vadd.f32 %v7297_v21, %v7296_v48  ;;  %v7299_v49 = vpop.f32.mrb[66].mxu1 }
0x1936   :  { %v7300_v9 = vpop.f32.mrb[67].mxu1 }
0x1937   :  { %v6640_v43 = vadd.f32 %v7298_v8, %v6604_v35 }
0x1939   :  { %6645 = vadd.xlane.f32.xlu1 %v6640_v43  ;;  %v6648_v50 = vmul.f32 %v6640_v43, %v6640_v43 }
0x193d   :  { %6649 = vadd.xlane.f32.xlu1 %v6648_v50 }
0x19c6   :  { %v6646_v46 = vpop.xlane.xlu1 %6645 }
0x19c7   :  { %v6647_v39 = vmul.f32 0.0078125, %v6646_v46 }
0x19c9   :  { %v6652_v5 = vmul.f32 %v6647_v39, %v6647_v39  ;;  %v6657_v20 = vsub.f32 %v6640_v43, %v6647_v39 }
0x19ca   :  { %v6650_v56 = vpop.xlane.xlu1 %6649 }
0x19cb   :  { %v6651_v44 = vmul.f32 0.0078125, %v6650_v56 }
0x19cd   :  { %v6653_v41 = vsub.f32 %v6651_v44, %v6652_v5 }
0x19cf   :  { %v6654_v1 = vmax.f32 %v6653_v41, 0.0 }
0x19d1   :  { %v6655_v29 = vadd.f32 1e-05, %v6654_v1 }
0x19d3   :  { %8146 = vrsqrt.f32 %v6655_v29 }
0x19dd   :  { %v8147_v63 = vpop.eup %8146 }
0x19de   :  { %v6658_v54 = vmul.f32 %v8147_v63, %v6657_v20 }
0x19e0   :  { %v6660_v38 = vmul.f32 %v6659_v15, %v6658_v54 }
0x19e2   :  { %v6662_v55 = vadd.f32 %v6661_v42, %v6660_v38 }
0x19e4   :  { %v6663_v62 = vmax.f32 %v6662_v55, 0.0 }
0x19e6   :  { %v6672_v57 = vpack.c.bf16 %v6663_v62, %v6663_v62 }
0x19e8   :  { %7371 = vmatmul.mubr.bf16.vlgmr.msra.gmra.mrb[68].mxu1 %v6672_v57 }
0x19e9   :  { %7382 = vmatprep.mubr.msk.bf16.mxu1 %vm8495_vm1, %v8494_v28  ;;  %7375 = vmatpush3.bf16.msra.mxu1 %v6735_v27 }
0x19ea   :  { %7376 = vmatprep.subr.bf16.mxu1 %v8494_v28 }
0x19ed   :  { %7377 = vmatpush3.bf16.msra.mxu1 %v6736_v11 }
0x19ee   :  { %7378 = vmatprep.subr.bf16.mxu1 %v8494_v28 }
0x19f1   :  { %7379 = vmatpush3.bf16.msra.mxu1 %v6737_v53 }
0x19f2   :  { %7380 = vmatprep.subr.bf16.mxu1 %v8494_v28 }
0x19f5   :  { %7381 = vmatpush3.bf16.msra.mxu1 %v6738_v30 }
0x1abb   :  { %v6708_v58 = vpop.f32.mrb[68].mxu1 }
0x1abc   :  { %v6709_v18 = vadd.f32 %v6708_v58, %v6673_v17  ;;  %v7372_v22 = vpop.f32.mrb[69].mxu1 }
0x1abd   :  { %v6711_v24 = vpop.f32.mrb[70].mxu1 }
0x1abe   :  { %v7373_v4 = vpop.f32.mrb[71].mxu1  ;;  %v6714_v51 = vsel %vm366_vm0, %v6709_v18, 0.0  ;;  %v6718_v37 = vmul.f32 %v6709_v18, %v6709_v18 }
0x1abf   :  { %6715 = vadd.xlane.f32.xlu0 %v6714_v51 }
0x1ac0   :  { %v6719_v59 = vsel %vm366_vm0, %v6718_v37, 0.0 }
0x1ac1   :  { %6720 = vadd.xlane.f32.xlu1 %v6719_v59 }
0x1b4c   :  { %v6716_v19 = vpop.xlane.xlu0 %6715 }
0x1b4d   :  { %v6717_v47 = vmul.f32 0.015625, %v6716_v19 }
0x1b4e   :  { %v6721_v23 = vpop.xlane.xlu1 %6720 }
0x1b4f   :  { %v6723_v16 = vmul.f32 %v6717_v47, %v6717_v47  ;;  %v6722_v25 = vmul.f32 0.015625, %v6721_v23  ;;  %v6728_v36 = vsub.f32 %v6709_v18, %v6717_v47 }
0x1b51   :  { %v6724_v31 = vsub.f32 %v6722_v25, %v6723_v16 }
0x1b53   :  { %v6725_v12 = vmax.f32 %v6724_v31, 0.0 }
0x1b55   :  { %v6726_v7 = vadd.f32 1e-05, %v6725_v12 }
0x1b57   :  { %8148 = vrsqrt.f32 %v6726_v7 }
0x1b61   :  { %v8149_v45 = vpop.eup %8148 }
0x1b62   :  { %v6729_v10 = vmul.f32 %v8149_v45, %v6728_v36 }
0x1b64   :  { %v6731_v0 = vmul.f32 %v6730_v14, %v6729_v10 }
0x1b66   :  { %v6733_v26 = vadd.f32 %v6732_v52, %v6731_v0 }
0x1b68   :  { %v6734_v60 = vmax.f32 %v6733_v26, 0.0 }
0x1b6a   :  { %v6739_v28 = vpack.c.bf16 %v6734_v60, %v6734_v60 }
0x1b6c   :  { %7383 = vmatmul.mubr.msk.bf16.vlgmr.msra.gmra.mrb[72].mxu1 %vm366_vm0, %v6739_v28 }
0x1c3f   :  { %v6778_v48 = vpop.f32.mrb[72].mxu1 }
0x1c40   :  { %v6779_v35 = vadd.f32 %v6778_v48, %v6740_v61  ;;  %v7384_v21 = vpop.f32.mrb[73].mxu1 }
0x1c41   :  { %v6781_v8 = vpop.f32.mrb[74].mxu1 }
0x1c42   :  { %v7261_v49 = vmul.f32 -1.442695, %v6779_v35  ;;  %v7385_v9 = vpop.f32.mrb[75].mxu1 }
0x1c44   :  { %8150 = vpow2.f32 %v7261_v49 }
0x1c4e   :  { %v8151_v43 = vpop.eup %8150 }
0x1c4f   :  { %v6787_v50 = vadd.f32 1.0, %v8151_v43 }
0x1c51   :  { %8152 = vrcp.f32 %v6787_v50 }
0x1c5b   :  { %v8153_v2 = vpop.eup %8152 }
0x1c5c   :  { %6791 = vst.msk [vmem:[%s9338_s18] sm:$0xff] %vm6790_vm4, %v8153_v2 }
0x1c5d   :  { %6796 = vsyncpa [#allocation7], 1 }
0x1c5e   :  { %6797 = vsyncpa [#allocation9], 1 }
0x1c5f   :  { %6798 = vsyncpa [#allocation12], 1 }
0x1c60   :  { %6799 = vsyncpa [#allocation15], 1 }
0x1c61   :  { %6800 = vsyncpa [#allocation18], 1 }
0x1c62   :  { %6801 = vsyncpa [#allocation21], 1 }
0x1c63   :  { %6802 = vsyncpa [#allocation24], 1 }
0x1c64   :  { %6803 = vsyncmov [#allocation5] }
0x1c67   :  { %s6804_s14 = vpop.sfrf %6803 }
0x1c68   :  { %p7262_p6 = scmp.ne.s32.totalorder %s6804_s14, 0 }
0x1c6a   :  { %6808 = shalt.err (%p7262_p6)  }
0x1c6b   :  { %6810 = vsyncmov [#allocation5 + $0x1] }
0x1c6e   :  { %s6811_s30 = vpop.sfrf %6810 }
0x1c6f   :  { %p7263_p7 = scmp.ne.s32.totalorder %s6811_s30, 0 }
0x1c71   :  { %6815 = shalt.err (%p7263_p7)  }
0x1c72   :  { %6817 = vsyncmov [#allocation5 + $0x2] }
0x1c75   :  { %s6818_s6 = vpop.sfrf %6817 }
0x1c76   :  { %p7264_p8 = scmp.ne.s32.totalorder %s6818_s6, 0 }
0x1c78   :  { %6822 = shalt.err (%p7264_p8)  }

</bundles_post_ra>
